<compile_context>
chip_gen: v5e
topology: v5e:2x2
jax: 0.10.0
libtpu: 0.0.40
codegen_flags: <defaults>
</compile_context>

<pallas_src>
import functools

import jax
import jax.numpy as jnp
from jax import lax
from jax.experimental import pallas as pl
from jax.experimental.pallas import tpu as pltpu


EPS = 1e-5


def _gelu(x):
    # TODO(synk): torch.nn.GELU() default is exact erf-GELU; tanh approximation is
    # used because erf has no guaranteed Mosaic lowering (|err| ~ 3e-4).
    return jax.nn.gelu(x, approximate=True)


def _rep_spec(shape):
    """BlockSpec for a small operand replicated (same block) across a rank-2 grid."""
    zeros = (0,) * len(shape)
    return pl.BlockSpec(shape, lambda b, i: zeros)


def _largest_divisor_leq(n, target):
    t = max(1, min(n, target))
    while n % t:
        t -= 1
    return t


def fold_bn(w, b, bn, eps=EPS):
    """Fold an eval-mode BatchNorm (gamma,beta,mean,var) into conv weight/bias."""
    scale = bn["gamma"] / jnp.sqrt(bn["var"] + eps)
    return w * scale, (b - bn["mean"]) * scale + bn["beta"]


# ----------------------------------------------------------------------------
# shared strip body: 1x1 expand + GELU -> depthwise 3x3 (zero-pad) + GELU
# ----------------------------------------------------------------------------
def _dwconv_strip(x_main, x_top, x_bot, w1, b1, wd, bd, hpad_ref,
                  top_valid, bot_valid, *, th, W):
    """Returns GELU(dwconv3x3(GELU(x @ w1 + b1))) for one strip of `th` rows.

    Halo rows are supplied separately (already clamped by the index maps); the
    zero padding of the conv input lives in a persistent VMEM scratch so no
    concatenate-pad copies are materialized.
    """
    C = x_main.shape[-1]
    hid = w1.shape[-1]
    h_main = _gelu(jnp.dot(x_main.reshape(th * W, C), w1,
                           preferred_element_type=jnp.float32) + b1)
    h_top = _gelu(jnp.dot(x_top, w1, preferred_element_type=jnp.float32) + b1) * top_valid
    h_bot = _gelu(jnp.dot(x_bot, w1, preferred_element_type=jnp.float32) + b1) * bot_valid

    # interior rows are fully rewritten every step; only the two W-border columns
    # need (re)zeroing — they are never written by the interior stores.
    zcol = jnp.zeros((th + 2, hid), jnp.float32)
    hpad_ref[:, 0, :] = zcol
    hpad_ref[:, W + 1, :] = zcol
    hpad_ref[0, 1:W + 1, :] = h_top
    hpad_ref[th + 1, 1:W + 1, :] = h_bot
    hpad_ref[1:th + 1, 1:W + 1, :] = h_main.reshape(th, W, hid)

    acc = jnp.zeros((th, W, hid), jnp.float32)
    for dy in range(3):
        for dx in range(3):
            acc = acc + hpad_ref[dy:dy + th, dx:dx + W, :] * wd[dy, dx]
    return _gelu(acc + bd)                                        # (th, W, hid)


# ----------------------------------------------------------------------------
# kernel 1a: squeeze-excite global-sum pass (accumulated over H-strips)
# ----------------------------------------------------------------------------
def _mb_se_stats_kernel(x_ref, xt_ref, xb_ref, w1_ref, b1_ref, wd_ref, bd_ref,
                        sum_ref, hpad_ref, *, th, W):
    i = pl.program_id(1)
    top_valid = (i > 0).astype(jnp.float32)
    bot_valid = (i < pl.num_programs(1) - 1).astype(jnp.float32)
    a = _dwconv_strip(x_ref[0].astype(jnp.float32),
                      xt_ref[0, 0].astype(jnp.float32),
                      xb_ref[0, 0].astype(jnp.float32),
                      w1_ref[...], b1_ref[...], wd_ref[...], bd_ref[...],
                      hpad_ref, top_valid, bot_valid, th=th, W=W)

    @pl.when(i == 0)
    def _():
        sum_ref[...] = jnp.zeros_like(sum_ref)

    sum_ref[0] = sum_ref[0] + jnp.sum(a.reshape(th * W, -1), axis=0, keepdims=True)


# ----------------------------------------------------------------------------
# kernel 1b: MBConv main pass (SE gate from global sums + project + residual)
# ----------------------------------------------------------------------------
def _mbconv_kernel(x_ref, xt_ref, xb_ref, sum_ref, w1_ref, b1_ref, wd_ref, bd_ref,
                   sew1_ref, sew2_ref, w3_ref, b3_ref, o_ref, hpad_ref, *, th, W, HW):
    i = pl.program_id(1)
    top_valid = (i > 0).astype(jnp.float32)
    bot_valid = (i < pl.num_programs(1) - 1).astype(jnp.float32)
    C = x_ref.shape[-1]
    x_main = x_ref[0].astype(jnp.float32)                         # (th, W, C)
    a = _dwconv_strip(x_main,
                      xt_ref[0, 0].astype(jnp.float32),
                      xb_ref[0, 0].astype(jnp.float32),
                      w1_ref[...], b1_ref[...], wd_ref[...], bd_ref[...],
                      hpad_ref, top_valid, bot_valid, th=th, W=W)
    hid = a.shape[-1]
    a2 = a.reshape(th * W, hid)

    # squeeze-excite: spatial mean over the FULL image via the precomputed sums
    m = sum_ref[0] * (1.0 / HW)                                   # (1, hid)
    s = jnp.dot(m, sew1_ref[...], preferred_element_type=jnp.float32)
    s = s * jax.nn.sigmoid(s)                                     # SiLU
    g = jax.nn.sigmoid(jnp.dot(s, sew2_ref[...], preferred_element_type=jnp.float32))

    # 1x1 project (+folded BN) + MBConvResidual (Dropsample == id)
    o = jnp.dot(a2 * g, w3_ref[...], preferred_element_type=jnp.float32) + b3_ref[...]
    o_ref[0] = (o.reshape(th, W, C) + x_main).astype(o_ref.dtype)


# ----------------------------------------------------------------------------
# kernel 2: GroupNorm(q, k) global statistics (LN + q/k projections, sums only)
# ----------------------------------------------------------------------------
def _gn_stats_kernel(y_ref, lng_ref, lnb_ref, wq_ref, bq_ref, wk_ref, bk_ref, e_ref,
                     st_ref, *, ts, W):
    C = y_ref.shape[-1]
    x = y_ref[0].reshape(ts * W, C).astype(jnp.float32)
    mu = jnp.mean(x, axis=-1, keepdims=True)
    var = jnp.mean(jnp.square(x - mu), axis=-1, keepdims=True)    # biased, like torch
    y = (x - mu) * lax.rsqrt(var + EPS) * lng_ref[...] + lnb_ref[...]
    q = jnp.dot(y, wq_ref[...], preferred_element_type=jnp.float32) + bq_ref[...]
    k = jnp.dot(y, wk_ref[...], preferred_element_type=jnp.float32) + bk_ref[...]
    rows = jnp.concatenate([jnp.sum(q, axis=0, keepdims=True),
                            jnp.sum(q * q, axis=0, keepdims=True),
                            jnp.sum(k, axis=0, keepdims=True),
                            jnp.sum(k * k, axis=0, keepdims=True)], axis=0)   # (4, C)
    part = jnp.dot(rows, e_ref[...], preferred_element_type=jnp.float32)      # (4, G)

    @pl.when(pl.program_id(1) == 0)
    def _():
        st_ref[...] = jnp.zeros_like(st_ref)

    st_ref[0] = st_ref[0] + part


# ----------------------------------------------------------------------------
# kernel 3: LN + q/k/v + GroupNorm apply + masked patch attention + gate + FF
# ----------------------------------------------------------------------------
def _att_ff_kernel(y_ref, st_ref, mask_ref, lng_ref, lnb_ref,
                   wq_ref, bq_ref, wk_ref, bk_ref, wv_ref, bv_ref,
                   eT_ref, gqg_ref, gqb_ref, gkg_ref, gkb_ref, wo_ref, bo_ref,
                   lfg_ref, lfb_ref, f1_ref, fb1_ref, f2_ref, fb2_ref,
                   o_ref, att_ref, *, sh, sw, gsz, nheads, HW, cg):
    C = y_ref.shape[-1]
    W = y_ref.shape[2]
    N = sh * W
    x = y_ref[0].astype(jnp.float32)                              # (sh, W, C)
    x2 = x.reshape(N, C)

    # pre-attention LayerNorm (channels-last)
    mu = jnp.mean(x2, axis=-1, keepdims=True)
    var = jnp.mean(jnp.square(x2 - mu), axis=-1, keepdims=True)
    yn = (x2 - mu) * lax.rsqrt(var + EPS) * lng_ref[...] + lnb_ref[...]

    # q/k/v 1x1 projections: three separate (C,C) matmuls, so no lane-slicing of a
    # fused 3C-wide output is needed (and no HBM qkv intermediate exists at all).
    q = jnp.dot(yn, wq_ref[...], preferred_element_type=jnp.float32) + bq_ref[...]
    k = jnp.dot(yn, wk_ref[...], preferred_element_type=jnp.float32) + bk_ref[...]
    v = jnp.dot(yn, wv_ref[...], preferred_element_type=jnp.float32) + bv_ref[...]

    # GroupNorm(q), GroupNorm(k) with global (full-image) statistics.
    st = st_ref[0]                                                # (4, G) raw sums
    n_el = float(HW * cg)
    eT = eT_ref[...]                                              # (G, C) one-hot

    def apply_gn(t, s1, s2, gamma, beta):
        m_g = s1 * (1.0 / n_el)
        # TODO(synk): E[x^2]-E[x]^2 in f32 can lose low-order bits vs torch for very
        # large spatial sizes; clamped at 0 to stay safe under cancellation.
        v_g = jnp.maximum(s2 * (1.0 / n_el) - m_g * m_g, 0.0)
        m_c = jnp.dot(m_g, eT, preferred_element_type=jnp.float32)            # (1, C)
        r_c = jnp.dot(lax.rsqrt(v_g + EPS), eT, preferred_element_type=jnp.float32)
        return (t - m_c) * r_c * gamma + beta

    qn = apply_gn(q, st[0:1], st[1:2], gqg_ref[...], gqb_ref[...])
    kn = apply_gn(k, st[2:3], st[3:4], gkg_ref[...], gkb_ref[...])

    # patch attention: group `gsz` patches per score matmul (block-diagonal additive
    # mask) so the MXU sees bigger tiles; results go straight into a VMEM scratch.
    Dh = C // nheads
    scale = 1.0 / (Dh ** 0.5)
    gw = gsz * sw
    Lt = sh * gw
    q3 = qn.reshape(sh, W, C)
    k3 = kn.reshape(sh, W, C)
    v3 = v.reshape(sh, W, C)
    mask = mask_ref[...]                                          # (Lt, Lt)
    for j in range(W // gw):
        cs = slice(j * gw, (j + 1) * gw)
        qg = q3[:, cs, :].reshape(Lt, C)
        kg = k3[:, cs, :].reshape(Lt, C)
        vg = v3[:, cs, :].reshape(Lt, C)
        for hh in range(nheads):
            hs = slice(hh * Dh, (hh + 1) * Dh)
            s = lax.dot_general(qg[:, hs], kg[:, hs], (((1,), (1,)), ((), ())),
                                preferred_element_type=jnp.float32) * scale + mask
            s = s - jnp.max(s, axis=-1, keepdims=True)
            p = jnp.exp(s)
            p = p / jnp.sum(p, axis=-1, keepdims=True)
            oh = jnp.dot(p, vg[:, hs], preferred_element_type=jnp.float32)    # (Lt, Dh)
            att_ref[:, cs, hs] = oh.reshape(sh, gw, Dh)

    # output projection + sigmoid gate, PreNormResidualAtt: (att + 1) * x
    att = att_ref[...].reshape(N, C)
    a = jax.nn.sigmoid(jnp.dot(att, wo_ref[...], preferred_element_type=jnp.float32)
                       + bo_ref[...])
    xg = (a + 1.0) * x2

    # fused PreNormResidual FeedForward: LN -> Linear -> GELU -> Linear -> + x
    mu2 = jnp.mean(xg, axis=-1, keepdims=True)
    var2 = jnp.mean(jnp.square(xg - mu2), axis=-1, keepdims=True)
    yf = (xg - mu2) * lax.rsqrt(var2 + EPS) * lfg_ref[...] + lfb_ref[...]
    h = _gelu(jnp.dot(yf, f1_ref[...], preferred_element_type=jnp.float32) + fb1_ref[...])
    out = jnp.dot(h, f2_ref[...], preferred_element_type=jnp.float32) + fb2_ref[...] + xg
    o_ref[0] = out.reshape(sh, W, C).astype(o_ref.dtype)


# ----------------------------------------------------------------------------
# wrappers
# ----------------------------------------------------------------------------
def _halo_specs(H, W, C, th):
    x_spec = pl.BlockSpec((1, th, W, C), lambda b, i: (b, i, 0, 0))
    # halo rows fetched via clamped index maps (row block size 1 => block index is
    # the row index); out-of-range rows get multiplied by 0 inside the kernel.
    xt_spec = pl.BlockSpec((1, 1, W, C),
                           lambda b, i: (b, jnp.maximum(i * th - 1, 0), 0, 0))
    xb_spec = pl.BlockSpec((1, 1, W, C),
                           lambda b, i: (b, jnp.minimum(i * th + th, H - 1), 0, 0))
    return x_spec, xt_spec, xb_spec


def mbconv_se_stats(x, mb, *, row_tile):
    B, H, W, C = x.shape
    hid = mb["w1"].shape[1]
    th = _largest_divisor_leq(H, row_tile)
    x_spec, xt_spec, xb_spec = _halo_specs(H, W, C, th)
    return pl.pallas_call(
        functools.partial(_mb_se_stats_kernel, th=th, W=W),
        out_shape=jax.ShapeDtypeStruct((B, 1, hid), jnp.float32),
        grid=(B, H // th),
        in_specs=[x_spec, xt_spec, xb_spec,
                  _rep_spec((C, hid)), _rep_spec((1, hid)),
                  _rep_spec((3, 3, hid)), _rep_spec((1, hid))],
        out_specs=pl.BlockSpec((1, 1, hid), lambda b, i: (b, 0, 0)),
        scratch_shapes=[pltpu.VMEM((th + 2, W + 2, hid), jnp.float32)],
        compiler_params=pltpu.CompilerParams(
            dimension_semantics=("parallel", "arbitrary")),
    )(x, x, x, mb["w1"], mb["b1"], mb["wd"], mb["bd"])


def mbconv_main(x, se_sums, mb, *, row_tile):
    B, H, W, C = x.shape
    hid = mb["w1"].shape[1]
    seh = mb["se_w1"].shape[1]
    th = _largest_divisor_leq(H, row_tile)
    x_spec, xt_spec, xb_spec = _halo_specs(H, W, C, th)
    return pl.pallas_call(
        functools.partial(_mbconv_kernel, th=th, W=W, HW=H * W),
        out_shape=jax.ShapeDtypeStruct((B, H, W, C), x.dtype),
        grid=(B, H // th),
        in_specs=[x_spec, xt_spec, xb_spec,
                  pl.BlockSpec((1, 1, hid), lambda b, i: (b, 0, 0)),
                  _rep_spec((C, hid)), _rep_spec((1, hid)),
                  _rep_spec((3, 3, hid)), _rep_spec((1, hid)),
                  _rep_spec((hid, seh)), _rep_spec((seh, hid)),
                  _rep_spec((hid, C)), _rep_spec((1, C))],
        out_specs=pl.BlockSpec((1, th, W, C), lambda b, i: (b, i, 0, 0)),
        scratch_shapes=[pltpu.VMEM((th + 2, W + 2, hid), jnp.float32)],
        compiler_params=pltpu.CompilerParams(
            dimension_semantics=("parallel", "parallel")),
    )(x, x, x, se_sums, mb["w1"], mb["b1"], mb["wd"], mb["bd"],
      mb["se_w1"], mb["se_w2"], mb["w3"], mb["b3"])


def gn_stats(y, p, *, row_tile):
    B, H, W, C = y.shape
    att = p["att"]
    G = att["E"].shape[1]
    ts = _largest_divisor_leq(H, row_tile)
    return pl.pallas_call(
        functools.partial(_gn_stats_kernel, ts=ts, W=W),
        out_shape=jax.ShapeDtypeStruct((B, 4, G), jnp.float32),
        grid=(B, H // ts),
        in_specs=[pl.BlockSpec((1, ts, W, C), lambda b, i: (b, i, 0, 0)),
                  _rep_spec((1, C)), _rep_spec((1, C)),
                  _rep_spec((C, C)), _rep_spec((1, C)),
                  _rep_spec((C, C)), _rep_spec((1, C)),
                  _rep_spec((C, G))],
        out_specs=pl.BlockSpec((1, 4, G), lambda b, i: (b, 0, 0)),
        compiler_params=pltpu.CompilerParams(
            dimension_semantics=("parallel", "arbitrary")),
    )(y, p["ln_att_g"], p["ln_att_b"], att["wq"], att["bq"],
      att["wk"], att["bk"], att["E"])


def _pick_group(Pw, L):
    """Number of patches per score matmul: target 64-128 tokens, <=4x masked FLOPs."""
    target = max(1, min(4, max(1, 128 // max(L, 1))))
    g = min(Pw, target)
    while Pw % g:
        g -= 1
    return g


def _build_patch_mask(sh, sw, gsz):
    gw = gsz * sw
    Lt = sh * gw
    pid = (jnp.arange(Lt) % gw) // sw
    same = pid[:, None] == pid[None, :]
    return jnp.where(same, 0.0, -1e30).astype(jnp.float32)


def att_ff(y, stats, p, *, nheads, scales):
    B, H, W, C = y.shape
    sh, sw = scales
    assert H % sh == 0 and W % sw == 0 and C % nheads == 0
    att, ff = p["att"], p["ff"]
    G = att["E"].shape[1]
    cg = C // G
    inner = ff["w1"].shape[1]
    gsz = _pick_group(W // sw, sh * sw)
    Lt = sh * gsz * sw
    mask = _build_patch_mask(sh, sw, gsz)
    return pl.pallas_call(
        functools.partial(_att_ff_kernel, sh=sh, sw=sw, gsz=gsz,
                          nheads=nheads, HW=H * W, cg=cg),
        out_shape=jax.ShapeDtypeStruct((B, H, W, C), y.dtype),
        grid=(B, H // sh),
        in_specs=[
            pl.BlockSpec((1, sh, W, C), lambda b, i: (b, i, 0, 0)),
            pl.BlockSpec((1, 4, G), lambda b, i: (b, 0, 0)),
            _rep_spec((Lt, Lt)),
            _rep_spec((1, C)), _rep_spec((1, C)),                      # ln_att
            _rep_spec((C, C)), _rep_spec((1, C)),                      # wq, bq
            _rep_spec((C, C)), _rep_spec((1, C)),                      # wk, bk
            _rep_spec((C, C)), _rep_spec((1, C)),                      # wv, bv
            _rep_spec((G, C)),                                         # ET
            _rep_spec((1, C)), _rep_spec((1, C)),                      # gn(q)
            _rep_spec((1, C)), _rep_spec((1, C)),                      # gn(k)
            _rep_spec((C, C)), _rep_spec((1, C)),                      # wo, bo
            _rep_spec((1, C)), _rep_spec((1, C)),                      # ln_ff
            _rep_spec((C, inner)), _rep_spec((1, inner)),              # ff w1, b1
            _rep_spec((inner, C)), _rep_spec((1, C)),                  # ff w2, b2
        ],
        out_specs=pl.BlockSpec((1, sh, W, C), lambda b, i: (b, i, 0, 0)),
        scratch_shapes=[pltpu.VMEM((sh, W, C), jnp.float32)],
        compiler_params=pltpu.CompilerParams(
            dimension_semantics=("parallel", "parallel")),
    )(y, stats, mask,
      p["ln_att_g"], p["ln_att_b"],
      att["wq"], att["bq"], att["wk"], att["bk"], att["wv"], att["bv"],
      att["ET"], att["gnq_g"], att["gnq_b"], att["gnk_g"], att["gnk_b"],
      att["wo"], att["bo"],
      p["ln_ff_g"], p["ln_ff_b"],
      ff["w1"], ff["b1"], ff["w2"], ff["b2"])


# ----------------------------------------------------------------------------
# module forward
# ----------------------------------------------------------------------------
def block_forward(x, p, *, nheads, scales, row_tile):
    se_sums = mbconv_se_stats(x, p["mbconv"], row_tile=row_tile)
    x = mbconv_main(x, se_sums, p["mbconv"], row_tile=row_tile)
    st = gn_stats(x, p, row_tile=row_tile)
    x = att_ff(x, st, p, nheads=nheads, scales=scales)
    return x


def ptavit_stage_no_down(x_nchw, params, *, nheads, scales, row_tile=8,
                         act_dtype=jnp.bfloat16):
    # NCHW -> NHWC; inter-kernel activations stored as bf16 in HBM (halves DMA
    # bytes for this memory-bound stage); all kernel math runs in f32.
    x = jnp.transpose(x_nchw, (0, 2, 3, 1)).astype(act_dtype)
    for p in params:
        x = block_forward(x, p, nheads=nheads, scales=scales, row_tile=row_tile)
    return jnp.transpose(x.astype(x_nchw.dtype), (0, 3, 1, 2))


# ----------------------------------------------------------------------------
# parameter initialization + one-time (outside jit) preparation
# ----------------------------------------------------------------------------
def init_params(key, dim, depth, *, expansion=4, shrinkage=0.25, ff_mult=4):
    hid = int(expansion * dim)
    se_h = int(hid * shrinkage)
    inner = int(dim * ff_mult)
    keys = iter(jax.random.split(key, depth * 64))

    def rnd(shape, s=0.05):
        return (s * jax.random.normal(next(keys), shape)).astype(jnp.float32)

    def bn_params(c):
        return dict(gamma=1.0 + rnd((c,), 0.1), beta=rnd((c,), 0.1),
                    mean=rnd((c,), 0.1), var=0.8 + jnp.abs(rnd((c,), 0.3)))

    params = []
    for _ in range(depth):
        params.append(dict(
            mbconv=dict(
                w1=rnd((dim, hid)), b1=rnd((hid,)), bn1=bn_params(hid),
                wd=rnd((3, 3, hid)), bd=rnd((hid,)), bn2=bn_params(hid),
                se_w1=rnd((hid, se_h)), se_w2=rnd((se_h, hid)),
                w3=rnd((hid, dim)), b3=rnd((dim,)), bn3=bn_params(dim),
            ),
            ln_att_g=1.0 + rnd((dim,), 0.1), ln_att_b=rnd((dim,), 0.1),
            att=dict(
                wq=rnd((dim, dim)), bq=rnd((dim,)),
                wk=rnd((dim, dim)), bk=rnd((dim,)),
                wv=rnd((dim, dim)), bv=rnd((dim,)),
                wo=rnd((dim, dim)), bo=rnd((dim,)),
                gnq_g=1.0 + rnd((dim,), 0.1), gnq_b=rnd((dim,), 0.1),
                gnk_g=1.0 + rnd((dim,), 0.1), gnk_b=rnd((dim,), 0.1),
            ),
            ln_ff_g=1.0 + rnd((dim,), 0.1), ln_ff_b=rnd((dim,), 0.1),
            ff=dict(ff_w1=rnd((dim, inner)), ff_b1=rnd((inner,)),
                    ff_w2=rnd((inner, dim)), ff_b2=rnd((dim,))),
        ))
    return params


def prepare_params(params):
    """Fold eval-mode BatchNorms and build the GroupNorm group indicators.
    Runs ONCE, outside the jitted forward."""
    prepared = []
    for p in params:
        mb = p["mbconv"]
        w1, b1 = fold_bn(mb["w1"], mb["b1"], mb["bn1"])
        wd, bd = fold_bn(mb["wd"], mb["bd"], mb["bn2"])
        w3, b3 = fold_bn(mb["w3"], mb["b3"], mb["bn3"])
        C, hid = w1.shape
        att = p["att"]
        groups = C // 4
        cg = C // groups
        E = (jnp.arange(C)[:, None] // cg ==
             jnp.arange(groups)[None, :]).astype(jnp.float32)          # (C, G)
        prepared.append(dict(
            mbconv=dict(w1=w1, b1=b1.reshape(1, hid), wd=wd, bd=bd.reshape(1, hid),
                        se_w1=mb["se_w1"], se_w2=mb["se_w2"],
                        w3=w3, b3=b3.reshape(1, C)),
            ln_att_g=p["ln_att_g"].reshape(1, C), ln_att_b=p["ln_att_b"].reshape(1, C),
            att=dict(wq=att["wq"], bq=att["bq"].reshape(1, C),
                     wk=att["wk"], bk=att["bk"].reshape(1, C),
                     wv=att["wv"], bv=att["bv"].reshape(1, C),
                     wo=att["wo"], bo=att["bo"].reshape(1, C),
                     E=E, ET=E.T,
                     gnq_g=att["gnq_g"].reshape(1, C), gnq_b=att["gnq_b"].reshape(1, C),
                     gnk_g=att["gnk_g"].reshape(1, C), gnk_b=att["gnk_b"].reshape(1, C)),
            ln_ff_g=p["ln_ff_g"].reshape(1, C), ln_ff_b=p["ln_ff_b"].reshape(1, C),
            ff=dict(w1=p["ff"]["ff_w1"], b1=p["ff"]["ff_b1"].reshape(1, -1),
                    w2=p["ff"]["ff_w2"], b2=p["ff"]["ff_b2"].reshape(1, C)),
        ))
    return prepared


# ----------------------------------------------------------------------------
# TODO(synk): RelPatchAttention2D's source is not provided with the module; the
# attention path is a stand-in (q/k/v 1x1 convs, GroupNorm(dim//4) on q and k,
# softmax multi-head attention within each (sh, sw) patch, sigmoid-gated output
# projection) matching the (att + 1) * x residual pattern — no relative-position
# bias is implemented.
# ----------------------------------------------------------------------------
if __name__ == "__main__":
    B, C, H, W = 2, 32, 16, 16          # layer_dim_in = 32, spatial_size = 16
    depth, nheads, scales = 2, 2, (4, 4)

    key = jax.random.PRNGKey(0)
    kx, kp = jax.random.split(key)
    x = jax.random.normal(kx, (B, C, H, W), jnp.float32)   # NCHW (PyTorch convention)
    params = init_params(kp, C, depth)
    prepared = prepare_params(params)    # BN folding / indicator build, outside jit

    fwd = jax.jit(functools.partial(ptavit_stage_no_down, nheads=nheads, scales=scales))
    out = fwd(x, prepared)
    jax.block_until_ready(out)
    assert out.shape == (B, C, H, W) and out.dtype == jnp.float32
    assert bool(jnp.all(jnp.isfinite(out)))
    print("KERNEL_OK")
</pallas_src>

<mosaic_0001>
module attributes {stable_mosaic.version = 11 : i64} {
  func.func @_mbconv_kernel(%arg0: i32, %arg1: i32, %arg2: memref<1x8x16x32xbf16, #tpu.memory_space<vmem>>, %arg3: memref<1x1x16x32xbf16, #tpu.memory_space<vmem>>, %arg4: memref<1x1x16x32xbf16, #tpu.memory_space<vmem>>, %arg5: memref<1x1x128xf32, #tpu.memory_space<vmem>>, %arg6: memref<32x128xf32, #tpu.memory_space<vmem>>, %arg7: memref<1x128xf32, #tpu.memory_space<vmem>>, %arg8: memref<3x3x128xf32, #tpu.memory_space<vmem>>, %arg9: memref<1x128xf32, #tpu.memory_space<vmem>>, %arg10: memref<128x32xf32, #tpu.memory_space<vmem>>, %arg11: memref<32x128xf32, #tpu.memory_space<vmem>>, %arg12: memref<128x32xf32, #tpu.memory_space<vmem>>, %arg13: memref<1x32xf32, #tpu.memory_space<vmem>>, %arg14: memref<1x8x16x32xbf16, #tpu.memory_space<vmem>>, %arg15: memref<10x18x128xf32, #tpu.memory_space<vmem>>) attributes {dimension_semantics = [#tpu.dimension_semantics<parallel>, #tpu.dimension_semantics<parallel>], iteration_bounds = array<i64: 2, 2>, scalar_prefetch = 0 : i64, scratch_operands = 1 : i64, tpu.core_type = #tpu.core_type<tc>, window_params = [{transform_indices = @transform_0, window_bounds = array<i64: 1, 8, 16, 32>}, {transform_indices = @transform_1, window_bounds = array<i64: 1, 1, 16, 32>}, {transform_indices = @transform_2, window_bounds = array<i64: 1, 1, 16, 32>}, {transform_indices = @transform_3, window_bounds = array<i64: 1, 1, 128>}, {pipeline_mode = #tpu.pipeline_mode<synchronous>, transform_indices = @transform_4, window_bounds = array<i64: 32, 128>}, {pipeline_mode = #tpu.pipeline_mode<synchronous>, transform_indices = @transform_5, window_bounds = array<i64: 1, 128>}, {pipeline_mode = #tpu.pipeline_mode<synchronous>, transform_indices = @transform_6, window_bounds = array<i64: 3, 3, 128>}, {pipeline_mode = #tpu.pipeline_mode<synchronous>, transform_indices = @transform_7, window_bounds = array<i64: 1, 128>}, {pipeline_mode = #tpu.pipeline_mode<synchronous>, transform_indices = @transform_8, window_bounds = array<i64: 128, 32>}, {pipeline_mode = #tpu.pipeline_mode<synchronous>, transform_indices = @transform_9, window_bounds = array<i64: 32, 128>}, {pipeline_mode = #tpu.pipeline_mode<synchronous>, transform_indices = @transform_10, window_bounds = array<i64: 128, 32>}, {pipeline_mode = #tpu.pipeline_mode<synchronous>, transform_indices = @transform_11, window_bounds = array<i64: 1, 32>}, {transform_indices = @transform_12, window_bounds = array<i64: 1, 8, 16, 32>}]} {
    %c0_i32 = arith.constant 0 : i32
    %0 = arith.cmpi sgt, %arg1, %c0_i32 : i32
    %1 = arith.extui %0 : i1 to i32
    %2 = arith.sitofp %1 : i32 to f32
    %c1_i32 = arith.constant 1 : i32
    %3 = arith.cmpi slt, %arg1, %c1_i32 : i32
    %4 = arith.extui %3 : i1 to i32
    %5 = arith.sitofp %4 : i32 to f32
    %c0 = arith.constant 0 : index
    %c0_0 = arith.constant 0 : index
    %c0_1 = arith.constant 0 : index
    %c0_2 = arith.constant 0 : index
    %6 = vector.load %arg2[%c0, %c0_0, %c0_1, %c0_2] : memref<1x8x16x32xbf16, #tpu.memory_space<vmem>>, vector<1x8x16x32xbf16>
    %7 = vector.shape_cast %6 : vector<1x8x16x32xbf16> to vector<8x16x32xbf16>
    %8 = arith.extf %7 : vector<8x16x32xbf16> to vector<8x16x32xf32>
    %c0_3 = arith.constant 0 : index
    %c0_4 = arith.constant 0 : index
    %c0_5 = arith.constant 0 : index
    %c0_6 = arith.constant 0 : index
    %9 = vector.load %arg3[%c0_3, %c0_4, %c0_5, %c0_6] : memref<1x1x16x32xbf16, #tpu.memory_space<vmem>>, vector<1x1x16x32xbf16>
    %10 = vector.shape_cast %9 : vector<1x1x16x32xbf16> to vector<16x32xbf16>
    %11 = arith.extf %10 : vector<16x32xbf16> to vector<16x32xf32>
    %c0_7 = arith.constant 0 : index
    %c0_8 = arith.constant 0 : index
    %c0_9 = arith.constant 0 : index
    %c0_10 = arith.constant 0 : index
    %12 = vector.load %arg4[%c0_7, %c0_8, %c0_9, %c0_10] : memref<1x1x16x32xbf16, #tpu.memory_space<vmem>>, vector<1x1x16x32xbf16>
    %13 = vector.shape_cast %12 : vector<1x1x16x32xbf16> to vector<16x32xbf16>
    %14 = arith.extf %13 : vector<16x32xbf16> to vector<16x32xf32>
    %c0_11 = arith.constant 0 : index
    %c0_12 = arith.constant 0 : index
    %15 = vector.load %arg6[%c0_11, %c0_12] : memref<32x128xf32, #tpu.memory_space<vmem>>, vector<32x128xf32>
    %c0_13 = arith.constant 0 : index
    %c0_14 = arith.constant 0 : index
    %16 = vector.load %arg7[%c0_13, %c0_14] : memref<1x128xf32, #tpu.memory_space<vmem>>, vector<1x128xf32>
    %c0_15 = arith.constant 0 : index
    %c0_16 = arith.constant 0 : index
    %c0_17 = arith.constant 0 : index
    %17 = vector.load %arg8[%c0_15, %c0_16, %c0_17] : memref<3x3x128xf32, #tpu.memory_space<vmem>>, vector<3x3x128xf32>
    %c0_18 = arith.constant 0 : index
    %c0_19 = arith.constant 0 : index
    %18 = vector.load %arg9[%c0_18, %c0_19] : memref<1x128xf32, #tpu.memory_space<vmem>>, vector<1x128xf32>
    %19 = vector.shape_cast %8 : vector<8x16x32xf32> to vector<128x32xf32>
    %cst = arith.constant dense<0.000000e+00> : vector<128x128xf32>
    %20 = tpu.matmul %19, %15, %cst {dimension_numbers = #tpu.dot_dimension_numbers<[1], [0], [0], [1], [0, 0, 1, 1], [], []>} : vector<128x32xf32>, vector<32x128xf32>, vector<128x128xf32> -> vector<128x128xf32>
    %21 = vector.broadcast %16 : vector<1x128xf32> to vector<128x128xf32>
    %22 = arith.addf %20, %21 : vector<128x128xf32>
    %23 = arith.mulf %22, %22 : vector<128x128xf32>
    %24 = arith.mulf %22, %23 : vector<128x128xf32>
    %cst_20 = arith.constant 4.471500e-02 : f32
    %25 = vector.broadcast %cst_20 : f32 to vector<128x128xf32>
    %26 = arith.mulf %25, %24 : vector<128x128xf32>
    %27 = arith.addf %22, %26 : vector<128x128xf32>
    %cst_21 = arith.constant 0.797884583 : f32
    %28 = vector.broadcast %cst_21 : f32 to vector<128x128xf32>
    %29 = arith.mulf %28, %27 : vector<128x128xf32>
    %30 = math.tanh %29 : vector<128x128xf32>
    %cst_22 = arith.constant 1.000000e+00 : f32
    %31 = vector.broadcast %cst_22 : f32 to vector<128x128xf32>
    %32 = arith.addf %31, %30 : vector<128x128xf32>
    %cst_23 = arith.constant 5.000000e-01 : f32
    %33 = vector.broadcast %cst_23 : f32 to vector<128x128xf32>
    %34 = arith.mulf %33, %32 : vector<128x128xf32>
    %35 = arith.mulf %22, %34 : vector<128x128xf32>
    %cst_24 = arith.constant dense<0.000000e+00> : vector<16x128xf32>
    %36 = tpu.matmul %11, %15, %cst_24 {dimension_numbers = #tpu.dot_dimension_numbers<[1], [0], [0], [1], [0, 0, 1, 1], [], []>} : vector<16x32xf32>, vector<32x128xf32>, vector<16x128xf32> -> vector<16x128xf32>
    %37 = vector.broadcast %16 : vector<1x128xf32> to vector<16x128xf32>
    %38 = arith.addf %36, %37 : vector<16x128xf32>
    %39 = arith.mulf %38, %38 : vector<16x128xf32>
    %40 = arith.mulf %38, %39 : vector<16x128xf32>
    %cst_25 = arith.constant 4.471500e-02 : f32
    %41 = vector.broadcast %cst_25 : f32 to vector<16x128xf32>
    %42 = arith.mulf %41, %40 : vector<16x128xf32>
    %43 = arith.addf %38, %42 : vector<16x128xf32>
    %cst_26 = arith.constant 0.797884583 : f32
    %44 = vector.broadcast %cst_26 : f32 to vector<16x128xf32>
    %45 = arith.mulf %44, %43 : vector<16x128xf32>
    %46 = math.tanh %45 : vector<16x128xf32>
    %cst_27 = arith.constant 1.000000e+00 : f32
    %47 = vector.broadcast %cst_27 : f32 to vector<16x128xf32>
    %48 = arith.addf %47, %46 : vector<16x128xf32>
    %cst_28 = arith.constant 5.000000e-01 : f32
    %49 = vector.broadcast %cst_28 : f32 to vector<16x128xf32>
    %50 = arith.mulf %49, %48 : vector<16x128xf32>
    %51 = arith.mulf %38, %50 : vector<16x128xf32>
    %52 = vector.broadcast %2 : f32 to vector<16x128xf32>
    %53 = arith.mulf %51, %52 : vector<16x128xf32>
    %cst_29 = arith.constant dense<0.000000e+00> : vector<16x128xf32>
    %54 = tpu.matmul %14, %15, %cst_29 {dimension_numbers = #tpu.dot_dimension_numbers<[1], [0], [0], [1], [0, 0, 1, 1], [], []>} : vector<16x32xf32>, vector<32x128xf32>, vector<16x128xf32> -> vector<16x128xf32>
    %55 = vector.broadcast %16 : vector<1x128xf32> to vector<16x128xf32>
    %56 = arith.addf %54, %55 : vector<16x128xf32>
    %57 = arith.mulf %56, %56 : vector<16x128xf32>
    %58 = arith.mulf %56, %57 : vector<16x128xf32>
    %cst_30 = arith.constant 4.471500e-02 : f32
    %59 = vector.broadcast %cst_30 : f32 to vector<16x128xf32>
    %60 = arith.mulf %59, %58 : vector<16x128xf32>
    %61 = arith.addf %56, %60 : vector<16x128xf32>
    %cst_31 = arith.constant 0.797884583 : f32
    %62 = vector.broadcast %cst_31 : f32 to vector<16x128xf32>
    %63 = arith.mulf %62, %61 : vector<16x128xf32>
    %64 = math.tanh %63 : vector<16x128xf32>
    %cst_32 = arith.constant 1.000000e+00 : f32
    %65 = vector.broadcast %cst_32 : f32 to vector<16x128xf32>
    %66 = arith.addf %65, %64 : vector<16x128xf32>
    %cst_33 = arith.constant 5.000000e-01 : f32
    %67 = vector.broadcast %cst_33 : f32 to vector<16x128xf32>
    %68 = arith.mulf %67, %66 : vector<16x128xf32>
    %69 = arith.mulf %56, %68 : vector<16x128xf32>
    %70 = vector.broadcast %5 : f32 to vector<16x128xf32>
    %71 = arith.mulf %69, %70 : vector<16x128xf32>
    %cst_34 = arith.constant 0.000000e+00 : f32
    %72 = vector.broadcast %cst_34 : f32 to vector<10x128xf32>
    %c0_35 = arith.constant 0 : index
    %c0_36 = arith.constant 0 : index
    %c0_37 = arith.constant 0 : index
    %73 = vector.load %arg15[%c0_35, %c0_36, %c0_37] : memref<10x18x128xf32, #tpu.memory_space<vmem>>, vector<10x1x128xf32>
    %74 = vector.shape_cast %73 : vector<10x1x128xf32> to vector<10x128xf32>
    %75 = vector.shape_cast %72 : vector<10x128xf32> to vector<10x1x128xf32>
    tpu.vector_store %arg15[%c0_35, %c0_36, %c0_37], %75 {strides = array<i32>} : memref<10x18x128xf32, #tpu.memory_space<vmem>>, vector<10x1x128xf32>,
    %c0_38 = arith.constant 0 : index
    %c17 = arith.constant 17 : index
    %c0_39 = arith.constant 0 : index
    %76 = vector.load %arg15[%c0_38, %c17, %c0_39] : memref<10x18x128xf32, #tpu.memory_space<vmem>>, vector<10x1x128xf32>
    %77 = vector.shape_cast %76 : vector<10x1x128xf32> to vector<10x128xf32>
    %78 = vector.shape_cast %72 : vector<10x128xf32> to vector<10x1x128xf32>
    tpu.vector_store %arg15[%c0_38, %c17, %c0_39], %78 {strides = array<i32>} : memref<10x18x128xf32, #tpu.memory_space<vmem>>, vector<10x1x128xf32>,
    %c0_40 = arith.constant 0 : index
    %c1 = arith.constant 1 : index
    %c0_41 = arith.constant 0 : index
    %79 = vector.load %arg15[%c0_40, %c1, %c0_41] : memref<10x18x128xf32, #tpu.memory_space<vmem>>, vector<1x16x128xf32>
    %80 = vector.shape_cast %79 : vector<1x16x128xf32> to vector<16x128xf32>
    %81 = vector.shape_cast %53 : vector<16x128xf32> to vector<1x16x128xf32>
    tpu.vector_store %arg15[%c0_40, %c1, %c0_41], %81 {strides = array<i32>} : memref<10x18x128xf32, #tpu.memory_space<vmem>>, vector<1x16x128xf32>,
    %c9 = arith.constant 9 : index
    %c1_42 = arith.constant 1 : index
    %c0_43 = arith.constant 0 : index
    %82 = vector.load %arg15[%c9, %c1_42, %c0_43] : memref<10x18x128xf32, #tpu.memory_space<vmem>>, vector<1x16x128xf32>
    %83 = vector.shape_cast %82 : vector<1x16x128xf32> to vector<16x128xf32>
    %84 = vector.shape_cast %71 : vector<16x128xf32> to vector<1x16x128xf32>
    tpu.vector_store %arg15[%c9, %c1_42, %c0_43], %84 {strides = array<i32>} : memref<10x18x128xf32, #tpu.memory_space<vmem>>, vector<1x16x128xf32>,
    %85 = vector.shape_cast %35 : vector<128x128xf32> to vector<8x16x128xf32>
    %c1_44 = arith.constant 1 : index
    %c1_45 = arith.constant 1 : index
    %c0_46 = arith.constant 0 : index
    %86 = vector.load %arg15[%c1_44, %c1_45, %c0_46] : memref<10x18x128xf32, #tpu.memory_space<vmem>>, vector<8x16x128xf32>
    tpu.vector_store %arg15[%c1_44, %c1_45, %c0_46], %85 {strides = array<i32>} : memref<10x18x128xf32, #tpu.memory_space<vmem>>, vector<8x16x128xf32>,
    %cst_47 = arith.constant 0.000000e+00 : f32
    %87 = vector.broadcast %cst_47 : f32 to vector<8x16x128xf32>
    %c0_48 = arith.constant 0 : index
    %c0_49 = arith.constant 0 : index
    %c0_50 = arith.constant 0 : index
    %88 = vector.load %arg15[%c0_48, %c0_49, %c0_50] : memref<10x18x128xf32, #tpu.memory_space<vmem>>, vector<8x16x128xf32>
    %89 = vector.extract_strided_slice %17 {offsets = [0, 0, 0], sizes = [1, 1, 128], strides = [1, 1, 1]} : vector<3x3x128xf32> to vector<1x1x128xf32>
    %90 = vector.shape_cast %89 : vector<1x1x128xf32> to vector<128xf32>
    %91 = vector.shape_cast %90 : vector<128xf32> to vector<1x1x128xf32>
    %92 = vector.broadcast %91 : vector<1x1x128xf32> to vector<8x16x128xf32>
    %93 = arith.mulf %88, %92 : vector<8x16x128xf32>
    %94 = arith.addf %87, %93 : vector<8x16x128xf32>
    %c0_51 = arith.constant 0 : index
    %c1_52 = arith.constant 1 : index
    %c0_53 = arith.constant 0 : index
    %95 = vector.load %arg15[%c0_51, %c1_52, %c0_53] : memref<10x18x128xf32, #tpu.memory_space<vmem>>, vector<8x16x128xf32>
    %96 = vector.extract_strided_slice %17 {offsets = [0, 1, 0], sizes = [1, 1, 128], strides = [1, 1, 1]} : vector<3x3x128xf32> to vector<1x1x128xf32>
    %97 = vector.shape_cast %96 : vector<1x1x128xf32> to vector<128xf32>
    %98 = vector.shape_cast %97 : vector<128xf32> to vector<1x1x128xf32>
    %99 = vector.broadcast %98 : vector<1x1x128xf32> to vector<8x16x128xf32>
    %100 = arith.mulf %95, %99 : vector<8x16x128xf32>
    %101 = arith.addf %94, %100 : vector<8x16x128xf32>
    %c0_54 = arith.constant 0 : index
    %c2 = arith.constant 2 : index
    %c0_55 = arith.constant 0 : index
    %102 = vector.load %arg15[%c0_54, %c2, %c0_55] : memref<10x18x128xf32, #tpu.memory_space<vmem>>, vector<8x16x128xf32>
    %103 = vector.extract_strided_slice %17 {offsets = [0, 2, 0], sizes = [1, 1, 128], strides = [1, 1, 1]} : vector<3x3x128xf32> to vector<1x1x128xf32>
    %104 = vector.shape_cast %103 : vector<1x1x128xf32> to vector<128xf32>
    %105 = vector.shape_cast %104 : vector<128xf32> to vector<1x1x128xf32>
    %106 = vector.broadcast %105 : vector<1x1x128xf32> to vector<8x16x128xf32>
    %107 = arith.mulf %102, %106 : vector<8x16x128xf32>
    %108 = arith.addf %101, %107 : vector<8x16x128xf32>
    %c1_56 = arith.constant 1 : index
    %c0_57 = arith.constant 0 : index
    %c0_58 = arith.constant 0 : index
    %109 = vector.load %arg15[%c1_56, %c0_57, %c0_58] : memref<10x18x128xf32, #tpu.memory_space<vmem>>, vector<8x16x128xf32>
    %110 = vector.extract_strided_slice %17 {offsets = [1, 0, 0], sizes = [1, 1, 128], strides = [1, 1, 1]} : vector<3x3x128xf32> to vector<1x1x128xf32>
    %111 = vector.shape_cast %110 : vector<1x1x128xf32> to vector<128xf32>
    %112 = vector.shape_cast %111 : vector<128xf32> to vector<1x1x128xf32>
    %113 = vector.broadcast %112 : vector<1x1x128xf32> to vector<8x16x128xf32>
    %114 = arith.mulf %109, %113 : vector<8x16x128xf32>
    %115 = arith.addf %108, %114 : vector<8x16x128xf32>
    %c1_59 = arith.constant 1 : index
    %c1_60 = arith.constant 1 : index
    %c0_61 = arith.constant 0 : index
    %116 = vector.load %arg15[%c1_59, %c1_60, %c0_61] : memref<10x18x128xf32, #tpu.memory_space<vmem>>, vector<8x16x128xf32>
    %117 = vector.extract_strided_slice %17 {offsets = [1, 1, 0], sizes = [1, 1, 128], strides = [1, 1, 1]} : vector<3x3x128xf32> to vector<1x1x128xf32>
    %118 = vector.shape_cast %117 : vector<1x1x128xf32> to vector<128xf32>
    %119 = vector.shape_cast %118 : vector<128xf32> to vector<1x1x128xf32>
    %120 = vector.broadcast %119 : vector<1x1x128xf32> to vector<8x16x128xf32>
    %121 = arith.mulf %116, %120 : vector<8x16x128xf32>
    %122 = arith.addf %115, %121 : vector<8x16x128xf32>
    %c1_62 = arith.constant 1 : index
    %c2_63 = arith.constant 2 : index
    %c0_64 = arith.constant 0 : index
    %123 = vector.load %arg15[%c1_62, %c2_63, %c0_64] : memref<10x18x128xf32, #tpu.memory_space<vmem>>, vector<8x16x128xf32>
    %124 = vector.extract_strided_slice %17 {offsets = [1, 2, 0], sizes = [1, 1, 128], strides = [1, 1, 1]} : vector<3x3x128xf32> to vector<1x1x128xf32>
    %125 = vector.shape_cast %124 : vector<1x1x128xf32> to vector<128xf32>
    %126 = vector.shape_cast %125 : vector<128xf32> to vector<1x1x128xf32>
    %127 = vector.broadcast %126 : vector<1x1x128xf32> to vector<8x16x128xf32>
    %128 = arith.mulf %123, %127 : vector<8x16x128xf32>
    %129 = arith.addf %122, %128 : vector<8x16x128xf32>
    %c2_65 = arith.constant 2 : index
    %c0_66 = arith.constant 0 : index
    %c0_67 = arith.constant 0 : index
    %130 = vector.load %arg15[%c2_65, %c0_66, %c0_67] : memref<10x18x128xf32, #tpu.memory_space<vmem>>, vector<8x16x128xf32>
    %131 = vector.extract_strided_slice %17 {offsets = [2, 0, 0], sizes = [1, 1, 128], strides = [1, 1, 1]} : vector<3x3x128xf32> to vector<1x1x128xf32>
    %132 = vector.shape_cast %131 : vector<1x1x128xf32> to vector<128xf32>
    %133 = vector.shape_cast %132 : vector<128xf32> to vector<1x1x128xf32>
    %134 = vector.broadcast %133 : vector<1x1x128xf32> to vector<8x16x128xf32>
    %135 = arith.mulf %130, %134 : vector<8x16x128xf32>
    %136 = arith.addf %129, %135 : vector<8x16x128xf32>
    %c2_68 = arith.constant 2 : index
    %c1_69 = arith.constant 1 : index
    %c0_70 = arith.constant 0 : index
    %137 = vector.load %arg15[%c2_68, %c1_69, %c0_70] : memref<10x18x128xf32, #tpu.memory_space<vmem>>, vector<8x16x128xf32>
    %138 = vector.extract_strided_slice %17 {offsets = [2, 1, 0], sizes = [1, 1, 128], strides = [1, 1, 1]} : vector<3x3x128xf32> to vector<1x1x128xf32>
    %139 = vector.shape_cast %138 : vector<1x1x128xf32> to vector<128xf32>
    %140 = vector.shape_cast %139 : vector<128xf32> to vector<1x1x128xf32>
    %141 = vector.broadcast %140 : vector<1x1x128xf32> to vector<8x16x128xf32>
    %142 = arith.mulf %137, %141 : vector<8x16x128xf32>
    %143 = arith.addf %136, %142 : vector<8x16x128xf32>
    %c2_71 = arith.constant 2 : index
    %c2_72 = arith.constant 2 : index
    %c0_73 = arith.constant 0 : index
    %144 = vector.load %arg15[%c2_71, %c2_72, %c0_73] : memref<10x18x128xf32, #tpu.memory_space<vmem>>, vector<8x16x128xf32>
    %145 = vector.extract_strided_slice %17 {offsets = [2, 2, 0], sizes = [1, 1, 128], strides = [1, 1, 1]} : vector<3x3x128xf32> to vector<1x1x128xf32>
    %146 = vector.shape_cast %145 : vector<1x1x128xf32> to vector<128xf32>
    %147 = vector.shape_cast %146 : vector<128xf32> to vector<1x1x128xf32>
    %148 = vector.broadcast %147 : vector<1x1x128xf32> to vector<8x16x128xf32>
    %149 = arith.mulf %144, %148 : vector<8x16x128xf32>
    %150 = arith.addf %143, %149 : vector<8x16x128xf32>
    %151 = vector.shape_cast %18 : vector<1x128xf32> to vector<1x1x128xf32>
    %152 = vector.broadcast %151 : vector<1x1x128xf32> to vector<8x16x128xf32>
    %153 = arith.addf %150, %152 : vector<8x16x128xf32>
    %154 = arith.mulf %153, %153 : vector<8x16x128xf32>
    %155 = arith.mulf %153, %154 : vector<8x16x128xf32>
    %cst_74 = arith.constant 4.471500e-02 : f32
    %156 = vector.broadcast %cst_74 : f32 to vector<8x16x128xf32>
    %157 = arith.mulf %156, %155 : vector<8x16x128xf32>
    %158 = arith.addf %153, %157 : vector<8x16x128xf32>
    %cst_75 = arith.constant 0.797884583 : f32
    %159 = vector.broadcast %cst_75 : f32 to vector<8x16x128xf32>
    %160 = arith.mulf %159, %158 : vector<8x16x128xf32>
    %161 = math.tanh %160 : vector<8x16x128xf32>
    %cst_76 = arith.constant 1.000000e+00 : f32
    %162 = vector.broadcast %cst_76 : f32 to vector<8x16x128xf32>
    %163 = arith.addf %162, %161 : vector<8x16x128xf32>
    %cst_77 = arith.constant 5.000000e-01 : f32
    %164 = vector.broadcast %cst_77 : f32 to vector<8x16x128xf32>
    %165 = arith.mulf %164, %163 : vector<8x16x128xf32>
    %166 = arith.mulf %153, %165 : vector<8x16x128xf32>
    %167 = vector.shape_cast %166 : vector<8x16x128xf32> to vector<128x128xf32>
    %c0_78 = arith.constant 0 : index
    %c0_79 = arith.constant 0 : index
    %c0_80 = arith.constant 0 : index
    %168 = vector.load %arg5[%c0_78, %c0_79, %c0_80] : memref<1x1x128xf32, #tpu.memory_space<vmem>>, vector<1x1x128xf32>
    %169 = vector.shape_cast %168 : vector<1x1x128xf32> to vector<1x128xf32>
    %cst_81 = arith.constant 3.906250e-03 : f32
    %170 = vector.broadcast %cst_81 : f32 to vector<1x128xf32>
    %171 = arith.mulf %169, %170 : vector<1x128xf32>
    %c0_82 = arith.constant 0 : index
    %c0_83 = arith.constant 0 : index
    %172 = vector.load %arg10[%c0_82, %c0_83] : memref<128x32xf32, #tpu.memory_space<vmem>>, vector<128x32xf32>
    %cst_84 = arith.constant dense<0.000000e+00> : vector<1x32xf32>
    %173 = tpu.matmul %171, %172, %cst_84 {dimension_numbers = #tpu.dot_dimension_numbers<[1], [0], [0], [1], [0, 0, 1, 1], [], []>} : vector<1x128xf32>, vector<128x32xf32>, vector<1x32xf32> -> vector<1x32xf32>
    %174 = arith.negf %173 : vector<1x32xf32>
    %175 = math.exp %174 : vector<1x32xf32>
    %cst_85 = arith.constant 1.000000e+00 : f32
    %176 = vector.broadcast %cst_85 : f32 to vector<1x32xf32>
    %177 = arith.addf %176, %175 : vector<1x32xf32>
    %178 = arith.divf %176, %177 : vector<1x32xf32>
    %179 = arith.mulf %173, %178 : vector<1x32xf32>
    %c0_86 = arith.constant 0 : index
    %c0_87 = arith.constant 0 : index
    %180 = vector.load %arg11[%c0_86, %c0_87] : memref<32x128xf32, #tpu.memory_space<vmem>>, vector<32x128xf32>
    %cst_88 = arith.constant dense<0.000000e+00> : vector<1x128xf32>
    %181 = tpu.matmul %179, %180, %cst_88 {dimension_numbers = #tpu.dot_dimension_numbers<[1], [0], [0], [1], [0, 0, 1, 1], [], []>} : vector<1x32xf32>, vector<32x128xf32>, vector<1x128xf32> -> vector<1x128xf32>
    %182 = arith.negf %181 : vector<1x128xf32>
    %183 = math.exp %182 : vector<1x128xf32>
    %cst_89 = arith.constant 1.000000e+00 : f32
    %184 = vector.broadcast %cst_89 : f32 to vector<1x128xf32>
    %185 = arith.addf %184, %183 : vector<1x128xf32>
    %186 = arith.divf %184, %185 : vector<1x128xf32>
    %187 = vector.broadcast %186 : vector<1x128xf32> to vector<128x128xf32>
    %188 = arith.mulf %167, %187 : vector<128x128xf32>
    %c0_90 = arith.constant 0 : index
    %c0_91 = arith.constant 0 : index
    %189 = vector.load %arg12[%c0_90, %c0_91] : memref<128x32xf32, #tpu.memory_space<vmem>>, vector<128x32xf32>
    %cst_92 = arith.constant dense<0.000000e+00> : vector<128x32xf32>
    %190 = tpu.matmul %188, %189, %cst_92 {dimension_numbers = #tpu.dot_dimension_numbers<[1], [0], [0], [1], [0, 0, 1, 1], [], []>} : vector<128x128xf32>, vector<128x32xf32>, vector<128x32xf32> -> vector<128x32xf32>
    %c0_93 = arith.constant 0 : index
    %c0_94 = arith.constant 0 : index
    %191 = vector.load %arg13[%c0_93, %c0_94] : memref<1x32xf32, #tpu.memory_space<vmem>>, vector<1x32xf32>
    %192 = vector.broadcast %191 : vector<1x32xf32> to vector<128x32xf32>
    %193 = arith.addf %190, %192 : vector<128x32xf32>
    %194 = vector.shape_cast %193 : vector<128x32xf32> to vector<8x16x32xf32>
    %195 = arith.addf %194, %8 : vector<8x16x32xf32>
    %196 = arith.truncf %195 : vector<8x16x32xf32> to vector<8x16x32xbf16>
    %c0_95 = arith.constant 0 : index
    %c0_96 = arith.constant 0 : index
    %c0_97 = arith.constant 0 : index
    %c0_98 = arith.constant 0 : index
    %197 = vector.load %arg14[%c0_95, %c0_96, %c0_97, %c0_98] : memref<1x8x16x32xbf16, #tpu.memory_space<vmem>>, vector<1x8x16x32xbf16>
    %198 = vector.shape_cast %197 : vector<1x8x16x32xbf16> to vector<8x16x32xbf16>
    %199 = vector.shape_cast %196 : vector<8x16x32xbf16> to vector<1x8x16x32xbf16>
    tpu.vector_store %arg14[%c0_95, %c0_96, %c0_97, %c0_98], %199 {strides = array<i32>} : memref<1x8x16x32xbf16, #tpu.memory_space<vmem>>, vector<1x8x16x32xbf16>,
    return
  }
  func.func @transform_0(%arg0: i32, %arg1: i32) -> (i32, i32, i32, i32) {
    %c0_i32 = arith.constant 0 : i32
    %c0_i32_0 = arith.constant 0 : i32
    %c0_i32_1 = arith.constant 0 : i32
    return %arg0, %arg1, %c0_i32, %c0_i32_0 : i32, i32, i32, i32
  }
  func.func @transform_1(%arg0: i32, %arg1: i32) -> (i32, i32, i32, i32) {
    %c8_i32 = arith.constant 8 : i32
    %0 = arith.muli %arg1, %c8_i32 : i32
    %c1_i32 = arith.constant 1 : i32
    %1 = arith.subi %0, %c1_i32 : i32
    %c0_i32 = arith.constant 0 : i32
    %2 = arith.maxsi %1, %c0_i32 : i32
    %c0_i32_0 = arith.constant 0 : i32
    %c0_i32_1 = arith.constant 0 : i32
    %c0_i32_2 = arith.constant 0 : i32
    return %arg0, %2, %c0_i32_0, %c0_i32_1 : i32, i32, i32, i32
  }
  func.func @transform_2(%arg0: i32, %arg1: i32) -> (i32, i32, i32, i32) {
    %c8_i32 = arith.constant 8 : i32
    %0 = arith.muli %arg1, %c8_i32 : i32
    %c8_i32_0 = arith.constant 8 : i32
    %1 = arith.addi %0, %c8_i32_0 : i32
    %c15_i32 = arith.constant 15 : i32
    %2 = arith.minsi %1, %c15_i32 : i32
    %c0_i32 = arith.constant 0 : i32
    %c0_i32_1 = arith.constant 0 : i32
    %c0_i32_2 = arith.constant 0 : i32
    return %arg0, %2, %c0_i32, %c0_i32_1 : i32, i32, i32, i32
  }
  func.func @transform_3(%arg0: i32, %arg1: i32) -> (i32, i32, i32) {
    %c0_i32 = arith.constant 0 : i32
    %c0_i32_0 = arith.constant 0 : i32
    %c0_i32_1 = arith.constant 0 : i32
    return %arg0, %c0_i32, %c0_i32_0 : i32, i32, i32
  }
  func.func @transform_4(%arg0: i32, %arg1: i32) -> (i32, i32) {
    %c0_i32 = arith.constant 0 : i32
    %c0_i32_0 = arith.constant 0 : i32
    %c0_i32_1 = arith.constant 0 : i32
    return %c0_i32, %c0_i32_0 : i32, i32
  }
  func.func @transform_5(%arg0: i32, %arg1: i32) -> (i32, i32) {
    %c0_i32 = arith.constant 0 : i32
    %c0_i32_0 = arith.constant 0 : i32
    %c0_i32_1 = arith.constant 0 : i32
    return %c0_i32, %c0_i32_0 : i32, i32
  }
  func.func @transform_6(%arg0: i32, %arg1: i32) -> (i32, i32, i32) {
    %c0_i32 = arith.constant 0 : i32
    %c0_i32_0 = arith.constant 0 : i32
    %c0_i32_1 = arith.constant 0 : i32
    %c0_i32_2 = arith.constant 0 : i32
    return %c0_i32, %c0_i32_0, %c0_i32_1 : i32, i32, i32
  }
  func.func @transform_7(%arg0: i32, %arg1: i32) -> (i32, i32) {
    %c0_i32 = arith.constant 0 : i32
    %c0_i32_0 = arith.constant 0 : i32
    %c0_i32_1 = arith.constant 0 : i32
    return %c0_i32, %c0_i32_0 : i32, i32
  }
  func.func @transform_8(%arg0: i32, %arg1: i32) -> (i32, i32) {
    %c0_i32 = arith.constant 0 : i32
    %c0_i32_0 = arith.constant 0 : i32
    %c0_i32_1 = arith.constant 0 : i32
    return %c0_i32, %c0_i32_0 : i32, i32
  }
  func.func @transform_9(%arg0: i32, %arg1: i32) -> (i32, i32) {
    %c0_i32 = arith.constant 0 : i32
    %c0_i32_0 = arith.constant 0 : i32
    %c0_i32_1 = arith.constant 0 : i32
    return %c0_i32, %c0_i32_0 : i32, i32
  }
  func.func @transform_10(%arg0: i32, %arg1: i32) -> (i32, i32) {
    %c0_i32 = arith.constant 0 : i32
    %c0_i32_0 = arith.constant 0 : i32
    %c0_i32_1 = arith.constant 0 : i32
    return %c0_i32, %c0_i32_0 : i32, i32
  }
  func.func @transform_11(%arg0: i32, %arg1: i32) -> (i32, i32) {
    %c0_i32 = arith.constant 0 : i32
    %c0_i32_0 = arith.constant 0 : i32
    %c0_i32_1 = arith.constant 0 : i32
    return %c0_i32, %c0_i32_0 : i32, i32
  }
  func.func @transform_12(%arg0: i32, %arg1: i32) -> (i32, i32, i32, i32) {
    %c0_i32 = arith.constant 0 : i32
    %c0_i32_0 = arith.constant 0 : i32
    %c0_i32_1 = arith.constant 0 : i32
    return %arg0, %arg1, %c0_i32, %c0_i32_0 : i32, i32, i32, i32
  }
}

module attributes {stable_mosaic.version = 11 : i64} {
  func.func @_mb_se_stats_kernel(%arg0: i32, %arg1: i32, %arg2: memref<1x8x16x32xbf16, #tpu.memory_space<vmem>>, %arg3: memref<1x1x16x32xbf16, #tpu.memory_space<vmem>>, %arg4: memref<1x1x16x32xbf16, #tpu.memory_space<vmem>>, %arg5: memref<32x128xf32, #tpu.memory_space<vmem>>, %arg6: memref<1x128xf32, #tpu.memory_space<vmem>>, %arg7: memref<3x3x128xf32, #tpu.memory_space<vmem>>, %arg8: memref<1x128xf32, #tpu.memory_space<vmem>>, %arg9: memref<1x1x128xf32, #tpu.memory_space<vmem>>, %arg10: memref<10x18x128xf32, #tpu.memory_space<vmem>>) attributes {dimension_semantics = [#tpu.dimension_semantics<parallel>, #tpu.dimension_semantics<arbitrary>], iteration_bounds = array<i64: 2, 2>, scalar_prefetch = 0 : i64, scratch_operands = 1 : i64, tpu.core_type = #tpu.core_type<tc>, window_params = [{transform_indices = @transform_0, window_bounds = array<i64: 1, 8, 16, 32>}, {transform_indices = @transform_1, window_bounds = array<i64: 1, 1, 16, 32>}, {transform_indices = @transform_2, window_bounds = array<i64: 1, 1, 16, 32>}, {pipeline_mode = #tpu.pipeline_mode<synchronous>, transform_indices = @transform_3, window_bounds = array<i64: 32, 128>}, {pipeline_mode = #tpu.pipeline_mode<synchronous>, transform_indices = @transform_4, window_bounds = array<i64: 1, 128>}, {pipeline_mode = #tpu.pipeline_mode<synchronous>, transform_indices = @transform_5, window_bounds = array<i64: 3, 3, 128>}, {pipeline_mode = #tpu.pipeline_mode<synchronous>, transform_indices = @transform_6, window_bounds = array<i64: 1, 128>}, {transform_indices = @transform_7, window_bounds = array<i64: 1, 1, 128>}]} {
    %c0_i32 = arith.constant 0 : i32
    %0 = arith.cmpi sgt, %arg1, %c0_i32 : i32
    %1 = arith.extui %0 : i1 to i32
    %2 = arith.sitofp %1 : i32 to f32
    %c1_i32 = arith.constant 1 : i32
    %3 = arith.cmpi slt, %arg1, %c1_i32 : i32
    %4 = arith.extui %3 : i1 to i32
    %5 = arith.sitofp %4 : i32 to f32
    %c0 = arith.constant 0 : index
    %c0_0 = arith.constant 0 : index
    %c0_1 = arith.constant 0 : index
    %c0_2 = arith.constant 0 : index
    %6 = vector.load %arg2[%c0, %c0_0, %c0_1, %c0_2] : memref<1x8x16x32xbf16, #tpu.memory_space<vmem>>, vector<1x8x16x32xbf16>
    %7 = vector.shape_cast %6 : vector<1x8x16x32xbf16> to vector<8x16x32xbf16>
    %8 = arith.extf %7 : vector<8x16x32xbf16> to vector<8x16x32xf32>
    %c0_3 = arith.constant 0 : index
    %c0_4 = arith.constant 0 : index
    %c0_5 = arith.constant 0 : index
    %c0_6 = arith.constant 0 : index
    %9 = vector.load %arg3[%c0_3, %c0_4, %c0_5, %c0_6] : memref<1x1x16x32xbf16, #tpu.memory_space<vmem>>, vector<1x1x16x32xbf16>
    %10 = vector.shape_cast %9 : vector<1x1x16x32xbf16> to vector<16x32xbf16>
    %11 = arith.extf %10 : vector<16x32xbf16> to vector<16x32xf32>
    %c0_7 = arith.constant 0 : index
    %c0_8 = arith.constant 0 : index
    %c0_9 = arith.constant 0 : index
    %c0_10 = arith.constant 0 : index
    %12 = vector.load %arg4[%c0_7, %c0_8, %c0_9, %c0_10] : memref<1x1x16x32xbf16, #tpu.memory_space<vmem>>, vector<1x1x16x32xbf16>
    %13 = vector.shape_cast %12 : vector<1x1x16x32xbf16> to vector<16x32xbf16>
    %14 = arith.extf %13 : vector<16x32xbf16> to vector<16x32xf32>
    %c0_11 = arith.constant 0 : index
    %c0_12 = arith.constant 0 : index
    %15 = vector.load %arg5[%c0_11, %c0_12] : memref<32x128xf32, #tpu.memory_space<vmem>>, vector<32x128xf32>
    %c0_13 = arith.constant 0 : index
    %c0_14 = arith.constant 0 : index
    %16 = vector.load %arg6[%c0_13, %c0_14] : memref<1x128xf32, #tpu.memory_space<vmem>>, vector<1x128xf32>
    %c0_15 = arith.constant 0 : index
    %c0_16 = arith.constant 0 : index
    %c0_17 = arith.constant 0 : index
    %17 = vector.load %arg7[%c0_15, %c0_16, %c0_17] : memref<3x3x128xf32, #tpu.memory_space<vmem>>, vector<3x3x128xf32>
    %c0_18 = arith.constant 0 : index
    %c0_19 = arith.constant 0 : index
    %18 = vector.load %arg8[%c0_18, %c0_19] : memref<1x128xf32, #tpu.memory_space<vmem>>, vector<1x128xf32>
    %19 = vector.shape_cast %8 : vector<8x16x32xf32> to vector<128x32xf32>
    %cst = arith.constant dense<0.000000e+00> : vector<128x128xf32>
    %20 = tpu.matmul %19, %15, %cst {dimension_numbers = #tpu.dot_dimension_numbers<[1], [0], [0], [1], [0, 0, 1, 1], [], []>} : vector<128x32xf32>, vector<32x128xf32>, vector<128x128xf32> -> vector<128x128xf32>
    %21 = vector.broadcast %16 : vector<1x128xf32> to vector<128x128xf32>
    %22 = arith.addf %20, %21 : vector<128x128xf32>
    %23 = arith.mulf %22, %22 : vector<128x128xf32>
    %24 = arith.mulf %22, %23 : vector<128x128xf32>
    %cst_20 = arith.constant 4.471500e-02 : f32
    %25 = vector.broadcast %cst_20 : f32 to vector<128x128xf32>
    %26 = arith.mulf %25, %24 : vector<128x128xf32>
    %27 = arith.addf %22, %26 : vector<128x128xf32>
    %cst_21 = arith.constant 0.797884583 : f32
    %28 = vector.broadcast %cst_21 : f32 to vector<128x128xf32>
    %29 = arith.mulf %28, %27 : vector<128x128xf32>
    %30 = math.tanh %29 : vector<128x128xf32>
    %cst_22 = arith.constant 1.000000e+00 : f32
    %31 = vector.broadcast %cst_22 : f32 to vector<128x128xf32>
    %32 = arith.addf %31, %30 : vector<128x128xf32>
    %cst_23 = arith.constant 5.000000e-01 : f32
    %33 = vector.broadcast %cst_23 : f32 to vector<128x128xf32>
    %34 = arith.mulf %33, %32 : vector<128x128xf32>
    %35 = arith.mulf %22, %34 : vector<128x128xf32>
    %cst_24 = arith.constant dense<0.000000e+00> : vector<16x128xf32>
    %36 = tpu.matmul %11, %15, %cst_24 {dimension_numbers = #tpu.dot_dimension_numbers<[1], [0], [0], [1], [0, 0, 1, 1], [], []>} : vector<16x32xf32>, vector<32x128xf32>, vector<16x128xf32> -> vector<16x128xf32>
    %37 = vector.broadcast %16 : vector<1x128xf32> to vector<16x128xf32>
    %38 = arith.addf %36, %37 : vector<16x128xf32>
    %39 = arith.mulf %38, %38 : vector<16x128xf32>
    %40 = arith.mulf %38, %39 : vector<16x128xf32>
    %cst_25 = arith.constant 4.471500e-02 : f32
    %41 = vector.broadcast %cst_25 : f32 to vector<16x128xf32>
    %42 = arith.mulf %41, %40 : vector<16x128xf32>
    %43 = arith.addf %38, %42 : vector<16x128xf32>
    %cst_26 = arith.constant 0.797884583 : f32
    %44 = vector.broadcast %cst_26 : f32 to vector<16x128xf32>
    %45 = arith.mulf %44, %43 : vector<16x128xf32>
    %46 = math.tanh %45 : vector<16x128xf32>
    %cst_27 = arith.constant 1.000000e+00 : f32
    %47 = vector.broadcast %cst_27 : f32 to vector<16x128xf32>
    %48 = arith.addf %47, %46 : vector<16x128xf32>
    %cst_28 = arith.constant 5.000000e-01 : f32
    %49 = vector.broadcast %cst_28 : f32 to vector<16x128xf32>
    %50 = arith.mulf %49, %48 : vector<16x128xf32>
    %51 = arith.mulf %38, %50 : vector<16x128xf32>
    %52 = vector.broadcast %2 : f32 to vector<16x128xf32>
    %53 = arith.mulf %51, %52 : vector<16x128xf32>
    %cst_29 = arith.constant dense<0.000000e+00> : vector<16x128xf32>
    %54 = tpu.matmul %14, %15, %cst_29 {dimension_numbers = #tpu.dot_dimension_numbers<[1], [0], [0], [1], [0, 0, 1, 1], [], []>} : vector<16x32xf32>, vector<32x128xf32>, vector<16x128xf32> -> vector<16x128xf32>
    %55 = vector.broadcast %16 : vector<1x128xf32> to vector<16x128xf32>
    %56 = arith.addf %54, %55 : vector<16x128xf32>
    %57 = arith.mulf %56, %56 : vector<16x128xf32>
    %58 = arith.mulf %56, %57 : vector<16x128xf32>
    %cst_30 = arith.constant 4.471500e-02 : f32
    %59 = vector.broadcast %cst_30 : f32 to vector<16x128xf32>
    %60 = arith.mulf %59, %58 : vector<16x128xf32>
    %61 = arith.addf %56, %60 : vector<16x128xf32>
    %cst_31 = arith.constant 0.797884583 : f32
    %62 = vector.broadcast %cst_31 : f32 to vector<16x128xf32>
    %63 = arith.mulf %62, %61 : vector<16x128xf32>
    %64 = math.tanh %63 : vector<16x128xf32>
    %cst_32 = arith.constant 1.000000e+00 : f32
    %65 = vector.broadcast %cst_32 : f32 to vector<16x128xf32>
    %66 = arith.addf %65, %64 : vector<16x128xf32>
    %cst_33 = arith.constant 5.000000e-01 : f32
    %67 = vector.broadcast %cst_33 : f32 to vector<16x128xf32>
    %68 = arith.mulf %67, %66 : vector<16x128xf32>
    %69 = arith.mulf %56, %68 : vector<16x128xf32>
    %70 = vector.broadcast %5 : f32 to vector<16x128xf32>
    %71 = arith.mulf %69, %70 : vector<16x128xf32>
    %cst_34 = arith.constant 0.000000e+00 : f32
    %72 = vector.broadcast %cst_34 : f32 to vector<10x128xf32>
    %c0_35 = arith.constant 0 : index
    %c0_36 = arith.constant 0 : index
    %c0_37 = arith.constant 0 : index
    %73 = vector.load %arg10[%c0_35, %c0_36, %c0_37] : memref<10x18x128xf32, #tpu.memory_space<vmem>>, vector<10x1x128xf32>
    %74 = vector.shape_cast %73 : vector<10x1x128xf32> to vector<10x128xf32>
    %75 = vector.shape_cast %72 : vector<10x128xf32> to vector<10x1x128xf32>
    tpu.vector_store %arg10[%c0_35, %c0_36, %c0_37], %75 {strides = array<i32>} : memref<10x18x128xf32, #tpu.memory_space<vmem>>, vector<10x1x128xf32>,
    %c0_38 = arith.constant 0 : index
    %c17 = arith.constant 17 : index
    %c0_39 = arith.constant 0 : index
    %76 = vector.load %arg10[%c0_38, %c17, %c0_39] : memref<10x18x128xf32, #tpu.memory_space<vmem>>, vector<10x1x128xf32>
    %77 = vector.shape_cast %76 : vector<10x1x128xf32> to vector<10x128xf32>
    %78 = vector.shape_cast %72 : vector<10x128xf32> to vector<10x1x128xf32>
    tpu.vector_store %arg10[%c0_38, %c17, %c0_39], %78 {strides = array<i32>} : memref<10x18x128xf32, #tpu.memory_space<vmem>>, vector<10x1x128xf32>,
    %c0_40 = arith.constant 0 : index
    %c1 = arith.constant 1 : index
    %c0_41 = arith.constant 0 : index
    %79 = vector.load %arg10[%c0_40, %c1, %c0_41] : memref<10x18x128xf32, #tpu.memory_space<vmem>>, vector<1x16x128xf32>
    %80 = vector.shape_cast %79 : vector<1x16x128xf32> to vector<16x128xf32>
    %81 = vector.shape_cast %53 : vector<16x128xf32> to vector<1x16x128xf32>
    tpu.vector_store %arg10[%c0_40, %c1, %c0_41], %81 {strides = array<i32>} : memref<10x18x128xf32, #tpu.memory_space<vmem>>, vector<1x16x128xf32>,
    %c9 = arith.constant 9 : index
    %c1_42 = arith.constant 1 : index
    %c0_43 = arith.constant 0 : index
    %82 = vector.load %arg10[%c9, %c1_42, %c0_43] : memref<10x18x128xf32, #tpu.memory_space<vmem>>, vector<1x16x128xf32>
    %83 = vector.shape_cast %82 : vector<1x16x128xf32> to vector<16x128xf32>
    %84 = vector.shape_cast %71 : vector<16x128xf32> to vector<1x16x128xf32>
    tpu.vector_store %arg10[%c9, %c1_42, %c0_43], %84 {strides = array<i32>} : memref<10x18x128xf32, #tpu.memory_space<vmem>>, vector<1x16x128xf32>,
    %85 = vector.shape_cast %35 : vector<128x128xf32> to vector<8x16x128xf32>
    %c1_44 = arith.constant 1 : index
    %c1_45 = arith.constant 1 : index
    %c0_46 = arith.constant 0 : index
    %86 = vector.load %arg10[%c1_44, %c1_45, %c0_46] : memref<10x18x128xf32, #tpu.memory_space<vmem>>, vector<8x16x128xf32>
    tpu.vector_store %arg10[%c1_44, %c1_45, %c0_46], %85 {strides = array<i32>} : memref<10x18x128xf32, #tpu.memory_space<vmem>>, vector<8x16x128xf32>,
    %cst_47 = arith.constant 0.000000e+00 : f32
    %87 = vector.broadcast %cst_47 : f32 to vector<8x16x128xf32>
    %c0_48 = arith.constant 0 : index
    %c0_49 = arith.constant 0 : index
    %c0_50 = arith.constant 0 : index
    %88 = vector.load %arg10[%c0_48, %c0_49, %c0_50] : memref<10x18x128xf32, #tpu.memory_space<vmem>>, vector<8x16x128xf32>
    %89 = vector.extract_strided_slice %17 {offsets = [0, 0, 0], sizes = [1, 1, 128], strides = [1, 1, 1]} : vector<3x3x128xf32> to vector<1x1x128xf32>
    %90 = vector.shape_cast %89 : vector<1x1x128xf32> to vector<128xf32>
    %91 = vector.shape_cast %90 : vector<128xf32> to vector<1x1x128xf32>
    %92 = vector.broadcast %91 : vector<1x1x128xf32> to vector<8x16x128xf32>
    %93 = arith.mulf %88, %92 : vector<8x16x128xf32>
    %94 = arith.addf %87, %93 : vector<8x16x128xf32>
    %c0_51 = arith.constant 0 : index
    %c1_52 = arith.constant 1 : index
    %c0_53 = arith.constant 0 : index
    %95 = vector.load %arg10[%c0_51, %c1_52, %c0_53] : memref<10x18x128xf32, #tpu.memory_space<vmem>>, vector<8x16x128xf32>
    %96 = vector.extract_strided_slice %17 {offsets = [0, 1, 0], sizes = [1, 1, 128], strides = [1, 1, 1]} : vector<3x3x128xf32> to vector<1x1x128xf32>
    %97 = vector.shape_cast %96 : vector<1x1x128xf32> to vector<128xf32>
    %98 = vector.shape_cast %97 : vector<128xf32> to vector<1x1x128xf32>
    %99 = vector.broadcast %98 : vector<1x1x128xf32> to vector<8x16x128xf32>
    %100 = arith.mulf %95, %99 : vector<8x16x128xf32>
    %101 = arith.addf %94, %100 : vector<8x16x128xf32>
    %c0_54 = arith.constant 0 : index
    %c2 = arith.constant 2 : index
    %c0_55 = arith.constant 0 : index
    %102 = vector.load %arg10[%c0_54, %c2, %c0_55] : memref<10x18x128xf32, #tpu.memory_space<vmem>>, vector<8x16x128xf32>
    %103 = vector.extract_strided_slice %17 {offsets = [0, 2, 0], sizes = [1, 1, 128], strides = [1, 1, 1]} : vector<3x3x128xf32> to vector<1x1x128xf32>
    %104 = vector.shape_cast %103 : vector<1x1x128xf32> to vector<128xf32>
    %105 = vector.shape_cast %104 : vector<128xf32> to vector<1x1x128xf32>
    %106 = vector.broadcast %105 : vector<1x1x128xf32> to vector<8x16x128xf32>
    %107 = arith.mulf %102, %106 : vector<8x16x128xf32>
    %108 = arith.addf %101, %107 : vector<8x16x128xf32>
    %c1_56 = arith.constant 1 : index
    %c0_57 = arith.constant 0 : index
    %c0_58 = arith.constant 0 : index
    %109 = vector.load %arg10[%c1_56, %c0_57, %c0_58] : memref<10x18x128xf32, #tpu.memory_space<vmem>>, vector<8x16x128xf32>
    %110 = vector.extract_strided_slice %17 {offsets = [1, 0, 0], sizes = [1, 1, 128], strides = [1, 1, 1]} : vector<3x3x128xf32> to vector<1x1x128xf32>
    %111 = vector.shape_cast %110 : vector<1x1x128xf32> to vector<128xf32>
    %112 = vector.shape_cast %111 : vector<128xf32> to vector<1x1x128xf32>
    %113 = vector.broadcast %112 : vector<1x1x128xf32> to vector<8x16x128xf32>
    %114 = arith.mulf %109, %113 : vector<8x16x128xf32>
    %115 = arith.addf %108, %114 : vector<8x16x128xf32>
    %c1_59 = arith.constant 1 : index
    %c1_60 = arith.constant 1 : index
    %c0_61 = arith.constant 0 : index
    %116 = vector.load %arg10[%c1_59, %c1_60, %c0_61] : memref<10x18x128xf32, #tpu.memory_space<vmem>>, vector<8x16x128xf32>
    %117 = vector.extract_strided_slice %17 {offsets = [1, 1, 0], sizes = [1, 1, 128], strides = [1, 1, 1]} : vector<3x3x128xf32> to vector<1x1x128xf32>
    %118 = vector.shape_cast %117 : vector<1x1x128xf32> to vector<128xf32>
    %119 = vector.shape_cast %118 : vector<128xf32> to vector<1x1x128xf32>
    %120 = vector.broadcast %119 : vector<1x1x128xf32> to vector<8x16x128xf32>
    %121 = arith.mulf %116, %120 : vector<8x16x128xf32>
    %122 = arith.addf %115, %121 : vector<8x16x128xf32>
    %c1_62 = arith.constant 1 : index
    %c2_63 = arith.constant 2 : index
    %c0_64 = arith.constant 0 : index
    %123 = vector.load %arg10[%c1_62, %c2_63, %c0_64] : memref<10x18x128xf32, #tpu.memory_space<vmem>>, vector<8x16x128xf32>
    %124 = vector.extract_strided_slice %17 {offsets = [1, 2, 0], sizes = [1, 1, 128], strides = [1, 1, 1]} : vector<3x3x128xf32> to vector<1x1x128xf32>
    %125 = vector.shape_cast %124 : vector<1x1x128xf32> to vector<128xf32>
    %126 = vector.shape_cast %125 : vector<128xf32> to vector<1x1x128xf32>
    %127 = vector.broadcast %126 : vector<1x1x128xf32> to vector<8x16x128xf32>
    %128 = arith.mulf %123, %127 : vector<8x16x128xf32>
    %129 = arith.addf %122, %128 : vector<8x16x128xf32>
    %c2_65 = arith.constant 2 : index
    %c0_66 = arith.constant 0 : index
    %c0_67 = arith.constant 0 : index
    %130 = vector.load %arg10[%c2_65, %c0_66, %c0_67] : memref<10x18x128xf32, #tpu.memory_space<vmem>>, vector<8x16x128xf32>
    %131 = vector.extract_strided_slice %17 {offsets = [2, 0, 0], sizes = [1, 1, 128], strides = [1, 1, 1]} : vector<3x3x128xf32> to vector<1x1x128xf32>
    %132 = vector.shape_cast %131 : vector<1x1x128xf32> to vector<128xf32>
    %133 = vector.shape_cast %132 : vector<128xf32> to vector<1x1x128xf32>
    %134 = vector.broadcast %133 : vector<1x1x128xf32> to vector<8x16x128xf32>
    %135 = arith.mulf %130, %134 : vector<8x16x128xf32>
    %136 = arith.addf %129, %135 : vector<8x16x128xf32>
    %c2_68 = arith.constant 2 : index
    %c1_69 = arith.constant 1 : index
    %c0_70 = arith.constant 0 : index
    %137 = vector.load %arg10[%c2_68, %c1_69, %c0_70] : memref<10x18x128xf32, #tpu.memory_space<vmem>>, vector<8x16x128xf32>
    %138 = vector.extract_strided_slice %17 {offsets = [2, 1, 0], sizes = [1, 1, 128], strides = [1, 1, 1]} : vector<3x3x128xf32> to vector<1x1x128xf32>
    %139 = vector.shape_cast %138 : vector<1x1x128xf32> to vector<128xf32>
    %140 = vector.shape_cast %139 : vector<128xf32> to vector<1x1x128xf32>
    %141 = vector.broadcast %140 : vector<1x1x128xf32> to vector<8x16x128xf32>
    %142 = arith.mulf %137, %141 : vector<8x16x128xf32>
    %143 = arith.addf %136, %142 : vector<8x16x128xf32>
    %c2_71 = arith.constant 2 : index
    %c2_72 = arith.constant 2 : index
    %c0_73 = arith.constant 0 : index
    %144 = vector.load %arg10[%c2_71, %c2_72, %c0_73] : memref<10x18x128xf32, #tpu.memory_space<vmem>>, vector<8x16x128xf32>
    %145 = vector.extract_strided_slice %17 {offsets = [2, 2, 0], sizes = [1, 1, 128], strides = [1, 1, 1]} : vector<3x3x128xf32> to vector<1x1x128xf32>
    %146 = vector.shape_cast %145 : vector<1x1x128xf32> to vector<128xf32>
    %147 = vector.shape_cast %146 : vector<128xf32> to vector<1x1x128xf32>
    %148 = vector.broadcast %147 : vector<1x1x128xf32> to vector<8x16x128xf32>
    %149 = arith.mulf %144, %148 : vector<8x16x128xf32>
    %150 = arith.addf %143, %149 : vector<8x16x128xf32>
    %151 = vector.shape_cast %18 : vector<1x128xf32> to vector<1x1x128xf32>
    %152 = vector.broadcast %151 : vector<1x1x128xf32> to vector<8x16x128xf32>
    %153 = arith.addf %150, %152 : vector<8x16x128xf32>
    %154 = arith.mulf %153, %153 : vector<8x16x128xf32>
    %155 = arith.mulf %153, %154 : vector<8x16x128xf32>
    %cst_74 = arith.constant 4.471500e-02 : f32
    %156 = vector.broadcast %cst_74 : f32 to vector<8x16x128xf32>
    %157 = arith.mulf %156, %155 : vector<8x16x128xf32>
    %158 = arith.addf %153, %157 : vector<8x16x128xf32>
    %cst_75 = arith.constant 0.797884583 : f32
    %159 = vector.broadcast %cst_75 : f32 to vector<8x16x128xf32>
    %160 = arith.mulf %159, %158 : vector<8x16x128xf32>
    %161 = math.tanh %160 : vector<8x16x128xf32>
    %cst_76 = arith.constant 1.000000e+00 : f32
    %162 = vector.broadcast %cst_76 : f32 to vector<8x16x128xf32>
    %163 = arith.addf %162, %161 : vector<8x16x128xf32>
    %cst_77 = arith.constant 5.000000e-01 : f32
    %164 = vector.broadcast %cst_77 : f32 to vector<8x16x128xf32>
    %165 = arith.mulf %164, %163 : vector<8x16x128xf32>
    %166 = arith.mulf %153, %165 : vector<8x16x128xf32>
    %c0_i32_78 = arith.constant 0 : i32
    %167 = arith.cmpi eq, %arg1, %c0_i32_78 : i32
    %168 = arith.extui %167 : i1 to i32
    %c0_i32_79 = arith.constant 0 : i32
    %169 = arith.cmpi ne, %168, %c0_i32_79 : i32
    scf.if %169 {
      %cst_87 = arith.constant 0.000000e+00 : f32
      %179 = vector.broadcast %cst_87 : f32 to vector<1x1x128xf32>
      %c0_88 = arith.constant 0 : index
      %c0_89 = arith.constant 0 : index
      %c0_90 = arith.constant 0 : index
      %180 = vector.load %arg9[%c0_88, %c0_89, %c0_90] : memref<1x1x128xf32, #tpu.memory_space<vmem>>, vector<1x1x128xf32>
      tpu.vector_store %arg9[%c0_88, %c0_89, %c0_90], %179 {strides = array<i32>} : memref<1x1x128xf32, #tpu.memory_space<vmem>>, vector<1x1x128xf32>,
    } else {
    }
    %c0_80 = arith.constant 0 : index
    %c0_81 = arith.constant 0 : index
    %c0_82 = arith.constant 0 : index
    %170 = vector.load %arg9[%c0_80, %c0_81, %c0_82] : memref<1x1x128xf32, #tpu.memory_space<vmem>>, vector<1x1x128xf32>
    %171 = vector.shape_cast %170 : vector<1x1x128xf32> to vector<1x128xf32>
    %172 = vector.shape_cast %166 : vector<8x16x128xf32> to vector<128x128xf32>
    %cst_83 = arith.constant dense<0.000000e+00> : vector<128xf32>
    %173 = vector.multi_reduction <add>, %172, %cst_83 [0] : vector<128x128xf32> to vector<128xf32>
    %174 = vector.shape_cast %173 : vector<128xf32> to vector<1x128xf32>
    %175 = arith.addf %171, %174 : vector<1x128xf32>
    %c0_84 = arith.constant 0 : index
    %c0_85 = arith.constant 0 : index
    %c0_86 = arith.constant 0 : index
    %176 = vector.load %arg9[%c0_84, %c0_85, %c0_86] : memref<1x1x128xf32, #tpu.memory_space<vmem>>, vector<1x1x128xf32>
    %177 = vector.shape_cast %176 : vector<1x1x128xf32> to vector<1x128xf32>
    %178 = vector.shape_cast %175 : vector<1x128xf32> to vector<1x1x128xf32>
    tpu.vector_store %arg9[%c0_84, %c0_85, %c0_86], %178 {strides = array<i32>} : memref<1x1x128xf32, #tpu.memory_space<vmem>>, vector<1x1x128xf32>,
    return
  }
  func.func @transform_0(%arg0: i32, %arg1: i32) -> (i32, i32, i32, i32) {
    %c0_i32 = arith.constant 0 : i32
    %c0_i32_0 = arith.constant 0 : i32
    %c0_i32_1 = arith.constant 0 : i32
    return %arg0, %arg1, %c0_i32, %c0_i32_0 : i32, i32, i32, i32
  }
  func.func @transform_1(%arg0: i32, %arg1: i32) -> (i32, i32, i32, i32) {
    %c8_i32 = arith.constant 8 : i32
    %0 = arith.muli %arg1, %c8_i32 : i32
    %c1_i32 = arith.constant 1 : i32
    %1 = arith.subi %0, %c1_i32 : i32
    %c0_i32 = arith.constant 0 : i32
    %2 = arith.maxsi %1, %c0_i32 : i32
    %c0_i32_0 = arith.constant 0 : i32
    %c0_i32_1 = arith.constant 0 : i32
    %c0_i32_2 = arith.constant 0 : i32
    return %arg0, %2, %c0_i32_0, %c0_i32_1 : i32, i32, i32, i32
  }
  func.func @transform_2(%arg0: i32, %arg1: i32) -> (i32, i32, i32, i32) {
    %c8_i32 = arith.constant 8 : i32
    %0 = arith.muli %arg1, %c8_i32 : i32
    %c8_i32_0 = arith.constant 8 : i32
    %1 = arith.addi %0, %c8_i32_0 : i32
    %c15_i32 = arith.constant 15 : i32
    %2 = arith.minsi %1, %c15_i32 : i32
    %c0_i32 = arith.constant 0 : i32
    %c0_i32_1 = arith.constant 0 : i32
    %c0_i32_2 = arith.constant 0 : i32
    return %arg0, %2, %c0_i32, %c0_i32_1 : i32, i32, i32, i32
  }
  func.func @transform_3(%arg0: i32, %arg1: i32) -> (i32, i32) {
    %c0_i32 = arith.constant 0 : i32
    %c0_i32_0 = arith.constant 0 : i32
    %c0_i32_1 = arith.constant 0 : i32
    return %c0_i32, %c0_i32_0 : i32, i32
  }
  func.func @transform_4(%arg0: i32, %arg1: i32) -> (i32, i32) {
    %c0_i32 = arith.constant 0 : i32
    %c0_i32_0 = arith.constant 0 : i32
    %c0_i32_1 = arith.constant 0 : i32
    return %c0_i32, %c0_i32_0 : i32, i32
  }
  func.func @transform_5(%arg0: i32, %arg1: i32) -> (i32, i32, i32) {
    %c0_i32 = arith.constant 0 : i32
    %c0_i32_0 = arith.constant 0 : i32
    %c0_i32_1 = arith.constant 0 : i32
    %c0_i32_2 = arith.constant 0 : i32
    return %c0_i32, %c0_i32_0, %c0_i32_1 : i32, i32, i32
  }
  func.func @transform_6(%arg0: i32, %arg1: i32) -> (i32, i32) {
    %c0_i32 = arith.constant 0 : i32
    %c0_i32_0 = arith.constant 0 : i32
    %c0_i32_1 = arith.constant 0 : i32
    return %c0_i32, %c0_i32_0 : i32, i32
  }
  func.func @transform_7(%arg0: i32, %arg1: i32) -> (i32, i32, i32) {
    %c0_i32 = arith.constant 0 : i32
    %c0_i32_0 = arith.constant 0 : i32
    %c0_i32_1 = arith.constant 0 : i32
    return %arg0, %c0_i32, %c0_i32_0 : i32, i32, i32
  }
}

module attributes {stable_mosaic.version = 11 : i64} {
  func.func @_gn_stats_kernel(%arg0: i32, %arg1: i32, %arg2: memref<1x8x16x32xbf16, #tpu.memory_space<vmem>>, %arg3: memref<1x32xf32, #tpu.memory_space<vmem>>, %arg4: memref<1x32xf32, #tpu.memory_space<vmem>>, %arg5: memref<32x32xf32, #tpu.memory_space<vmem>>, %arg6: memref<1x32xf32, #tpu.memory_space<vmem>>, %arg7: memref<32x32xf32, #tpu.memory_space<vmem>>, %arg8: memref<1x32xf32, #tpu.memory_space<vmem>>, %arg9: memref<32x8xf32, #tpu.memory_space<vmem>>, %arg10: memref<1x4x8xf32, #tpu.memory_space<vmem>>) attributes {dimension_semantics = [#tpu.dimension_semantics<parallel>, #tpu.dimension_semantics<arbitrary>], iteration_bounds = array<i64: 2, 2>, scalar_prefetch = 0 : i64, scratch_operands = 0 : i64, tpu.core_type = #tpu.core_type<tc>, window_params = [{transform_indices = @transform_0, window_bounds = array<i64: 1, 8, 16, 32>}, {pipeline_mode = #tpu.pipeline_mode<synchronous>, transform_indices = @transform_1, window_bounds = array<i64: 1, 32>}, {pipeline_mode = #tpu.pipeline_mode<synchronous>, transform_indices = @transform_2, window_bounds = array<i64: 1, 32>}, {pipeline_mode = #tpu.pipeline_mode<synchronous>, transform_indices = @transform_3, window_bounds = array<i64: 32, 32>}, {pipeline_mode = #tpu.pipeline_mode<synchronous>, transform_indices = @transform_4, window_bounds = array<i64: 1, 32>}, {pipeline_mode = #tpu.pipeline_mode<synchronous>, transform_indices = @transform_5, window_bounds = array<i64: 32, 32>}, {pipeline_mode = #tpu.pipeline_mode<synchronous>, transform_indices = @transform_6, window_bounds = array<i64: 1, 32>}, {pipeline_mode = #tpu.pipeline_mode<synchronous>, transform_indices = @transform_7, window_bounds = array<i64: 32, 8>}, {transform_indices = @transform_8, window_bounds = array<i64: 1, 4, 8>}]} {
    %c0 = arith.constant 0 : index
    %c0_0 = arith.constant 0 : index
    %c0_1 = arith.constant 0 : index
    %c0_2 = arith.constant 0 : index
    %0 = vector.load %arg2[%c0, %c0_0, %c0_1, %c0_2] : memref<1x8x16x32xbf16, #tpu.memory_space<vmem>>, vector<1x8x16x32xbf16>
    %1 = vector.shape_cast %0 : vector<1x8x16x32xbf16> to vector<8x16x32xbf16>
    %2 = vector.shape_cast %1 : vector<8x16x32xbf16> to vector<128x32xbf16>
    %3 = arith.extf %2 : vector<128x32xbf16> to vector<128x32xf32>
    %cst = arith.constant dense<0.000000e+00> : vector<128xf32>
    %4 = vector.multi_reduction <add>, %3, %cst [1] : vector<128x32xf32> to vector<128xf32>
    %5 = vector.shape_cast %4 : vector<128xf32> to vector<128x1xf32>
    %cst_3 = arith.constant 3.200000e+01 : f32
    %6 = vector.broadcast %cst_3 : f32 to vector<128x1xf32>
    %7 = arith.divf %5, %6 : vector<128x1xf32>
    %8 = vector.broadcast %7 : vector<128x1xf32> to vector<128x32xf32>
    %9 = arith.subf %3, %8 : vector<128x32xf32>
    %10 = arith.mulf %9, %9 : vector<128x32xf32>
    %cst_4 = arith.constant dense<0.000000e+00> : vector<128xf32>
    %11 = vector.multi_reduction <add>, %10, %cst_4 [1] : vector<128x32xf32> to vector<128xf32>
    %12 = vector.shape_cast %11 : vector<128xf32> to vector<128x1xf32>
    %cst_5 = arith.constant 3.200000e+01 : f32
    %13 = vector.broadcast %cst_5 : f32 to vector<128x1xf32>
    %14 = arith.divf %12, %13 : vector<128x1xf32>
    %15 = vector.broadcast %7 : vector<128x1xf32> to vector<128x32xf32>
    %16 = arith.subf %3, %15 : vector<128x32xf32>
    %cst_6 = arith.constant 9.99999974E-6 : f32
    %17 = vector.broadcast %cst_6 : f32 to vector<128x1xf32>
    %18 = arith.addf %14, %17 : vector<128x1xf32>
    %19 = math.rsqrt %18 : vector<128x1xf32>
    %20 = vector.broadcast %19 : vector<128x1xf32> to vector<128x32xf32>
    %21 = arith.mulf %16, %20 : vector<128x32xf32>
    %c0_7 = arith.constant 0 : index
    %c0_8 = arith.constant 0 : index
    %22 = vector.load %arg3[%c0_7, %c0_8] : memref<1x32xf32, #tpu.memory_space<vmem>>, vector<1x32xf32>
    %23 = vector.broadcast %22 : vector<1x32xf32> to vector<128x32xf32>
    %24 = arith.mulf %21, %23 : vector<128x32xf32>
    %c0_9 = arith.constant 0 : index
    %c0_10 = arith.constant 0 : index
    %25 = vector.load %arg4[%c0_9, %c0_10] : memref<1x32xf32, #tpu.memory_space<vmem>>, vector<1x32xf32>
    %26 = vector.broadcast %25 : vector<1x32xf32> to vector<128x32xf32>
    %27 = arith.addf %24, %26 : vector<128x32xf32>
    %c0_11 = arith.constant 0 : index
    %c0_12 = arith.constant 0 : index
    %28 = vector.load %arg5[%c0_11, %c0_12] : memref<32x32xf32, #tpu.memory_space<vmem>>, vector<32x32xf32>
    %cst_13 = arith.constant dense<0.000000e+00> : vector<128x32xf32>
    %29 = tpu.matmul %27, %28, %cst_13 {dimension_numbers = #tpu.dot_dimension_numbers<[1], [0], [0], [1], [0, 0, 1, 1], [], []>} : vector<128x32xf32>, vector<32x32xf32>, vector<128x32xf32> -> vector<128x32xf32>
    %c0_14 = arith.constant 0 : index
    %c0_15 = arith.constant 0 : index
    %30 = vector.load %arg6[%c0_14, %c0_15] : memref<1x32xf32, #tpu.memory_space<vmem>>, vector<1x32xf32>
    %31 = vector.broadcast %30 : vector<1x32xf32> to vector<128x32xf32>
    %32 = arith.addf %29, %31 : vector<128x32xf32>
    %c0_16 = arith.constant 0 : index
    %c0_17 = arith.constant 0 : index
    %33 = vector.load %arg7[%c0_16, %c0_17] : memref<32x32xf32, #tpu.memory_space<vmem>>, vector<32x32xf32>
    %cst_18 = arith.constant dense<0.000000e+00> : vector<128x32xf32>
    %34 = tpu.matmul %27, %33, %cst_18 {dimension_numbers = #tpu.dot_dimension_numbers<[1], [0], [0], [1], [0, 0, 1, 1], [], []>} : vector<128x32xf32>, vector<32x32xf32>, vector<128x32xf32> -> vector<128x32xf32>
    %c0_19 = arith.constant 0 : index
    %c0_20 = arith.constant 0 : index
    %35 = vector.load %arg8[%c0_19, %c0_20] : memref<1x32xf32, #tpu.memory_space<vmem>>, vector<1x32xf32>
    %36 = vector.broadcast %35 : vector<1x32xf32> to vector<128x32xf32>
    %37 = arith.addf %34, %36 : vector<128x32xf32>
    %cst_21 = arith.constant dense<0.000000e+00> : vector<32xf32>
    %38 = vector.multi_reduction <add>, %32, %cst_21 [0] : vector<128x32xf32> to vector<32xf32>
    %39 = vector.shape_cast %38 : vector<32xf32> to vector<1x32xf32>
    %40 = arith.mulf %32, %32 : vector<128x32xf32>
    %cst_22 = arith.constant dense<0.000000e+00> : vector<32xf32>
    %41 = vector.multi_reduction <add>, %40, %cst_22 [0] : vector<128x32xf32> to vector<32xf32>
    %42 = vector.shape_cast %41 : vector<32xf32> to vector<1x32xf32>
    %cst_23 = arith.constant dense<0.000000e+00> : vector<32xf32>
    %43 = vector.multi_reduction <add>, %37, %cst_23 [0] : vector<128x32xf32> to vector<32xf32>
    %44 = vector.shape_cast %43 : vector<32xf32> to vector<1x32xf32>
    %45 = arith.mulf %37, %37 : vector<128x32xf32>
    %cst_24 = arith.constant dense<0.000000e+00> : vector<32xf32>
    %46 = vector.multi_reduction <add>, %45, %cst_24 [0] : vector<128x32xf32> to vector<32xf32>
    %47 = vector.shape_cast %46 : vector<32xf32> to vector<1x32xf32>
    %48 = tpu.concatenate %39, %42, %44, %47 in 0 : vector<1x32xf32>, vector<1x32xf32>, vector<1x32xf32>, vector<1x32xf32> -> vector<4x32xf32>
    %c0_25 = arith.constant 0 : index
    %c0_26 = arith.constant 0 : index
    %49 = vector.load %arg9[%c0_25, %c0_26] : memref<32x8xf32, #tpu.memory_space<vmem>>, vector<32x8xf32>
    %cst_27 = arith.constant dense<0.000000e+00> : vector<4x8xf32>
    %50 = tpu.matmul %48, %49, %cst_27 {dimension_numbers = #tpu.dot_dimension_numbers<[1], [0], [0], [1], [0, 0, 1, 1], [], []>} : vector<4x32xf32>, vector<32x8xf32>, vector<4x8xf32> -> vector<4x8xf32>
    %c0_i32 = arith.constant 0 : i32
    %51 = arith.cmpi eq, %arg1, %c0_i32 : i32
    %52 = arith.extui %51 : i1 to i32
    %c0_i32_28 = arith.constant 0 : i32
    %53 = arith.cmpi ne, %52, %c0_i32_28 : i32
    scf.if %53 {
      %cst_35 = arith.constant 0.000000e+00 : f32
      %60 = vector.broadcast %cst_35 : f32 to vector<1x4x8xf32>
      %c0_36 = arith.constant 0 : index
      %c0_37 = arith.constant 0 : index
      %c0_38 = arith.constant 0 : index
      %61 = vector.load %arg10[%c0_36, %c0_37, %c0_38] : memref<1x4x8xf32, #tpu.memory_space<vmem>>, vector<1x4x8xf32>
      tpu.vector_store %arg10[%c0_36, %c0_37, %c0_38], %60 {strides = array<i32>} : memref<1x4x8xf32, #tpu.memory_space<vmem>>, vector<1x4x8xf32>,
    } else {
    }
    %c0_29 = arith.constant 0 : index
    %c0_30 = arith.constant 0 : index
    %c0_31 = arith.constant 0 : index
    %54 = vector.load %arg10[%c0_29, %c0_30, %c0_31] : memref<1x4x8xf32, #tpu.memory_space<vmem>>, vector<1x4x8xf32>
    %55 = vector.shape_cast %54 : vector<1x4x8xf32> to vector<4x8xf32>
    %56 = arith.addf %55, %50 : vector<4x8xf32>
    %c0_32 = arith.constant 0 : index
    %c0_33 = arith.constant 0 : index
    %c0_34 = arith.constant 0 : index
    %57 = vector.load %arg10[%c0_32, %c0_33, %c0_34] : memref<1x4x8xf32, #tpu.memory_space<vmem>>, vector<1x4x8xf32>
    %58 = vector.shape_cast %57 : vector<1x4x8xf32> to vector<4x8xf32>
    %59 = vector.shape_cast %56 : vector<4x8xf32> to vector<1x4x8xf32>
    tpu.vector_store %arg10[%c0_32, %c0_33, %c0_34], %59 {strides = array<i32>} : memref<1x4x8xf32, #tpu.memory_space<vmem>>, vector<1x4x8xf32>,
    return
  }
  func.func @transform_0(%arg0: i32, %arg1: i32) -> (i32, i32, i32, i32) {
    %c0_i32 = arith.constant 0 : i32
    %c0_i32_0 = arith.constant 0 : i32
    %c0_i32_1 = arith.constant 0 : i32
    return %arg0, %arg1, %c0_i32, %c0_i32_0 : i32, i32, i32, i32
  }
  func.func @transform_1(%arg0: i32, %arg1: i32) -> (i32, i32) {
    %c0_i32 = arith.constant 0 : i32
    %c0_i32_0 = arith.constant 0 : i32
    %c0_i32_1 = arith.constant 0 : i32
    return %c0_i32, %c0_i32_0 : i32, i32
  }
  func.func @transform_2(%arg0: i32, %arg1: i32) -> (i32, i32) {
    %c0_i32 = arith.constant 0 : i32
    %c0_i32_0 = arith.constant 0 : i32
    %c0_i32_1 = arith.constant 0 : i32
    return %c0_i32, %c0_i32_0 : i32, i32
  }
  func.func @transform_3(%arg0: i32, %arg1: i32) -> (i32, i32) {
    %c0_i32 = arith.constant 0 : i32
    %c0_i32_0 = arith.constant 0 : i32
    %c0_i32_1 = arith.constant 0 : i32
    return %c0_i32, %c0_i32_0 : i32, i32
  }
  func.func @transform_4(%arg0: i32, %arg1: i32) -> (i32, i32) {
    %c0_i32 = arith.constant 0 : i32
    %c0_i32_0 = arith.constant 0 : i32
    %c0_i32_1 = arith.constant 0 : i32
    return %c0_i32, %c0_i32_0 : i32, i32
  }
  func.func @transform_5(%arg0: i32, %arg1: i32) -> (i32, i32) {
    %c0_i32 = arith.constant 0 : i32
    %c0_i32_0 = arith.constant 0 : i32
    %c0_i32_1 = arith.constant 0 : i32
    return %c0_i32, %c0_i32_0 : i32, i32
  }
  func.func @transform_6(%arg0: i32, %arg1: i32) -> (i32, i32) {
    %c0_i32 = arith.constant 0 : i32
    %c0_i32_0 = arith.constant 0 : i32
    %c0_i32_1 = arith.constant 0 : i32
    return %c0_i32, %c0_i32_0 : i32, i32
  }
  func.func @transform_7(%arg0: i32, %arg1: i32) -> (i32, i32) {
    %c0_i32 = arith.constant 0 : i32
    %c0_i32_0 = arith.constant 0 : i32
    %c0_i32_1 = arith.constant 0 : i32
    return %c0_i32, %c0_i32_0 : i32, i32
  }
  func.func @transform_8(%arg0: i32, %arg1: i32) -> (i32, i32, i32) {
    %c0_i32 = arith.constant 0 : i32
    %c0_i32_0 = arith.constant 0 : i32
    %c0_i32_1 = arith.constant 0 : i32
    return %arg0, %c0_i32, %c0_i32_0 : i32, i32, i32
  }
}

module attributes {stable_mosaic.version = 11 : i64} {
  func.func @_att_ff_kernel(%arg0: i32, %arg1: i32, %arg2: memref<1x4x16x32xbf16, #tpu.memory_space<vmem>>, %arg3: memref<1x4x8xf32, #tpu.memory_space<vmem>>, %arg4: memref<64x64xf32, #tpu.memory_space<vmem>>, %arg5: memref<1x32xf32, #tpu.memory_space<vmem>>, %arg6: memref<1x32xf32, #tpu.memory_space<vmem>>, %arg7: memref<32x32xf32, #tpu.memory_space<vmem>>, %arg8: memref<1x32xf32, #tpu.memory_space<vmem>>, %arg9: memref<32x32xf32, #tpu.memory_space<vmem>>, %arg10: memref<1x32xf32, #tpu.memory_space<vmem>>, %arg11: memref<32x32xf32, #tpu.memory_space<vmem>>, %arg12: memref<1x32xf32, #tpu.memory_space<vmem>>, %arg13: memref<8x32xf32, #tpu.memory_space<vmem>>, %arg14: memref<1x32xf32, #tpu.memory_space<vmem>>, %arg15: memref<1x32xf32, #tpu.memory_space<vmem>>, %arg16: memref<1x32xf32, #tpu.memory_space<vmem>>, %arg17: memref<1x32xf32, #tpu.memory_space<vmem>>, %arg18: memref<32x32xf32, #tpu.memory_space<vmem>>, %arg19: memref<1x32xf32, #tpu.memory_space<vmem>>, %arg20: memref<1x32xf32, #tpu.memory_space<vmem>>, %arg21: memref<1x32xf32, #tpu.memory_space<vmem>>, %arg22: memref<32x128xf32, #tpu.memory_space<vmem>>, %arg23: memref<1x128xf32, #tpu.memory_space<vmem>>, %arg24: memref<128x32xf32, #tpu.memory_space<vmem>>, %arg25: memref<1x32xf32, #tpu.memory_space<vmem>>, %arg26: memref<1x4x16x32xbf16, #tpu.memory_space<vmem>>, %arg27: memref<4x16x32xf32, #tpu.memory_space<vmem>>) attributes {dimension_semantics = [#tpu.dimension_semantics<parallel>, #tpu.dimension_semantics<parallel>], iteration_bounds = array<i64: 2, 4>, scalar_prefetch = 0 : i64, scratch_operands = 1 : i64, tpu.core_type = #tpu.core_type<tc>, window_params = [{transform_indices = @transform_0, window_bounds = array<i64: 1, 4, 16, 32>}, {transform_indices = @transform_1, window_bounds = array<i64: 1, 4, 8>}, {pipeline_mode = #tpu.pipeline_mode<synchronous>, transform_indices = @transform_2, window_bounds = array<i64: 64, 64>}, {pipeline_mode = #tpu.pipeline_mode<synchronous>, transform_indices = @transform_3, window_bounds = array<i64: 1, 32>}, {pipeline_mode = #tpu.pipeline_mode<synchronous>, transform_indices = @transform_4, window_bounds = array<i64: 1, 32>}, {pipeline_mode = #tpu.pipeline_mode<synchronous>, transform_indices = @transform_5, window_bounds = array<i64: 32, 32>}, {pipeline_mode = #tpu.pipeline_mode<synchronous>, transform_indices = @transform_6, window_bounds = array<i64: 1, 32>}, {pipeline_mode = #tpu.pipeline_mode<synchronous>, transform_indices = @transform_7, window_bounds = array<i64: 32, 32>}, {pipeline_mode = #tpu.pipeline_mode<synchronous>, transform_indices = @transform_8, window_bounds = array<i64: 1, 32>}, {pipeline_mode = #tpu.pipeline_mode<synchronous>, transform_indices = @transform_9, window_bounds = array<i64: 32, 32>}, {pipeline_mode = #tpu.pipeline_mode<synchronous>, transform_indices = @transform_10, window_bounds = array<i64: 1, 32>}, {pipeline_mode = #tpu.pipeline_mode<synchronous>, transform_indices = @transform_11, window_bounds = array<i64: 8, 32>}, {pipeline_mode = #tpu.pipeline_mode<synchronous>, transform_indices = @transform_12, window_bounds = array<i64: 1, 32>}, {pipeline_mode = #tpu.pipeline_mode<synchronous>, transform_indices = @transform_13, window_bounds = array<i64: 1, 32>}, {pipeline_mode = #tpu.pipeline_mode<synchronous>, transform_indices = @transform_14, window_bounds = array<i64: 1, 32>}, {pipeline_mode = #tpu.pipeline_mode<synchronous>, transform_indices = @transform_15, window_bounds = array<i64: 1, 32>}, {pipeline_mode = #tpu.pipeline_mode<synchronous>, transform_indices = @transform_16, window_bounds = array<i64: 32, 32>}, {pipeline_mode = #tpu.pipeline_mode<synchronous>, transform_indices = @transform_17, window_bounds = array<i64: 1, 32>}, {pipeline_mode = #tpu.pipeline_mode<synchronous>, transform_indices = @transform_18, window_bounds = array<i64: 1, 32>}, {pipeline_mode = #tpu.pipeline_mode<synchronous>, transform_indices = @transform_19, window_bounds = array<i64: 1, 32>}, {pipeline_mode = #tpu.pipeline_mode<synchronous>, transform_indices = @transform_20, window_bounds = array<i64: 32, 128>}, {pipeline_mode = #tpu.pipeline_mode<synchronous>, transform_indices = @transform_21, window_bounds = array<i64: 1, 128>}, {pipeline_mode = #tpu.pipeline_mode<synchronous>, transform_indices = @transform_22, window_bounds = array<i64: 128, 32>}, {pipeline_mode = #tpu.pipeline_mode<synchronous>, transform_indices = @transform_23, window_bounds = array<i64: 1, 32>}, {transform_indices = @transform_24, window_bounds = array<i64: 1, 4, 16, 32>}]} {
    %c0 = arith.constant 0 : index
    %c0_0 = arith.constant 0 : index
    %c0_1 = arith.constant 0 : index
    %c0_2 = arith.constant 0 : index
    %0 = vector.load %arg2[%c0, %c0_0, %c0_1, %c0_2] : memref<1x4x16x32xbf16, #tpu.memory_space<vmem>>, vector<1x4x16x32xbf16>
    %1 = vector.shape_cast %0 : vector<1x4x16x32xbf16> to vector<4x16x32xbf16>
    %2 = arith.extf %1 : vector<4x16x32xbf16> to vector<4x16x32xf32>
    %3 = vector.shape_cast %2 : vector<4x16x32xf32> to vector<64x32xf32>
    %cst = arith.constant dense<0.000000e+00> : vector<64xf32>
    %4 = vector.multi_reduction <add>, %3, %cst [1] : vector<64x32xf32> to vector<64xf32>
    %5 = vector.shape_cast %4 : vector<64xf32> to vector<64x1xf32>
    %cst_3 = arith.constant 3.200000e+01 : f32
    %6 = vector.broadcast %cst_3 : f32 to vector<64x1xf32>
    %7 = arith.divf %5, %6 : vector<64x1xf32>
    %8 = vector.broadcast %7 : vector<64x1xf32> to vector<64x32xf32>
    %9 = arith.subf %3, %8 : vector<64x32xf32>
    %10 = arith.mulf %9, %9 : vector<64x32xf32>
    %cst_4 = arith.constant dense<0.000000e+00> : vector<64xf32>
    %11 = vector.multi_reduction <add>, %10, %cst_4 [1] : vector<64x32xf32> to vector<64xf32>
    %12 = vector.shape_cast %11 : vector<64xf32> to vector<64x1xf32>
    %cst_5 = arith.constant 3.200000e+01 : f32
    %13 = vector.broadcast %cst_5 : f32 to vector<64x1xf32>
    %14 = arith.divf %12, %13 : vector<64x1xf32>
    %15 = vector.broadcast %7 : vector<64x1xf32> to vector<64x32xf32>
    %16 = arith.subf %3, %15 : vector<64x32xf32>
    %cst_6 = arith.constant 9.99999974E-6 : f32
    %17 = vector.broadcast %cst_6 : f32 to vector<64x1xf32>
    %18 = arith.addf %14, %17 : vector<64x1xf32>
    %19 = math.rsqrt %18 : vector<64x1xf32>
    %20 = vector.broadcast %19 : vector<64x1xf32> to vector<64x32xf32>
    %21 = arith.mulf %16, %20 : vector<64x32xf32>
    %c0_7 = arith.constant 0 : index
    %c0_8 = arith.constant 0 : index
    %22 = vector.load %arg5[%c0_7, %c0_8] : memref<1x32xf32, #tpu.memory_space<vmem>>, vector<1x32xf32>
    %23 = vector.broadcast %22 : vector<1x32xf32> to vector<64x32xf32>
    %24 = arith.mulf %21, %23 : vector<64x32xf32>
    %c0_9 = arith.constant 0 : index
    %c0_10 = arith.constant 0 : index
    %25 = vector.load %arg6[%c0_9, %c0_10] : memref<1x32xf32, #tpu.memory_space<vmem>>, vector<1x32xf32>
    %26 = vector.broadcast %25 : vector<1x32xf32> to vector<64x32xf32>
    %27 = arith.addf %24, %26 : vector<64x32xf32>
    %c0_11 = arith.constant 0 : index
    %c0_12 = arith.constant 0 : index
    %28 = vector.load %arg7[%c0_11, %c0_12] : memref<32x32xf32, #tpu.memory_space<vmem>>, vector<32x32xf32>
    %cst_13 = arith.constant dense<0.000000e+00> : vector<64x32xf32>
    %29 = tpu.matmul %27, %28, %cst_13 {dimension_numbers = #tpu.dot_dimension_numbers<[1], [0], [0], [1], [0, 0, 1, 1], [], []>} : vector<64x32xf32>, vector<32x32xf32>, vector<64x32xf32> -> vector<64x32xf32>
    %c0_14 = arith.constant 0 : index
    %c0_15 = arith.constant 0 : index
    %30 = vector.load %arg8[%c0_14, %c0_15] : memref<1x32xf32, #tpu.memory_space<vmem>>, vector<1x32xf32>
    %31 = vector.broadcast %30 : vector<1x32xf32> to vector<64x32xf32>
    %32 = arith.addf %29, %31 : vector<64x32xf32>
    %c0_16 = arith.constant 0 : index
    %c0_17 = arith.constant 0 : index
    %33 = vector.load %arg9[%c0_16, %c0_17] : memref<32x32xf32, #tpu.memory_space<vmem>>, vector<32x32xf32>
    %cst_18 = arith.constant dense<0.000000e+00> : vector<64x32xf32>
    %34 = tpu.matmul %27, %33, %cst_18 {dimension_numbers = #tpu.dot_dimension_numbers<[1], [0], [0], [1], [0, 0, 1, 1], [], []>} : vector<64x32xf32>, vector<32x32xf32>, vector<64x32xf32> -> vector<64x32xf32>
    %c0_19 = arith.constant 0 : index
    %c0_20 = arith.constant 0 : index
    %35 = vector.load %arg10[%c0_19, %c0_20] : memref<1x32xf32, #tpu.memory_space<vmem>>, vector<1x32xf32>
    %36 = vector.broadcast %35 : vector<1x32xf32> to vector<64x32xf32>
    %37 = arith.addf %34, %36 : vector<64x32xf32>
    %c0_21 = arith.constant 0 : index
    %c0_22 = arith.constant 0 : index
    %38 = vector.load %arg11[%c0_21, %c0_22] : memref<32x32xf32, #tpu.memory_space<vmem>>, vector<32x32xf32>
    %cst_23 = arith.constant dense<0.000000e+00> : vector<64x32xf32>
    %39 = tpu.matmul %27, %38, %cst_23 {dimension_numbers = #tpu.dot_dimension_numbers<[1], [0], [0], [1], [0, 0, 1, 1], [], []>} : vector<64x32xf32>, vector<32x32xf32>, vector<64x32xf32> -> vector<64x32xf32>
    %c0_24 = arith.constant 0 : index
    %c0_25 = arith.constant 0 : index
    %40 = vector.load %arg12[%c0_24, %c0_25] : memref<1x32xf32, #tpu.memory_space<vmem>>, vector<1x32xf32>
    %41 = vector.broadcast %40 : vector<1x32xf32> to vector<64x32xf32>
    %42 = arith.addf %39, %41 : vector<64x32xf32>
    %c0_26 = arith.constant 0 : index
    %c0_27 = arith.constant 0 : index
    %c0_28 = arith.constant 0 : index
    %43 = vector.load %arg3[%c0_26, %c0_27, %c0_28] : memref<1x4x8xf32, #tpu.memory_space<vmem>>, vector<1x4x8xf32>
    %44 = vector.shape_cast %43 : vector<1x4x8xf32> to vector<4x8xf32>
    %c0_29 = arith.constant 0 : index
    %c0_30 = arith.constant 0 : index
    %45 = vector.load %arg13[%c0_29, %c0_30] : memref<8x32xf32, #tpu.memory_space<vmem>>, vector<8x32xf32>
    %46 = vector.extract_strided_slice %44 {offsets = [0, 0], sizes = [1, 8], strides = [1, 1]} : vector<4x8xf32> to vector<1x8xf32>
    %47 = vector.extract_strided_slice %44 {offsets = [1, 0], sizes = [1, 8], strides = [1, 1]} : vector<4x8xf32> to vector<1x8xf32>
    %c0_31 = arith.constant 0 : index
    %c0_32 = arith.constant 0 : index
    %48 = vector.load %arg14[%c0_31, %c0_32] : memref<1x32xf32, #tpu.memory_space<vmem>>, vector<1x32xf32>
    %c0_33 = arith.constant 0 : index
    %c0_34 = arith.constant 0 : index
    %49 = vector.load %arg15[%c0_33, %c0_34] : memref<1x32xf32, #tpu.memory_space<vmem>>, vector<1x32xf32>
    %cst_35 = arith.constant 9.765625E-4 : f32
    %50 = vector.broadcast %cst_35 : f32 to vector<1x8xf32>
    %51 = arith.mulf %46, %50 : vector<1x8xf32>
    %cst_36 = arith.constant 9.765625E-4 : f32
    %52 = vector.broadcast %cst_36 : f32 to vector<1x8xf32>
    %53 = arith.mulf %47, %52 : vector<1x8xf32>
    %54 = arith.mulf %51, %51 : vector<1x8xf32>
    %55 = arith.subf %53, %54 : vector<1x8xf32>
    %cst_37 = arith.constant 0.000000e+00 : f32
    %56 = vector.broadcast %cst_37 : f32 to vector<1x8xf32>
    %57 = arith.maximumf %55, %56 : vector<1x8xf32>
    %cst_38 = arith.constant dense<0.000000e+00> : vector<1x32xf32>
    %58 = tpu.matmul %51, %45, %cst_38 {dimension_numbers = #tpu.dot_dimension_numbers<[1], [0], [0], [1], [0, 0, 1, 1], [], []>} : vector<1x8xf32>, vector<8x32xf32>, vector<1x32xf32> -> vector<1x32xf32>
    %cst_39 = arith.constant 9.99999974E-6 : f32
    %59 = vector.broadcast %cst_39 : f32 to vector<1x8xf32>
    %60 = arith.addf %57, %59 : vector<1x8xf32>
    %61 = math.rsqrt %60 : vector<1x8xf32>
    %cst_40 = arith.constant dense<0.000000e+00> : vector<1x32xf32>
    %62 = tpu.matmul %61, %45, %cst_40 {dimension_numbers = #tpu.dot_dimension_numbers<[1], [0], [0], [1], [0, 0, 1, 1], [], []>} : vector<1x8xf32>, vector<8x32xf32>, vector<1x32xf32> -> vector<1x32xf32>
    %63 = vector.broadcast %58 : vector<1x32xf32> to vector<64x32xf32>
    %64 = arith.subf %32, %63 : vector<64x32xf32>
    %65 = vector.broadcast %62 : vector<1x32xf32> to vector<64x32xf32>
    %66 = arith.mulf %64, %65 : vector<64x32xf32>
    %67 = vector.broadcast %48 : vector<1x32xf32> to vector<64x32xf32>
    %68 = arith.mulf %66, %67 : vector<64x32xf32>
    %69 = vector.broadcast %49 : vector<1x32xf32> to vector<64x32xf32>
    %70 = arith.addf %68, %69 : vector<64x32xf32>
    %71 = vector.extract_strided_slice %44 {offsets = [2, 0], sizes = [1, 8], strides = [1, 1]} : vector<4x8xf32> to vector<1x8xf32>
    %72 = vector.extract_strided_slice %44 {offsets = [3, 0], sizes = [1, 8], strides = [1, 1]} : vector<4x8xf32> to vector<1x8xf32>
    %c0_41 = arith.constant 0 : index
    %c0_42 = arith.constant 0 : index
    %73 = vector.load %arg16[%c0_41, %c0_42] : memref<1x32xf32, #tpu.memory_space<vmem>>, vector<1x32xf32>
    %c0_43 = arith.constant 0 : index
    %c0_44 = arith.constant 0 : index
    %74 = vector.load %arg17[%c0_43, %c0_44] : memref<1x32xf32, #tpu.memory_space<vmem>>, vector<1x32xf32>
    %cst_45 = arith.constant 9.765625E-4 : f32
    %75 = vector.broadcast %cst_45 : f32 to vector<1x8xf32>
    %76 = arith.mulf %71, %75 : vector<1x8xf32>
    %cst_46 = arith.constant 9.765625E-4 : f32
    %77 = vector.broadcast %cst_46 : f32 to vector<1x8xf32>
    %78 = arith.mulf %72, %77 : vector<1x8xf32>
    %79 = arith.mulf %76, %76 : vector<1x8xf32>
    %80 = arith.subf %78, %79 : vector<1x8xf32>
    %cst_47 = arith.constant 0.000000e+00 : f32
    %81 = vector.broadcast %cst_47 : f32 to vector<1x8xf32>
    %82 = arith.maximumf %80, %81 : vector<1x8xf32>
    %cst_48 = arith.constant dense<0.000000e+00> : vector<1x32xf32>
    %83 = tpu.matmul %76, %45, %cst_48 {dimension_numbers = #tpu.dot_dimension_numbers<[1], [0], [0], [1], [0, 0, 1, 1], [], []>} : vector<1x8xf32>, vector<8x32xf32>, vector<1x32xf32> -> vector<1x32xf32>
    %cst_49 = arith.constant 9.99999974E-6 : f32
    %84 = vector.broadcast %cst_49 : f32 to vector<1x8xf32>
    %85 = arith.addf %82, %84 : vector<1x8xf32>
    %86 = math.rsqrt %85 : vector<1x8xf32>
    %cst_50 = arith.constant dense<0.000000e+00> : vector<1x32xf32>
    %87 = tpu.matmul %86, %45, %cst_50 {dimension_numbers = #tpu.dot_dimension_numbers<[1], [0], [0], [1], [0, 0, 1, 1], [], []>} : vector<1x8xf32>, vector<8x32xf32>, vector<1x32xf32> -> vector<1x32xf32>
    %88 = vector.broadcast %83 : vector<1x32xf32> to vector<64x32xf32>
    %89 = arith.subf %37, %88 : vector<64x32xf32>
    %90 = vector.broadcast %87 : vector<1x32xf32> to vector<64x32xf32>
    %91 = arith.mulf %89, %90 : vector<64x32xf32>
    %92 = vector.broadcast %73 : vector<1x32xf32> to vector<64x32xf32>
    %93 = arith.mulf %91, %92 : vector<64x32xf32>
    %94 = vector.broadcast %74 : vector<1x32xf32> to vector<64x32xf32>
    %95 = arith.addf %93, %94 : vector<64x32xf32>
    %96 = vector.shape_cast %70 : vector<64x32xf32> to vector<4x16x32xf32>
    %97 = vector.shape_cast %95 : vector<64x32xf32> to vector<4x16x32xf32>
    %98 = vector.shape_cast %42 : vector<64x32xf32> to vector<4x16x32xf32>
    %c0_51 = arith.constant 0 : index
    %c0_52 = arith.constant 0 : index
    %99 = vector.load %arg4[%c0_51, %c0_52] : memref<64x64xf32, #tpu.memory_space<vmem>>, vector<64x64xf32>
    %100 = vector.shape_cast %96 : vector<4x16x32xf32> to vector<64x32xf32>
    %101 = vector.shape_cast %97 : vector<4x16x32xf32> to vector<64x32xf32>
    %102 = vector.shape_cast %98 : vector<4x16x32xf32> to vector<64x32xf32>
    %103 = vector.extract_strided_slice %100 {offsets = [0, 0], sizes = [64, 16], strides = [1, 1]} : vector<64x32xf32> to vector<64x16xf32>
    %104 = vector.extract_strided_slice %101 {offsets = [0, 0], sizes = [64, 16], strides = [1, 1]} : vector<64x32xf32> to vector<64x16xf32>
    %cst_53 = arith.constant dense<0.000000e+00> : vector<64x64xf32>
    %105 = tpu.matmul %103, %104, %cst_53 {dimension_numbers = #tpu.dot_dimension_numbers<[1], [1], [0], [0], [0, 0, 1, 0], [], []>} : vector<64x16xf32>, vector<64x16xf32>, vector<64x64xf32> -> vector<64x64xf32>
    %cst_54 = arith.constant 2.500000e-01 : f32
    %106 = vector.broadcast %cst_54 : f32 to vector<64x64xf32>
    %107 = arith.mulf %105, %106 : vector<64x64xf32>
    %108 = arith.addf %107, %99 : vector<64x64xf32>
    %cst_55 = arith.constant dense<0xFF800000> : vector<64xf32>
    %109 = vector.multi_reduction <maximumf>, %108, %cst_55 [1] : vector<64x64xf32> to vector<64xf32>
    %110 = vector.shape_cast %109 : vector<64xf32> to vector<64x1xf32>
    %111 = vector.broadcast %110 : vector<64x1xf32> to vector<64x64xf32>
    %112 = arith.subf %108, %111 : vector<64x64xf32>
    %113 = math.exp %112 : vector<64x64xf32>
    %cst_56 = arith.constant dense<0.000000e+00> : vector<64xf32>
    %114 = vector.multi_reduction <add>, %113, %cst_56 [1] : vector<64x64xf32> to vector<64xf32>
    %115 = vector.shape_cast %114 : vector<64xf32> to vector<64x1xf32>
    %116 = vector.broadcast %115 : vector<64x1xf32> to vector<64x64xf32>
    %117 = arith.divf %113, %116 : vector<64x64xf32>
    %118 = vector.extract_strided_slice %102 {offsets = [0, 0], sizes = [64, 16], strides = [1, 1]} : vector<64x32xf32> to vector<64x16xf32>
    %cst_57 = arith.constant dense<0.000000e+00> : vector<64x16xf32>
    %119 = tpu.matmul %117, %118, %cst_57 {dimension_numbers = #tpu.dot_dimension_numbers<[1], [0], [0], [1], [0, 0, 1, 1], [], []>} : vector<64x64xf32>, vector<64x16xf32>, vector<64x16xf32> -> vector<64x16xf32>
    %120 = vector.shape_cast %119 : vector<64x16xf32> to vector<4x16x16xf32>
    %c0_58 = arith.constant 0 : index
    %c0_59 = arith.constant 0 : index
    %c0_60 = arith.constant 0 : index
    %121 = vector.load %arg27[%c0_58, %c0_59, %c0_60] : memref<4x16x32xf32, #tpu.memory_space<vmem>>, vector<4x16x16xf32>
    tpu.vector_store %arg27[%c0_58, %c0_59, %c0_60], %120 {strides = array<i32>} : memref<4x16x32xf32, #tpu.memory_space<vmem>>, vector<4x16x16xf32>,
    %122 = vector.extract_strided_slice %100 {offsets = [0, 16], sizes = [64, 16], strides = [1, 1]} : vector<64x32xf32> to vector<64x16xf32>
    %123 = vector.extract_strided_slice %101 {offsets = [0, 16], sizes = [64, 16], strides = [1, 1]} : vector<64x32xf32> to vector<64x16xf32>
    %cst_61 = arith.constant dense<0.000000e+00> : vector<64x64xf32>
    %124 = tpu.matmul %122, %123, %cst_61 {dimension_numbers = #tpu.dot_dimension_numbers<[1], [1], [0], [0], [0, 0, 1, 0], [], []>} : vector<64x16xf32>, vector<64x16xf32>, vector<64x64xf32> -> vector<64x64xf32>
    %cst_62 = arith.constant 2.500000e-01 : f32
    %125 = vector.broadcast %cst_62 : f32 to vector<64x64xf32>
    %126 = arith.mulf %124, %125 : vector<64x64xf32>
    %127 = arith.addf %126, %99 : vector<64x64xf32>
    %cst_63 = arith.constant dense<0xFF800000> : vector<64xf32>
    %128 = vector.multi_reduction <maximumf>, %127, %cst_63 [1] : vector<64x64xf32> to vector<64xf32>
    %129 = vector.shape_cast %128 : vector<64xf32> to vector<64x1xf32>
    %130 = vector.broadcast %129 : vector<64x1xf32> to vector<64x64xf32>
    %131 = arith.subf %127, %130 : vector<64x64xf32>
    %132 = math.exp %131 : vector<64x64xf32>
    %cst_64 = arith.constant dense<0.000000e+00> : vector<64xf32>
    %133 = vector.multi_reduction <add>, %132, %cst_64 [1] : vector<64x64xf32> to vector<64xf32>
    %134 = vector.shape_cast %133 : vector<64xf32> to vector<64x1xf32>
    %135 = vector.broadcast %134 : vector<64x1xf32> to vector<64x64xf32>
    %136 = arith.divf %132, %135 : vector<64x64xf32>
    %137 = vector.extract_strided_slice %102 {offsets = [0, 16], sizes = [64, 16], strides = [1, 1]} : vector<64x32xf32> to vector<64x16xf32>
    %cst_65 = arith.constant dense<0.000000e+00> : vector<64x16xf32>
    %138 = tpu.matmul %136, %137, %cst_65 {dimension_numbers = #tpu.dot_dimension_numbers<[1], [0], [0], [1], [0, 0, 1, 1], [], []>} : vector<64x64xf32>, vector<64x16xf32>, vector<64x16xf32> -> vector<64x16xf32>
    %139 = vector.shape_cast %138 : vector<64x16xf32> to vector<4x16x16xf32>
    %c0_66 = arith.constant 0 : index
    %c0_67 = arith.constant 0 : index
    %c16 = arith.constant 16 : index
    %140 = vector.load %arg27[%c0_66, %c0_67, %c16] : memref<4x16x32xf32, #tpu.memory_space<vmem>>, vector<4x16x16xf32>
    tpu.vector_store %arg27[%c0_66, %c0_67, %c16], %139 {strides = array<i32>} : memref<4x16x32xf32, #tpu.memory_space<vmem>>, vector<4x16x16xf32>,
    %c0_68 = arith.constant 0 : index
    %c0_69 = arith.constant 0 : index
    %c0_70 = arith.constant 0 : index
    %141 = vector.load %arg27[%c0_68, %c0_69, %c0_70] : memref<4x16x32xf32, #tpu.memory_space<vmem>>, vector<4x16x32xf32>
    %142 = vector.shape_cast %141 : vector<4x16x32xf32> to vector<64x32xf32>
    %c0_71 = arith.constant 0 : index
    %c0_72 = arith.constant 0 : index
    %143 = vector.load %arg18[%c0_71, %c0_72] : memref<32x32xf32, #tpu.memory_space<vmem>>, vector<32x32xf32>
    %cst_73 = arith.constant dense<0.000000e+00> : vector<64x32xf32>
    %144 = tpu.matmul %142, %143, %cst_73 {dimension_numbers = #tpu.dot_dimension_numbers<[1], [0], [0], [1], [0, 0, 1, 1], [], []>} : vector<64x32xf32>, vector<32x32xf32>, vector<64x32xf32> -> vector<64x32xf32>
    %c0_74 = arith.constant 0 : index
    %c0_75 = arith.constant 0 : index
    %145 = vector.load %arg19[%c0_74, %c0_75] : memref<1x32xf32, #tpu.memory_space<vmem>>, vector<1x32xf32>
    %146 = vector.broadcast %145 : vector<1x32xf32> to vector<64x32xf32>
    %147 = arith.addf %144, %146 : vector<64x32xf32>
    %148 = arith.negf %147 : vector<64x32xf32>
    %149 = math.exp %148 : vector<64x32xf32>
    %cst_76 = arith.constant 1.000000e+00 : f32
    %150 = vector.broadcast %cst_76 : f32 to vector<64x32xf32>
    %151 = arith.addf %150, %149 : vector<64x32xf32>
    %152 = arith.divf %150, %151 : vector<64x32xf32>
    %cst_77 = arith.constant 1.000000e+00 : f32
    %153 = vector.broadcast %cst_77 : f32 to vector<64x32xf32>
    %154 = arith.addf %152, %153 : vector<64x32xf32>
    %155 = arith.mulf %154, %3 : vector<64x32xf32>
    %cst_78 = arith.constant dense<0.000000e+00> : vector<64xf32>
    %156 = vector.multi_reduction <add>, %155, %cst_78 [1] : vector<64x32xf32> to vector<64xf32>
    %157 = vector.shape_cast %156 : vector<64xf32> to vector<64x1xf32>
    %cst_79 = arith.constant 3.200000e+01 : f32
    %158 = vector.broadcast %cst_79 : f32 to vector<64x1xf32>
    %159 = arith.divf %157, %158 : vector<64x1xf32>
    %160 = vector.broadcast %159 : vector<64x1xf32> to vector<64x32xf32>
    %161 = arith.subf %155, %160 : vector<64x32xf32>
    %162 = arith.mulf %161, %161 : vector<64x32xf32>
    %cst_80 = arith.constant dense<0.000000e+00> : vector<64xf32>
    %163 = vector.multi_reduction <add>, %162, %cst_80 [1] : vector<64x32xf32> to vector<64xf32>
    %164 = vector.shape_cast %163 : vector<64xf32> to vector<64x1xf32>
    %cst_81 = arith.constant 3.200000e+01 : f32
    %165 = vector.broadcast %cst_81 : f32 to vector<64x1xf32>
    %166 = arith.divf %164, %165 : vector<64x1xf32>
    %167 = vector.broadcast %159 : vector<64x1xf32> to vector<64x32xf32>
    %168 = arith.subf %155, %167 : vector<64x32xf32>
    %cst_82 = arith.constant 9.99999974E-6 : f32
    %169 = vector.broadcast %cst_82 : f32 to vector<64x1xf32>
    %170 = arith.addf %166, %169 : vector<64x1xf32>
    %171 = math.rsqrt %170 : vector<64x1xf32>
    %172 = vector.broadcast %171 : vector<64x1xf32> to vector<64x32xf32>
    %173 = arith.mulf %168, %172 : vector<64x32xf32>
    %c0_83 = arith.constant 0 : index
    %c0_84 = arith.constant 0 : index
    %174 = vector.load %arg20[%c0_83, %c0_84] : memref<1x32xf32, #tpu.memory_space<vmem>>, vector<1x32xf32>
    %175 = vector.broadcast %174 : vector<1x32xf32> to vector<64x32xf32>
    %176 = arith.mulf %173, %175 : vector<64x32xf32>
    %c0_85 = arith.constant 0 : index
    %c0_86 = arith.constant 0 : index
    %177 = vector.load %arg21[%c0_85, %c0_86] : memref<1x32xf32, #tpu.memory_space<vmem>>, vector<1x32xf32>
    %178 = vector.broadcast %177 : vector<1x32xf32> to vector<64x32xf32>
    %179 = arith.addf %176, %178 : vector<64x32xf32>
    %c0_87 = arith.constant 0 : index
    %c0_88 = arith.constant 0 : index
    %180 = vector.load %arg22[%c0_87, %c0_88] : memref<32x128xf32, #tpu.memory_space<vmem>>, vector<32x128xf32>
    %cst_89 = arith.constant dense<0.000000e+00> : vector<64x128xf32>
    %181 = tpu.matmul %179, %180, %cst_89 {dimension_numbers = #tpu.dot_dimension_numbers<[1], [0], [0], [1], [0, 0, 1, 1], [], []>} : vector<64x32xf32>, vector<32x128xf32>, vector<64x128xf32> -> vector<64x128xf32>
    %c0_90 = arith.constant 0 : index
    %c0_91 = arith.constant 0 : index
    %182 = vector.load %arg23[%c0_90, %c0_91] : memref<1x128xf32, #tpu.memory_space<vmem>>, vector<1x128xf32>
    %183 = vector.broadcast %182 : vector<1x128xf32> to vector<64x128xf32>
    %184 = arith.addf %181, %183 : vector<64x128xf32>
    %185 = arith.mulf %184, %184 : vector<64x128xf32>
    %186 = arith.mulf %184, %185 : vector<64x128xf32>
    %cst_92 = arith.constant 4.471500e-02 : f32
    %187 = vector.broadcast %cst_92 : f32 to vector<64x128xf32>
    %188 = arith.mulf %187, %186 : vector<64x128xf32>
    %189 = arith.addf %184, %188 : vector<64x128xf32>
    %cst_93 = arith.constant 0.797884583 : f32
    %190 = vector.broadcast %cst_93 : f32 to vector<64x128xf32>
    %191 = arith.mulf %190, %189 : vector<64x128xf32>
    %192 = math.tanh %191 : vector<64x128xf32>
    %cst_94 = arith.constant 1.000000e+00 : f32
    %193 = vector.broadcast %cst_94 : f32 to vector<64x128xf32>
    %194 = arith.addf %193, %192 : vector<64x128xf32>
    %cst_95 = arith.constant 5.000000e-01 : f32
    %195 = vector.broadcast %cst_95 : f32 to vector<64x128xf32>
    %196 = arith.mulf %195, %194 : vector<64x128xf32>
    %197 = arith.mulf %184, %196 : vector<64x128xf32>
    %c0_96 = arith.constant 0 : index
    %c0_97 = arith.constant 0 : index
    %198 = vector.load %arg24[%c0_96, %c0_97] : memref<128x32xf32, #tpu.memory_space<vmem>>, vector<128x32xf32>
    %cst_98 = arith.constant dense<0.000000e+00> : vector<64x32xf32>
    %199 = tpu.matmul %197, %198, %cst_98 {dimension_numbers = #tpu.dot_dimension_numbers<[1], [0], [0], [1], [0, 0, 1, 1], [], []>} : vector<64x128xf32>, vector<128x32xf32>, vector<64x32xf32> -> vector<64x32xf32>
    %c0_99 = arith.constant 0 : index
    %c0_100 = arith.constant 0 : index
    %200 = vector.load %arg25[%c0_99, %c0_100] : memref<1x32xf32, #tpu.memory_space<vmem>>, vector<1x32xf32>
    %201 = vector.broadcast %200 : vector<1x32xf32> to vector<64x32xf32>
    %202 = arith.addf %199, %201 : vector<64x32xf32>
    %203 = arith.addf %202, %155 : vector<64x32xf32>
    %204 = vector.shape_cast %203 : vector<64x32xf32> to vector<4x16x32xf32>
    %205 = arith.truncf %204 : vector<4x16x32xf32> to vector<4x16x32xbf16>
    %c0_101 = arith.constant 0 : index
    %c0_102 = arith.constant 0 : index
    %c0_103 = arith.constant 0 : index
    %c0_104 = arith.constant 0 : index
    %206 = vector.load %arg26[%c0_101, %c0_102, %c0_103, %c0_104] : memref<1x4x16x32xbf16, #tpu.memory_space<vmem>>, vector<1x4x16x32xbf16>
    %207 = vector.shape_cast %206 : vector<1x4x16x32xbf16> to vector<4x16x32xbf16>
    %208 = vector.shape_cast %205 : vector<4x16x32xbf16> to vector<1x4x16x32xbf16>
    tpu.vector_store %arg26[%c0_101, %c0_102, %c0_103, %c0_104], %208 {strides = array<i32>} : memref<1x4x16x32xbf16, #tpu.memory_space<vmem>>, vector<1x4x16x32xbf16>,
    return
  }
  func.func @transform_0(%arg0: i32, %arg1: i32) -> (i32, i32, i32, i32) {
    %c0_i32 = arith.constant 0 : i32
    %c0_i32_0 = arith.constant 0 : i32
    %c0_i32_1 = arith.constant 0 : i32
    return %arg0, %arg1, %c0_i32, %c0_i32_0 : i32, i32, i32, i32
  }
  func.func @transform_1(%arg0: i32, %arg1: i32) -> (i32, i32, i32) {
    %c0_i32 = arith.constant 0 : i32
    %c0_i32_0 = arith.constant 0 : i32
    %c0_i32_1 = arith.constant 0 : i32
    return %arg0, %c0_i32, %c0_i32_0 : i32, i32, i32
  }
  func.func @transform_2(%arg0: i32, %arg1: i32) -> (i32, i32) {
    %c0_i32 = arith.constant 0 : i32
    %c0_i32_0 = arith.constant 0 : i32
    %c0_i32_1 = arith.constant 0 : i32
    return %c0_i32, %c0_i32_0 : i32, i32
  }
  func.func @transform_3(%arg0: i32, %arg1: i32) -> (i32, i32) {
    %c0_i32 = arith.constant 0 : i32
    %c0_i32_0 = arith.constant 0 : i32
    %c0_i32_1 = arith.constant 0 : i32
    return %c0_i32, %c0_i32_0 : i32, i32
  }
  func.func @transform_4(%arg0: i32, %arg1: i32) -> (i32, i32) {
    %c0_i32 = arith.constant 0 : i32
    %c0_i32_0 = arith.constant 0 : i32
    %c0_i32_1 = arith.constant 0 : i32
    return %c0_i32, %c0_i32_0 : i32, i32
  }
  func.func @transform_5(%arg0: i32, %arg1: i32) -> (i32, i32) {
    %c0_i32 = arith.constant 0 : i32
    %c0_i32_0 = arith.constant 0 : i32
    %c0_i32_1 = arith.constant 0 : i32
    return %c0_i32, %c0_i32_0 : i32, i32
  }
  func.func @transform_6(%arg0: i32, %arg1: i32) -> (i32, i32) {
    %c0_i32 = arith.constant 0 : i32
    %c0_i32_0 = arith.constant 0 : i32
    %c0_i32_1 = arith.constant 0 : i32
    return %c0_i32, %c0_i32_0 : i32, i32
  }
  func.func @transform_7(%arg0: i32, %arg1: i32) -> (i32, i32) {
    %c0_i32 = arith.constant 0 : i32
    %c0_i32_0 = arith.constant 0 : i32
    %c0_i32_1 = arith.constant 0 : i32
    return %c0_i32, %c0_i32_0 : i32, i32
  }
  func.func @transform_8(%arg0: i32, %arg1: i32) -> (i32, i32) {
    %c0_i32 = arith.constant 0 : i32
    %c0_i32_0 = arith.constant 0 : i32
    %c0_i32_1 = arith.constant 0 : i32
    return %c0_i32, %c0_i32_0 : i32, i32
  }
  func.func @transform_9(%arg0: i32, %arg1: i32) -> (i32, i32) {
    %c0_i32 = arith.constant 0 : i32
    %c0_i32_0 = arith.constant 0 : i32
    %c0_i32_1 = arith.constant 0 : i32
    return %c0_i32, %c0_i32_0 : i32, i32
  }
  func.func @transform_10(%arg0: i32, %arg1: i32) -> (i32, i32) {
    %c0_i32 = arith.constant 0 : i32
    %c0_i32_0 = arith.constant 0 : i32
    %c0_i32_1 = arith.constant 0 : i32
    return %c0_i32, %c0_i32_0 : i32, i32
  }
  func.func @transform_11(%arg0: i32, %arg1: i32) -> (i32, i32) {
    %c0_i32 = arith.constant 0 : i32
    %c0_i32_0 = arith.constant 0 : i32
    %c0_i32_1 = arith.constant 0 : i32
    return %c0_i32, %c0_i32_0 : i32, i32
  }
  func.func @transform_12(%arg0: i32, %arg1: i32) -> (i32, i32) {
    %c0_i32 = arith.constant 0 : i32
    %c0_i32_0 = arith.constant 0 : i32
    %c0_i32_1 = arith.constant 0 : i32
    return %c0_i32, %c0_i32_0 : i32, i32
  }
  func.func @transform_13(%arg0: i32, %arg1: i32) -> (i32, i32) {
    %c0_i32 = arith.constant 0 : i32
    %c0_i32_0 = arith.constant 0 : i32
    %c0_i32_1 = arith.constant 0 : i32
    return %c0_i32, %c0_i32_0 : i32, i32
  }
  func.func @transform_14(%arg0: i32, %arg1: i32) -> (i32, i32) {
    %c0_i32 = arith.constant 0 : i32
    %c0_i32_0 = arith.constant 0 : i32
    %c0_i32_1 = arith.constant 0 : i32
    return %c0_i32, %c0_i32_0 : i32, i32
  }
  func.func @transform_15(%arg0: i32, %arg1: i32) -> (i32, i32) {
    %c0_i32 = arith.constant 0 : i32
    %c0_i32_0 = arith.constant 0 : i32
    %c0_i32_1 = arith.constant 0 : i32
    return %c0_i32, %c0_i32_0 : i32, i32
  }
  func.func @transform_16(%arg0: i32, %arg1: i32) -> (i32, i32) {
    %c0_i32 = arith.constant 0 : i32
    %c0_i32_0 = arith.constant 0 : i32
    %c0_i32_1 = arith.constant 0 : i32
    return %c0_i32, %c0_i32_0 : i32, i32
  }
  func.func @transform_17(%arg0: i32, %arg1: i32) -> (i32, i32) {
    %c0_i32 = arith.constant 0 : i32
    %c0_i32_0 = arith.constant 0 : i32
    %c0_i32_1 = arith.constant 0 : i32
    return %c0_i32, %c0_i32_0 : i32, i32
  }
  func.func @transform_18(%arg0: i32, %arg1: i32) -> (i32, i32) {
    %c0_i32 = arith.constant 0 : i32
    %c0_i32_0 = arith.constant 0 : i32
    %c0_i32_1 = arith.constant 0 : i32
    return %c0_i32, %c0_i32_0 : i32, i32
  }
  func.func @transform_19(%arg0: i32, %arg1: i32) -> (i32, i32) {
    %c0_i32 = arith.constant 0 : i32
    %c0_i32_0 = arith.constant 0 : i32
    %c0_i32_1 = arith.constant 0 : i32
    return %c0_i32, %c0_i32_0 : i32, i32
  }
  func.func @transform_20(%arg0: i32, %arg1: i32) -> (i32, i32) {
    %c0_i32 = arith.constant 0 : i32
    %c0_i32_0 = arith.constant 0 : i32
    %c0_i32_1 = arith.constant 0 : i32
    return %c0_i32, %c0_i32_0 : i32, i32
  }
  func.func @transform_21(%arg0: i32, %arg1: i32) -> (i32, i32) {
    %c0_i32 = arith.constant 0 : i32
    %c0_i32_0 = arith.constant 0 : i32
    %c0_i32_1 = arith.constant 0 : i32
    return %c0_i32, %c0_i32_0 : i32, i32
  }
  func.func @transform_22(%arg0: i32, %arg1: i32) -> (i32, i32) {
    %c0_i32 = arith.constant 0 : i32
    %c0_i32_0 = arith.constant 0 : i32
    %c0_i32_1 = arith.constant 0 : i32
    return %c0_i32, %c0_i32_0 : i32, i32
  }
  func.func @transform_23(%arg0: i32, %arg1: i32) -> (i32, i32) {
    %c0_i32 = arith.constant 0 : i32
    %c0_i32_0 = arith.constant 0 : i32
    %c0_i32_1 = arith.constant 0 : i32
    return %c0_i32, %c0_i32_0 : i32, i32
  }
  func.func @transform_24(%arg0: i32, %arg1: i32) -> (i32, i32, i32, i32) {
    %c0_i32 = arith.constant 0 : i32
    %c0_i32_0 = arith.constant 0 : i32
    %c0_i32_1 = arith.constant 0 : i32
    return %arg0, %arg1, %c0_i32, %c0_i32_0 : i32, i32, i32, i32
  }
}

</mosaic_0001>

<bundles_post_ra>
// kernel: ptavit_stage_no_down.9
= control target key start
LH: loop header
LB: loop body
LE: loop exit
PB: predicated region body
PF: predicated region fallthrough
CT: control target
= control target key end

     0   :  { %s2424_s21 = smov 0   ;;  %s2426_s22 = smov 0   ;;  %s3610_s0 = inlined_call_operand.vmem [shape: bf16[2,16,16,32], index: 0, kind: input, shape index: {}, may-alias: {0,1,2}]   ;;  %s3611_s1 = inlined_call_operand.vmem [shape: bf16[2,16,16,32], index: 1, kind: input, shape index: {}, may-alias: {0,1,2}]   ;;  %s3612_s2 = inlined_call_operand.vmem [shape: bf16[2,16,16,32], index: 2, kind: input, shape index: {}, may-alias: {0,1,2}]   ;;  %s3613_s3 = inlined_call_operand.vmem [shape: f32[2,1,128], index: 3, kind: input, shape index: {}]   ;;  %s3614_s4 = inlined_call_operand.vmem [shape: f32[32,128], index: 4, kind: input, shape index: {}]   ;;  %s3615_s5 = inlined_call_operand.vmem [shape: f32[1,128], index: 5, kind: input, shape index: {}]   ;;  %s3616_s6 = inlined_call_operand.vmem [shape: f32[3,3,128], index: 6, kind: input, shape index: {}]   ;;  %s3617_s7 = inlined_call_operand.vmem [shape: f32[1,128], index: 7, kind: input, shape index: {}]   ;;  %s3618_s8 = inlined_call_operand.vmem [shape: f32[128,32], index: 8, kind: input, shape index: {}]   ;;  %s3619_s9 = inlined_call_operand.vmem [shape: f32[32,128], index: 9, kind: input, shape index: {}]   ;;  %s3620_s10 = inlined_call_operand.vmem [shape: f32[128,32], index: 10, kind: input, shape index: {}]   ;;  %s3621_s11 = inlined_call_operand.vmem [shape: f32[1,32], index: 11, kind: input, shape index: {}]   ;;  %s3622_s12 = inlined_call_operand.vmem [shape: bf16[2,16,16,32], index: 12, kind: output, shape index: {}]  }
   0x1   :  { %3662 = sst [smem:[#allocation20_spill]] %s3610_s0  ;;  %s2428_s23 = smov 0  }
   0x2   :  { %3663 = sst [smem:[#allocation21_spill]] %s3614_s4  ;;  %s2430_s24 = smov 0  }
   0x3   :  { %s2432_s25 = smov 0  }
   0x4 LB: > { %s31_s26 = sadd.s32 1, %s2348_s23  ;;  %s34_s27 = sadd.s32 1, %s2352_s24  ;;  %s2356_s25 = sphi %s2432_s25, %s22_s25   ;;  %s2352_s24 = sphi %s2430_s24, %s3721_s24   ;;  %s2348_s23 = sphi %s2428_s23, %s3720_s23   ;;  %s2344_s22 = sphi %s2426_s22, %s3719_s22   ;;  %s2340_s21 = sphi %s2424_s21, %s3718_s21  }
   0x5   : > { %p32_p0 = scmp.ge.s32.totalorder %s31_s26, 2  ;;  %p2074_p1 = scmp.ge.s32.totalorder %s2356_s25, 1 }
   0x6   : > { %p456_p2 = scmp.lt.s32.totalorder %s2356_s25, 5 }
   0x7   : > { %s3723_s26 = smov (%p32_p0, %s31_s26), 0  ;;  %s3725_s27 = smov (!%p32_p0, %s34_s27), %s2352_s24 }
   0x8   : > { %3664 = sst [smem:[#allocation3_spill]] %s3723_s26  ;;  %p457_p3 = pnand %p2074_p1, %p456_p2 }
   0x9   : > { %p36_p4 = scmp.ge.s32.totalorder %s3725_s27, 2 }
   0xa   : > { %460 = sbr.rel (%p457_p3) target bundleno = 608 (0x260), region = 68 }
   0xb   : > { %s3727_s27 = smov (%p36_p4, %s3725_s27), 0 }
   0xc   : > { %3665 = sst [smem:[#allocation4_spill]] %s3727_s27 }
   0xf   : > { %s3666_s4 = sld [smem:[#allocation21_spill]]  ;;  %s2463_s14 = sshll.u32 %s2340_s21, 3  ;;  %vm654_vm0 = vcmask 261120   ;;  %v1676_v9 = vld [vmem:[%s3618_s8 + $0x78] sm:$0xff]  ;;  %v1675_v10 = vld [vmem:[%s3618_s8 + $0x70] sm:$0xff]  ;;  %v1674_v15 = vld [vmem:[%s3618_s8 + $0x68] sm:$0xff] }
  0x10   : > { %p538_p5 = scmp.lt.s32.totalorder %s2344_s22, 1  ;;  %p540_p6 = scmp.lt.s32.totalorder %s2463_s14, 15  ;;  %v1673_v16 = vld [vmem:[%s3618_s8 + $0x60] sm:$0xff]  ;;  %v1672_v18 = vld [vmem:[%s3618_s8 + $0x58] sm:$0xff]  ;;  %v1671_v21 = vld [vmem:[%s3618_s8 + $0x50] sm:$0xff]  ;;  %v2358_v55 = vmov 0.0  }
  0x11   : > { %s566_s15 = sadd.s32 8, %s2463_s14  ;;  %s3668_s0 = sld [smem:[#allocation20_spill]]  ;;  %v1670_v23 = vld [vmem:[%s3618_s8 + $0x48] sm:$0xff]  ;;  %v1669_v24 = vld [vmem:[%s3618_s8 + $0x40] sm:$0xff]  ;;  %v1668_v26 = vld [vmem:[%s3618_s8 + $0x38] sm:$0xff]  ;;  %vm1897_vm9 = vcmask 257024  }
  0x12   : > { %s3729_s22 = smov (!%p538_p5, %s2344_s22), 1  ;;  %p2479_p7 = scmp.lt.s32.totalorder %s566_s15, 15  ;;  %v1667_v29 = vld [vmem:[%s3618_s8 + $0x30] sm:$0xff]  ;;  %v1666_v30 = vld [vmem:[%s3618_s8 + $0x28] sm:$0xff]  ;;  %v1665_v31 = vld [vmem:[%s3618_s8 + $0x20] sm:$0xff] }
  0x13   : > { %s541_s18 = scalar_select %p540_p6, %s2463_s14, 15  ;;  %v1664_v33 = vld [vmem:[%s3618_s8 + $0x18] sm:$0xff]  ;;  %v1663_v36 = vld [vmem:[%s3618_s8 + $0x10] sm:$0xff]  ;;  %v1662_v37 = vld [vmem:[%s3618_s8 + $0x8] sm:$0xff]  ;;  %1012 = vst [vmem:[#allocation2] sm:$0x1] %v2358_v55 }
  0x14   : > { %s2477_s28 = sshll.u32 %s3729_s22, 5  ;;  %s3731_s15 = smov (!%p2479_p7, %s566_s15), 15  ;;  %v1661_v38 = vld [vmem:[%s3618_s8] sm:$0xff]  ;;  %1013 = vst [vmem:[#allocation2 + $0x18] sm:$0x1] %v2358_v55 }
  0x15   : > { %v645_v0 = vld [vmem:[%s3666_s4 + $0x18] sm:$0xff]  ;;  %v644_v1 = vld [vmem:[%s3666_s4 + $0x10] sm:$0xff]  ;;  %v643_v2 = vld [vmem:[%s3666_s4 + $0x8] sm:$0xff]  ;;  %s2076_s29 = sshll.u32 %s541_s18, 1  ;;  %s3733_s15 = smov (!%p2479_p7, %s3731_s15), 15 }
  0x16   : > { %715 = vmatpush.msra.mxu0 %v645_v0  ;;  %2174 = vmatpush.msra.mxu3 %v645_v0  ;;  %v642_v3 = vld [vmem:[%s3666_s4] sm:$0xff]  ;;  %s2484_s13 = sadd.s32 %s2477_s28, %s2076_s29  ;;  %s2093_s17 = sshll.u32 %s3733_s15, 1  ;;  %1014 = vst [vmem:[#allocation2 + $0x30] sm:$0x1] %v2358_v55 }
  0x17   : > { %980 = vmatpush.msra.mxu2 %v645_v0  ;;  %s3623_s16 = sshll.u32 %s2484_s13, 2  ;;  %s575_s19 = sadd.s32 %s2093_s17, %s2477_s28  ;;  %v2654_v52 = vld [vmem:[%s3615_s5] ss:$0 sm:$0xff]  ;;  %1015 = vst [vmem:[#allocation2 + $0x48] sm:$0x1] %v2358_v55 }
  0x18   : > { %716 = vmatpush.msra.mxu0 %v644_v1  ;;  %2175 = vmatpush.msra.mxu3 %v644_v1  ;;  %s2492_s20 = scalar_lea.vmem %s3668_s0, %s3623_s16  ;;  %s2095_s0 = sshll.u32 %s575_s19, 2  ;;  %1016 = vst [vmem:[#allocation2 + $0x60] sm:$0x1] %v2358_v55 }
  0x19   : > { %981 = vmatpush.msra.mxu2 %v644_v1  ;;  %v2495_v4 = vld [vmem:[%s2492_s20] sm:$0xff]   ;;  %v2498_v5 = vld [vmem:[%s2492_s20 + $0x28] sm:$0xff]   ;;  %v2513_v8 = vld [vmem:[%s2492_s20 + $0x30] sm:$0xff]   ;;  %s577_s26 = scalar_lea.vmem %s3612_s2, %s2095_s0  ;;  %s2080_s29 = sadd.s32 4294967295, %s2463_s14  ;;  %1017 = vst [vmem:[#allocation2 + $0x78] sm:$0x1] %v2358_v55 }
  0x1a   : > { %717 = vmatpush.msra.mxu0 %v643_v2  ;;  %2176 = vmatpush.msra.mxu3 %v643_v2  ;;  %3669 = vst [vmem:[#allocation5_spill] sm:$0xff] %v2495_v4  ;;  %v3639_v6 = vunpack.c.l.bf16 %v2495_v4  ;;  %v3632_v7 = vunpack.c.h.bf16 %v2498_v5  ;;  %v3637_v11 = vunpack.c.h.bf16 %v2495_v4  ;;  %v3630_v12 = vunpack.c.l.bf16 %v2513_v8  ;;  %v2164_v13 = vld [vmem:[%s577_s26] sm:$0xff]   ;;  %v2541_v17 = vld [vmem:[%s2492_s20 + $0x8] sm:$0xff]   ;;  %p550_p8 = scmp.gt.s32.totalorder %s2080_s29, 0  ;;  %p2081_p9 = scmp.lt.s32.totalorder %s2080_s29, 15  ;;  %v2565_v25 = vld [vmem:[%s2492_s20 + $0x38] sm:$0xff]  }
  0x1b   : > { %982 = vmatpush.msra.mxu2 %v643_v2  ;;  %3670 = vst [vmem:[#allocation6_spill] sm:$0xff] %v2498_v5  ;;  %v2165_v14 = vunpack.c.l.bf16 %v2164_v13  ;;  %v3635_v19 = vunpack.c.l.bf16 %v2541_v17  ;;  %v3628_v20 = vunpack.c.h.bf16 %v2513_v8  ;;  %v2166_v22 = vunpack.c.h.bf16 %v2164_v13  ;;  %v2590_v32 = vld [vmem:[%s2492_s20 + $0x10] sm:$0xff]   ;;  %v2621_v42 = vld [vmem:[%s2492_s20 + $0x18] sm:$0xff]   ;;  %s584_s15 = scalar_lea.vmem %s3613_s3, %s3729_s22  ;;  %v2637_v48 = vld [vmem:[%s2492_s20 + $0x20] sm:$0xff]   ;;  %p599_p10 = scmp.lt.s32.totalorder %s2340_s21, 1 }
  0x1c   : > { %718 = vmatpush.msra.mxu0 %v642_v3  ;;  %2177 = vmatpush.msra.mxu3 %v642_v3  ;;  %3671 = vst [vmem:[#allocation7_spill] sm:$0xff] %v2513_v8  ;;  %s3735_s29 = smov (!%p550_p8, %s2080_s29), 0  ;;  %v3633_v27 = vunpack.c.h.bf16 %v2541_v17  ;;  %v3626_v28 = vunpack.c.l.bf16 %v2565_v25  ;;  %v3631_v34 = vunpack.c.l.bf16 %v2590_v32  ;;  %v3624_v35 = vunpack.c.h.bf16 %v2565_v25  ;;  %v1659_v45 = vld [vmem:[%s584_s15] sm:$0x1]  ;;  %p596_p11 = scmp.gt.s32.totalorder %s2340_s21, 0 }
  0x1d   : > { %983 = vmatpush.msra.mxu2 %v642_v3  ;;  %2100 = vmatmul.msk.f32.vlgmr.msra.gmra.mxu0 %vm654_vm0, %v3639_v6  ;;  %3672 = vst [vmem:[#allocation8_spill] sm:$0xff] %v2541_v17  ;;  %s3737_s29 = smov (!%p2081_p9, %s3735_s29), 15  ;;  %v3629_v40 = vunpack.c.h.bf16 %v2590_v32  ;;  %v3627_v43 = vunpack.c.l.bf16 %v2621_v42  ;;  %v3625_v46 = vunpack.c.h.bf16 %v2621_v42  ;;  %v1660_v47 = vmul.f32 0.00390625, %v1659_v45  ;;  %s3693_s26 = sshll.u32 %s2484_s13, 2 }
  0x1e   : > { %930 = vmatpush.msrb.mxu3 %v645_v0  ;;  %2118 = vmatmul.msk.f32.vlgmr.msra.gmra.mxu2 %vm654_vm0, %v2165_v14  ;;  %3673 = vst [vmem:[#allocation9_spill] sm:$0xff] %v2565_v25  ;;  %s2086_s4 = sshll.u32 %s3737_s29, 1  ;;  %v3638_v49 = vunpack.c.l.bf16 %v2637_v48  ;;  %v3636_v50 = vunpack.c.h.bf16 %v2637_v48  ;;  %v3634_v51 = vunpack.c.l.bf16 %v2498_v5  ;;  %s3516_s19 = scalar_lea.vmem %s3622_s12, %s3693_s26 }
  0x1f   : > { %2111 = vmatmul.msk.f32.vlgmr.msra.gmra.mxu3 %vm654_vm0, %v3632_v7  ;;  %s558_s14 = sadd.s32 %s2086_s4, %s2477_s28  ;;  %3674 = vst [vmem:[#allocation10_spill] sm:$0xff] %v2590_v32 }
  0x20   : > { %931 = vmatpush.msrb.mxu3 %v644_v1  ;;  %s2088_s18 = sshll.u32 %s558_s14, 2  ;;  %3675 = vst [vmem:[#allocation11_spill] sm:$0xff] %v2621_v42 }
  0x21   : > { %s560_s4 = scalar_lea.vmem %s3611_s1, %s2088_s18  ;;  %3676 = vst [vmem:[#allocation12_spill] sm:$0xff] %v2637_v48 }
  0x22   : > { %932 = vmatpush.msrb.mxu3 %v643_v2  ;;  %v2160_v39 = vld [vmem:[%s560_s4] sm:$0xff]   ;;  %1018 = vst [vmem:[#allocation2 + $0x90] sm:$0x1] %v2358_v55  ;;  %s2730_s18 = scalar_select %p599_p10, 1, 0 }
  0x23   : > { %v2161_v41 = vunpack.c.l.bf16 %v2160_v39  ;;  %v2162_v44 = vunpack.c.h.bf16 %v2160_v39  ;;  %1019 = vst [vmem:[#allocation2 + $0xa8] sm:$0x1] %v2358_v55  ;;  %s2822_s30 = scalar_select %p596_p11, 1, 0 }
  0x24   : > { %933 = vmatpush.msrb.mxu3 %v642_v3  ;;  %1020 = vst [vmem:[#allocation2 + $0xc0] sm:$0x1] %v2358_v55  ;;  %s601_s16 = scvt.s32.f32 %s2730_s18 }
  0x25   : > { %2101 = vmatmul.msk.f32.gmra.mxu0 %vm654_vm0, %v3637_v11  ;;  %1021 = vst [vmem:[#allocation2 + $0xd8] sm:$0x1] %v2358_v55  ;;  %s598_s21 = scvt.s32.f32 %s2822_s30 }
  0x26   : > { %1677 = vmatpush.msra.mxu3 %v1676_v9  ;;  %2119 = vmatmul.msk.f32.gmra.mxu2 %vm654_vm0, %v2166_v22  ;;  %1022 = vst [vmem:[#allocation2 + $0x11] sm:$0x1] %v2358_v55 }
  0x27   : > { %2112 = vmatmul.msk.f32.gmra.mxu3 %vm654_vm0, %v3630_v12  ;;  %1023 = vst [vmem:[#allocation2 + $0x29] sm:$0x1] %v2358_v55 }
  0x28   : > { %1678 = vmatpush.msra.mxu3 %v1675_v10  ;;  %1024 = vst [vmem:[#allocation2 + $0x41] sm:$0x1] %v2358_v55 }
  0x29   : > { %1025 = vst [vmem:[#allocation2 + $0x59] sm:$0x1] %v2358_v55 }
  0x2a   : > { %1679 = vmatpush.msra.mxu3 %v1674_v15  ;;  %1026 = vst [vmem:[#allocation2 + $0x71] sm:$0x1] %v2358_v55 }
  0x2b   : > { %1027 = vst [vmem:[#allocation2 + $0x89] sm:$0x1] %v2358_v55 }
  0x2c   : > { %1680 = vmatpush.msra.mxu3 %v1673_v16  ;;  %1028 = vst [vmem:[#allocation2 + $0xa1] sm:$0x1] %v2358_v55 }
  0x2d   : > { %2102 = vmatmul.msk.f32.gmra.mxu0 %vm654_vm0, %v3635_v19  ;;  %1029 = vst [vmem:[#allocation2 + $0xb9] sm:$0x1] %v2358_v55 }
  0x2e   : > { %1681 = vmatpush.msra.mxu3 %v1672_v18  ;;  %1030 = vst [vmem:[#allocation2 + $0xd1] sm:$0x1] %v2358_v55 }
  0x2f   : > { %2113 = vmatmul.msk.f32.gmra.mxu3 %vm654_vm0, %v3628_v20  ;;  %1031 = vst [vmem:[#allocation2 + $0xe9] sm:$0x1] %v2358_v55 }
  0x30   : > { %1682 = vmatpush.msra.mxu3 %v1671_v21 }
  0x32   : > { %1683 = vmatpush.msra.mxu3 %v1670_v23 }
  0x34   : > { %1684 = vmatpush.msra.mxu3 %v1669_v24 }
  0x35   : > { %2103 = vmatmul.msk.f32.gmra.mxu0 %vm654_vm0, %v3633_v27 }
  0x36   : > { %1685 = vmatpush.msra.mxu3 %v1668_v26 }
  0x37   : > { %2114 = vmatmul.msk.f32.gmra.mxu3 %vm654_vm0, %v3626_v28 }
  0x38   : > { %1686 = vmatpush.msra.mxu3 %v1667_v29 }
  0x3a   : > { %1687 = vmatpush.msra.mxu3 %v1666_v30 }
  0x3c   : > { %1688 = vmatpush.msra.mxu3 %v1665_v31 }
  0x3d   : > { %2104 = vmatmul.msk.f32.gmra.mxu0 %vm654_vm0, %v3631_v34 }
  0x3e   : > { %1689 = vmatpush.msra.mxu3 %v1664_v33 }
  0x3f   : > { %2115 = vmatmul.msk.f32.gmra.mxu3 %vm654_vm0, %v3624_v35 }
  0x40   : > { %1690 = vmatpush.msra.mxu3 %v1663_v36 }
  0x42   : > { %1691 = vmatpush.msra.mxu3 %v1662_v37 }
  0x44   : > { %1692 = vmatpush.msra.mxu3 %v1661_v38 }
  0x45   : > { %2105 = vmatmul.msk.f32.gmra.mxu0 %vm654_vm0, %v3629_v40 }
  0x47   : > { %2116 = vmatmul.msk.f32.vlgmr.msrb.gmra.mxu3 %vm654_vm0, %v2161_v41 }
  0x4d   : > { %2106 = vmatmul.msk.f32.gmra.mxu0 %vm654_vm0, %v3627_v43 }
  0x4f   : > { %2117 = vmatmul.msk.f32.gmra.mxu3 %vm654_vm0, %v2162_v44 }
  0x55   : > { %2107 = vmatmul.msk.f32.gmra.mxu0 %vm654_vm0, %v3625_v46 }
  0x57   : > { %1693 = vmatmul.f32.vlgmr.msra.gmra.mxu3 %v1660_v47 }
  0x5d   : > { %2108 = vmatmul.msk.f32.gmra.mxu0 %vm654_vm0, %v3638_v49 }
  0x65   : > { %2109 = vmatmul.msk.f32.gmra.mxu0 %vm654_vm0, %v3636_v50 }
  0x6d   : > { %2110 = vmatmul.msk.f32.gmra.mxu0 %vm654_vm0, %v3634_v51 }
  0x9a   : > { %v720_v53 = vpop.f32.mrf.mxu0 }
  0x9b   : > { %v2657_v54 = vadd.f32 %v2654_v52, %v720_v53 }
  0x9d   : > { %v768_v56 = vmul.f32 %v2657_v54, %v2657_v54 }
  0x9f   : > { %v784_v57 = vmul.f32 %v768_v56, %v2657_v54 }
  0xa1   : > { %v800_v59 = vmul.f32 0.044715, %v784_v57  ;;  %v985_v18 = vpop.f32.mrf.mxu2 }
  0xa2   : > { %v753_v58 = vpop.f32.mrf.mxu3  ;;  %v723_v61 = vpop.f32.mrf.mxu0  ;;  %v2680_v22 = vadd.f32 %v2654_v52, %v985_v18 }
  0xa3   : > { %v2663_v60 = vadd.f32 %v2654_v52, %v753_v58  ;;  %v816_v62 = vadd.f32 %v800_v59, %v2657_v54  ;;  %v2669_v0 = vadd.f32 %v2654_v52, %v723_v61 }
  0xa4   : > { %v991_v30 = vmul.f32 %v2680_v22, %v2680_v22 }
  0xa5   : > { %v779_v63 = vmul.f32 %v2663_v60, %v2663_v60  ;;  %v832_v1 = vmul.f32 0.7978846, %v816_v62  ;;  %v769_v3 = vmul.f32 %v2669_v0, %v2669_v0 }
  0xa6   : > { %v993_v39 = vmul.f32 %v991_v30, %v2680_v22 }
  0xa7   : > { %v795_v2 = vmul.f32 %v779_v63, %v2663_v60  ;;  %2238 = vtanh.f32 %v832_v1  ;;  %v785_v10 = vmul.f32 %v769_v3, %v2669_v0 }
  0xa8   : > { %v995_v53 = vmul.f32 0.044715, %v993_v39 }
  0xa9   : > { %v811_v9 = vmul.f32 0.044715, %v795_v2  ;;  %v801_v15 = vmul.f32 0.044715, %v785_v10  ;;  %v988_v59 = vpop.f32.mrf.mxu2 }
  0xaa   : > { %v756_v13 = vpop.f32.mrf.mxu3  ;;  %v726_v21 = vpop.f32.mrf.mxu0  ;;  %v997_v55 = vadd.f32 %v995_v53, %v2680_v22  ;;  %v2704_v63 = vadd.f32 %v2654_v52, %v988_v59 }
  0xab   : > { %v827_v14 = vadd.f32 %v811_v9, %v2663_v60  ;;  %v2677_v16 = vadd.f32 %v2654_v52, %v756_v13  ;;  %v817_v24 = vadd.f32 %v801_v15, %v2669_v0  ;;  %v2686_v29 = vadd.f32 %v2654_v52, %v726_v21 }
  0xac   : > { %v999_v13 = vmul.f32 0.7978846, %v997_v55 }
  0xad   : > { %v843_v23 = vmul.f32 0.7978846, %v827_v14  ;;  %v780_v26 = vmul.f32 %v2677_v16, %v2677_v16  ;;  %v2239_v31 = vpop.eup %2238  ;;  %v833_v33 = vmul.f32 0.7978846, %v817_v24  ;;  %v770_v37 = vmul.f32 %v2686_v29, %v2686_v29 }
  0xae   : > { %v864_v38 = vadd.f32 1.0, %v2239_v31  ;;  %v992_v14 = vmul.f32 %v2704_v63, %v2704_v63 }
  0xaf   : > { %2240 = vtanh.f32 %v843_v23  ;;  %v796_v36 = vmul.f32 %v780_v26, %v2677_v16  ;;  %v786_v44 = vmul.f32 %v770_v37, %v2686_v29 }
  0xb0   : > { %2242 = vtanh.f32 %v833_v33  ;;  %v880_v45 = vmul.f32 0.5, %v864_v38  ;;  %v994_v30 = vmul.f32 %v992_v14, %v2704_v63 }
  0xb1   : > { %v812_v41 = vmul.f32 0.044715, %v796_v36  ;;  %v802_v57 = vmul.f32 0.044715, %v786_v44 }
  0xb2   : > { %v759_v47 = vpop.f32.mrf.mxu3  ;;  %v2700_v61 = vmul.f32 %v880_v45, %v2657_v54  ;;  %v729_v62 = vpop.f32.mrf.mxu0  ;;  %v996_v39 = vmul.f32 0.044715, %v994_v30 }
  0xb3   : > { %v828_v56 = vadd.f32 %v812_v41, %v2677_v16  ;;  %v2697_v58 = vadd.f32 %v2654_v52, %v759_v47  ;;  %v818_v3 = vadd.f32 %v802_v57, %v2686_v29  ;;  %v2710_v10 = vadd.f32 %v2654_v52, %v729_v62 }
  0xb4   : > { %1038 = vst [vmem:[#allocation2 + $0x19] sm:$0xff] %v2700_v61 }
  0xb5   : > { %v2241_v1 = vpop.eup %2240  ;;  %v844_v2 = vmul.f32 0.7978846, %v828_v56  ;;  %v781_v9 = vmul.f32 %v2697_v58, %v2697_v58  ;;  %v834_v18 = vmul.f32 0.7978846, %v818_v3  ;;  %v771_v23 = vmul.f32 %v2710_v10, %v2710_v10 }
  0xb6   : > { %v875_v54 = vadd.f32 1.0, %v2241_v1  ;;  %v2243_v15 = vpop.eup %2242 }
  0xb7   : > { %2244 = vtanh.f32 %v844_v2  ;;  %v797_v21 = vmul.f32 %v781_v9, %v2697_v58  ;;  %v865_v26 = vadd.f32 1.0, %v2243_v15  ;;  %v787_v33 = vmul.f32 %v771_v23, %v2710_v10 }
  0xb8   : > { %v891_v24 = vmul.f32 0.5, %v875_v54  ;;  %2246 = vtanh.f32 %v999_v13 }
  0xb9   : > { %2248 = vtanh.f32 %v834_v18  ;;  %v813_v31 = vmul.f32 0.044715, %v797_v21  ;;  %v881_v37 = vmul.f32 0.5, %v865_v26  ;;  %v803_v44 = vmul.f32 0.044715, %v787_v33 }
  0xba   : > { %v2722_v36 = vmul.f32 %v891_v24, %v2663_v60  ;;  %v762_v38 = vpop.f32.mrf.mxu3  ;;  %v732_v53 = vpop.f32.mrf.mxu0  ;;  %v998_v60 = vadd.f32 %v996_v39, %v2704_v63 }
  0xbb   : > { %v829_v41 = vadd.f32 %v813_v31, %v2697_v58  ;;  %v2726_v45 = vadd.f32 %v2654_v52, %v762_v38  ;;  %v2734_v47 = vmul.f32 %v881_v37, %v2669_v0  ;;  %v819_v59 = vadd.f32 %v803_v44, %v2710_v10 }
  0xbc   : > { %1049 = vst [vmem:[#allocation2 + $0x99] sm:$0xff] %v2722_v36  ;;  %v2741_v55 = vadd.f32 %v2654_v52, %v732_v53  ;;  %v1000_v0 = vmul.f32 0.7978846, %v998_v60  ;;  %v1009_v38 = vstv %s601_s16 }
  0xbd   : > { %v2245_v56 = vpop.eup %2244  ;;  %v845_v57 = vmul.f32 0.7978846, %v829_v41  ;;  %v782_v62 = vmul.f32 %v2726_v45, %v2726_v45  ;;  %1039 = vst [vmem:[#allocation2 + $0x21] sm:$0xff] %v2734_v47  ;;  %v835_v9 = vmul.f32 0.7978846, %v819_v59 }
  0xbe   : > { %v2247_v1 = vpop.eup %2246  ;;  %v876_v2 = vadd.f32 1.0, %v2245_v56  ;;  %v772_v13 = vmul.f32 %v2741_v55, %v2741_v55 }
  0xbf   : > { %v2249_v3 = vpop.eup %2248  ;;  %2250 = vtanh.f32 %v845_v57  ;;  %v798_v54 = vmul.f32 %v782_v62, %v2726_v45  ;;  %v1003_v18 = vadd.f32 1.0, %v2247_v1 }
  0xc0   : > { %v892_v14 = vmul.f32 0.5, %v876_v2  ;;  %v866_v15 = vadd.f32 1.0, %v2249_v3  ;;  %2252 = vtanh.f32 %v1000_v0  ;;  %v788_v23 = vmul.f32 %v772_v13, %v2741_v55 }
  0xc1   : > { %2254 = vtanh.f32 %v835_v9  ;;  %v814_v21 = vmul.f32 0.044715, %v798_v54  ;;  %v1005_v30 = vmul.f32 0.5, %v1003_v18 }
  0xc2   : > { %v908_v24 = vmul.f32 %v892_v14, %v2677_v16  ;;  %v882_v26 = vmul.f32 0.5, %v866_v15  ;;  %v765_v31 = vpop.f32.mrf.mxu3  ;;  %v804_v37 = vmul.f32 0.044715, %v788_v23  ;;  %v735_v53 = vpop.f32.mrf.mxu0 }
  0xc3   : > { %v830_v33 = vadd.f32 %v814_v21, %v2726_v45  ;;  %v2752_v39 = vadd.f32 %v2654_v52, %v765_v31  ;;  %v1007_v44 = vmul.f32 %v1005_v30, %v2680_v22  ;;  %v2762_v59 = vadd.f32 %v2654_v52, %v735_v53 }
  0xc4   : > { %1050 = vst [vmem:[#allocation2 + $0xa9] sm:$0xff] %v908_v24  ;;  %v2755_v41 = vmul.f32 %v882_v26, %v2686_v29  ;;  %v820_v16 = vadd.f32 %v804_v37, %v2741_v55 }
  0xc5   : > { %v2251_v60 = vpop.eup %2250  ;;  %v846_v56 = vmul.f32 0.7978846, %v830_v33  ;;  %v783_v57 = vmul.f32 %v2752_v39, %v2752_v39  ;;  %v1010_v2 = vmul.f32 %v1009_v38, %v1007_v44  ;;  %v773_v3 = vmul.f32 %v2762_v59, %v2762_v59 }
  0xc6   : > { %v2253_v62 = vpop.eup %2252  ;;  %1040 = vst [vmem:[#allocation2 + $0x31] sm:$0xff] %v2755_v41  ;;  %v877_v1 = vadd.f32 1.0, %v2251_v60  ;;  %v836_v0 = vmul.f32 0.7978846, %v820_v16 }
  0xc7   : > { %v2255_v29 = vpop.eup %2254  ;;  %2256 = vtanh.f32 %v846_v56  ;;  %v799_v22 = vmul.f32 %v783_v57, %v2752_v39  ;;  %1035 = vst [vmem:[#allocation2 + $0xd9] sm:$0xff] %v1010_v2  ;;  %v1004_v13 = vadd.f32 1.0, %v2253_v62  ;;  %v789_v15 = vmul.f32 %v773_v3, %v2762_v59 }
  0xc8   : > { %v893_v9 = vmul.f32 0.5, %v877_v1  ;;  %v867_v54 = vadd.f32 1.0, %v2255_v29  ;;  %2258 = vtanh.f32 %v836_v0 }
  0xc9   : > { %v815_v14 = vmul.f32 0.044715, %v799_v22  ;;  %v1006_v23 = vmul.f32 0.5, %v1004_v13  ;;  %v805_v30 = vmul.f32 0.044715, %v789_v15  ;;  %v1720_v13 = vld [vmem:[%s3619_s9 + $0x18] sm:$0xff] }
  0xca   : > { %v909_v18 = vmul.f32 %v893_v9, %v2697_v58  ;;  %v883_v21 = vmul.f32 0.5, %v867_v54  ;;  %v935_v24 = vpop.f32.mrf.mxu3  ;;  %v738_v44 = vpop.f32.mrf.mxu0  ;;  %1736 = vmatpush.msrb.mxu3 %v1720_v13 }
  0xcb   : > { %v831_v26 = vadd.f32 %v815_v14, %v2752_v39  ;;  %v2772_v31 = vadd.f32 %v2654_v52, %v935_v24  ;;  %v1008_v37 = vmul.f32 %v1006_v23, %v2704_v63  ;;  %v821_v58 = vadd.f32 %v805_v30, %v2762_v59 }
  0xcc   : > { %1051 = vst [vmem:[#allocation2 + $0xb1] sm:$0xff] %v909_v18  ;;  %v2775_v33 = vmul.f32 %v883_v21, %v2710_v10  ;;  %v2782_v16 = vadd.f32 %v2654_v52, %v738_v44 }
  0xcd   : > { %v2257_v53 = vpop.eup %2256  ;;  %v847_v60 = vmul.f32 0.7978846, %v831_v26  ;;  %v941_v56 = vmul.f32 %v2772_v31, %v2772_v31  ;;  %v1011_v62 = vmul.f32 %v1009_v38, %v1008_v37  ;;  %v837_v10 = vmul.f32 0.7978846, %v821_v58 }
  0xce   : > { %1041 = vst [vmem:[#allocation2 + $0x39] sm:$0xff] %v2775_v33  ;;  %v878_v57 = vadd.f32 1.0, %v2257_v53  ;;  %v2259_v1 = vpop.eup %2258  ;;  %v774_v2 = vmul.f32 %v2782_v16, %v2782_v16  ;;  %v1718_v53 = vld [vmem:[%s3619_s9 + $0x8] sm:$0xff] }
  0xcf   : > { %2260 = vtanh.f32 %v847_v60  ;;  %v943_v63 = vmul.f32 %v941_v56, %v2772_v31  ;;  %v868_v0 = vadd.f32 1.0, %v2259_v1  ;;  %1036 = vst [vmem:[#allocation2 + $0xe1] sm:$0xff] %v1011_v62 }
  0xd0   : > { %v894_v29 = vmul.f32 0.5, %v878_v57  ;;  %2262 = vtanh.f32 %v837_v10  ;;  %v790_v3 = vmul.f32 %v774_v2, %v2782_v16  ;;  %v1717_v10 = vld [vmem:[%s3619_s9] sm:$0xff] }
  0xd1   : > { %v945_v22 = vmul.f32 0.044715, %v943_v63  ;;  %v884_v54 = vmul.f32 0.5, %v868_v0 }
  0xd2   : > { %v910_v9 = vmul.f32 %v894_v29, %v2726_v45  ;;  %v938_v38 = vpop.f32.mrf.mxu3  ;;  %v806_v15 = vmul.f32 0.044715, %v790_v3  ;;  %v741_v23 = vpop.f32.mrf.mxu0  ;;  %v1719_v45 = vld [vmem:[%s3619_s9 + $0x10] sm:$0xff] }
  0xd3   : > { %v947_v14 = vadd.f32 %v945_v22, %v2772_v31  ;;  %v2795_v18 = vadd.f32 %v2654_v52, %v938_v38  ;;  %v2798_v21 = vmul.f32 %v884_v54, %v2741_v55  ;;  %v2808_v44 = vadd.f32 %v2654_v52, %v741_v23  ;;  %1737 = vmatpush.msrb.mxu3 %v1719_v45  ;;  %v647_v45 = vld [vmem:[%s3616_s6] sm:$0x7]  ;;  %v3215_v4 = vld [vmem:[#allocation2 + $0xb2] sm:$0xff] }
  0xd4   : > { %1052 = vst [vmem:[#allocation2 + $0xc1] sm:$0xff] %v910_v9  ;;  %v822_v30 = vadd.f32 %v806_v15, %v2782_v16 }
  0xd5   : > { %v2261_v24 = vpop.eup %2260  ;;  %v949_v26 = vmul.f32 0.7978846, %v947_v14  ;;  %v942_v37 = vmul.f32 %v2795_v18, %v2795_v18  ;;  %1042 = vst [vmem:[#allocation2 + $0x49] sm:$0xff] %v2798_v21  ;;  %v775_v57 = vmul.f32 %v2808_v44, %v2808_v44  ;;  %1738 = vmatpush.msrb.mxu3 %v1718_v53  ;;  %v2899_v28 = vld [vmem:[#allocation2 + $0x32] sm:$0xff] }
  0xd6   : > { %v879_v55 = vadd.f32 1.0, %v2261_v24  ;;  %v2263_v60 = vpop.eup %2262  ;;  %v838_v58 = vmul.f32 0.7978846, %v822_v30 }
  0xd7   : > { %2264 = vtanh.f32 %v949_v26  ;;  %v944_v56 = vmul.f32 %v942_v37, %v2795_v18  ;;  %v869_v1 = vadd.f32 1.0, %v2263_v60  ;;  %v791_v2 = vmul.f32 %v775_v57, %v2808_v44  ;;  %1739 = vmatpush.msrb.mxu3 %v1717_v10 }
  0xd8   : > { %v895_v62 = vmul.f32 0.5, %v879_v55  ;;  %2266 = vtanh.f32 %v838_v58  ;;  %v2844_v37 = vperm.slane %v647_v45, 0  ;;  %v1105_v55 = vld [vmem:[#allocation2 + $0x19] sm:$0xff]  ;;  %v2846_v58 = vperm.slane %v647_v45, 1 }
  0xd9   : > { %v946_v63 = vmul.f32 0.044715, %v944_v56  ;;  %v885_v0 = vmul.f32 0.5, %v869_v1  ;;  %v807_v9 = vmul.f32 0.044715, %v791_v2  ;;  %v1201_v56 = vld [vmem:[#allocation2 + $0x18] sm:$0xff]  ;;  %v959_v57 = vstv %s598_s21 }
  0xda   : > { %v911_v29 = vmul.f32 %v895_v62, %v2752_v39  ;;  %v2826_v22 = vpop.f32.mrf.mxu3  ;;  %v744_v13 = vpop.f32.mrf.mxu0  ;;  %v1073_v1 = vmul.f32 %v1201_v56, %v2844_v37  ;;  %v1122_v2 = vmul.f32 %v2846_v58, %v1105_v55  ;;  %v2876_v55 = vld [vmem:[#allocation2 + $0x30] sm:$0xff] }
  0xdb   : > { %v948_v3 = vadd.f32 %v946_v63, %v2795_v18  ;;  %v2120_v54 = vmul.f32 -1.442695, %v2826_v22  ;;  %v2831_v38 = vmul.f32 %v885_v0, %v2762_v59  ;;  %v823_v23 = vadd.f32 %v807_v9, %v2808_v44 }
  0xdc   : > { %1053 = vst [vmem:[#allocation2 + $0xc9] sm:$0xff] %v911_v29  ;;  %v2836_v39 = vadd.f32 %v2654_v52, %v744_v13  ;;  %v2855_v9 = vperm.slane %v647_v45, 2  ;;  %v1138_v45 = vadd.f32 %v1122_v2, %v1073_v1  ;;  %v2886_v2 = vld [vmem:[%s3616_s6 + $0x8] sm:$0x7] }
  0xdd   : > { %v2265_v14 = vpop.eup %2264  ;;  %v950_v15 = vmul.f32 0.7978846, %v948_v3  ;;  %2268 = vpow2.f32 %v2120_v54  ;;  %1043 = vst [vmem:[#allocation2 + $0x51] sm:$0xff] %v2831_v38  ;;  %v839_v59 = vmul.f32 0.7978846, %v823_v23  ;;  %v2866_v23 = vld [vmem:[#allocation2 + $0x1a] sm:$0xff] }
  0xde   : > { %v953_v24 = vadd.f32 1.0, %v2265_v14  ;;  %v2267_v26 = vpop.eup %2266  ;;  %v776_v30 = vmul.f32 %v2836_v39, %v2836_v39  ;;  %v648_v3 = vld [vmem:[%s3616_s6 + $0x4] sm:$0x7]  ;;  %v2897_v46 = vperm.slane %v2886_v2, 1  ;;  %v2901_v20 = vld [vmem:[#allocation2 + $0x48] sm:$0xff] }
  0xdf   : > { %2270 = vtanh.f32 %v950_v15  ;;  %v870_v60 = vadd.f32 1.0, %v2267_v26  ;;  %v2892_v35 = vperm.slane %v648_v3, 2 }
  0xe0   : > { %v955_v53 = vmul.f32 0.5, %v953_v24  ;;  %2272 = vtanh.f32 %v839_v59  ;;  %v792_v62 = vmul.f32 %v776_v30, %v2836_v39  ;;  %v1171_v30 = vmul.f32 %v2866_v23, %v2855_v9 }
  0xe1   : > { %v886_v63 = vmul.f32 0.5, %v870_v60 }
  0xe2   : > { %v957_v10 = vmul.f32 %v955_v53, %v2772_v31  ;;  %v808_v0 = vmul.f32 0.044715, %v792_v62  ;;  %v747_v15 = vpop.f32.mrf.mxu0  ;;  %v2864_v31 = vperm.slane %v648_v3, 0 }
  0xe3   : > { %v2269_v29 = vpop.eup %2268  ;;  %v2860_v13 = vmul.f32 %v886_v63, %v2782_v16  ;;  %v2870_v59 = vadd.f32 %v2654_v52, %v747_v15  ;;  %v1187_v15 = vadd.f32 %v1171_v30, %v1138_v45  ;;  %v2909_v30 = vld [vmem:[#allocation2 + $0x20] sm:$0xff] }
  0xe4   : > { %v2857_v54 = vmul.f32 %v959_v57, %v957_v10  ;;  %v2862_v14 = vadd.f32 1.0, %v2269_v29  ;;  %v824_v26 = vadd.f32 %v808_v0, %v2836_v39  ;;  %v1220_v1 = vmul.f32 %v2876_v55, %v2864_v31 }
  0xe5   : > { %v2271_v24 = vpop.eup %2270  ;;  %1044 = vst [vmem:[#allocation2 + $0x61] sm:$0xff] %v2860_v13  ;;  %v777_v62 = vmul.f32 %v2870_v59, %v2870_v59  ;;  %v2888_v29 = vperm.slane %v648_v3, 1  ;;  %v2907_v3 = vperm.slane %v2886_v2, 0 }
  0xe6   : > { %1032 = vst [vmem:[#allocation2 + $0x1] sm:$0xff] %v2857_v54  ;;  %v954_v16 = vadd.f32 1.0, %v2271_v24  ;;  %2274 = vrcp.f32 %v2862_v14  ;;  %v2273_v53 = vpop.eup %2272  ;;  %v840_v60 = vmul.f32 0.7978846, %v824_v26  ;;  %v1236_v43 = vadd.f32 %v1220_v1, %v1187_v15 }
  0xe7   : > { %v871_v63 = vadd.f32 1.0, %v2273_v53  ;;  %v793_v0 = vmul.f32 %v777_v62, %v2870_v59  ;;  %v2922_v15 = vmul.f32 %v2888_v29, %v2700_v61  ;;  %v1712_v34 = vand.u32 2147483648, %v2862_v14 }
  0xe8   : > { %v956_v10 = vmul.f32 0.5, %v954_v16  ;;  %2276 = vtanh.f32 %v840_v60  ;;  %v1269_v16 = vmul.f32 %v2888_v29, %v2755_v41  ;;  %vm1706_vm2 = vweird.f32 %v2862_v14 }
  0xe9   : > { %v887_v26 = vmul.f32 0.5, %v871_v63  ;;  %v809_v53 = vmul.f32 0.044715, %v793_v0 }
  0xea   : > { %v958_v24 = vmul.f32 %v956_v10, %v2795_v18  ;;  %v750_v18 = vpop.f32.mrf.mxu0  ;;  %v1318_v10 = vmul.f32 %v2899_v28, %v2892_v35 }
  0xeb   : > { %v2904_v45 = vmul.f32 %v887_v26, %v2808_v44  ;;  %v825_v1 = vadd.f32 %v809_v53, %v2870_v59  ;;  %v2916_v0 = vadd.f32 %v2654_v52, %v750_v18  ;;  %v1710_v44 = vand.u32 2147483647, %v2862_v14 }
  0xec   : > { %v2275_v60 = vpop.eup %2274  ;;  %v961_v62 = vmul.f32 %v959_v57, %v958_v24  ;;  %v1218_v57 = vmul.f32 %v2864_v31, %v1201_v56  ;;  %v1285_v24 = vadd.f32 %v1269_v16, %v1236_v43  ;;  %v1368_v26 = vmul.f32 %v2907_v3, %v2901_v20  ;;  %v2932_v7 = vld [vmem:[#allocation2 + $0x60] sm:$0xff] }
  0xed   : > { %v1702_v63 = vmul.f32 %v2275_v60, %v2862_v14  ;;  %1045 = vst [vmem:[#allocation2 + $0x69] sm:$0xff] %v2904_v45  ;;  %v841_v12 = vmul.f32 0.7978846, %v825_v1  ;;  %v778_v52 = vmul.f32 %v2916_v0, %v2916_v0  ;;  %v1054_v56 = vld [vmem:[#allocation2] sm:$0xff]  ;;  %v1219_v18 = vmul.f32 %v2864_v31, %v2909_v30 }
  0xee   : > { %1033 = vst [vmem:[#allocation2 + $0x9] sm:$0xff] %v961_v62  ;;  %v2277_v40 = vpop.eup %2276  ;;  %v1334_v43 = vadd.f32 %v1318_v10, %v1285_v24  ;;  %v1417_v16 = vmul.f32 %v2897_v46, %v2798_v21  ;;  %vm1707_vm1 = vweird.f32 %v2275_v60  ;;  %v1071_v51 = vmul.f32 %v2844_v37, %v1054_v56  ;;  %v3190_v8 = vld [vmem:[#allocation2 + $0x61] sm:$0xff] }
  0xef   : > { %v1703_v53 = vsub.f32 1.0, %v1702_v63  ;;  %v872_v61 = vadd.f32 1.0, %v2277_v40  ;;  %2278 = vtanh.f32 %v841_v12  ;;  %v794_v63 = vmul.f32 %v778_v52, %v2916_v0  ;;  %vm1708_vm3 = vmor %vm1706_vm2, %vm1707_vm1 }
  0xf0   : > { %v1384_v19 = vadd.f32 %v1368_v26, %v1334_v43  ;;  %v1079_v40 = vmul.f32 %v2844_v37, %v2932_v7  ;;  %v1128_v10 = vmul.f32 %v2846_v58, %v2860_v13  ;;  %v1713_v21 = vor.u32 1.1754944e-38, %v1712_v34 }
  0xf1   : > { %v1704_v27 = vmul.f32 %v2275_v60, %v1703_v53  ;;  %v888_v1 = vmul.f32 0.5, %v872_v61  ;;  %v810_v11 = vmul.f32 0.044715, %v794_v63  ;;  %v1120_v14 = vmul.f32 %v2846_v58, %v2857_v54 }
  0xf2   : > { %v2948_v24 = vadd.f32 %v1417_v16, %v1384_v19  ;;  %vm1711_vm4 = vcmp.eq.f32.partialorder %v1710_v44, 8.507059e+37  ;;  %v1121_v56 = vmul.f32 %v2846_v58, %v961_v62 }
  0xf3   : > { %v1705_v50 = vadd.f32 %v2275_v60, %v1704_v27  ;;  %v2944_v12 = vmul.f32 %v888_v1, %v2836_v39  ;;  %v826_v27 = vadd.f32 %v810_v11, %v2916_v0  ;;  %v1136_v34 = vadd.f32 %v1120_v14, %v1071_v51  ;;  %v2961_v51 = vld [vmem:[#allocation2 + $0x22] sm:$0xff] }
  0xf4   : > { %v2954_v43 = vld [vmem:[#allocation2 + $0x62] sm:$0xff]  ;;  %v1144_v11 = vadd.f32 %v1128_v10, %v1079_v40  ;;  %v1268_v40 = vmul.f32 %v2888_v29, %v2734_v47  ;;  %v2968_v10 = vld [vmem:[#allocation2 + $0x38] sm:$0xff]  ;;  %v1415_v47 = vmul.f32 %v2897_v46, %v2755_v41 }
  0xf5   : > { %v1709_v53 = vsel %vm1708_vm3, %v2275_v60, %v1705_v50  ;;  %v1152_v26 = vld [vmem:[#allocation2 + $0x2] sm:$0xff]  ;;  %v1153_v61 = vld [vmem:[#allocation2 + $0xa] sm:$0xff]  ;;  %1046 = vst [vmem:[#allocation2 + $0x79] sm:$0xff] %v2944_v12  ;;  %v2279_v54 = vpop.eup %2278  ;;  %v842_v60 = vmul.f32 0.7978846, %v826_v27  ;;  %v1177_v44 = vmul.f32 %v2855_v9, %v2954_v43  ;;  %v1275_v41 = vmul.f32 %v2888_v29, %v2944_v12 }
  0xf6   : > { %v1055_v52 = vld [vmem:[#allocation2 + $0x8] sm:$0xff]  ;;  %v1714_v13 = vsel %vm1711_vm4, %v1713_v21, %v1709_v53  ;;  %v1169_v39 = vmul.f32 %v2855_v9, %v1152_v26  ;;  %v873_v62 = vadd.f32 1.0, %v2279_v54  ;;  %v1170_v1 = vmul.f32 %v2855_v9, %v1153_v61 }
  0xf7   : > { %v1072_v19 = vmul.f32 %v2844_v37, %v1055_v52  ;;  %v1716_v50 = vmul.f32 %v1714_v13, %v2826_v22  ;;  %2280 = vtanh.f32 %v842_v60  ;;  %v1316_v21 = vmul.f32 %v2892_v35, %v2866_v23  ;;  %v2970_v27 = vld [vmem:[#allocation2 + $0x68] sm:$0xff] }
  0xf8   : > { %v1185_v16 = vadd.f32 %v1169_v39, %v1136_v34  ;;  %v889_v14 = vmul.f32 0.5, %v873_v62  ;;  %v1366_v26 = vmul.f32 %v2907_v3, %v2876_v55  ;;  %v1317_v52 = vmul.f32 %v2892_v35, %v2961_v51  ;;  %v2995_v54 = vld [vmem:[#allocation2 + $0x6a] sm:$0xff] }
  0xf9   : > { %v1137_v63 = vadd.f32 %v1121_v56, %v1072_v19  ;;  %2121 = vmatmul.msk.f32.vlgmr.msrb.gmra.mxu3 %vm654_vm0, %v1716_v50  ;;  %v1367_v34 = vmul.f32 %v2907_v3, %v2968_v10  ;;  %v1080_v39 = vmul.f32 %v2844_v37, %v2970_v27  ;;  %v1129_v19 = vmul.f32 %v2846_v58, %v2904_v45 }
  0xfa   : > { %v1234_v22 = vadd.f32 %v1218_v57, %v1185_v16  ;;  %v2977_v56 = vmul.f32 %v889_v14, %v2870_v59  ;;  %v1193_v57 = vadd.f32 %v1177_v44, %v1144_v11  ;;  %v1416_v60 = vmul.f32 %v2897_v46, %v2775_v33 }
  0xfb   : > { %v1186_v53 = vadd.f32 %v1170_v1, %v1137_v63  ;;  %v1145_v16 = vadd.f32 %v1129_v19, %v1080_v39  ;;  %v1178_v63 = vmul.f32 %v2855_v9, %v2995_v54 }
  0xfc   : > { %v1283_v23 = vadd.f32 %v2922_v15, %v1234_v22  ;;  %v2982_v13 = vld [vmem:[#allocation2 + $0x78] sm:$0xff]  ;;  %1047 = vst [vmem:[#allocation2 + $0x81] sm:$0xff] %v2977_v56 }
  0xfd   : > { %v1235_v61 = vadd.f32 %v1219_v18, %v1186_v53  ;;  %v1226_v15 = vmul.f32 %v2864_v31, %v2982_v13  ;;  %v2281_v50 = vpop.eup %2280  ;;  %v1194_v33 = vadd.f32 %v1178_v63, %v1145_v16 }
  0xfe   : > { %v1332_v59 = vadd.f32 %v1316_v21, %v1283_v23  ;;  %v874_v11 = vadd.f32 1.0, %v2281_v50 }
  0xff   : > { %v1284_v18 = vadd.f32 %v1268_v40, %v1235_v61  ;;  %v1242_v62 = vadd.f32 %v1226_v15, %v1193_v57 }
 0x100   : > { %v1382_v44 = vadd.f32 %v1366_v26, %v1332_v59  ;;  %v890_v1 = vmul.f32 0.5, %v874_v11  ;;  %v1081_v26 = vmul.f32 %v2982_v13, %v2844_v37 }
 0x101   : > { %v1333_v45 = vadd.f32 %v1317_v52, %v1284_v18  ;;  %v1291_v14 = vadd.f32 %v1275_v41, %v1242_v62  ;;  %v1130_v52 = vmul.f32 %v2846_v58, %v2944_v12 }
 0x102   : > { %v1431_v21 = vadd.f32 %v1415_v47, %v1382_v44  ;;  %v3002_v53 = vmul.f32 %v890_v1, %v2916_v0  ;;  %v1276_v47 = vmul.f32 %v2888_v29, %v2977_v56 }
 0x103   : > { %v1383_v22 = vadd.f32 %v1367_v34, %v1333_v45  ;;  %v3006_v23 = vld [vmem:[#allocation2 + $0x7a] sm:$0xff]  ;;  %v3015_v57 = vld [vmem:[#allocation2 + $0x82] sm:$0xff]  ;;  %v1146_v59 = vadd.f32 %v1130_v52, %v1081_v26 }
 0x104   : > { %v3008_v61 = vld [vmem:[#allocation2 + $0x80] sm:$0xff]  ;;  %1048 = vst [vmem:[#allocation2 + $0x91] sm:$0xff] %v3002_v53  ;;  %v1324_v34 = vmul.f32 %v2892_v35, %v3006_v23  ;;  %v1325_v19 = vmul.f32 %v2892_v35, %v3015_v57  ;;  %v1179_v12 = vmul.f32 %v3006_v23, %v2855_v9  ;;  %v1423_v62 = vmul.f32 %v2897_v46, %v3002_v53 }
 0x105   : > { %v3004_v40 = vadd.f32 %v1416_v60, %v1383_v22  ;;  %3677 = vst [vmem:[#allocation13_spill] sm:$0xff] %v3008_v61  ;;  %v1227_v0 = vmul.f32 %v2864_v31, %v3008_v61  ;;  %v1277_v63 = vmul.f32 %v2888_v29, %v3002_v53  ;;  %v1424_v22 = vmul.f32 %v2897_v46, %v2722_v36 }
 0x106   : > { %3678 = vst [vmem:[#allocation14_spill] sm:$0xff] %v3015_v57  ;;  %v1340_v41 = vadd.f32 %v1324_v34, %v1291_v14  ;;  %v1195_v11 = vadd.f32 %v1179_v12, %v1146_v59  ;;  %v1074_v34 = vmul.f32 %v2909_v30, %v2844_v37  ;;  %v1172_v59 = vmul.f32 %v2961_v51, %v2855_v9  ;;  %v3063_v30 = vld [vmem:[#allocation2 + $0x3a] sm:$0xff] }
 0x107   : > { %v1243_v39 = vadd.f32 %v1227_v0, %v1194_v33  ;;  %v1221_v36 = vmul.f32 %v2968_v10, %v2864_v31  ;;  %v1319_v51 = vmul.f32 %v3063_v30, %v2892_v35 }
 0x109   : > { %v1292_v15 = vadd.f32 %v1276_v47, %v1243_v39  ;;  %v1106_v47 = vld [vmem:[#allocation2 + $0x21] sm:$0xff] }
 0x10a   : > { %v1123_v39 = vmul.f32 %v2846_v58, %v1106_v47  ;;  %v1131_v47 = vmul.f32 %v2846_v58, %v2977_v56  ;;  %v1418_v56 = vmul.f32 %v2897_v46, %v2831_v38 }
 0x10b   : > { %v3027_v18 = vld [vmem:[#allocation2 + $0x90] sm:$0xff]  ;;  %v1341_v50 = vadd.f32 %v1325_v19, %v1292_v15  ;;  %v3029_v60 = vld [vmem:[#allocation2 + $0x98] sm:$0xff] }
 0x10c   : > { %v1374_v44 = vmul.f32 %v2907_v3, %v3027_v18  ;;  %v1375_v45 = vmul.f32 %v2907_v3, %v3029_v60  ;;  %v1228_v16 = vmul.f32 %v3027_v18, %v2864_v31  ;;  %v1139_v19 = vadd.f32 %v1123_v39, %v1074_v34  ;;  %v3056_v15 = vld [vmem:[#allocation2 + $0x39] sm:$0xff] }
 0x10d   : > { %v3084_v34 = vld [vmem:[%s3617_s7] ss:$0 sm:$0xff] }
 0x10e   : > { %v1390_v1 = vadd.f32 %v1374_v44, %v1340_v41  ;;  %v1391_v14 = vadd.f32 %v1375_v45, %v1341_v50  ;;  %v1244_v33 = vadd.f32 %v1228_v16, %v1195_v11  ;;  %v1188_v12 = vadd.f32 %v1172_v59, %v1139_v19  ;;  %v3069_v45 = vld [vmem:[#allocation2 + $0x50] sm:$0xff] }
 0x10f   : > { %v1270_v50 = vmul.f32 %v2888_v29, %v3056_v15  ;;  %v3061_v11 = vperm.slane %v2886_v2, 2  ;;  %v1107_v16 = vld [vmem:[#allocation2 + $0x31] sm:$0xff] }
 0x110   : > { %v3043_v26 = vadd.f32 %v1423_v62, %v1390_v1  ;;  %v3045_v52 = vadd.f32 %v1424_v22, %v1391_v14  ;;  %v3047_v0 = vadd.f32 %v1277_v63, %v1244_v33  ;;  %v1237_v41 = vadd.f32 %v1221_v36, %v1188_v12  ;;  %v3075_v22 = vld [vmem:[#allocation2 + $0x4a] sm:$0xff] }
 0x111   : > { %v1464_v44 = vmul.f32 %v3061_v11, %v2899_v28  ;;  %v1369_v14 = vmul.f32 %v2907_v3, %v3069_v45  ;;  %v1465_v2 = vmul.f32 %v3061_v11, %v3063_v30  ;;  %v1082_v33 = vmul.f32 %v3008_v61, %v2844_v37 }
 0x112   : > { %v1286_v62 = vadd.f32 %v1270_v50, %v1237_v41  ;;  %v1124_v39 = vmul.f32 %v2846_v58, %v1107_v16  ;;  %v1466_v59 = vmul.f32 %v3061_v11, %v3075_v22  ;;  %v3097_v41 = vld [vmem:[#allocation2 + $0x52] sm:$0xff] }
 0x113   : > { %v1480_v63 = vadd.f32 %v1464_v44, %v1431_v21  ;;  %v1075_v21 = vmul.f32 %v2876_v55, %v2844_v37  ;;  %v1481_v36 = vadd.f32 %v1465_v2, %v3004_v40  ;;  %v1147_v50 = vadd.f32 %v1131_v47, %v1082_v33  ;;  %v3108_v40 = vld [vmem:[#allocation2 + $0x92] sm:$0xff]  ;;  %v3117_v47 = vld [vmem:[#allocation2 + $0x49] sm:$0xff] }
 0x114   : > { %v1335_v1 = vadd.f32 %v1319_v51, %v1286_v62  ;;  %v1180_v55 = vmul.f32 %v3015_v57, %v2855_v9  ;;  %v1173_v62 = vmul.f32 %v2899_v28, %v2855_v9  ;;  %v1482_v16 = vadd.f32 %v1466_v59, %v2948_v24  ;;  %v1795_v24 = vld [vmem:[%s3620_s10 + $0x78] sm:$0xff] }
 0x115   : > { %v3090_v19 = vadd.f32 %v3084_v34, %v1480_v63  ;;  %v1140_v44 = vadd.f32 %v1124_v39, %v1075_v21  ;;  %v1467_v38 = vmul.f32 %v3061_v11, %v3097_v41  ;;  %v1229_v2 = vmul.f32 %v3029_v60, %v2864_v31  ;;  %1800 = vmatpush.msra.mxu1 %v1795_v24 }
 0x116   : > { %v1385_v12 = vadd.f32 %v1369_v14, %v1335_v1  ;;  %v3111_v1 = vadd.f32 %v3084_v34, %v1481_v36  ;;  %v1196_v14 = vadd.f32 %v1180_v55, %v1147_v50  ;;  %v1222_v28 = vmul.f32 %v2901_v20, %v2864_v31  ;;  %2178 = vmatpush.msrb.mxu2 %v1795_v24  ;;  %v3132_v50 = vld [vmem:[#allocation2 + $0x9a] sm:$0xff] }
 0x117   : > { %v1515_v51 = vmul.f32 %v3090_v19, %v3090_v19  ;;  %v1189_v33 = vadd.f32 %v1173_v62, %v1140_v44  ;;  %v1472_v39 = vmul.f32 %v3061_v11, %v3108_v40  ;;  %v3126_v59 = vadd.f32 %v3084_v34, %v1482_v16  ;;  %v3136_v44 = vld [vmem:[#allocation2 + $0xa8] sm:$0xff] }
 0x118   : > { %v1434_v63 = vadd.f32 %v1418_v56, %v1385_v12  ;;  %3679 = vst [vmem:[#allocation15_spill] sm:$0xff] %v3111_v1  ;;  %v3128_v56 = vld [vmem:[#allocation2 + $0x99] sm:$0xff]  ;;  %v1516_v36 = vmul.f32 %v3111_v1, %v3111_v1  ;;  %v1326_v55 = vmul.f32 %v3108_v40, %v2892_v35  ;;  %v1245_v62 = vadd.f32 %v1229_v2, %v1196_v14  ;;  %v1793_v14 = vld [vmem:[%s3620_s10 + $0x68] sm:$0xff] }
 0x119   : > { %v1531_v21 = vmul.f32 %v1515_v51, %v3090_v19  ;;  %3680 = vst [vmem:[#allocation16_spill] sm:$0xff] %v3126_v59  ;;  %v1794_v51 = vld [vmem:[%s3620_s10 + $0x70] sm:$0xff]  ;;  %v1488_v16 = vadd.f32 %v1472_v39, %v3043_v26  ;;  %v1278_v49 = vmul.f32 %v2888_v29, %v3128_v56  ;;  %v1473_v6 = vmul.f32 %v3061_v11, %v3132_v50 }
 0x11a   : > { %v1483_v12 = vadd.f32 %v1467_v38, %v1434_v63  ;;  %v1238_v63 = vadd.f32 %v1222_v28, %v1189_v33  ;;  %v1271_v38 = vmul.f32 %v2888_v29, %v3117_v47  ;;  %1801 = vmatpush.msra.mxu1 %v1794_v51  ;;  %2179 = vmatpush.msrb.mxu2 %v1794_v51  ;;  %v3157_v28 = vld [vmem:[#allocation2 + $0xa9] sm:$0xff] }
 0x11b   : > { %v1342_v24 = vadd.f32 %v1326_v55, %v3047_v0  ;;  %v1547_v2 = vmul.f32 0.044715, %v1531_v21  ;;  %v1517_v26 = vmul.f32 %v3126_v59, %v3126_v59  ;;  %v1376_v33 = vmul.f32 %v2907_v3, %v3136_v44  ;;  %v1792_v21 = vld [vmem:[%s3620_s10 + $0x60] sm:$0xff] }
 0x11c   : > { %1802 = vmatpush.msra.mxu1 %v1793_v14  ;;  %2180 = vmatpush.msrb.mxu2 %v1793_v14  ;;  %v1532_v0 = vmul.f32 %v1516_v36, %v3111_v1  ;;  %v3160_v39 = vadd.f32 %v3084_v34, %v1483_v12  ;;  %v1294_v55 = vadd.f32 %v1278_v49, %v1245_v62  ;;  %v1791_v49 = vld [vmem:[%s3620_s10 + $0x58] sm:$0xff] }
 0x11d   : > { %v3166_v51 = vadd.f32 %v3084_v34, %v1488_v16  ;;  %v1489_v25 = vadd.f32 %v1473_v6, %v3045_v52  ;;  %v1287_v42 = vadd.f32 %v1271_v38, %v1238_v63  ;;  %v1320_v14 = vmul.f32 %v3075_v22, %v2892_v35  ;;  %v3179_v6 = vld [vmem:[#allocation2 + $0xb0] sm:$0xff] }
 0x11e   : > { %3681 = vst [vmem:[#allocation17_spill] sm:$0xff] %v3160_v39  ;;  %1803 = vmatpush.msra.mxu1 %v1792_v21  ;;  %2181 = vmatpush.msrb.mxu2 %v1792_v21  ;;  %v1392_v36 = vadd.f32 %v1376_v33, %v1342_v24  ;;  %v1327_v12 = vmul.f32 %v3132_v50, %v2892_v35  ;;  %v1548_v38 = vmul.f32 0.044715, %v1532_v0  ;;  %v3186_v33 = vld [vmem:[#allocation2 + $0xaa] sm:$0xff] }
 0x11f   : > { %v1563_v62 = vadd.f32 %v1547_v2, %v3090_v19  ;;  %v1425_v16 = vmul.f32 %v2897_v46, %v3157_v28  ;;  %v1083_v52 = vmul.f32 %v3027_v18, %v2844_v37  ;;  %v1132_v63 = vmul.f32 %v2846_v58, %v3002_v53  ;;  %v1790_v18 = vld [vmem:[%s3620_s10 + $0x50] sm:$0xff] }
 0x120   : > { %1804 = vmatpush.msra.mxu1 %v1791_v49  ;;  %2182 = vmatpush.msrb.mxu2 %v1791_v49  ;;  %v1533_v24 = vmul.f32 %v1517_v26, %v3126_v59  ;;  %v1518_v2 = vmul.f32 %v3160_v39, %v3160_v39  ;;  %v1343_v21 = vadd.f32 %v1327_v12, %v1294_v55  ;;  %v1789_v12 = vld [vmem:[%s3620_s10 + $0x48] sm:$0xff] }
 0x121   : > { %v1523_v53 = vmul.f32 %v3166_v51, %v3166_v51  ;;  %v3198_v49 = vadd.f32 %v3084_v34, %v1489_v25  ;;  %v1336_v0 = vadd.f32 %v1320_v14, %v1287_v42  ;;  %v1370_v26 = vmul.f32 %v2907_v3, %v2932_v7  ;;  %v3209_v25 = vld [vmem:[#allocation2 + $0xb1] sm:$0xff] }
 0x122   : > { %1805 = vmatpush.msra.mxu1 %v1790_v18  ;;  %2183 = vmatpush.msrb.mxu2 %v1790_v18  ;;  %v1441_v32 = vadd.f32 %v1425_v16, %v1392_v36  ;;  %v1377_v55 = vmul.f32 %v2907_v3, %v3179_v6  ;;  %v1579_v5 = vmul.f32 0.7978846, %v1563_v62  ;;  %v1474_v17 = vmul.f32 %v3061_v11, %v3186_v33  ;;  %v1788_v62 = vld [vmem:[%s3620_s10 + $0x40] sm:$0xff] }
 0x123   : > { %3682 = vst [vmem:[#allocation18_spill] sm:$0xff] %v3198_v49  ;;  %v1419_v42 = vmul.f32 %v2897_v46, %v3190_v8  ;;  %v1148_v14 = vadd.f32 %v1132_v63, %v1083_v52  ;;  %v1564_v36 = vadd.f32 %v1548_v38, %v3111_v1  ;;  %v1549_v16 = vmul.f32 0.044715, %v1533_v24 }
 0x124   : > { %1806 = vmatpush.msra.mxu1 %v1789_v12  ;;  %2184 = vmatpush.msrb.mxu2 %v1789_v12  ;;  %v1534_v18 = vmul.f32 %v1518_v2, %v3160_v39  ;;  %v1393_v48 = vadd.f32 %v1377_v55, %v1343_v21  ;;  %v1539_v57 = vmul.f32 %v1523_v53, %v3166_v51  ;;  %v1787_v2 = vld [vmem:[%s3620_s10 + $0x38] sm:$0xff]  ;;  %2282 = vtanh.f32 %v1579_v5  ;;  %v1786_v5 = vld [vmem:[%s3620_s10 + $0x30] sm:$0xff] }
 0x125   : > { %v1524_v61 = vmul.f32 %v3198_v49, %v3198_v49  ;;  %v1386_v52 = vadd.f32 %v1370_v26, %v1336_v0  ;;  %v1181_v63 = vmul.f32 %v3108_v40, %v2855_v9  ;;  %v1490_v38 = vadd.f32 %v1474_v17, %v1441_v32 }
 0x126   : > { %1807 = vmatpush.msra.mxu1 %v1788_v62  ;;  %2185 = vmatpush.msrb.mxu2 %v1788_v62  ;;  %v1426_v24 = vmul.f32 %v2897_v46, %v3209_v25  ;;  %v1475_v21 = vmul.f32 %v3061_v11, %v3215_v4  ;;  %v1230_v0 = vmul.f32 %v3136_v44, %v2864_v31  ;;  %v1580_v40 = vmul.f32 0.7978846, %v1564_v36 }
 0x127   : > { %v1197_v53 = vadd.f32 %v1181_v63, %v1148_v14  ;;  %v1565_v17 = vadd.f32 %v1549_v16, %v3126_v59  ;;  %v1468_v26 = vmul.f32 %v3061_v11, %v2954_v43  ;;  %v1555_v55 = vmul.f32 0.044715, %v1539_v57  ;;  %v1785_v16 = vld [vmem:[%s3620_s10 + $0x28] sm:$0xff] }
 0x128   : > { %1808 = vmatpush.msra.mxu1 %v1787_v2  ;;  %2186 = vmatpush.msrb.mxu2 %v1787_v2  ;;  %v1442_v32 = vadd.f32 %v1426_v24, %v1393_v48  ;;  %v1540_v12 = vmul.f32 %v1524_v61, %v3198_v49  ;;  %v1550_v14 = vmul.f32 0.044715, %v1534_v18  ;;  %v1435_v62 = vadd.f32 %v1419_v42, %v1386_v52 }
 0x129   : > { %v3242_v63 = vadd.f32 %v3084_v34, %v1490_v38  ;;  %v1076_v48 = vmul.f32 %v2968_v10, %v2844_v37  ;;  %v1125_v36 = vmul.f32 %v3056_v15, %v2846_v58  ;;  %v1246_v57 = vadd.f32 %v1230_v0, %v1197_v53  ;;  %v1784_v38 = vld [vmem:[%s3620_s10 + $0x20] sm:$0xff] }
 0x12a   : > { %1809 = vmatpush.msra.mxu1 %v1786_v5  ;;  %2187 = vmatpush.msrb.mxu2 %v1786_v5  ;;  %v1279_v61 = vmul.f32 %v3157_v28, %v2888_v29  ;;  %v1084_v42 = vmul.f32 %v3029_v60, %v2844_v37  ;;  %2284 = vtanh.f32 %v1580_v40  ;;  %v1581_v18 = vmul.f32 0.7978846, %v1565_v17  ;;  %v2283_v15 = vpop.eup %2282  ;;  %v3262_v60 = vld [vmem:[#allocation2 + $0xc0] sm:$0xff]  ;;  %v1783_v17 = vld [vmem:[%s3620_s10 + $0x18] sm:$0xff] }
 0x12b   : > { %v1491_v52 = vadd.f32 %v1475_v21, %v1442_v32  ;;  %v1133_v10 = vmul.f32 %v3128_v56, %v2846_v58  ;;  %v1571_v24 = vadd.f32 %v1555_v55, %v3166_v51  ;;  %v1556_v2 = vmul.f32 0.044715, %v1540_v12  ;;  %v3264_v5 = vld [vmem:[#allocation2 + $0xc1] sm:$0xff] }
 0x12c   : > { %1810 = vmatpush.msra.mxu1 %v1785_v16  ;;  %2188 = vmatpush.msrb.mxu2 %v1785_v16  ;;  %v1566_v53 = vadd.f32 %v1550_v14, %v3160_v39  ;;  %v1484_v0 = vadd.f32 %v1468_v26, %v1435_v62  ;;  %v1525_v56 = vmul.f32 %v3242_v63, %v3242_v63  ;;  %v1611_v14 = vadd.f32 1.0, %v2283_v15 }
 0x12d   : > { %v1141_v21 = vadd.f32 %v1125_v36, %v1076_v48  ;;  %v1174_v40 = vmul.f32 %v3063_v30, %v2855_v9  ;;  %v1295_v32 = vadd.f32 %v1279_v61, %v1246_v57  ;;  %v1328_v26 = vmul.f32 %v3186_v33, %v2892_v35  ;;  %v1782_v36 = vld [vmem:[%s3620_s10 + $0x10] sm:$0xff]  ;;  %v3291_v61 = vld [vmem:[#allocation2 + $0xc2] sm:$0xff] }
 0x12e   : > { %1811 = vmatpush.msra.mxu1 %v1784_v38  ;;  %2189 = vmatpush.msrb.mxu2 %v1784_v38  ;;  %v1149_v55 = vadd.f32 %v1133_v10, %v1084_v42  ;;  %v1182_v12 = vmul.f32 %v3132_v50, %v2855_v9  ;;  %v3278_v62 = vadd.f32 %v3084_v34, %v1491_v52  ;;  %v1587_v16 = vmul.f32 0.7978846, %v1571_v24  ;;  %v1781_v52 = vld [vmem:[%s3620_s10 + $0x8] sm:$0xff]  ;;  %v1780_v24 = vld [vmem:[%s3620_s10] sm:$0xff] }
 0x12f   : > { %v1378_v30 = vmul.f32 %v2907_v3, %v3262_v60  ;;  %v1427_v48 = vmul.f32 %v2897_v46, %v3264_v5  ;;  %v1572_v57 = vadd.f32 %v1556_v2, %v3198_v49  ;;  %2286 = vtanh.f32 %v1581_v18 }
 0x130   : > { %1812 = vmatpush.msra.mxu1 %v1783_v17  ;;  %2190 = vmatpush.msrb.mxu2 %v1783_v17  ;;  %v3289_v50 = vadd.f32 %v3084_v34, %v1484_v0  ;;  %v2285_v42 = vpop.eup %2284  ;;  %v1541_v10 = vmul.f32 %v1525_v56, %v3242_v63  ;;  %v3297_v15 = vmul.f32 0.7978846, %v1566_v53  ;;  %v1190_v38 = vadd.f32 %v1174_v40, %v1141_v21  ;;  %v1255_v0 = vld [vmem:[#allocation2 + $0x51] sm:$0xff] }
 0x131   : > { %v1223_v18 = vmul.f32 %v3069_v45, %v2864_v31  ;;  %v1344_v2 = vadd.f32 %v1328_v26, %v1295_v32  ;;  %v1198_v17 = vadd.f32 %v1182_v12, %v1149_v55  ;;  %v1126_v39 = vmul.f32 %v3117_v47, %v2846_v58 }
 0x132   : > { %1813 = vmatpush.msra.mxu1 %v1782_v36  ;;  %2191 = vmatpush.msrb.mxu2 %v1782_v36  ;;  %3683 = vst [vmem:[#allocation19_spill] sm:$0xff] %v3297_v15  ;;  %v1077_v36 = vmul.f32 %v2901_v20, %v2844_v37  ;;  %v1627_v53 = vmul.f32 0.5, %v1611_v14  ;;  %v1526_v56 = vmul.f32 %v3278_v62, %v3278_v62  ;;  %2288 = vtanh.f32 %v1587_v16 }
 0x133   : > { %v3312_v21 = vmul.f32 %v3061_v11, %v3291_v61  ;;  %v1231_v40 = vmul.f32 %v3179_v6, %v2864_v31  ;;  %v3316_v26 = vadd.f32 1.0, %v2285_v42  ;;  %v1588_v20 = vmul.f32 0.7978846, %v1572_v57 }
 0x134   : > { %1814 = vmatpush.msra.mxu1 %v1781_v52  ;;  %2192 = vmatpush.msrb.mxu2 %v1781_v52  ;;  %v1519_v47 = vmul.f32 %v3289_v50, %v3289_v50  ;;  %v1557_v12 = vmul.f32 0.044715, %v1541_v10  ;;  %v1239_v14 = vadd.f32 %v1223_v18, %v1190_v38  ;;  %v1272_v52 = vmul.f32 %v2888_v29, %v1255_v0 }
 0x135   : > { %v3321_v59 = vpop.eup %2286  ;;  %v1394_v49 = vadd.f32 %v1378_v30, %v1344_v2  ;;  %v1247_v1 = vadd.f32 %v1231_v40, %v1198_v17  ;;  %v1142_v15 = vadd.f32 %v1126_v39, %v1077_v36  ;;  %v1175_v16 = vmul.f32 %v3075_v22, %v2855_v9 }
 0x136   : > { %1815 = vmatpush.msra.mxu1 %v1780_v24  ;;  %2193 = vmatpush.msrb.mxu2 %v1780_v24  ;;  %v1542_v57 = vmul.f32 %v1526_v56, %v3278_v62  ;;  %v1085_v42 = vmul.f32 %v3136_v44, %v2844_v37  ;;  %v1134_v10 = vmul.f32 %v3157_v28, %v2846_v58 }
 0x137   : > { %v3331_v38 = vmul.f32 %v1627_v53, %v3090_v19  ;;  %v3334_v30 = vmul.f32 %v1519_v47, %v3289_v50  ;;  %v1280_v39 = vmul.f32 %v3209_v25, %v2888_v29  ;;  %v1573_v22 = vadd.f32 %v1557_v12, %v3242_v63 }
 0x138   : > { %v1288_v18 = vadd.f32 %v1272_v52, %v1239_v14  ;;  %v1321_v24 = vmul.f32 %v3097_v41, %v2892_v35  ;;  %v1183_v44 = vmul.f32 %v3186_v33, %v2855_v9  ;;  %v2289_v28 = vpop.eup %2288  ;;  %v1443_v2 = vadd.f32 %v1427_v48, %v1394_v49 }
 0x139   : > { %v1296_v19 = vadd.f32 %v1280_v39, %v1247_v1  ;;  %v1191_v17 = vadd.f32 %v1175_v16, %v1142_v15  ;;  %v1224_v36 = vmul.f32 %v2864_v31, %v2932_v7  ;;  %v1558_v53 = vmul.f32 0.044715, %v1542_v57  ;;  %v1411_v57 = vld [vmem:[#allocation2 + $0xc9] sm:$0xff] }
 0x13a   : > { %v1329_v56 = vmul.f32 %v3215_v4, %v2892_v35  ;;  %v1150_v40 = vadd.f32 %v1134_v10, %v1085_v42  ;;  %v1078_v47 = vmul.f32 %v3069_v45, %v2844_v37  ;;  %v1127_v33 = vmul.f32 %v1255_v0, %v2846_v58  ;;  %v1403_v45 = vld [vmem:[#allocation2 + $0x69] sm:$0xff] }
 0x13b   : > { %v1086_v1 = vmul.f32 %v3179_v6, %v2844_v37  ;;  %v1135_v7 = vmul.f32 %v3209_v25, %v2846_v58  ;;  %v1589_v48 = vmul.f32 0.7978846, %v1573_v22  ;;  %v1337_v15 = vadd.f32 %v1321_v24, %v1288_v18  ;;  %v1363_v24 = vld [vmem:[#allocation2 + $0xd8] sm:$0xff] }
 0x13c   : > { %v1199_v12 = vadd.f32 %v1183_v44, %v1150_v40  ;;  %v1345_v52 = vadd.f32 %v1329_v56, %v1296_v19  ;;  %v1240_v0 = vadd.f32 %v1224_v36, %v1191_v17  ;;  %v1273_v37 = vmul.f32 %v3190_v8, %v2888_v29  ;;  %v1460_v56 = vld [vmem:[#allocation2 + $0xca] sm:$0xff] }
 0x13d   : > { %v1281_v25 = vmul.f32 %v3264_v5, %v2888_v29  ;;  %v1330_v16 = vmul.f32 %v3291_v61, %v2892_v35  ;;  %v1143_v42 = vadd.f32 %v1127_v33, %v1078_v47  ;;  %v1176_v10 = vmul.f32 %v3097_v41, %v2855_v9 }
 0x13e   : > { %v1151_v39 = vadd.f32 %v1135_v7, %v1086_v1  ;;  %v1492_v22 = vadd.f32 %v3312_v21, %v1443_v2  ;;  %v1420_v18 = vmul.f32 %v2897_v46, %v1403_v45  ;;  %v1184_v5 = vmul.f32 %v3215_v4, %v2855_v9 }
 0x13f   : > { %v1289_v19 = vadd.f32 %v1273_v37, %v1240_v0  ;;  %v1322_v61 = vmul.f32 %v2892_v35, %v2954_v43  ;;  %v1619_v36 = vadd.f32 1.0, %v2289_v28  ;;  %v3380_v41 = vadd.f32 %v1558_v53, %v3278_v62 }
 0x140   : > { %v1428_v21 = vmul.f32 %v2897_v46, %v1411_v57  ;;  %v1380_v40 = vmul.f32 %v2907_v3, %v1363_v24  ;;  %v1225_v4 = vmul.f32 %v2864_v31, %v2970_v27  ;;  %v1200_v9 = vadd.f32 %v1184_v5, %v1151_v39 }
 0x141   : > { %v3387_v47 = vadd.f32 %v3084_v34, %v1492_v22  ;;  %v1469_v28 = vmul.f32 %v3061_v11, %v2995_v54  ;;  %v1338_v7 = vadd.f32 %v1322_v61, %v1289_v19  ;;  %v1274_v37 = vmul.f32 %v1403_v45, %v2888_v29 }
 0x142   : > { %v1323_v5 = vmul.f32 %v2892_v35, %v2995_v54 }
 0x17c   : > { %v1741_v32 = vpop.f32.mrf.mxu3 }
 0x17d   : > { %v2122_v55 = vmul.f32 -1.442695, %v1741_v32  ;;  %v1232_v32 = vmul.f32 %v3262_v60, %v2864_v31 }
 0x17f   : > { %2290 = vpow2.f32 %v2122_v55  ;;  %v1371_v55 = vmul.f32 %v2907_v3, %v2970_v27  ;;  %v1248_v58 = vadd.f32 %v1232_v32, %v1199_v12  ;;  %v1192_v32 = vadd.f32 %v1176_v10, %v1143_v42  ;;  %v1404_v12 = vld [vmem:[#allocation2 + $0x79] sm:$0xff] }
 0x180   : > { %2292 = vtanh.f32 %v1588_v20  ;;  %v1362_v20 = vld [vmem:[#allocation2 + $0xc8] sm:$0xff]  ;;  %v1477_v27 = vmul.f32 %v3061_v11, %v1460_v56  ;;  %v1461_v42 = vld [vmem:[#allocation2 + $0xda] sm:$0xff]  ;;  %v1421_v45 = vmul.f32 %v2897_v46, %v1404_v12 }
 0x181   : > { %v1379_v6 = vmul.f32 %v2907_v3, %v1362_v20  ;;  %v1387_v8 = vadd.f32 %v1371_v55, %v1337_v15  ;;  %v1233_v17 = vmul.f32 %v1362_v20, %v2864_v31  ;;  %v1297_v2 = vadd.f32 %v1281_v25, %v1248_v58  ;;  %v1412_v20 = vld [vmem:[#allocation2 + $0xd9] sm:$0xff] }
 0x182   : > { %v1635_v31 = vmul.f32 0.5, %v1619_v36  ;;  %v1241_v0 = vadd.f32 %v1225_v4, %v1192_v32  ;;  %v1527_v25 = vmul.f32 %v3387_v47, %v3387_v47 }
 0x183   : > { %v1395_v44 = vadd.f32 %v1379_v6, %v1345_v52  ;;  %v1436_v43 = vadd.f32 %v1420_v18, %v1387_v8  ;;  %v1346_v53 = vadd.f32 %v1330_v16, %v1297_v2  ;;  %v1249_v15 = vadd.f32 %v1233_v17, %v1200_v9  ;;  %v1364_v8 = vld [vmem:[#allocation2 + $0xe0] sm:$0xff] }
 0x184   : > { %v1429_v52 = vmul.f32 %v2897_v46, %v1412_v20  ;;  %v1282_v6 = vmul.f32 %v1411_v57, %v2888_v29  ;;  %v1478_v29 = vmul.f32 %v3061_v11, %v1461_v42  ;;  %v1290_v57 = vadd.f32 %v1274_v37, %v1241_v0  ;;  %v1462_v0 = vld [vmem:[#allocation2 + $0xe2] sm:$0xff] }
 0x185   : > { %v2291_v49 = vpop.eup %2290  ;;  %v1444_v1 = vadd.f32 %v1428_v21, %v1395_v44  ;;  %v1396_v16 = vadd.f32 %v1380_v40, %v1346_v53  ;;  %v1331_v44 = vmul.f32 %v1460_v56, %v2892_v35  ;;  %v1381_v36 = vmul.f32 %v2907_v3, %v1364_v8  ;;  %v1413_v56 = vld [vmem:[#allocation2 + $0xe1] sm:$0xff] }
 0x186   : > { %v3358_v60 = vpop.eup %2292  ;;  %v3360_v14 = vadd.f32 1.0, %v2291_v49  ;;  %v1372_v49 = vmul.f32 %v2907_v3, %v2982_v13  ;;  %v1485_v13 = vadd.f32 %v1469_v28, %v1436_v43  ;;  %v1298_v22 = vadd.f32 %v1282_v6, %v1249_v15  ;;  %v3684_v28 = vld [vmem:[#allocation13_spill] sm:$0xff]  ;;  %v3687_v8 = vld [vmem:[#allocation15_spill] sm:$0xff] }
 0x187   : > { %v1543_v2 = vmul.f32 %v1527_v25, %v3387_v47  ;;  %v1445_v40 = vadd.f32 %v1429_v52, %v1396_v16  ;;  %v1339_v43 = vadd.f32 %v1323_v5, %v1290_v57  ;;  %v1373_v53 = vmul.f32 %v2907_v3, %v3684_v28 }
 0x188   : > { %2294 = vrcp.f32 %v3360_v14  ;;  %v1759_v10 = vand.u32 2147483648, %v3360_v14  ;;  %v1388_v39 = vadd.f32 %v1372_v49, %v1338_v7  ;;  %v1757_v24 = vand.u32 2147483647, %v3360_v14  ;;  %v1405_v49 = vld [vmem:[#allocation2 + $0x81] sm:$0xff] }
 0x189   : > { %2296 = vtanh.f32 %v1589_v48  ;;  %v1493_v48 = vadd.f32 %v1477_v27, %v1444_v1  ;;  %vm1753_vm6 = vweird.f32 %v3360_v14  ;;  %v3409_v17 = vadd.f32 %v3084_v34, %v1485_v13 }
 0x18a   : > { %v1760_v21 = vor.u32 1.1754944e-38, %v1759_v10  ;;  %v1347_v32 = vadd.f32 %v1331_v44, %v1298_v22  ;;  %vm1758_vm8 = vcmp.eq.f32.partialorder %v1757_v24, 8.507059e+37  ;;  %v1437_v35 = vadd.f32 %v1421_v45, %v1388_v39  ;;  %v3686_v39 = vld [vmem:[#allocation14_spill] sm:$0xff] }
 0x18b   : > { %v3414_v54 = vadd.f32 %v3084_v34, %v1493_v48  ;;  %v1651_v1 = vmul.f32 %v1635_v31, %v3166_v51  ;;  %v1551_v7 = vmul.f32 0.044715, %v3334_v30  ;;  %v1590_v15 = vmul.f32 0.7978846, %v3380_v41  ;;  %v3688_v24 = vld [vmem:[#allocation18_spill] sm:$0xff] }
 0x18c   : > { %v1494_v27 = vadd.f32 %v1478_v29, %v1445_v40  ;;  %v1559_v52 = vmul.f32 0.044715, %v1543_v2  ;;  %v1397_v51 = vadd.f32 %v1381_v36, %v1347_v32  ;;  %v1389_v31 = vadd.f32 %v1373_v53, %v1339_v43 }
 0x18d   : > { %v1422_v41 = vmul.f32 %v2897_v46, %v1405_v49  ;;  %v1628_v37 = vmul.f32 0.5, %v3316_v26  ;;  %v1471_v22 = vmul.f32 %v3061_v11, %v3686_v39  ;;  %v1613_v29 = vadd.f32 1.0, %v3321_v59 }
 0x18e   : > { %v2295_v33 = vpop.eup %2294  ;;  %v1575_v13 = vadd.f32 %v1559_v52, %v3387_v47  ;;  %v3441_v16 = vadd.f32 %v3084_v34, %v1494_v27 }
 0x18f   : > { %v1749_v55 = vmul.f32 %v2295_v33, %v3360_v14  ;;  %vm1754_vm5 = vweird.f32 %v2295_v33  ;;  %v2297_v19 = vpop.eup %2296  ;;  %v1470_v14 = vmul.f32 %v3061_v11, %v3006_v23  ;;  %v1430_v23 = vmul.f32 %v2897_v46, %v1413_v56 }
 0x190   : > { %vm1755_vm7 = vmor %vm1753_vm6, %vm1754_vm5  ;;  %v1479_v46 = vmul.f32 %v3061_v11, %v1462_v0  ;;  %v1438_v48 = vadd.f32 %v1422_v41, %v1389_v31  ;;  %v1621_v57 = vadd.f32 1.0, %v2297_v19  ;;  %v1529_v2 = vmul.f32 %v3441_v16, %v3441_v16 }
 0x191   : > { %v1750_v58 = vsub.f32 1.0, %v1749_v55  ;;  %v1520_v55 = vmul.f32 %v3409_v17, %v3409_v17  ;;  %v1486_v30 = vadd.f32 %v1470_v14, %v1437_v35  ;;  %v1446_v42 = vadd.f32 %v1430_v23, %v1397_v51 }
 0x192   : > { %v1591_v11 = vmul.f32 0.7978846, %v1575_v13  ;;  %v1487_v56 = vadd.f32 %v1471_v22, %v1438_v48  ;;  %v1629_v59 = vmul.f32 0.5, %v1613_v29  ;;  %v1637_v19 = vmul.f32 0.5, %v1621_v57 }
 0x193   : > { %v1751_v18 = vmul.f32 %v2295_v33, %v1750_v58  ;;  %v3685_v58 = vld [vmem:[#allocation19_spill] sm:$0xff]  ;;  %v1536_v25 = vmul.f32 %v1520_v55, %v3409_v17  ;;  %v3446_v26 = vadd.f32 %v3084_v34, %v1486_v30  ;;  %v1495_v40 = vadd.f32 %v1479_v46, %v1446_v42 }
 0x194   : > { %2298 = vtanh.f32 %v3685_v58  ;;  %v1545_v14 = vmul.f32 %v1529_v2, %v3441_v16  ;;  %v1653_v49 = vmul.f32 %v1637_v19, %v3242_v63 }
 0x195   : > { %v1752_v61 = vadd.f32 %v2295_v33, %v1751_v18  ;;  %2300 = vtanh.f32 %v1590_v15  ;;  %v1644_v18 = vmul.f32 %v1628_v37, %v3687_v8  ;;  %v1552_v44 = vmul.f32 0.044715, %v1536_v25 }
 0x196   : > { %v1521_v35 = vmul.f32 %v3446_v26, %v3446_v26  ;;  %v3462_v43 = vadd.f32 %v3084_v34, %v1495_v40 }
 0x197   : > { %v1756_v4 = vsel %vm1755_vm7, %v2295_v33, %v1752_v61  ;;  %v1620_v33 = vadd.f32 1.0, %v3358_v60  ;;  %v1528_v60 = vmul.f32 %v3414_v54, %v3414_v54 }
 0x198   : > { %v1761_v9 = vsel %vm1758_vm8, %v1760_v21, %v1756_v4  ;;  %v1537_v53 = vmul.f32 %v1521_v35, %v3446_v26  ;;  %v1530_v52 = vmul.f32 %v3462_v43, %v3462_v43 }
 0x199   : > { %v3420_v20 = vperm.slane %v1761_v9, 0  ;;  %v1636_v6 = vmul.f32 0.5, %v1620_v33  ;;  %v1544_v10 = vmul.f32 %v1528_v60, %v3414_v54  ;;  %v1568_v9 = vadd.f32 %v1552_v44, %v3409_v17  ;;  %v3689_v33 = vld [vmem:[#allocation16_spill] sm:$0xff] }
 0x19a   : > { %v2299_v61 = vpop.eup %2298  ;;  %v1553_v60 = vmul.f32 0.044715, %v1537_v53  ;;  %v1546_v37 = vmul.f32 %v1530_v52, %v3462_v43 }
 0x19b   : > { %v1764_v3 = vmul.f32 %v3420_v20, %v3331_v38  ;;  %v1772_v12 = vmul.f32 %v3420_v20, %v1651_v1  ;;  %v1567_v38 = vadd.f32 %v1551_v7, %v3289_v50  ;;  %v1652_v45 = vmul.f32 %v1636_v6, %v3688_v24  ;;  %v2301_v32 = vpop.eup %2300 }
 0x19c   : > { %v1765_v36 = vmul.f32 %v3420_v20, %v1644_v18  ;;  %v1560_v4 = vmul.f32 0.044715, %v1544_v10  ;;  %v3467_v1 = vadd.f32 %v3084_v34, %v1487_v56  ;;  %v1645_v7 = vmul.f32 %v1629_v59, %v3689_v33 }
 0x19d   : > { %1816 = vmatmul.f32.vlgmr.msra.gmra.mxu1 %v1764_v3  ;;  %1840 = vmatmul.f32.vlgmr.msrb.gmra.mxu2 %v1772_v12  ;;  %v1583_v5 = vmul.f32 0.7978846, %v1567_v38  ;;  %v1773_v21 = vmul.f32 %v3420_v20, %v1652_v45  ;;  %v1614_v15 = vadd.f32 1.0, %v2299_v61  ;;  %v1622_v55 = vadd.f32 1.0, %v2301_v32  ;;  %v3690_v38 = vld [vmem:[#allocation17_spill] sm:$0xff] }
 0x19e   : > { %v1576_v28 = vadd.f32 %v1560_v4, %v3414_v54  ;;  %v1584_v27 = vmul.f32 0.7978846, %v1568_v9  ;;  %v1766_v23 = vmul.f32 %v3420_v20, %v1645_v7  ;;  %v1774_v3 = vmul.f32 %v3420_v20, %v1653_v49 }
 0x19f   : > { %2302 = vtanh.f32 %v1583_v5  ;;  %v1561_v12 = vmul.f32 0.044715, %v1545_v14  ;;  %v1522_v34 = vmul.f32 %v3467_v1, %v3467_v1  ;;  %v1630_v63 = vmul.f32 0.5, %v1614_v15 }
 0x1a0   : > { %2304 = vtanh.f32 %v1591_v11  ;;  %v1592_v51 = vmul.f32 0.7978846, %v1576_v28  ;;  %v1638_v31 = vmul.f32 0.5, %v1622_v55  ;;  %v1569_v6 = vadd.f32 %v1553_v60, %v3446_v26 }
 0x1a1   : > { %2306 = vtanh.f32 %v1584_v27  ;;  %v1577_v0 = vadd.f32 %v1561_v12, %v3441_v16  ;;  %v1538_v58 = vmul.f32 %v1522_v34, %v3467_v1  ;;  %v1646_v25 = vmul.f32 %v1630_v63, %v3690_v38  ;;  %v3691_v63 = vld [vmem:[#allocation5_spill] sm:$0xff] }
 0x1a2   : > { %2308 = vtanh.f32 %v1592_v51  ;;  %v1654_v13 = vmul.f32 %v1638_v31, %v3278_v62  ;;  %v1562_v22 = vmul.f32 0.044715, %v1546_v37  ;;  %v1585_v8 = vmul.f32 0.7978846, %v1569_v6  ;;  %v3694_v37 = vld [vmem:[#allocation12_spill] sm:$0xff] }
 0x1a3   : > { %v1767_v10 = vmul.f32 %v3420_v20, %v1646_v25  ;;  %v1593_v39 = vmul.f32 0.7978846, %v1577_v0  ;;  %v1554_v18 = vmul.f32 0.044715, %v1538_v58  ;;  %v3692_v31 = vunpack.c.l.bf16 %v3691_v63 }
 0x1a4   : > { %v1775_v48 = vmul.f32 %v3420_v20, %v1654_v13  ;;  %v1578_v5 = vadd.f32 %v1562_v22, %v3462_v43  ;;  %v3695_v6 = vunpack.c.l.bf16 %v3694_v37  ;;  %v3696_v13 = vunpack.c.h.bf16 %v3691_v63 }
 0x1a5   : > { %1819 = vmatmul.f32.gmra.mxu1 %v1765_v36  ;;  %1843 = vmatmul.f32.gmra.mxu2 %v1773_v21  ;;  %v2303_v30 = vpop.eup %2302  ;;  %2310 = vtanh.f32 %v1593_v39  ;;  %v1570_v62 = vadd.f32 %v1554_v18, %v3467_v1  ;;  %v3697_v22 = vunpack.c.h.bf16 %v3694_v37 }
 0x1a6   : > { %v2305_v41 = vpop.eup %2304  ;;  %v1615_v42 = vadd.f32 1.0, %v2303_v30  ;;  %2312 = vtanh.f32 %v1585_v8  ;;  %v1594_v32 = vmul.f32 0.7978846, %v1578_v5 }
 0x1a7   : > { %v1623_v46 = vadd.f32 1.0, %v2305_v41  ;;  %v2307_v24 = vpop.eup %2306  ;;  %v1586_v11 = vmul.f32 0.7978846, %v1570_v62 }
 0x1a8   : > { %v1631_v45 = vmul.f32 0.5, %v1615_v42  ;;  %v2309_v57 = vpop.eup %2308  ;;  %v1616_v36 = vadd.f32 1.0, %v2307_v24  ;;  %2314 = vtanh.f32 %v1594_v32 }
 0x1a9   : > { %v1639_v29 = vmul.f32 0.5, %v1623_v46  ;;  %v1624_v21 = vadd.f32 1.0, %v2309_v57  ;;  %2316 = vtanh.f32 %v1586_v11 }
 0x1aa   : > { %v1647_v44 = vmul.f32 %v1631_v45, %v3289_v50  ;;  %v1632_v35 = vmul.f32 0.5, %v1616_v36  ;;  %v3698_v45 = vld [vmem:[#allocation8_spill] sm:$0xff]  ;;  %v3700_v36 = vld [vmem:[#allocation6_spill] sm:$0xff] }
 0x1ab   : > { %v1655_v61 = vmul.f32 %v1639_v29, %v3387_v47  ;;  %v2311_v4 = vpop.eup %2310  ;;  %v1640_v56 = vmul.f32 0.5, %v1624_v21  ;;  %v3699_v29 = vunpack.c.l.bf16 %v3698_v45  ;;  %v3701_v21 = vunpack.c.l.bf16 %v3700_v36 }
 0x1ac   : > { %v1768_v2 = vmul.f32 %v3420_v20, %v1647_v44  ;;  %v2313_v59 = vpop.eup %2312  ;;  %v1648_v50 = vmul.f32 %v1632_v35, %v3409_v17  ;;  %v1625_v9 = vadd.f32 1.0, %v2311_v4  ;;  %v3702_v11 = vunpack.c.h.bf16 %v3698_v45 }
 0x1ad   : > { %1822 = vmatmul.f32.gmra.mxu1 %v1766_v23  ;;  %1846 = vmatmul.f32.gmra.mxu2 %v1774_v3  ;;  %v1776_v40 = vmul.f32 %v3420_v20, %v1655_v61  ;;  %v1656_v47 = vmul.f32 %v1640_v56, %v3414_v54  ;;  %v1617_v19 = vadd.f32 1.0, %v2313_v59 }
 0x1ae   : > { %v1769_v14 = vmul.f32 %v3420_v20, %v1648_v50  ;;  %v2315_v53 = vpop.eup %2314  ;;  %v1641_v7 = vmul.f32 0.5, %v1625_v9 }
 0x1af   : > { %v1777_v28 = vmul.f32 %v3420_v20, %v1656_v47  ;;  %v1633_v33 = vmul.f32 0.5, %v1617_v19  ;;  %v2317_v49 = vpop.eup %2316  ;;  %v1626_v17 = vadd.f32 1.0, %v2315_v53  ;;  %v3703_v47 = vunpack.c.h.bf16 %v3700_v36 }
 0x1b0   : > { %v1657_v55 = vmul.f32 %v1641_v7, %v3441_v16  ;;  %v1618_v27 = vadd.f32 1.0, %v2317_v49  ;;  %v3506_v16 = vld [vmem:[%s3621_s11] ss:$0 sm:$0xff] }
 0x1b1   : > { %v1649_v15 = vmul.f32 %v1633_v33, %v3446_v26  ;;  %v1642_v12 = vmul.f32 0.5, %v1626_v17 }
 0x1b2   : > { %v1778_v23 = vmul.f32 %v3420_v20, %v1657_v55  ;;  %v1634_v3 = vmul.f32 0.5, %v1618_v27  ;;  %v3706_v27 = vld [vmem:[#allocation7_spill] sm:$0xff] }
 0x1b3   : > { %v1770_v54 = vmul.f32 %v3420_v20, %v1649_v15  ;;  %v1658_v51 = vmul.f32 %v1642_v12, %v3462_v43  ;;  %v3707_v17 = vunpack.c.l.bf16 %v3706_v27 }
 0x1b4   : > { %v1650_v52 = vmul.f32 %v1634_v3, %v3467_v1 }
 0x1b5   : > { %1825 = vmatmul.f32.gmra.mxu1 %v1767_v10  ;;  %1849 = vmatmul.f32.gmra.mxu2 %v1775_v48  ;;  %v1779_v26 = vmul.f32 %v3420_v20, %v1658_v51 }
 0x1b6   : > { %v1771_v60 = vmul.f32 %v3420_v20, %v1650_v52 }
 0x1bd   : > { %1828 = vmatmul.f32.gmra.mxu1 %v1768_v2  ;;  %1852 = vmatmul.f32.gmra.mxu2 %v1776_v40 }
 0x1c5   : > { %1831 = vmatmul.f32.gmra.mxu1 %v1769_v14  ;;  %1855 = vmatmul.f32.gmra.mxu2 %v1777_v28  ;;  %v3704_v28 = vld [vmem:[#allocation10_spill] sm:$0xff] }
 0x1c6   : > { %v3705_v53 = vunpack.c.l.bf16 %v3704_v28  ;;  %v3708_v12 = vunpack.c.h.bf16 %v3704_v28 }
 0x1cd   : > { %1834 = vmatmul.f32.gmra.mxu1 %v1770_v54  ;;  %1858 = vmatmul.f32.gmra.mxu2 %v1778_v23 }
 0x1d5   : > { %1837 = vmatmul.f32.gmra.mxu1 %v1771_v60  ;;  %1861 = vmatmul.f32.gmra.mxu2 %v1779_v26 }
 0x21a   : > { %v1817_v34 = vpop.f32.mrf.mxu1 }
 0x21b   : > { %v1818_v30 = vadd.f32 %v3506_v16, %v1817_v34 }
 0x21d   : > { %v1865_v41 = vadd.f32 %v3692_v31, %v1818_v30  ;;  %v3709_v30 = vunpack.c.h.bf16 %v3706_v27 }
 0x21f   : > { %v1881_v20 = vpack.c.bf16 %v1865_v41, %v1865_v41 }
 0x220   : > { %v1841_v43 = vpop.f32.mrf.mxu2 }
 0x221   : > { %1898 = vst.msk [vmem:[%s3516_s19] sm:$0xf] %vm1897_vm9, %v1881_v20  ;;  %v1842_v1 = vadd.f32 %v3506_v16, %v1841_v43  ;;  %v3710_v20 = vld [vmem:[#allocation11_spill] sm:$0xff] }
 0x222   : > { %v1820_v0 = vpop.f32.mrf.mxu1  ;;  %v3711_v43 = vunpack.c.l.bf16 %v3710_v20 }
 0x223   : > { %v1873_v58 = vadd.f32 %v3695_v6, %v1842_v1  ;;  %v1821_v38 = vadd.f32 %v3506_v16, %v1820_v0 }
 0x225   : > { %v1889_v25 = vpack.c.bf16 %v1873_v58, %v1873_v58  ;;  %v1866_v42 = vadd.f32 %v3696_v13, %v1821_v38  ;;  %v3712_v38 = vld [vmem:[#allocation9_spill] sm:$0xff] }
 0x227   : > { %1906 = vst.msk [vmem:[%s3516_s19 + $0x20] sm:$0xf] %vm1897_vm9, %v1889_v25  ;;  %v1882_v46 = vpack.c.bf16 %v1866_v42, %v1866_v42  ;;  %v3713_v25 = vunpack.c.l.bf16 %v3712_v38 }
 0x228   : > { %v1844_v10 = vpop.f32.mrf.mxu2 }
 0x229   : > { %1899 = vst.msk [vmem:[%s3516_s19 + $0x4] sm:$0xf] %vm1897_vm9, %v1882_v46  ;;  %v1845_v48 = vadd.f32 %v3506_v16, %v1844_v10  ;;  %v3714_v10 = vunpack.c.h.bf16 %v3710_v20 }
 0x22a   : > { %v1823_v39 = vpop.f32.mrf.mxu1 }
 0x22b   : > { %v1874_v8 = vadd.f32 %v3697_v22, %v1845_v48  ;;  %v1824_v18 = vadd.f32 %v3506_v16, %v1823_v39 }
 0x22d   : > { %v1890_v24 = vpack.c.bf16 %v1874_v8, %v1874_v8  ;;  %v1867_v57 = vadd.f32 %v3699_v29, %v1824_v18  ;;  %v3715_v18 = vunpack.c.h.bf16 %v3712_v38 }
 0x22f   : > { %1907 = vst.msk [vmem:[%s3516_s19 + $0x24] sm:$0xf] %vm1897_vm9, %v1890_v24  ;;  %v1883_v5 = vpack.c.bf16 %v1867_v57, %v1867_v57 }
 0x230   : > { %v1847_v62 = vpop.f32.mrf.mxu2 }
 0x231   : > { %1900 = vst.msk [vmem:[%s3516_s19 + $0x8] sm:$0xf] %vm1897_vm9, %v1883_v5  ;;  %v1848_v44 = vadd.f32 %v3506_v16, %v1847_v62 }
 0x232   : > { %v1826_v61 = vpop.f32.mrf.mxu1 }
 0x233   : > { %v1875_v2 = vadd.f32 %v3701_v21, %v1848_v44  ;;  %v1827_v40 = vadd.f32 %v3506_v16, %v1826_v61 }
 0x235   : > { %v1891_v32 = vpack.c.bf16 %v1875_v2, %v1875_v2  ;;  %v1868_v4 = vadd.f32 %v3702_v11, %v1827_v40 }
 0x237   : > { %1908 = vst.msk [vmem:[%s3516_s19 + $0x28] sm:$0xf] %vm1897_vm9, %v1891_v32  ;;  %v1884_v35 = vpack.c.bf16 %v1868_v4, %v1868_v4 }
 0x238   : > { %v1850_v56 = vpop.f32.mrf.mxu2 }
 0x239   : > { %1901 = vst.msk [vmem:[%s3516_s19 + $0xc] sm:$0xf] %vm1897_vm9, %v1884_v35  ;;  %v1851_v59 = vadd.f32 %v3506_v16, %v1850_v56 }
 0x23a   : > { %v1829_v50 = vpop.f32.mrf.mxu1 }
 0x23b   : > { %v1876_v19 = vadd.f32 %v3703_v47, %v1851_v59  ;;  %v1830_v9 = vadd.f32 %v3506_v16, %v1829_v50 }
 0x23d   : > { %v1892_v14 = vpack.c.bf16 %v1876_v19, %v1876_v19  ;;  %v1869_v33 = vadd.f32 %v3705_v53, %v1830_v9 }
 0x23f   : > { %1909 = vst.msk [vmem:[%s3516_s19 + $0x2c] sm:$0xf] %vm1897_vm9, %v1892_v14  ;;  %v1885_v7 = vpack.c.bf16 %v1869_v33, %v1869_v33 }
 0x240   : > { %v1853_v49 = vpop.f32.mrf.mxu2 }
 0x241   : > { %1902 = vst.msk [vmem:[%s3516_s19 + $0x10] sm:$0xf] %vm1897_vm9, %v1885_v7  ;;  %v1854_v15 = vadd.f32 %v3506_v16, %v1853_v49 }
 0x242   : > { %v1832_v55 = vpop.f32.mrf.mxu1 }
 0x243   : > { %v1877_v54 = vadd.f32 %v3707_v17, %v1854_v15  ;;  %v1833_v23 = vadd.f32 %v3506_v16, %v1832_v55 }
 0x245   : > { %v1893_v3 = vpack.c.bf16 %v1877_v54, %v1877_v54  ;;  %v1870_v52 = vadd.f32 %v3708_v12, %v1833_v23 }
 0x247   : > { %1910 = vst.msk [vmem:[%s3516_s19 + $0x30] sm:$0xf] %vm1897_vm9, %v1893_v3  ;;  %v1886_v51 = vpack.c.bf16 %v1870_v52, %v1870_v52 }
 0x248   : > { %v1856_v60 = vpop.f32.mrf.mxu2 }
 0x249   : > { %1903 = vst.msk [vmem:[%s3516_s19 + $0x14] sm:$0xf] %vm1897_vm9, %v1886_v51  ;;  %v1857_v26 = vadd.f32 %v3506_v16, %v1856_v60 }
 0x24a   : > { %v1835_v34 = vpop.f32.mrf.mxu1 }
 0x24b   : > { %v1878_v63 = vadd.f32 %v3709_v30, %v1857_v26  ;;  %v1836_v31 = vadd.f32 %v3506_v16, %v1835_v34 }
 0x24d   : > { %v1894_v41 = vpack.c.bf16 %v1878_v63, %v1878_v63  ;;  %v1871_v1 = vadd.f32 %v3711_v43, %v1836_v31 }
 0x24f   : > { %1911 = vst.msk [vmem:[%s3516_s19 + $0x34] sm:$0xf] %vm1897_vm9, %v1894_v41  ;;  %v1887_v0 = vpack.c.bf16 %v1871_v1, %v1871_v1 }
 0x250   : > { %v1859_v37 = vpop.f32.mrf.mxu2 }
 0x251   : > { %1904 = vst.msk [vmem:[%s3516_s19 + $0x18] sm:$0xf] %vm1897_vm9, %v1887_v0  ;;  %v1860_v6 = vadd.f32 %v3506_v16, %v1859_v37 }
 0x252   : > { %v1838_v58 = vpop.f32.mrf.mxu1 }
 0x253   : > { %v1879_v13 = vadd.f32 %v3713_v25, %v1860_v6  ;;  %v1839_v42 = vadd.f32 %v3506_v16, %v1838_v58 }
 0x255   : > { %v1895_v46 = vpack.c.bf16 %v1879_v13, %v1879_v13  ;;  %v1872_v48 = vadd.f32 %v3714_v10, %v1839_v42 }
 0x257   : > { %1912 = vst.msk [vmem:[%s3516_s19 + $0x38] sm:$0xf] %vm1897_vm9, %v1895_v46  ;;  %v1888_v39 = vpack.c.bf16 %v1872_v48, %v1872_v48 }
 0x258   : > { %v1862_v22 = vpop.f32.mrf.mxu2 }
 0x259   : > { %1905 = vst.msk [vmem:[%s3516_s19 + $0x1c] sm:$0xf] %vm1897_vm9, %v1888_v39  ;;  %v1863_v8 = vadd.f32 %v3506_v16, %v1862_v22 }
 0x25b   : > { %v1880_v24 = vadd.f32 %v3715_v18, %v1863_v8 }
 0x25d   : > { %v1896_v45 = vpack.c.bf16 %v1880_v24, %v1880_v24 }
 0x25f   : > { %1913 = vst.msk [vmem:[%s3516_s19 + $0x3c] sm:$0xf] %vm1897_vm9, %v1896_v45 }
 0x260 PF: > { %s22_s25 = sadd.s32 1, %s2356_s25   ;;  %s3716_s13 = sld [smem:[#allocation3_spill]] }
 0x261   : > { %p19_p12 = scmp.ge.s32.totalorder %s22_s25, 6   ;;  %s3717_s30 = sld [smem:[#allocation4_spill]] }
 0x262   : > { %s3718_s21 = smov %s2348_s23  ;;  %s3719_s22 = smov %s2352_s24 }
 0x263   :  { %21 = sbr.rel (!%p19_p12) target bundleno = 4 (0x4), region = 110 }
 0x266   : > { %s3720_s23 = smov %s3716_s13 }
 0x267   : > { %s3721_s24 = smov %s3717_s30 }

// kernel: ptavit_stage_no_down.8
= control target key start
LH: loop header
LB: loop body
LE: loop exit
PB: predicated region body
PF: predicated region fallthrough
CT: control target
= control target key end

     0   :  { %s1945_s24 = smov 0   ;;  %s1947_s25 = smov 0   ;;  %s2907_s0 = inlined_call_operand.vmem [shape: bf16[2,16,16,32], index: 0, kind: input, shape index: {}, may-alias: {0,1,2}]   ;;  %s2908_s1 = inlined_call_operand.vmem [shape: bf16[2,16,16,32], index: 1, kind: input, shape index: {}, may-alias: {0,1,2}]   ;;  %s2909_s2 = inlined_call_operand.vmem [shape: bf16[2,16,16,32], index: 2, kind: input, shape index: {}, may-alias: {0,1,2}]   ;;  %s2910_s3 = inlined_call_operand.vmem [shape: f32[32,128], index: 3, kind: input, shape index: {}]   ;;  %s2911_s4 = inlined_call_operand.vmem [shape: f32[1,128], index: 4, kind: input, shape index: {}]   ;;  %s2912_s5 = inlined_call_operand.vmem [shape: f32[3,3,128], index: 5, kind: input, shape index: {}]   ;;  %s2913_s6 = inlined_call_operand.vmem [shape: f32[1,128], index: 6, kind: input, shape index: {}]   ;;  %s2914_s7 = inlined_call_operand.vmem [shape: f32[2,1,128], index: 7, kind: output, shape index: {}]  }
   0x1   :  { %s1949_s26 = smov 0   ;;  %s1951_s27 = smov 0  }
   0x2   :  { %s1953_s28 = smov 0  }
   0x3 LB: > { %s26_s29 = sadd.s32 1, %s1893_s26  ;;  %s29_s30 = sadd.s32 1, %s1897_s27  ;;  %s1901_s28 = sphi %s1953_s28, %s17_s28   ;;  %s1897_s27 = sphi %s1951_s27, %s2994_s27   ;;  %s1893_s26 = sphi %s1949_s26, %s2993_s26   ;;  %s1889_s25 = sphi %s1947_s25, %s2992_s25   ;;  %s1885_s24 = sphi %s1945_s24, %s2991_s24  }
   0x4   : > { %p27_p0 = scmp.ge.s32.totalorder %s26_s29, 2  ;;  %p1641_p1 = scmp.ge.s32.totalorder %s1901_s28, 1 }
   0x5   : > { %p321_p2 = scmp.lt.s32.totalorder %s1901_s28, 5 }
   0x6   : > { %s2996_s29 = smov (%p27_p0, %s26_s29), 0  ;;  %s2998_s30 = smov (!%p27_p0, %s29_s30), %s1897_s27 }
   0x7   : > { %p322_p3 = pnand %p1641_p1, %p321_p2  ;;  %p31_p4 = scmp.ge.s32.totalorder %s2998_s30, 2 }
   0x9   : > { %s3000_s30 = smov (%p31_p4, %s2998_s30), 0  ;;  %325 = sbr.rel (%p322_p3) target bundleno = 396 (0x18c), region = 48 }
   0xe   : > { %v479_v0 = vld [vmem:[%s2910_s3 + $0x18] sm:$0xff]  ;;  %v478_v1 = vld [vmem:[%s2910_s3 + $0x10] sm:$0xff]  ;;  %s1984_s12 = sshll.u32 %s1885_s24, 3  ;;  %p383_p5 = scmp.lt.s32.totalorder %s1889_s25, 1  ;;  %v477_v2 = vld [vmem:[%s2910_s3 + $0x8] sm:$0xff]  ;;  %vm488_vm0 = vcmask 261120  }
   0xf   : > { %549 = vmatpush.msra.mxu0 %v479_v0  ;;  %1735 = vmatpush.msra.mxu1 %v479_v0  ;;  %p385_p6 = scmp.lt.s32.totalorder %s1984_s12, 15  ;;  %s1988_s13 = sadd.s32 4294967295, %s1984_s12  ;;  %v476_v3 = vld [vmem:[%s2910_s3] sm:$0xff]  ;;  %v1903_v34 = vmov 0.0  }
  0x10   : > { %1736 = vmatpush.msra.mxu2 %v479_v0  ;;  %1737 = vmatpush.msra.mxu3 %v479_v0  ;;  %s3002_s25 = smov (!%p383_p5, %s1889_s25), 1  ;;  %p395_p7 = scmp.gt.s32.totalorder %s1988_s13, 0  ;;  %847 = vst [vmem:[#allocation2 + $0x18] sm:$0x1] %v1903_v34  ;;  %v2069_v35 = vld [vmem:[%s2911_s4] ss:$0 sm:$0xff] }
  0x11   : > { %550 = vmatpush.msra.mxu0 %v478_v1  ;;  %1738 = vmatpush.msra.mxu1 %v478_v1  ;;  %s386_s16 = scalar_select %p385_p6, %s1984_s12, 15  ;;  %846 = vst [vmem:[#allocation2] sm:$0x1] %v1903_v34 }
  0x12   : > { %1739 = vmatpush.msra.mxu2 %v478_v1  ;;  %1740 = vmatpush.msra.mxu3 %v478_v1  ;;  %s1997_s19 = sshll.u32 %s3002_s25, 5  ;;  %s2002_s22 = scalar_lea.vmem %s2914_s7, %s3002_s25  ;;  %848 = vst [vmem:[#allocation2 + $0x30] sm:$0x1] %v1903_v34 }
  0x13   : > { %551 = vmatpush.msra.mxu0 %v477_v2  ;;  %1741 = vmatpush.msra.mxu1 %v477_v2  ;;  %s1643_s23 = sshll.u32 %s386_s16, 1  ;;  %p1648_p8 = scmp.lt.s32.totalorder %s1988_s13, 15  ;;  %849 = vst [vmem:[#allocation2 + $0x48] sm:$0x1] %v1903_v34 }
  0x14   : > { %1742 = vmatpush.msra.mxu2 %v477_v2  ;;  %1743 = vmatpush.msra.mxu3 %v477_v2  ;;  %s389_s8 = sadd.s32 %s1997_s19, %s1643_s23  ;;  %s411_s10 = sadd.s32 8, %s1984_s12  ;;  %850 = vst [vmem:[#allocation2 + $0x60] sm:$0x1] %v1903_v34 }
  0x15   : > { %552 = vmatpush.msra.mxu0 %v476_v3  ;;  %1744 = vmatpush.msra.mxu1 %v476_v3  ;;  %s1645_s9 = sshll.u32 %s389_s8, 2  ;;  %p2013_p9 = scmp.lt.s32.totalorder %s411_s10, 15  ;;  %851 = vst [vmem:[#allocation2 + $0x78] sm:$0x1] %v1903_v34 }
  0x16   : > { %1745 = vmatpush.msra.mxu2 %v476_v3  ;;  %1746 = vmatpush.msra.mxu3 %v476_v3  ;;  %s2011_s25 = scalar_lea.vmem %s2907_s0, %s1645_s9  ;;  %852 = vst [vmem:[#allocation2 + $0x90] sm:$0x1] %v1903_v34  ;;  %p430_p10 = scmp.gt.s32.totalorder %s1885_s24, 0 }
  0x17   : > { %v1689_v4 = vld [vmem:[%s2011_s25] sm:$0xff]   ;;  %v2019_v5 = vld [vmem:[%s2011_s25 + $0x10] sm:$0xff]   ;;  %764 = vmatpush.msrb.mxu1 %v479_v0  ;;  %s396_s12 = scalar_select %p395_p7, %s1988_s13, 0  ;;  %v1732_v10 = vld [vmem:[%s2011_s25 + $0x28] sm:$0xff]   ;;  %853 = vst [vmem:[#allocation2 + $0xa8] sm:$0x1] %v1903_v34 }
  0x18   : > { %v1731_v6 = vld [vmem:[%s2011_s25 + $0x20] sm:$0xff]   ;;  %814 = vmatpush.msrb.mxu2 %v479_v0  ;;  %v1690_v7 = vunpack.c.l.bf16 %v1689_v4  ;;  %v1699_v8 = vunpack.c.h.bf16 %v2019_v5  ;;  %s3004_s10 = smov (!%p2013_p9, %s411_s10), 15  ;;  %v1711_v11 = vunpack.c.h.bf16 %v1732_v10  ;;  %v1730_v12 = vld [vmem:[%s2011_s25 + $0x18] sm:$0xff]   ;;  %v1733_v13 = vld [vmem:[%s2011_s25 + $0x30] sm:$0xff]   ;;  %v1691_v14 = vunpack.c.h.bf16 %v1689_v4  ;;  %854 = vst [vmem:[#allocation2 + $0xc0] sm:$0x1] %v1903_v34 }
  0x19   : > { %v1706_v9 = vunpack.c.l.bf16 %v1731_v6  ;;  %765 = vmatpush.msrb.mxu1 %v478_v1  ;;  %s3006_s12 = smov (!%p1648_p8, %s396_s12), 15  ;;  %s3008_s10 = smov (!%p2013_p9, %s3004_s10), 15  ;;  %v1702_v15 = vunpack.c.l.bf16 %v1730_v12  ;;  %v1707_v16 = vunpack.c.h.bf16 %v1731_v6  ;;  %v1714_v17 = vunpack.c.l.bf16 %v1733_v13  ;;  %v1728_v18 = vld [vmem:[%s2011_s25 + $0x8] sm:$0xff]   ;;  %v1734_v24 = vld [vmem:[%s2011_s25 + $0x38] sm:$0xff]   ;;  %855 = vst [vmem:[#allocation2 + $0xd8] sm:$0x1] %v1903_v34 }
  0x1a   : > { %815 = vmatpush.msrb.mxu2 %v478_v1  ;;  %1663 = vmatmul.msk.f32.vlgmr.msra.gmra.mxu0 %vm488_vm0, %v1690_v7  ;;  %s1653_s16 = sshll.u32 %s3006_s12, 1  ;;  %s1660_s17 = sshll.u32 %s3008_s10, 1  ;;  %v1694_v19 = vunpack.c.l.bf16 %v1728_v18  ;;  %v1703_v20 = vunpack.c.h.bf16 %v1730_v12  ;;  %v1710_v21 = vunpack.c.l.bf16 %v1732_v10  ;;  %v1715_v22 = vunpack.c.h.bf16 %v1733_v13  ;;  %856 = vst [vmem:[#allocation2 + $0x11] sm:$0x1] %v1903_v34 }
  0x1b   : > { %1668 = vmatmul.msk.f32.vlgmr.msra.gmra.mxu1 %vm488_vm0, %v1699_v8  ;;  %1671 = vmatmul.msk.f32.vlgmr.msra.gmra.mxu2 %vm488_vm0, %v1706_v9  ;;  %s403_s13 = sadd.s32 %s1653_s16, %s1997_s19  ;;  %s420_s18 = sadd.s32 %s1660_s17, %s1997_s19  ;;  %v1695_v26 = vunpack.c.h.bf16 %v1728_v18  ;;  %v1718_v28 = vunpack.c.l.bf16 %v1734_v24  ;;  %v1698_v30 = vunpack.c.l.bf16 %v2019_v5  ;;  %v1719_v32 = vunpack.c.h.bf16 %v1734_v24  ;;  %857 = vst [vmem:[#allocation2 + $0x29] sm:$0x1] %v1903_v34 }
  0x1c   : > { %1674 = vmatmul.msk.f32.vlgmr.msra.gmra.mxu3 %vm488_vm0, %v1711_v11  ;;  %766 = vmatpush.msrb.mxu1 %v477_v2  ;;  %s1655_s20 = sshll.u32 %s403_s13, 2  ;;  %s1662_s21 = sshll.u32 %s420_s18, 2  ;;  %858 = vst [vmem:[#allocation2 + $0x41] sm:$0x1] %v1903_v34 }
  0x1d   : > { %816 = vmatpush.msrb.mxu2 %v477_v2  ;;  %s405_s9 = scalar_lea.vmem %s2908_s1, %s1655_s20  ;;  %s422_s14 = scalar_lea.vmem %s2909_s2, %s1662_s21  ;;  %859 = vst [vmem:[#allocation2 + $0x59] sm:$0x1] %v1903_v34 }
  0x1e   : > { %767 = vmatpush.msrb.mxu1 %v476_v3  ;;  %v1721_v23 = vld [vmem:[%s405_s9] sm:$0xff]   ;;  %860 = vst [vmem:[#allocation2 + $0x71] sm:$0x1] %v1903_v34  ;;  %s2523_s23 = scalar_select %p430_p10, 1, 0 }
  0x1f   : > { %817 = vmatpush.msrb.mxu2 %v476_v3  ;;  %v1725_v25 = vld [vmem:[%s422_s14] sm:$0xff]   ;;  %v1722_v27 = vunpack.c.l.bf16 %v1721_v23  ;;  %v1723_v31 = vunpack.c.h.bf16 %v1721_v23  ;;  %861 = vst [vmem:[#allocation2 + $0x89] sm:$0x1] %v1903_v34  ;;  %p433_p11 = scmp.lt.s32.totalorder %s1885_s24, 1  ;;  %p1683_p12 = scmp.ne.s32.totalorder %s1885_s24, 0 }
  0x20   : > { %v1726_v29 = vunpack.c.l.bf16 %v1725_v25  ;;  %v1727_v33 = vunpack.c.h.bf16 %v1725_v25  ;;  %862 = vst [vmem:[#allocation2 + $0xa1] sm:$0x1] %v1903_v34  ;;  %s432_s8 = scvt.s32.f32 %s2523_s23 }
  0x21   : > { %863 = vst [vmem:[#allocation2 + $0xb9] sm:$0x1] %v1903_v34  ;;  %s2583_s9 = scalar_select %p433_p11, 1, 0 }
  0x22   : > { %1664 = vmatmul.msk.f32.gmra.mxu0 %vm488_vm0, %v1691_v14  ;;  %864 = vst [vmem:[#allocation2 + $0xd1] sm:$0x1] %v1903_v34 }
  0x23   : > { %1669 = vmatmul.msk.f32.gmra.mxu1 %vm488_vm0, %v1702_v15  ;;  %1672 = vmatmul.msk.f32.gmra.mxu2 %vm488_vm0, %v1707_v16  ;;  %865 = vst [vmem:[#allocation2 + $0xe9] sm:$0x1] %v1903_v34  ;;  %s435_s10 = scvt.s32.f32 %s2583_s9 }
  0x24   : > { %1675 = vmatmul.msk.f32.gmra.mxu3 %vm488_vm0, %v1714_v17 }
  0x2a   : > { %1665 = vmatmul.msk.f32.gmra.mxu0 %vm488_vm0, %v1694_v19 }
  0x2b   : > { %1670 = vmatmul.msk.f32.gmra.mxu1 %vm488_vm0, %v1703_v20  ;;  %1673 = vmatmul.msk.f32.gmra.mxu2 %vm488_vm0, %v1710_v21 }
  0x2c   : > { %1676 = vmatmul.msk.f32.gmra.mxu3 %vm488_vm0, %v1715_v22 }
  0x32   : > { %1666 = vmatmul.msk.f32.gmra.mxu0 %vm488_vm0, %v1695_v26 }
  0x33   : > { %1679 = vmatmul.msk.f32.vlgmr.msrb.gmra.mxu1 %vm488_vm0, %v1722_v27  ;;  %1681 = vmatmul.msk.f32.vlgmr.msrb.gmra.mxu2 %vm488_vm0, %v1726_v29 }
  0x34   : > { %1677 = vmatmul.msk.f32.gmra.mxu3 %vm488_vm0, %v1718_v28 }
  0x3a   : > { %1667 = vmatmul.msk.f32.gmra.mxu0 %vm488_vm0, %v1698_v30 }
  0x3b   : > { %1680 = vmatmul.msk.f32.gmra.mxu1 %vm488_vm0, %v1723_v31  ;;  %1682 = vmatmul.msk.f32.gmra.mxu2 %vm488_vm0, %v1727_v33 }
  0x3c   : > { %1678 = vmatmul.msk.f32.gmra.mxu3 %vm488_vm0, %v1719_v32 }
  0x97   : > { %v554_v36 = vpop.f32.mrf.mxu0 }
  0x98   : > { %v569_v37 = vpop.f32.mrf.mxu1  ;;  %v2072_v38 = vadd.f32 %v2069_v35, %v554_v36 }
  0x99   : > { %v2075_v39 = vadd.f32 %v2069_v35, %v569_v37 }
  0x9a   : > { %v602_v40 = vmul.f32 %v2072_v38, %v2072_v38 }
  0x9b   : > { %v607_v41 = vmul.f32 %v2075_v39, %v2075_v39 }
  0x9c   : > { %v618_v42 = vmul.f32 %v602_v40, %v2072_v38 }
  0x9d   : > { %v623_v43 = vmul.f32 %v607_v41, %v2075_v39 }
  0x9e   : > { %v634_v44 = vmul.f32 0.044715, %v618_v42  ;;  %v578_v46 = vpop.f32.mrf.mxu2 }
  0x9f   : > { %v639_v45 = vmul.f32 0.044715, %v623_v43  ;;  %v587_v47 = vpop.f32.mrf.mxu3  ;;  %v2084_v48 = vadd.f32 %v2069_v35, %v578_v46  ;;  %v557_v50 = vpop.f32.mrf.mxu0 }
  0xa0   : > { %v2087_v49 = vadd.f32 %v2069_v35, %v587_v47  ;;  %v572_v51 = vpop.f32.mrf.mxu1  ;;  %v650_v52 = vadd.f32 %v634_v44, %v2072_v38  ;;  %v2092_v54 = vadd.f32 %v2069_v35, %v557_v50 }
  0xa1   : > { %v655_v53 = vadd.f32 %v639_v45, %v2075_v39  ;;  %v2095_v55 = vadd.f32 %v2069_v35, %v572_v51  ;;  %v610_v56 = vmul.f32 %v2084_v48, %v2084_v48 }
  0xa2   : > { %v613_v57 = vmul.f32 %v2087_v49, %v2087_v49  ;;  %v666_v58 = vmul.f32 0.7978846, %v650_v52  ;;  %v603_v60 = vmul.f32 %v2092_v54, %v2092_v54 }
  0xa3   : > { %v671_v59 = vmul.f32 0.7978846, %v655_v53  ;;  %v608_v61 = vmul.f32 %v2095_v55, %v2095_v55  ;;  %v626_v62 = vmul.f32 %v610_v56, %v2084_v48 }
  0xa4   : > { %v629_v63 = vmul.f32 %v613_v57, %v2087_v49  ;;  %1791 = vtanh.f32 %v666_v58  ;;  %v619_v0 = vmul.f32 %v603_v60, %v2092_v54 }
  0xa5   : > { %v624_v1 = vmul.f32 %v608_v61, %v2095_v55  ;;  %1793 = vtanh.f32 %v671_v59  ;;  %v642_v2 = vmul.f32 0.044715, %v626_v62 }
  0xa6   : > { %v645_v3 = vmul.f32 0.044715, %v629_v63  ;;  %v635_v4 = vmul.f32 0.044715, %v619_v0  ;;  %v581_v6 = vpop.f32.mrf.mxu2 }
  0xa7   : > { %v640_v5 = vmul.f32 0.044715, %v624_v1  ;;  %v590_v7 = vpop.f32.mrf.mxu3  ;;  %v658_v8 = vadd.f32 %v642_v2, %v2084_v48  ;;  %v2112_v10 = vadd.f32 %v2069_v35, %v581_v6  ;;  %v560_v12 = vpop.f32.mrf.mxu0 }
  0xa8   : > { %v661_v9 = vadd.f32 %v645_v3, %v2087_v49  ;;  %v2115_v11 = vadd.f32 %v2069_v35, %v590_v7  ;;  %v575_v13 = vpop.f32.mrf.mxu1  ;;  %v651_v14 = vadd.f32 %v635_v4, %v2092_v54  ;;  %v2120_v16 = vadd.f32 %v2069_v35, %v560_v12 }
  0xa9   : > { %v656_v15 = vadd.f32 %v640_v5, %v2095_v55  ;;  %v2123_v17 = vadd.f32 %v2069_v35, %v575_v13  ;;  %v674_v18 = vmul.f32 0.7978846, %v658_v8  ;;  %v611_v20 = vmul.f32 %v2112_v10, %v2112_v10 }
  0xaa   : > { %v677_v19 = vmul.f32 0.7978846, %v661_v9  ;;  %v614_v21 = vmul.f32 %v2115_v11, %v2115_v11  ;;  %v1792_v22 = vpop.eup %1791  ;;  %v667_v23 = vmul.f32 0.7978846, %v651_v14  ;;  %v604_v25 = vmul.f32 %v2120_v16, %v2120_v16 }
  0xab   : > { %v672_v24 = vmul.f32 0.7978846, %v656_v15  ;;  %v609_v26 = vmul.f32 %v2123_v17, %v2123_v17  ;;  %v1794_v27 = vpop.eup %1793  ;;  %v698_v28 = vadd.f32 1.0, %v1792_v22  ;;  %1795 = vtanh.f32 %v674_v18 }
  0xac   : > { %v627_v29 = vmul.f32 %v611_v20, %v2112_v10  ;;  %v630_v30 = vmul.f32 %v614_v21, %v2115_v11  ;;  %v703_v31 = vadd.f32 1.0, %v1794_v27  ;;  %1797 = vtanh.f32 %v677_v19  ;;  %v482_v21 = vld [vmem:[%s2912_s5 + $0x4] sm:$0x7] }
  0xad   : > { %v620_v32 = vmul.f32 %v604_v25, %v2120_v16  ;;  %v625_v33 = vmul.f32 %v609_v26, %v2123_v17  ;;  %v714_v34 = vmul.f32 0.5, %v698_v28  ;;  %1799 = vtanh.f32 %v667_v23 }
  0xae   : > { %v643_v36 = vmul.f32 0.044715, %v627_v29  ;;  %v646_v37 = vmul.f32 0.044715, %v630_v30  ;;  %v719_v40 = vmul.f32 0.5, %v703_v31  ;;  %1801 = vtanh.f32 %v672_v24  ;;  %v584_v46 = vpop.f32.mrf.mxu2 }
  0xaf   : > { %v636_v41 = vmul.f32 0.044715, %v620_v32  ;;  %v641_v42 = vmul.f32 0.044715, %v625_v33  ;;  %v2138_v43 = vmul.f32 %v714_v34, %v2072_v38  ;;  %v2150_v58 = vadd.f32 %v2069_v35, %v584_v46  ;;  %v593_v5 = vpop.f32.mrf.mxu3  ;;  %v563_v26 = vpop.f32.mrf.mxu0 }
  0xb0   : > { %v659_v44 = vadd.f32 %v643_v36, %v2112_v10  ;;  %v662_v45 = vadd.f32 %v646_v37, %v2115_v11  ;;  %v2143_v47 = vmul.f32 %v719_v40, %v2075_v39  ;;  %v2187_v30 = vperm.slane %v482_v21, 1 }
  0xb1   : > { %v652_v50 = vadd.f32 %v636_v41, %v2120_v16  ;;  %v657_v51 = vadd.f32 %v641_v42, %v2123_v17  ;;  %v1796_v52 = vpop.eup %1795  ;;  %872 = vst [vmem:[#allocation2 + $0x19] sm:$0xff] %v2138_v43  ;;  %v612_v8 = vmul.f32 %v2150_v58, %v2150_v58  ;;  %v2199_v36 = vadd.f32 %v2069_v35, %v563_v26 }
  0xb2   : > { %v675_v53 = vmul.f32 0.7978846, %v659_v44  ;;  %v678_v56 = vmul.f32 0.7978846, %v662_v45  ;;  %v1798_v57 = vpop.eup %1797  ;;  %877 = vst [vmem:[#allocation2 + $0x51] sm:$0xff] %v2143_v47  ;;  %v706_v38 = vadd.f32 1.0, %v1796_v52 }
  0xb3   : > { %v1800_v59 = vpop.eup %1799  ;;  %v709_v60 = vadd.f32 1.0, %v1798_v57  ;;  %v668_v39 = vmul.f32 0.7978846, %v652_v50  ;;  %v673_v61 = vmul.f32 0.7978846, %v657_v51  ;;  %v628_v15 = vmul.f32 %v612_v8, %v2150_v58  ;;  %2926 = vst [vmem:[#allocation4_spill] sm:$0xff] %v2187_v30 }
  0xb4   : > { %1803 = vtanh.f32 %v675_v53  ;;  %v1802_v62 = vpop.eup %1801  ;;  %v722_v63 = vmul.f32 0.5, %v706_v38  ;;  %v699_v0 = vadd.f32 1.0, %v1800_v59  ;;  %v2203_v40 = vperm.slane %v482_v21, 0 }
  0xb5   : > { %1805 = vtanh.f32 %v678_v56  ;;  %v725_v1 = vmul.f32 0.5, %v709_v60  ;;  %v704_v2 = vadd.f32 1.0, %v1802_v62  ;;  %v644_v28 = vmul.f32 0.044715, %v628_v15 }
  0xb6   : > { %1807 = vtanh.f32 %v668_v39  ;;  %v2153_v3 = vmul.f32 %v722_v63, %v2084_v48  ;;  %v715_v4 = vmul.f32 0.5, %v699_v0  ;;  %v2166_v48 = vadd.f32 %v2069_v35, %v593_v5 }
  0xb7   : > { %1809 = vtanh.f32 %v673_v61  ;;  %v2156_v6 = vmul.f32 %v725_v1, %v2087_v49  ;;  %v720_v7 = vmul.f32 0.5, %v704_v2  ;;  %v2208_v44 = vperm.slane %v482_v21, 2 }
  0xb8   : > { %880 = vst [vmem:[#allocation2 + $0x79] sm:$0xff] %v2153_v3  ;;  %v2162_v9 = vmul.f32 %v715_v4, %v2092_v54  ;;  %v481_v54 = vld [vmem:[%s2912_s5] sm:$0x7]  ;;  %v615_v22 = vmul.f32 %v2166_v48, %v2166_v48  ;;  %v890_v42 = vld [vmem:[#allocation2 + $0x18] sm:$0xff]  ;;  %v660_v46 = vadd.f32 %v644_v28, %v2150_v58  ;;  %v2218_v51 = vmul.f32 %v2187_v30, %v2138_v43 }
  0xb9   : > { %883 = vst [vmem:[#allocation2 + $0x99] sm:$0xff] %v2156_v6  ;;  %v2170_v14 = vmul.f32 %v720_v7, %v2095_v55  ;;  %v483_v55 = vld [vmem:[%s2912_s5 + $0x8] sm:$0x7]  ;;  %v2185_v29 = vperm.slane %v481_v54, 1  ;;  %v2201_v37 = vperm.slane %v481_v54, 0  ;;  %v2205_v41 = vperm.slane %v481_v54, 2 }
  0xba   : > { %v1804_v12 = vpop.eup %1803  ;;  %873 = vst [vmem:[#allocation2 + $0x21] sm:$0xff] %v2162_v9  ;;  %v2192_v32 = vperm.slane %v483_v55, 1  ;;  %v631_v34 = vmul.f32 %v615_v22, %v2166_v48  ;;  %v2210_v45 = vperm.slane %v483_v55, 2  ;;  %v2224_v53 = vperm.slane %v483_v55, 0  ;;  %v993_v56 = vld [vmem:[#allocation2 + $0x52] sm:$0xff] }
  0xbb   : > { %v1806_v13 = vpop.eup %1805  ;;  %v707_v19 = vadd.f32 1.0, %v1804_v12  ;;  %878 = vst [vmem:[#allocation2 + $0x61] sm:$0xff] %v2170_v14  ;;  %v956_v50 = vmul.f32 %v2185_v29, %v2138_v43  ;;  %v2222_v52 = vmul.f32 %v2185_v29, %v2143_v47  ;;  %v2228_v57 = vmul.f32 %v2187_v30, %v2143_v47 }
  0xbc   : > { %v1808_v49 = vpop.eup %1807  ;;  %v710_v20 = vadd.f32 1.0, %v1806_v13  ;;  %2925 = vst [vmem:[#allocation3_spill] sm:$0xff] %v2185_v29  ;;  %v2232_v38 = vmul.f32 %v2192_v32, %v2143_v47  ;;  %v647_v59 = vmul.f32 0.044715, %v631_v34  ;;  %v605_v43 = vmul.f32 %v2199_v36, %v2199_v36  ;;  %v769_v13 = vpop.f32.mrf.mxu1 }
  0xbd   : > { %v1810_v18 = vpop.eup %1809  ;;  %v723_v23 = vmul.f32 0.5, %v707_v19  ;;  %v700_v25 = vadd.f32 1.0, %v1808_v49  ;;  %2927 = vst [vmem:[#allocation5_spill] sm:$0xff] %v2218_v51  ;;  %v907_v60 = vmul.f32 %v2201_v37, %v890_v42  ;;  %v964_v39 = vmul.f32 %v2185_v29, %v2153_v3 }
  0xbe   : > { %v726_v24 = vmul.f32 0.5, %v710_v20  ;;  %v705_v27 = vadd.f32 1.0, %v1810_v18  ;;  %2928 = vst [vmem:[#allocation6_spill] sm:$0xff] %v2222_v52  ;;  %v2241_v61 = vmul.f32 %v2187_v30, %v2153_v3  ;;  %v2247_v63 = vmul.f32 %v2203_v40, %v890_v42 }
  0xbf   : > { %v2190_v31 = vmul.f32 %v723_v23, %v2112_v10  ;;  %v716_v10 = vmul.f32 0.5, %v700_v25  ;;  %2929 = vst [vmem:[#allocation7_spill] sm:$0xff] %v2228_v57  ;;  %v898_v47 = vld [vmem:[#allocation2 + $0x78] sm:$0xff]  ;;  %v2251_v0 = vmul.f32 %v2192_v32, %v2153_v3  ;;  %v676_v2 = vmul.f32 0.7978846, %v660_v46 }
  0xc0   : > { %v2195_v33 = vmul.f32 %v726_v24, %v2115_v11  ;;  %v721_v11 = vmul.f32 0.5, %v705_v27  ;;  %2930 = vst [vmem:[#allocation8_spill] sm:$0xff] %v2232_v38  ;;  %v2257_v4 = vmul.f32 %v2205_v41, %v993_v56  ;;  %v2260_v5 = vmul.f32 %v2208_v44, %v993_v56  ;;  %v999_v18 = vld [vmem:[#allocation2 + $0x9a] sm:$0xff] }
  0xc1   : > { %881 = vst [vmem:[#allocation2 + $0x81] sm:$0xff] %v2190_v31  ;;  %v2244_v62 = vmul.f32 %v716_v10, %v2120_v16  ;;  %v2264_v16 = vmul.f32 %v2185_v29, %v2156_v6  ;;  %v2268_v7 = vmul.f32 %v2187_v30, %v2156_v6  ;;  %v988_v3 = vld [vmem:[#allocation2 + $0x1a] sm:$0xff]  ;;  %1811 = vtanh.f32 %v676_v2  ;;  %v989_v26 = vld [vmem:[#allocation2 + $0x22] sm:$0xff] }
  0xc2   : > { %884 = vst [vmem:[#allocation2 + $0xa9] sm:$0xff] %v2195_v33  ;;  %v2254_v1 = vmul.f32 %v721_v11, %v2123_v17  ;;  %v2272_v17 = vmul.f32 %v2210_v45, %v993_v56  ;;  %v663_v8 = vadd.f32 %v647_v59, %v2166_v48  ;;  %v621_v12 = vmul.f32 %v605_v43, %v2199_v36  ;;  %v2284_v54 = vld [vmem:[#allocation2 + $0x60] sm:$0xff] }
  0xc3   : > { %2931 = vst [vmem:[#allocation9_spill] sm:$0xff] %v2247_v63  ;;  %v972_v49 = vadd.f32 %v956_v50, %v907_v60  ;;  %v915_v15 = vmul.f32 %v2201_v37, %v898_v47  ;;  %v2280_v19 = vmul.f32 %v2192_v32, %v2156_v6  ;;  %v957_v20 = vmul.f32 %v2185_v29, %v2162_v9  ;;  %v891_v21 = vld [vmem:[#allocation2 + $0x20] sm:$0xff] }
  0xc4   : > { %2932 = vst [vmem:[#allocation10_spill] sm:$0xff] %v2251_v0  ;;  %v2288_v22 = vmul.f32 %v2187_v30, %v2162_v9  ;;  %v962_v55 = vmul.f32 %v2185_v29, %v2170_v14  ;;  %v2294_v23 = vmul.f32 %v2187_v30, %v2170_v14  ;;  %v2298_v6 = vmul.f32 %v2192_v32, %v2170_v14 }
  0xc5   : > { %2933 = vst [vmem:[#allocation11_spill] sm:$0xff] %v2257_v4  ;;  %v1060_v24 = vmul.f32 %v2203_v40, %v898_v47  ;;  %v2302_v25 = vmul.f32 %v2224_v53, %v898_v47  ;;  %v1005_v9 = vmul.f32 %v2205_v41, %v988_v3  ;;  %v2306_v27 = vadd.f32 %v2069_v35, %v769_v13 }
  0xc6   : > { %2934 = vst [vmem:[#allocation12_spill] sm:$0xff] %v2260_v5  ;;  %v2309_v28 = vmul.f32 %v2205_v41, %v999_v18  ;;  %v913_v34 = vmul.f32 %v2201_v37, %v2284_v54  ;;  %v679_v10 = vmul.f32 0.7978846, %v663_v8  ;;  %v637_v14 = vmul.f32 0.044715, %v621_v12 }
  0xc7   : > { %874 = vst [vmem:[#allocation2 + $0x31] sm:$0xff] %v2244_v62  ;;  %v2313_v42 = vadd.f32 %v964_v39, %v915_v15  ;;  %v2316_v11 = vmul.f32 %v2208_v44, %v999_v18  ;;  %v2319_v46 = vmul.f32 %v2210_v45, %v999_v18  ;;  %v908_v50 = vmul.f32 %v2201_v37, %v891_v21  ;;  %v1812_v56 = vpop.eup %1811 }
  0xc8   : > { %2935 = vst [vmem:[#allocation13_spill] sm:$0xff] %v2272_v17  ;;  %v1006_v59 = vmul.f32 %v2205_v41, %v989_v26  ;;  %v2324_v43 = vmul.f32 %v2203_v40, %v891_v21  ;;  %v2327_v60 = vmul.f32 %v2208_v44, %v988_v3  ;;  %1813 = vtanh.f32 %v679_v10 }
  0xc9   : > { %879 = vst [vmem:[#allocation2 + $0x69] sm:$0xff] %v2254_v1  ;;  %v1021_v39 = vadd.f32 %v1005_v9, %v972_v49  ;;  %v708_v15 = vadd.f32 1.0, %v1812_v56  ;;  %v653_v18 = vadd.f32 %v637_v14, %v2199_v36  ;;  %v978_v21 = vadd.f32 %v962_v55, %v913_v34  ;;  %v596_v9 = vpop.f32.mrf.mxu3 }
  0xca   : > { %2936 = vst [vmem:[#allocation14_spill] sm:$0xff] %v2288_v22  ;;  %v963_v10 = vmul.f32 %v2185_v29, %v2254_v1  ;;  %v2349_v22 = vld [vmem:[#allocation2 + $0x80] sm:$0xff]  ;;  %v965_v56 = vmul.f32 %v2185_v29, %v2190_v31  ;;  %v1103_v55 = vmul.f32 %v2187_v30, %v2244_v62  ;;  %v973_v34 = vadd.f32 %v957_v20, %v908_v50 }
  0xcb   : > { %2937 = vst [vmem:[#allocation15_spill] sm:$0xff] %v2294_v23  ;;  %v724_v63 = vmul.f32 0.5, %v708_v15  ;;  %v775_v20 = vmul.f32 %v2306_v27, %v2306_v27  ;;  %v916_v50 = vmul.f32 %v2201_v37, %v2349_v22 }
  0xcc   : > { %2938 = vst [vmem:[#allocation16_spill] sm:$0xff] %v2298_v6 }
  0xcd   : > { %2939 = vst [vmem:[#allocation17_spill] sm:$0xff] %v2302_v25  ;;  %v740_v15 = vmul.f32 %v724_v63, %v2150_v58  ;;  %v2384_v58 = vmul.f32 %v2224_v53, %v2284_v54 }
  0xce   : > { %2940 = vst [vmem:[#allocation18_spill] sm:$0xff] %v2324_v43  ;;  %v2329_v47 = vld [vmem:[#allocation2 + $0x30] sm:$0xff]  ;;  %v1814_v6 = vpop.eup %1813 }
  0xcf   : > { %2941 = vst [vmem:[#allocation19_spill] sm:$0xff] %v2327_v60  ;;  %v1054_v2 = vmul.f32 %v2203_v40, %v2329_v47  ;;  %v2347_v60 = vmul.f32 %v2208_v44, %v989_v26  ;;  %v669_v26 = vmul.f32 0.7978846, %v653_v18  ;;  %v711_v18 = vadd.f32 1.0, %v1814_v6 }
  0xd0   : > { %v2333_v8 = vld [vmem:[#allocation2 + $0x68] sm:$0xff]  ;;  %2948 = vst [vmem:[#allocation26_spill] sm:$0xff] %v2384_v58 }
  0xd1   : > { %v2335_v12 = vld [vmem:[#allocation2 + $0x62] sm:$0xff]  ;;  %v2337_v13 = vld [vmem:[#allocation2 + $0x6a] sm:$0xff]  ;;  %v914_v3 = vmul.f32 %v2201_v37, %v2333_v8  ;;  %2944 = vst [vmem:[#allocation22_spill] sm:$0xff] %v2347_v60  ;;  %v1070_v14 = vadd.f32 %v1054_v2, %v1021_v39  ;;  %v2360_v60 = vadd.f32 %v2069_v35, %v596_v9  ;;  %v1061_v39 = vmul.f32 %v2203_v40, %v2349_v22 }
  0xd2   : > { %2942 = vst [vmem:[#allocation20_spill] sm:$0xff] %v2335_v12  ;;  %v1011_v49 = vmul.f32 %v2205_v41, %v2335_v12  ;;  %v1012_v51 = vmul.f32 %v2205_v41, %v2337_v13  ;;  %1815 = vtanh.f32 %v669_v26  ;;  %v727_v63 = vmul.f32 0.5, %v711_v18 }
  0xd3   : > { %2943 = vst [vmem:[#allocation21_spill] sm:$0xff] %v2337_v13  ;;  %v979_v0 = vadd.f32 %v963_v10, %v914_v3  ;;  %v2357_v25 = vadd.f32 %v1103_v55, %v1070_v14  ;;  %v1110_v3 = vmul.f32 %v2187_v30, %v2190_v31  ;;  %v2375_v10 = vmul.f32 %v2192_v32, %v2190_v31  ;;  %v2399_v55 = vld [vmem:[#allocation2 + $0xa8] sm:$0xff] }
  0xd4   : > { %v1027_v43 = vadd.f32 %v1011_v49, %v978_v21  ;;  %v2368_v21 = vld [vmem:[#allocation2 + $0x7a] sm:$0xff]  ;;  %882 = vst [vmem:[#allocation2 + $0x91] sm:$0xff] %v740_v15  ;;  %v616_v6 = vmul.f32 %v2360_v60, %v2360_v60  ;;  %v2388_v49 = vld [vmem:[#allocation2 + $0x82] sm:$0xff]  ;;  %v777_v9 = vmul.f32 %v775_v20, %v2306_v27  ;;  %v2397_v14 = vadd.f32 %v1006_v59, %v973_v34 }
  0xd5   : > { %2945 = vst [vmem:[#allocation23_spill] sm:$0xff] %v2357_v25  ;;  %v1028_v2 = vadd.f32 %v1012_v51, %v979_v0  ;;  %v1013_v31 = vmul.f32 %v2205_v41, %v2368_v21  ;;  %v2402_v26 = vmul.f32 %v727_v63, %v2166_v48  ;;  %v2413_v18 = vmul.f32 %v2192_v32, %v2195_v33 }
  0xd6   : > { %v1076_v23 = vadd.f32 %v1060_v24, %v1027_v43  ;;  %2946 = vst [vmem:[#allocation24_spill] sm:$0xff] %v2375_v10  ;;  %v819_v24 = vpop.f32.mrf.mxu2  ;;  %v2380_v43 = vmul.f32 %v2203_v40, %v2284_v54  ;;  %v981_v54 = vadd.f32 %v965_v56, %v916_v50  ;;  %v2417_v59 = vmul.f32 %v2185_v29, %v2244_v62 }
  0xd7   : > { %v1077_v51 = vadd.f32 %v1061_v39, %v1028_v2  ;;  %v2405_v39 = vadd.f32 %v2069_v35, %v819_v24  ;;  %v2409_v2 = vmul.f32 %v2187_v30, %v2195_v33  ;;  %v2421_v56 = vmul.f32 %v2192_v32, %v2244_v62  ;;  %885 = vst [vmem:[#allocation2 + $0xb1] sm:$0xff] %v2402_v26 }
  0xd8   : > { %v1125_v0 = vadd.f32 %v2241_v61, %v1076_v23  ;;  %2947 = vst [vmem:[#allocation25_spill] sm:$0xff] %v2380_v43  ;;  %v2394_v61 = vmul.f32 %v2185_v29, %v2195_v33  ;;  %v1816_v48 = vpop.eup %1815  ;;  %v1014_v34 = vmul.f32 %v2205_v41, %v2388_v49  ;;  %v1158_v20 = vmul.f32 %v2208_v44, %v2368_v21 }
  0xd9   : > { %v1126_v23 = vadd.f32 %v1110_v3, %v1077_v51  ;;  %2949 = vst [vmem:[#allocation27_spill] sm:$0xff] %v2417_v59  ;;  %v1159_v50 = vmul.f32 %v2208_v44, %v2388_v49  ;;  %v632_v33 = vmul.f32 %v616_v6, %v2360_v60  ;;  %v1029_v3 = vadd.f32 %v1013_v31, %v2313_v42 }
  0xda   : > { %2950 = vst [vmem:[#allocation28_spill] sm:$0xff] %v2421_v56  ;;  %v1064_v62 = vmul.f32 %v2203_v40, %v2399_v55  ;;  %v701_v51 = vadd.f32 1.0, %v1816_v48  ;;  %v779_v24 = vmul.f32 0.044715, %v777_v9  ;;  %v1030_v63 = vadd.f32 %v1014_v34, %v981_v54 }
  0xdb   : > { %v966_v56 = vmul.f32 %v2185_v29, %v740_v15  ;;  %v1111_v10 = vmul.f32 %v2187_v30, %v740_v15  ;;  %v825_v58 = vmul.f32 %v2405_v39, %v2405_v39  ;;  %v900_v17 = vld [vmem:[#allocation2 + $0x90] sm:$0xff]  ;;  %v901_v5 = vld [vmem:[#allocation2 + $0x98] sm:$0xff]  ;;  %v1174_v38 = vadd.f32 %v1158_v20, %v1125_v0 }
  0xdc   : > { %v998_v43 = vld [vmem:[#allocation2 + $0x92] sm:$0xff]  ;;  %v1175_v6 = vadd.f32 %v1159_v50, %v1126_v23  ;;  %v1257_v42 = vmul.f32 %v2192_v32, %v740_v15  ;;  %v717_v31 = vmul.f32 0.5, %v701_v51  ;;  %v917_v57 = vmul.f32 %v2201_v37, %v900_v17 }
  0xdd   : > { %v918_v9 = vmul.f32 %v2201_v37, %v901_v5  ;;  %v1062_v54 = vmul.f32 %v2203_v40, %v900_v17  ;;  %v648_v48 = vmul.f32 0.044715, %v632_v33  ;;  %v1063_v34 = vmul.f32 %v2203_v40, %v901_v5 }
  0xde   : > { %v1208_v4 = vmul.f32 %v2224_v53, %v900_v17  ;;  %v1209_v52 = vmul.f32 %v2224_v53, %v901_v5  ;;  %v781_v25 = vadd.f32 %v779_v24, %v2306_v27  ;;  %v982_v0 = vadd.f32 %v966_v56, %v917_v57  ;;  %v2452_v29 = vld [vmem:[#allocation2 + $0xb0] sm:$0xff] }
  0xdf   : > { %v983_v23 = vadd.f32 %v2264_v16, %v918_v9  ;;  %v1015_v15 = vmul.f32 %v2205_v41, %v998_v43  ;;  %v1078_v20 = vadd.f32 %v1062_v54, %v1029_v3  ;;  %v1079_v50 = vadd.f32 %v1063_v34, %v1030_v63 }
  0xe0   : > { %v1224_v51 = vadd.f32 %v1208_v4, %v1174_v38  ;;  %v1225_v13 = vadd.f32 %v1209_v52, %v1175_v6  ;;  %v2449_v12 = vmul.f32 %v717_v31, %v2199_v36  ;;  %v1160_v17 = vmul.f32 %v2208_v44, %v998_v43  ;;  %v2461_v36 = vld [vmem:[%s2913_s6] ss:$0 sm:$0xff]  ;;  %v2471_v6 = vld [vmem:[#allocation2 + $0xaa] sm:$0xff] }
  0xe1   : > { %v1031_v33 = vadd.f32 %v1015_v15, %v982_v0  ;;  %v1127_v59 = vadd.f32 %v1111_v10, %v1078_v20  ;;  %v664_v5 = vadd.f32 %v648_v48, %v2360_v60  ;;  %v1128_v57 = vadd.f32 %v2268_v7, %v1079_v50  ;;  %v2495_v0 = vld [vmem:[#allocation2 + $0xb2] sm:$0xff] }
  0xe2   : > { %v1273_v16 = vadd.f32 %v1257_v42, %v1224_v51  ;;  %v1274_v56 = vadd.f32 %v2280_v19, %v1225_v13  ;;  %v1306_v3 = vmul.f32 %v2210_v45, %v998_v43  ;;  %875 = vst [vmem:[#allocation2 + $0x39] sm:$0xff] %v2449_v12  ;;  %v1210_v52 = vmul.f32 %v2224_v53, %v2399_v55  ;;  %v566_v43 = vpop.f32.mrf.mxu0 }
  0xe3   : > { %v1080_v38 = vadd.f32 %v1064_v62, %v1031_v33  ;;  %v1176_v4 = vadd.f32 %v1160_v17, %v1127_v59  ;;  %v1032_v10 = vadd.f32 %v2309_v28, %v983_v23  ;;  %v1065_v19 = vmul.f32 %v2203_v40, %v2452_v29 }
  0xe4   : > { %v1322_v7 = vadd.f32 %v1306_v3, %v1273_v16  ;;  %v1323_v24 = vadd.f32 %v2319_v46, %v1274_v56  ;;  %v827_v13 = vmul.f32 %v825_v58, %v2405_v39  ;;  %v1114_v42 = vmul.f32 %v2187_v30, %v2402_v26 }
  0xe5   : > { %v1226_v63 = vadd.f32 %v1210_v52, %v1176_v4  ;;  %v2476_v59 = vadd.f32 %v2409_v2, %v1080_v38  ;;  %v783_v28 = vmul.f32 0.7978846, %v781_v25  ;;  %v1081_v31 = vadd.f32 %v1065_v19, %v1032_v10 }
  0xe6   : > { %v2479_v62 = vadd.f32 %v2461_v36, %v1322_v7  ;;  %v2482_v46 = vadd.f32 %v2461_v36, %v1323_v24  ;;  %v680_v58 = vmul.f32 0.7978846, %v664_v5  ;;  %v1177_v9 = vadd.f32 %v2316_v11, %v1128_v57  ;;  %v772_v5 = vpop.f32.mrf.mxu1 }
  0xe7   : > { %v1211_v54 = vmul.f32 %v2224_v53, %v2452_v29  ;;  %v1275_v48 = vadd.f32 %v2413_v18, %v1226_v63  ;;  %v2489_v34 = vadd.f32 %v2069_v35, %v566_v43  ;;  %v2497_v23 = vadd.f32 %v1114_v42, %v1081_v31 }
  0xe8   : > { %v1357_v25 = vmul.f32 %v2479_v62, %v2479_v62  ;;  %v1358_v2 = vmul.f32 %v2482_v46, %v2482_v46  ;;  %v1308_v11 = vmul.f32 %v2210_v45, %v2471_v6  ;;  %v2504_v18 = vmul.f32 %v2187_v30, %v2254_v1 }
  0xe9   : > { %v1227_v15 = vadd.f32 %v1211_v54, %v1177_v9  ;;  %v1260_v20 = vmul.f32 %v2192_v32, %v2402_v26  ;;  %v2508_v50 = vld [vmem:[#allocation2 + $0x38] sm:$0xff]  ;;  %1817 = vtanh.f32 %v783_v28  ;;  %v1309_v16 = vmul.f32 %v2210_v45, %v2495_v0 }
  0xea   : > { %v1373_v51 = vmul.f32 %v1357_v25, %v2479_v62  ;;  %v1374_v33 = vmul.f32 %v1358_v2, %v2482_v46  ;;  %v1324_v17 = vadd.f32 %v1308_v11, %v1275_v48  ;;  %1819 = vtanh.f32 %v680_v58  ;;  %v599_v48 = vpop.f32.mrf.mxu3 }
  0xeb   : > { %v1276_v57 = vadd.f32 %v1260_v20, %v1227_v15  ;;  %v829_v56 = vmul.f32 0.044715, %v827_v13  ;;  %v606_v3 = vmul.f32 %v2489_v34, %v2489_v34  ;;  %v1055_v10 = vmul.f32 %v2203_v40, %v2508_v50 }
  0xec   : > { %v1389_v52 = vmul.f32 0.044715, %v1373_v51  ;;  %v1390_v38 = vmul.f32 0.044715, %v1374_v33  ;;  %v2517_v4 = vadd.f32 %v2461_v36, %v1324_v17  ;;  %v2527_v7 = vmul.f32 %v2192_v32, %v2254_v1 }
  0xed   : > { %v1325_v24 = vadd.f32 %v1309_v16, %v1276_v57  ;;  %v1104_v19 = vmul.f32 %v2187_v30, %v2449_v12  ;;  %v2532_v13 = vadd.f32 %v2069_v35, %v772_v5  ;;  %v1071_v28 = vadd.f32 %v1055_v10, %v2397_v14 }
  0xee   : > { %v1405_v43 = vadd.f32 %v1389_v52, %v2479_v62  ;;  %v1406_v63 = vadd.f32 %v1390_v38, %v2482_v46  ;;  %v1359_v42 = vmul.f32 %v2517_v4, %v2517_v4  ;;  %v2541_v1 = vmul.f32 %v2224_v53, %v2349_v22 }
  0xef   : > { %v1818_v31 = vpop.eup %1817  ;;  %v2544_v58 = vadd.f32 %v2461_v36, %v1325_v24  ;;  %v831_v9 = vadd.f32 %v829_v56, %v2405_v39  ;;  %v622_v54 = vmul.f32 %v606_v3, %v2489_v34  ;;  %v2549_v20 = vadd.f32 %v1104_v19, %v1071_v28 }
  0xf0   : > { %v1820_v25 = vpop.eup %1819  ;;  %v1421_v2 = vmul.f32 0.7978846, %v1405_v43  ;;  %v1422_v11 = vmul.f32 0.7978846, %v1406_v63  ;;  %v1375_v15 = vmul.f32 %v1359_v42, %v2517_v4  ;;  %v2554_v22 = vmul.f32 %v2210_v45, %v2368_v21  ;;  %v822_v43 = vpop.f32.mrf.mxu2 }
  0xf1   : > { %v2558_v14 = vmul.f32 %v2210_v45, %v2388_v49  ;;  %v1360_v51 = vmul.f32 %v2544_v58, %v2544_v58  ;;  %v776_v33 = vmul.f32 %v2532_v13, %v2532_v13  ;;  %v919_v17 = vmul.f32 %v2201_v37, %v2399_v55 }
  0xf2   : > { %1821 = vtanh.f32 %v1421_v2  ;;  %v1391_v5 = vmul.f32 0.044715, %v1375_v15  ;;  %v2567_v57 = vadd.f32 %v2069_v35, %v599_v48  ;;  %v787_v16 = vadd.f32 1.0, %v1818_v31 }
  0xf3   : > { %1823 = vtanh.f32 %v1422_v11  ;;  %v1376_v21 = vmul.f32 %v1360_v51, %v2544_v58  ;;  %v712_v49 = vadd.f32 1.0, %v1820_v25  ;;  %v2571_v3 = vstv %s432_s8 }
  0xf4   : > { %v1407_v56 = vadd.f32 %v1391_v5, %v2517_v4  ;;  %v833_v52 = vmul.f32 0.7978846, %v831_v9  ;;  %v638_v38 = vmul.f32 0.044715, %v622_v54  ;;  %v789_v55 = vmul.f32 0.5, %v787_v16 }
  0xf5   : > { %v1392_v10 = vmul.f32 0.044715, %v1376_v21  ;;  %v728_v24 = vmul.f32 0.5, %v712_v49  ;;  %v778_v19 = vmul.f32 %v776_v33, %v2532_v13  ;;  %v617_v28 = vmul.f32 %v2567_v57, %v2567_v57 }
  0xf6   : > { %v1423_v63 = vmul.f32 0.7978846, %v1407_v56  ;;  %1825 = vtanh.f32 %v833_v52  ;;  %v654_v42 = vadd.f32 %v638_v38, %v2489_v34  ;;  %v791_v48 = vmul.f32 %v789_v55, %v2306_v27 }
  0xf7   : > { %v1408_v31 = vadd.f32 %v1392_v10, %v2544_v58  ;;  %v744_v9 = vmul.f32 %v728_v24, %v2360_v60  ;;  %v780_v54 = vmul.f32 0.044715, %v778_v19  ;;  %v633_v11 = vmul.f32 %v617_v28, %v2567_v57 }
  0xf8   : > { %v1822_v25 = vpop.eup %1821  ;;  %1827 = vtanh.f32 %v1423_v63  ;;  %v670_v2 = vmul.f32 0.7978846, %v654_v42  ;;  %v2587_v15 = vadd.f32 %v2069_v35, %v822_v43  ;;  %v984_v33 = vadd.f32 %v2394_v61, %v919_v17 }
  0xf9   : > { %v1824_v51 = vpop.eup %1823  ;;  %v1453_v5 = vadd.f32 1.0, %v1822_v25  ;;  %v1424_v27 = vmul.f32 0.7978846, %v1408_v31  ;;  %v2591_v60 = vmul.f32 %v2571_v3, %v791_v48  ;;  %886 = vst [vmem:[#allocation2 + $0xc1] sm:$0xff] %v744_v9  ;;  %v909_v21 = vmul.f32 %v2201_v37, %v2329_v47 }
  0xfa   : > { %v1454_v16 = vadd.f32 1.0, %v1824_v51  ;;  %1829 = vtanh.f32 %v670_v2  ;;  %v782_v49 = vadd.f32 %v780_v54, %v2532_v13  ;;  %v2598_v35 = vmul.f32 %v2224_v53, %v2329_v47 }
  0xfb   : > { %v1469_v56 = vmul.f32 0.5, %v1453_v5  ;;  %1831 = vtanh.f32 %v1424_v27  ;;  %866 = vst [vmem:[#allocation2 + $0x1] sm:$0xff] %v2591_v60  ;;  %v649_v61 = vmul.f32 0.044715, %v633_v11  ;;  %v1017_v38 = vmul.f32 %v2205_v41, %v2471_v6 }
  0xfc   : > { %v1826_v17 = vpop.eup %1825  ;;  %v1470_v52 = vmul.f32 0.5, %v1454_v16  ;;  %v784_v10 = vmul.f32 0.7978846, %v782_v49  ;;  %v826_v55 = vmul.f32 %v2587_v15, %v2587_v15  ;;  %v1162_v47 = vmul.f32 %v2208_v44, %v2471_v6 }
  0xfd   : > { %v2607_v24 = vmul.f32 %v1469_v56, %v2479_v62  ;;  %v837_v19 = vadd.f32 1.0, %v1826_v17  ;;  %v665_v43 = vadd.f32 %v649_v61, %v2567_v57  ;;  %v920_v28 = vmul.f32 %v2201_v37, %v2452_v29 }
  0xfe   : > { %v1828_v63 = vpop.eup %1827  ;;  %v2613_v42 = vmul.f32 %v1470_v52, %v2482_v46  ;;  %1833 = vtanh.f32 %v784_v10  ;;  %v828_v31 = vmul.f32 %v826_v55, %v2587_v15  ;;  %v1178_v48 = vadd.f32 %v1162_v47, %v2476_v59 }
  0xff   : > { %2951 = vst [vmem:[#allocation29_spill] sm:$0xff] %v2607_v24  ;;  %v1455_v62 = vadd.f32 1.0, %v1828_v63  ;;  %v839_v54 = vmul.f32 0.5, %v837_v19  ;;  %v681_v25 = vmul.f32 0.7978846, %v665_v43  ;;  %v1033_v6 = vadd.f32 %v1017_v38, %v984_v33 }
 0x100   : > { %2952 = vst [vmem:[#allocation30_spill] sm:$0xff] %v2613_v42  ;;  %v1830_v2 = vpop.eup %1829  ;;  %v1049_v11 = vld [vmem:[#allocation2 + $0xc0] sm:$0xff]  ;;  %v1115_v51 = vmul.f32 %v2187_v30, %v744_v9  ;;  %v2620_v5 = vstv %s435_s10  ;;  %v830_v46 = vmul.f32 0.044715, %v828_v31  ;;  %v1261_v10 = vmul.f32 %v2192_v32, %v744_v9  ;;  %v990_v31 = vld [vmem:[#allocation2 + $0x32] sm:$0xff] }
 0x101   : > { %2953 = vst [vmem:[#allocation31_spill] sm:$0xff] %v2620_v5  ;;  %v1832_v27 = vpop.eup %1831  ;;  %v1471_v16 = vmul.f32 0.5, %v1455_v62  ;;  %v1066_v29 = vmul.f32 %v2203_v40, %v1049_v11  ;;  %v1212_v49 = vmul.f32 %v2224_v53, %v1049_v11  ;;  %v841_v56 = vmul.f32 %v839_v54, %v2405_v39  ;;  %v2957_v9 = vld [vmem:[#allocation3_spill] sm:$0xff] }
 0x102   : > { %v1456_v59 = vadd.f32 1.0, %v1832_v27  ;;  %v702_v61 = vadd.f32 1.0, %v1830_v2  ;;  %1835 = vtanh.f32 %v681_v25  ;;  %v832_v17 = vadd.f32 %v830_v46, %v2587_v15  ;;  %v2959_v11 = vld [vmem:[#allocation27_spill] sm:$0xff]  ;;  %v2960_v46 = vld [vmem:[#allocation20_spill] sm:$0xff] }
 0x103   : > { %v2627_v33 = vmul.f32 %v1471_v16, %v2517_v4  ;;  %v1082_v52 = vadd.f32 %v1066_v29, %v1033_v6  ;;  %v1228_v38 = vadd.f32 %v1212_v49, %v1178_v48  ;;  %v2631_v19 = vmul.f32 %v2620_v5, %v841_v56  ;;  %v2961_v56 = vld [vmem:[#allocation21_spill] sm:$0xff]  ;;  %v2965_v5 = vld [vmem:[#allocation7_spill] sm:$0xff] }
 0x104   : > { %v1834_v55 = vpop.eup %1833  ;;  %v1472_v47 = vmul.f32 0.5, %v1456_v59  ;;  %v718_v43 = vmul.f32 0.5, %v702_v61  ;;  %v834_v63 = vmul.f32 0.7978846, %v832_v17  ;;  %v910_v39 = vmul.f32 %v2201_v37, %v2508_v50  ;;  %v2661_v59 = vld [vmem:[#allocation2 + $0x3a] sm:$0xff] }
 0x105   : > { %2954 = vst [vmem:[#allocation32_spill] sm:$0xff] %v2627_v33  ;;  %v2635_v62 = vadd.f32 %v1115_v51, %v1082_v52  ;;  %v2637_v54 = vadd.f32 %v1261_v10, %v1228_v38  ;;  %v788_v4 = vadd.f32 1.0, %v1834_v55  ;;  %v2641_v48 = vmul.f32 %v2203_v40, %v2333_v8  ;;  %v888_v61 = vld [vmem:[#allocation2] sm:$0xff] }
 0x106   : > { %2955 = vst [vmem:[#allocation33_spill] sm:$0xff] %v2631_v19  ;;  %v969_v25 = vmul.f32 %v2957_v9, %v2402_v26  ;;  %v2646_v2 = vmul.f32 %v1472_v47, %v2544_v58  ;;  %v734_v6 = vmul.f32 %v718_v43, %v2489_v34  ;;  %v974_v51 = vadd.f32 %v2959_v11, %v909_v21 }
 0x107   : > { %2956 = vst [vmem:[#allocation34_spill] sm:$0xff] %v2635_v62  ;;  %v2653_v27 = vmul.f32 %v2208_v44, %v2960_v46  ;;  %v959_v16 = vmul.f32 %v2957_v9, %v2449_v12  ;;  %v790_v29 = vmul.f32 0.5, %v788_v4  ;;  %v2659_v26 = vmul.f32 %v2208_v44, %v2961_v56 }
 0x108   : > { %2958 = vst [vmem:[#allocation3_spill] sm:$0xff] %v2646_v2  ;;  %v1836_v49 = vpop.eup %1835  ;;  %v985_v58 = vadd.f32 %v969_v25, %v920_v28  ;;  %v1007_v34 = vmul.f32 %v2205_v41, %v990_v31  ;;  %1837 = vtanh.f32 %v834_v63  ;;  %v1152_v17 = vmul.f32 %v2208_v44, %v990_v31 }
 0x109   : > { %869 = vst [vmem:[#allocation2 + $0xd9] sm:$0xff] %v2631_v19  ;;  %v975_v21 = vadd.f32 %v959_v16, %v910_v39  ;;  %v792_v52 = vmul.f32 %v790_v29, %v2532_v13  ;;  %v713_v38 = vadd.f32 1.0, %v1836_v49  ;;  %v2668_v10 = vmul.f32 %v2224_v53, %v2333_v8  ;;  %v2962_v16 = vld [vmem:[#allocation23_spill] sm:$0xff] }
 0x10a   : > { %876 = vst [vmem:[#allocation2 + $0x49] sm:$0xff] %v734_v6  ;;  %v2672_v28 = vmul.f32 %v2210_v45, %v2960_v46  ;;  %v2676_v55 = vmul.f32 %v2210_v45, %v2961_v56  ;;  %v1018_v47 = vmul.f32 %v2205_v41, %v2495_v0  ;;  %v1008_v43 = vmul.f32 %v2205_v41, %v2661_v59 }
 0x10b   : > { %v905_v13 = vmul.f32 %v2201_v37, %v888_v61  ;;  %v795_v63 = vmul.f32 %v2571_v3, %v792_v52  ;;  %v729_v8 = vmul.f32 0.5, %v713_v38  ;;  %v2688_v4 = vmul.f32 %v2208_v44, %v2495_v0 }
 0x10c   : > { %v2684_v39 = vadd.f32 %v1018_v47, %v985_v58  ;;  %v1023_v25 = vadd.f32 %v1007_v34, %v974_v51  ;;  %v1153_v11 = vmul.f32 %v2208_v44, %v2661_v59  ;;  %v1024_v46 = vadd.f32 %v1008_v43, %v975_v21 }
 0x10d   : > { %v1168_v29 = vadd.f32 %v1152_v17, %v2962_v16  ;;  %v954_v49 = vmul.f32 %v2957_v9, %v2591_v60  ;;  %867 = vst [vmem:[#allocation2 + $0x9] sm:$0xff] %v795_v63  ;;  %v2696_v3 = vmul.f32 %v729_v8, %v2567_v57  ;;  %v2701_v0 = vmul.f32 %v2224_v53, %v2508_v50 }
 0x10e   : > { %v1838_v56 = vpop.eup %1837  ;;  %v1169_v58 = vadd.f32 %v1153_v11, %v2549_v20  ;;  %v2705_v51 = vmul.f32 %v2192_v32, %v2449_v12  ;;  %v2708_v34 = vmul.f32 %v2210_v45, %v990_v31  ;;  %v960_v57 = vmul.f32 %v2957_v9, %v734_v6 }
 0x10f   : > { %v970_v61 = vadd.f32 %v954_v49, %v905_v13  ;;  %v1105_v52 = vmul.f32 %v2187_v30, %v734_v6  ;;  %v1251_v20 = vmul.f32 %v2192_v32, %v734_v6  ;;  %887 = vst [vmem:[#allocation2 + $0xc9] sm:$0xff] %v2696_v3  ;;  %v955_v31 = vmul.f32 %v2957_v9, %v795_v63  ;;  %v2963_v6 = vld [vmem:[#allocation6_spill] sm:$0xff]  ;;  %v2964_v63 = vld [vmem:[#allocation11_spill] sm:$0xff] }
 0x110   : > { %v2721_v8 = vadd.f32 1.0, %v1838_v56 }
 0x111   : > { %v894_v60 = vld [vmem:[#allocation2 + $0x48] sm:$0xff]  ;;  %v895_v21 = vld [vmem:[#allocation2 + $0x50] sm:$0xff] }
 0x112   : > { %v992_v17 = vld [vmem:[#allocation2 + $0x4a] sm:$0xff]  ;;  %v911_v50 = vmul.f32 %v2201_v37, %v894_v60  ;;  %v912_v12 = vmul.f32 %v2201_v37, %v895_v21  ;;  %v1056_v38 = vmul.f32 %v2203_v40, %v894_v60  ;;  %v1057_v47 = vmul.f32 %v2203_v40, %v895_v21 }
 0x113   : > { %v1202_v43 = vmul.f32 %v2224_v53, %v894_v60  ;;  %v1203_v13 = vmul.f32 %v2224_v53, %v895_v21  ;;  %v1009_v49 = vmul.f32 %v2205_v41, %v992_v17  ;;  %v1154_v42 = vmul.f32 %v2208_v44, %v992_v17 }
 0x114   : > { %v976_v11 = vadd.f32 %v960_v57, %v911_v50  ;;  %v977_v16 = vadd.f32 %v2963_v6, %v912_v12  ;;  %v1072_v2 = vadd.f32 %v1056_v38, %v1023_v25  ;;  %v1073_v33 = vadd.f32 %v1057_v47, %v1024_v46  ;;  %v889_v21 = vld [vmem:[#allocation2 + $0x8] sm:$0xff]  ;;  %v2966_v12 = vld [vmem:[#allocation8_spill] sm:$0xff]  ;;  %v2967_v38 = vld [vmem:[#allocation25_spill] sm:$0xff] }
 0x115   : > { %v1218_v24 = vadd.f32 %v1202_v43, %v1168_v29  ;;  %v1219_v19 = vadd.f32 %v1203_v13, %v1169_v58  ;;  %v1300_v60 = vmul.f32 %v2210_v45, %v992_v17  ;;  %v986_v56 = vld [vmem:[#allocation2 + $0x2] sm:$0xff]  ;;  %v906_v25 = vmul.f32 %v2201_v37, %v889_v21  ;;  %v987_v46 = vld [vmem:[#allocation2 + $0xa] sm:$0xff] }
 0x116   : > { %v1025_v9 = vadd.f32 %v1009_v49, %v976_v11  ;;  %v1026_v30 = vadd.f32 %v2964_v63, %v977_v16  ;;  %v1121_v62 = vadd.f32 %v1105_v52, %v1072_v2  ;;  %v1122_v57 = vadd.f32 %v2965_v5, %v1073_v33  ;;  %v2968_v2 = vld [vmem:[#allocation12_spill] sm:$0xff]  ;;  %v2969_v13 = vld [vmem:[#allocation13_spill] sm:$0xff]  ;;  %v2970_v5 = vld [vmem:[#allocation15_spill] sm:$0xff] }
 0x117   : > { %v1267_v50 = vadd.f32 %v1251_v20, %v1218_v24  ;;  %v1268_v6 = vadd.f32 %v2966_v12, %v1219_v19  ;;  %v1003_v43 = vmul.f32 %v2205_v41, %v986_v56  ;;  %v971_v16 = vadd.f32 %v955_v31, %v906_v25  ;;  %v2971_v19 = vld [vmem:[#allocation26_spill] sm:$0xff]  ;;  %v2973_v21 = vld [vmem:[#allocation9_spill] sm:$0xff] }
 0x118   : > { %v1074_v47 = vadd.f32 %v2967_v38, %v1025_v9  ;;  %v1075_v29 = vadd.f32 %v2641_v48, %v1026_v30  ;;  %v1170_v58 = vadd.f32 %v1154_v42, %v1121_v62  ;;  %v1171_v52 = vadd.f32 %v2968_v2, %v1122_v57  ;;  %v2972_v9 = vld [vmem:[#allocation16_spill] sm:$0xff]  ;;  %v2974_v57 = vld [vmem:[#allocation17_spill] sm:$0xff] }
 0x119   : > { %v1316_v17 = vadd.f32 %v1300_v60, %v1267_v50  ;;  %v1317_v11 = vadd.f32 %v2969_v13, %v1268_v6  ;;  %v1004_v20 = vmul.f32 %v2205_v41, %v987_v46  ;;  %v1019_v62 = vadd.f32 %v1003_v43, %v970_v61  ;;  %v2976_v46 = vld [vmem:[#allocation5_spill] sm:$0xff]  ;;  %v2980_v13 = vld [vmem:[#allocation19_spill] sm:$0xff] }
 0x11a   : > { %v1123_v24 = vadd.f32 %v2970_v5, %v1074_v47  ;;  %v1124_v33 = vadd.f32 %v2504_v18, %v1075_v29  ;;  %v1220_v37 = vadd.f32 %v2971_v19, %v1170_v58  ;;  %v1221_v49 = vadd.f32 %v2668_v10, %v1171_v52  ;;  %v2977_v47 = vld [vmem:[#allocation10_spill] sm:$0xff]  ;;  %v2978_v58 = vld [vmem:[#allocation24_spill] sm:$0xff] }
 0x11b   : > { %v2742_v30 = vadd.f32 %v2461_v36, %v1316_v17  ;;  %v2745_v42 = vadd.f32 %v2461_v36, %v1317_v11  ;;  %v1020_v18 = vadd.f32 %v1004_v20, %v971_v16  ;;  %v1068_v56 = vadd.f32 %v2973_v21, %v1019_v62 }
 0x11c   : > { %v1172_v48 = vadd.f32 %v2653_v27, %v1123_v24  ;;  %v1173_v31 = vadd.f32 %v2659_v26, %v1124_v33  ;;  %v1269_v63 = vadd.f32 %v2972_v9, %v1220_v37  ;;  %v1270_v60 = vadd.f32 %v2527_v7, %v1221_v49  ;;  %v2975_v26 = vld [vmem:[#allocation18_spill] sm:$0xff] }
 0x11d   : > { %v1351_v41 = vmul.f32 %v2742_v30, %v2742_v30  ;;  %v1352_v10 = vmul.f32 %v2745_v42, %v2745_v42  ;;  %v1069_v12 = vadd.f32 %v2975_v26, %v1020_v18  ;;  %v1117_v38 = vadd.f32 %v2976_v46, %v1068_v56  ;;  %v2981_v33 = vld [vmem:[#allocation22_spill] sm:$0xff] }
 0x11e   : > { %v1222_v50 = vadd.f32 %v2974_v57, %v1172_v48  ;;  %v1223_v61 = vadd.f32 %v2541_v1, %v1173_v31  ;;  %v1318_v27 = vadd.f32 %v2672_v28, %v1269_v63  ;;  %v1319_v6 = vadd.f32 %v2676_v55, %v1270_v60  ;;  %v2979_v1 = vld [vmem:[#allocation14_spill] sm:$0xff]  ;;  %v2982_v60 = vld [vmem:[#allocation28_spill] sm:$0xff] }
 0x11f   : > { %v1367_v7 = vmul.f32 %v1351_v41, %v2742_v30  ;;  %v1368_v25 = vmul.f32 %v1352_v10, %v2745_v42  ;;  %v1118_v52 = vadd.f32 %v2979_v1, %v1069_v12  ;;  %v1166_v11 = vadd.f32 %v2980_v13, %v1117_v38 }
 0x120   : > { %v1271_v29 = vadd.f32 %v2977_v47, %v1222_v50  ;;  %v1272_v43 = vadd.f32 %v2978_v58, %v1223_v61  ;;  %v2767_v2 = vadd.f32 %v2461_v36, %v1318_v27  ;;  %v2771_v28 = vadd.f32 %v2461_v36, %v1319_v6  ;;  %v1050_v61 = vld [vmem:[#allocation2 + $0xc8] sm:$0xff] }
 0x121   : > { %v1383_v17 = vmul.f32 0.044715, %v1367_v7  ;;  %v1384_v55 = vmul.f32 0.044715, %v1368_v25  ;;  %v1167_v19 = vadd.f32 %v2981_v33, %v1118_v52  ;;  %v1216_v62 = vadd.f32 %v2598_v35, %v1166_v11 }
 0x122   : > { %v1320_v16 = vadd.f32 %v2554_v22, %v1271_v29  ;;  %v1321_v5 = vadd.f32 %v2558_v14, %v1272_v43  ;;  %v1353_v24 = vmul.f32 %v2767_v2, %v2767_v2  ;;  %v1354_v37 = vmul.f32 %v2771_v28, %v2771_v28 }
 0x123   : > { %v1399_v20 = vadd.f32 %v1383_v17, %v2742_v30  ;;  %v1400_v49 = vadd.f32 %v1384_v55, %v2745_v42  ;;  %v1217_v31 = vadd.f32 %v2701_v0, %v1167_v19  ;;  %v1265_v41 = vadd.f32 %v2982_v60, %v1216_v62 }
 0x124   : > { %v2785_v48 = vadd.f32 %v2461_v36, %v1320_v16  ;;  %v2788_v22 = vadd.f32 %v2461_v36, %v1321_v5  ;;  %v1369_v14 = vmul.f32 %v1353_v24, %v2767_v2  ;;  %v1370_v9 = vmul.f32 %v1354_v37, %v2771_v28 }
 0x125   : > { %v1415_v63 = vmul.f32 0.7978846, %v1399_v20  ;;  %v1416_v18 = vmul.f32 0.7978846, %v1400_v49  ;;  %v1266_v56 = vadd.f32 %v2705_v51, %v1217_v31  ;;  %v1299_v57 = vmul.f32 %v2210_v45, %v2661_v59  ;;  %v1148_v20 = vld [vmem:[#allocation2 + $0xca] sm:$0xff] }
 0x126   : > { %v1355_v10 = vmul.f32 %v2785_v48, %v2785_v48  ;;  %v1356_v35 = vmul.f32 %v2788_v22, %v2788_v22  ;;  %v1385_v21 = vmul.f32 0.044715, %v1369_v14  ;;  %v1386_v50 = vmul.f32 0.044715, %v1370_v9 }
 0x127   : > { %1839 = vtanh.f32 %v1415_v63  ;;  %v1314_v0 = vadd.f32 %v2708_v34, %v1265_v41  ;;  %v1315_v7 = vadd.f32 %v1299_v57, %v1266_v56  ;;  %v840_v59 = vmul.f32 0.5, %v2721_v8 }
 0x128   : > { %v1371_v27 = vmul.f32 %v1355_v10, %v2785_v48  ;;  %v1372_v26 = vmul.f32 %v1356_v35, %v2788_v22  ;;  %v1401_v12 = vadd.f32 %v1385_v21, %v2767_v2  ;;  %1841 = vtanh.f32 %v1416_v18  ;;  %v1197_v21 = vld [vmem:[#allocation2 + $0xd8] sm:$0xff] }
 0x129   : > { %v1402_v6 = vadd.f32 %v1386_v50, %v2771_v28  ;;  %v2807_v51 = vadd.f32 %v2461_v36, %v1314_v0  ;;  %v1067_v34 = vmul.f32 %v2203_v40, %v1050_v61  ;;  %v1179_v47 = vadd.f32 %v2688_v4, %v2497_v23  ;;  %v1147_v4 = vld [vmem:[#allocation2 + $0xc2] sm:$0xff] }
 0x12a   : > { %v1387_v25 = vmul.f32 0.044715, %v1371_v27  ;;  %v1388_v46 = vmul.f32 0.044715, %v1372_v26  ;;  %v1417_v38 = vmul.f32 0.7978846, %v1401_v12  ;;  %v2814_v58 = vadd.f32 %v2461_v36, %v1315_v7 }
 0x12b   : > { %v1418_v29 = vmul.f32 0.7978846, %v1402_v6  ;;  %v1349_v43 = vmul.f32 %v2807_v51, %v2807_v51  ;;  %v1262_v8 = vmul.f32 %v2192_v32, %v2696_v3  ;;  %v842_v55 = vmul.f32 %v840_v59, %v2587_v15 }
 0x12c   : > { %v1403_v1 = vadd.f32 %v1387_v25, %v2785_v48  ;;  %v1404_v52 = vadd.f32 %v1388_v46, %v2788_v22  ;;  %1843 = vtanh.f32 %v1417_v38  ;;  %v1350_v40 = vmul.f32 %v2814_v58, %v2814_v58 }
 0x12d   : > { %v1840_v17 = vpop.eup %1839  ;;  %1845 = vtanh.f32 %v1418_v29  ;;  %v1365_v23 = vmul.f32 %v1349_v43, %v2807_v51  ;;  %v1083_v24 = vadd.f32 %v1067_v34, %v2684_v39  ;;  %v1213_v49 = vmul.f32 %v2224_v53, %v1050_v61 }
 0x12e   : > { %v1842_v13 = vpop.eup %1841  ;;  %v1419_v11 = vmul.f32 0.7978846, %v1403_v1  ;;  %v1420_v16 = vmul.f32 0.7978846, %v1404_v52  ;;  %v1447_v5 = vadd.f32 1.0, %v1840_v17  ;;  %v1366_v19 = vmul.f32 %v1350_v40, %v2814_v58  ;;  %v2985_v1 = vld [vmem:[#allocation4_spill] sm:$0xff] }
 0x12f   : > { %v1448_v33 = vadd.f32 1.0, %v1842_v13  ;;  %v1381_v37 = vmul.f32 0.044715, %v1365_v23  ;;  %v1164_v14 = vmul.f32 %v2208_v44, %v1147_v4  ;;  %v1310_v31 = vmul.f32 %v2210_v45, %v1147_v4 }
 0x130   : > { %1847 = vtanh.f32 %v1419_v11  ;;  %v1463_v62 = vmul.f32 0.5, %v1447_v5  ;;  %v1382_v9 = vmul.f32 0.044715, %v1366_v19  ;;  %v1229_v60 = vadd.f32 %v1213_v49, %v1179_v47 }
 0x131   : > { %1849 = vtanh.f32 %v1420_v16  ;;  %v1464_v15 = vmul.f32 0.5, %v1448_v33  ;;  %v1397_v63 = vadd.f32 %v1381_v37, %v2807_v51  ;;  %v1311_v41 = vmul.f32 %v2210_v45, %v1148_v20  ;;  %v2986_v33 = vld [vmem:[#allocation33_spill] sm:$0xff] }
 0x132   : > { %v1844_v18 = vpop.eup %1843  ;;  %v2833_v39 = vmul.f32 %v1463_v62, %v2742_v30  ;;  %v1326_v10 = vadd.f32 %v1310_v31, %v2637_v54  ;;  %v1398_v50 = vadd.f32 %v1382_v9, %v2814_v58  ;;  %v1278_v27 = vadd.f32 %v1262_v8, %v1229_v60  ;;  %v2983_v30 = vld [vmem:[#allocation31_spill] sm:$0xff]  ;;  %v2984_v54 = vld [vmem:[#allocation34_spill] sm:$0xff] }
 0x133   : > { %v1846_v35 = vpop.eup %1845  ;;  %v1449_v56 = vadd.f32 1.0, %v1844_v18  ;;  %v2838_v57 = vmul.f32 %v1464_v15, %v2745_v42  ;;  %v1413_v0 = vmul.f32 0.7978846, %v1397_v63  ;;  %v845_v12 = vmul.f32 %v2983_v30, %v842_v55 }
 0x134   : > { %v1450_v61 = vadd.f32 1.0, %v1846_v35  ;;  %v2842_v26 = vadd.f32 %v2461_v36, %v1326_v10  ;;  %v1414_v7 = vmul.f32 0.7978846, %v1398_v50  ;;  %v1180_v59 = vadd.f32 %v1164_v14, %v2984_v54 }
 0x135   : > { %v1465_v6 = vmul.f32 0.5, %v1449_v56  ;;  %1851 = vtanh.f32 %v1413_v0  ;;  %v1214_v46 = vmul.f32 %v2224_v53, %v1197_v21  ;;  %v1327_v38 = vadd.f32 %v1311_v41, %v1278_v27  ;;  %870 = vst [vmem:[#allocation2 + $0xe1] sm:$0xff] %v845_v12 }
 0x136   : > { %v1848_v25 = vpop.eup %1847  ;;  %v1466_v42 = vmul.f32 0.5, %v1450_v61  ;;  %v1361_v34 = vmul.f32 %v2842_v26, %v2842_v26  ;;  %1853 = vtanh.f32 %v1414_v7  ;;  %v1116_v52 = vmul.f32 %v2985_v1, %v2696_v3 }
 0x137   : > { %v1850_v47 = vpop.eup %1849  ;;  %v1451_v29 = vadd.f32 1.0, %v1848_v25  ;;  %v2850_v43 = vmul.f32 %v1465_v6, %v2767_v2  ;;  %v1346_v40 = vadd.f32 %v2461_v36, %v1327_v38  ;;  %v1230_v13 = vadd.f32 %v1214_v46, %v1180_v59 }
 0x138   : > { %v1452_v8 = vadd.f32 1.0, %v1850_v47  ;;  %v2855_v17 = vmul.f32 %v1466_v42, %v2771_v28  ;;  %v1377_v23 = vmul.f32 %v1361_v34, %v2842_v26  ;;  %v1132_v55 = vadd.f32 %v1116_v52, %v1083_v24 }
 0x139   : > { %v1467_v4 = vmul.f32 0.5, %v1451_v29  ;;  %v1362_v16 = vmul.f32 %v1346_v40, %v1346_v40  ;;  %v1263_v19 = vmul.f32 %v2192_v32, %v2986_v33  ;;  %v1165_v28 = vmul.f32 %v2208_v44, %v1148_v20 }
 0x13a   : > { %v1468_v11 = vmul.f32 0.5, %v1452_v8  ;;  %v1393_v5 = vmul.f32 0.044715, %v1377_v23  ;;  %v1264_v50 = vmul.f32 %v2192_v32, %v845_v12 }
 0x13b   : > { %v1852_v2 = vpop.eup %1851  ;;  %v2862_v3 = vmul.f32 %v1467_v4, %v2785_v48  ;;  %v1378_v62 = vmul.f32 %v1362_v16, %v1346_v40  ;;  %v1181_v31 = vadd.f32 %v1165_v28, %v1132_v55  ;;  %v1279_v9 = vadd.f32 %v1263_v19, %v1230_v13 }
 0x13c   : > { %v2866_v37 = vmul.f32 %v1468_v11, %v2788_v22  ;;  %v1445_v49 = vadd.f32 1.0, %v1852_v2  ;;  %v1409_v24 = vadd.f32 %v1393_v5, %v2842_v26  ;;  %v1854_v14 = vpop.eup %1853  ;;  %v1198_v15 = vld [vmem:[#allocation2 + $0xe0] sm:$0xff] }
 0x13d   : > { %v1295_v63 = vld [vmem:[#allocation2 + $0xda] sm:$0xff]  ;;  %v1446_v18 = vadd.f32 1.0, %v1854_v14  ;;  %v1394_v41 = vmul.f32 0.044715, %v1378_v62  ;;  %v1215_v48 = vmul.f32 %v2224_v53, %v1198_v15  ;;  %v1296_v21 = vld [vmem:[#allocation2 + $0xe2] sm:$0xff] }
 0x13e   : > { %v1461_v60 = vmul.f32 0.5, %v1445_v49  ;;  %v1425_v10 = vmul.f32 0.7978846, %v1409_v24  ;;  %v1312_v44 = vmul.f32 %v2210_v45, %v1295_v63  ;;  %v1313_v6 = vmul.f32 %v2210_v45, %v1296_v21 }
 0x13f   : > { %v1462_v20 = vmul.f32 0.5, %v1446_v18  ;;  %v1410_v35 = vadd.f32 %v1394_v41, %v1346_v40  ;;  %v1231_v56 = vadd.f32 %v1215_v48, %v1181_v31 }
 0x140   : > { %v1477_v22 = vmul.f32 %v1461_v60, %v2807_v51  ;;  %1855 = vtanh.f32 %v1425_v10  ;;  %v1328_v0 = vadd.f32 %v1312_v44, %v1279_v9 }
 0x141   : > { %v1478_v61 = vmul.f32 %v1462_v20, %v2814_v58  ;;  %v1426_v27 = vmul.f32 0.7978846, %v1410_v35  ;;  %v1280_v30 = vadd.f32 %v1264_v50, %v1231_v56 }
 0x142   : > { %v1347_v53 = vadd.f32 %v2461_v36, %v1328_v0 }
 0x143   : > { %1857 = vtanh.f32 %v1426_v27  ;;  %v1329_v7 = vadd.f32 %v1313_v6, %v1280_v30 }
 0x144   : > { %v1363_v54 = vmul.f32 %v1347_v53, %v1347_v53 }
 0x145   : > { %v1348_v25 = vadd.f32 %v2461_v36, %v1329_v7 }
 0x146   : > { %v1856_v59 = vpop.eup %1855  ;;  %v1379_v46 = vmul.f32 %v1363_v54, %v1347_v53 }
 0x147   : > { %v1457_v51 = vadd.f32 1.0, %v1856_v59  ;;  %v1364_v38 = vmul.f32 %v1348_v25, %v1348_v25 }
 0x148   : > { %v1395_v32 = vmul.f32 0.044715, %v1379_v46 }
 0x149   : > { %v1473_v42 = vmul.f32 0.5, %v1457_v51  ;;  %v1858_v12 = vpop.eup %1857  ;;  %v1380_v47 = vmul.f32 %v1364_v38, %v1348_v25 }
 0x14a   : > { %v1458_v34 = vadd.f32 1.0, %v1858_v12  ;;  %v1411_v29 = vadd.f32 %v1395_v32, %v1347_v53 }
 0x14b   : > { %v1489_v58 = vmul.f32 %v1473_v42, %v2842_v26  ;;  %v1396_v1 = vmul.f32 0.044715, %v1380_v47 }
 0x14c   : > { %v1474_v45 = vmul.f32 0.5, %v1458_v34  ;;  %v1427_v52 = vmul.f32 0.7978846, %v1411_v29 }
 0x14d   : > { %v1412_v23 = vadd.f32 %v1396_v1, %v1348_v25 }
 0x14e   : > { %v1490_v8 = vmul.f32 %v1474_v45, %v1346_v40  ;;  %1859 = vtanh.f32 %v1427_v52 }
 0x14f   : > { %v1428_v4 = vmul.f32 0.7978846, %v1412_v23 }
 0x151   : > { %1861 = vtanh.f32 %v1428_v4 }
 0x154   : > { %v1860_v55 = vpop.eup %1859 }
 0x155   : > { %v1459_v36 = vadd.f32 1.0, %v1860_v55 }
 0x157   : > { %v1475_v13 = vmul.f32 0.5, %v1459_v36  ;;  %v1862_v11 = vpop.eup %1861 }
 0x158   : > { %v1460_v16 = vadd.f32 1.0, %v1862_v11  ;;  %1496 = sbr.rel (%p1683_p12) target bundleno = 351 (0x15f), region = 52 }
 0x159   : > { %v1491_v5 = vmul.f32 %v1475_v13, %v1347_v53 }
 0x15a   : > { %v1476_v2 = vmul.f32 0.5, %v1460_v16 }
 0x15c   : > { %v1492_v33 = vmul.f32 %v1476_v2, %v1348_v25 }
 0x15d   : > { %v1904_v26 = vmov 0.0  }
 0x15e   : > { %1497 = vst [vmem:[%s2002_s22] sm:$0x1] %v1904_v26 }
 0x15f PF: > { %v1499_v40 = vadd.f32 %v1478_v61, %v1477_v22  ;;  %v2987_v31 = vld [vmem:[#allocation29_spill] sm:$0xff]  ;;  %v2988_v9 = vld [vmem:[#allocation30_spill] sm:$0xff]  ;;  %v2989_v18 = vld [vmem:[#allocation32_spill] sm:$0xff] }
 0x160   : > { %v2990_v41 = vld [vmem:[#allocation3_spill] sm:$0xff] }
 0x161   : > { %v1500_v19 = vadd.f32 %v1499_v40, %v2833_v39 }
 0x163   : > { %v1501_v28 = vadd.f32 %v1500_v19, %v2838_v57 }
 0x165   : > { %v1502_v49 = vadd.f32 %v1501_v28, %v2850_v43  ;;  %v1498_v35 = vld [vmem:[%s2002_s22] sm:$0x1] }
 0x167   : > { %v1503_v62 = vadd.f32 %v1502_v49, %v2855_v17 }
 0x169   : > { %v1504_v24 = vadd.f32 %v1503_v62, %v2862_v3 }
 0x16b   : > { %v1505_v14 = vadd.f32 %v1504_v24, %v2866_v37 }
 0x16d   : > { %v1506_v15 = vadd.f32 %v1505_v14, %v2987_v31 }
 0x16f   : > { %v1507_v63 = vadd.f32 %v1506_v15, %v2988_v9 }
 0x171   : > { %v1508_v60 = vadd.f32 %v1507_v63, %v2989_v18 }
 0x173   : > { %v1509_v39 = vadd.f32 %v1508_v60, %v2990_v41 }
 0x175   : > { %v1510_v10 = vadd.f32 %v1509_v39, %v1489_v58 }
 0x177   : > { %v1511_v57 = vadd.f32 %v1510_v10, %v1490_v8 }
 0x179   : > { %v1512_v48 = vadd.f32 %v1511_v57, %v1491_v5 }
 0x17b   : > { %v1513_v43 = vadd.f32 %v1512_v48, %v1492_v33 }
 0x17d   : > { %v1514_v44 = vrot.slane %v1513_v43, 4 }
 0x17f   : > { %v1515_v17 = vadd.f32 %v1514_v44, %v1513_v43 }
 0x181   : > { %v1516_v20 = vrot.slane %v1515_v17, 2 }
 0x183   : > { %v1517_v22 = vadd.f32 %v1516_v20, %v1515_v17 }
 0x185   : > { %v1518_v3 = vrot.slane %v1517_v22, 1 }
 0x187   : > { %v1519_v37 = vadd.f32 %v1518_v3, %v1517_v22 }
 0x189   : > { %v1520_v21 = vadd.f32 %v1519_v37, %v1498_v35 }
 0x18b   : > { %1521 = vst [vmem:[%s2002_s22] sm:$0x1] %v1520_v21 }
 0x18c PF: > { %s17_s28 = sadd.s32 1, %s1901_s28   ;;  %s2991_s24 = smov %s1893_s26 }
 0x18d   : > { %p14_p13 = scmp.ge.s32.totalorder %s17_s28, 6   ;;  %s2992_s25 = smov %s1897_s27 }
 0x18e   : > { %s2993_s26 = smov %s2996_s29  ;;  %s2994_s27 = smov %s3000_s30 }
 0x18f   :  { %16 = sbr.rel (!%p14_p13) target bundleno = 3 (0x3), region = 91 }

// kernel: ptavit_stage_no_down.10
= control target key start
LH: loop header
LB: loop body
LE: loop exit
PB: predicated region body
PF: predicated region fallthrough
CT: control target
= control target key end

     0   :  { %s1517_s27 = smov 0   ;;  %s1519_s28 = smov 0   ;;  %s2277_s0 = inlined_call_operand.vmem [shape: bf16[2,16,16,32], index: 0, kind: input, shape index: {}]   ;;  %s2278_s1 = inlined_call_operand.vmem [shape: f32[1,32], index: 1, kind: input, shape index: {}]   ;;  %s2279_s2 = inlined_call_operand.vmem [shape: f32[1,32], index: 2, kind: input, shape index: {}]   ;;  %s2280_s3 = inlined_call_operand.vmem [shape: f32[32,32], index: 3, kind: input, shape index: {}]   ;;  %s2281_s4 = inlined_call_operand.vmem [shape: f32[1,32], index: 4, kind: input, shape index: {}]   ;;  %s2282_s5 = inlined_call_operand.vmem [shape: f32[32,32], index: 5, kind: input, shape index: {}]   ;;  %s2283_s6 = inlined_call_operand.vmem [shape: f32[1,32], index: 6, kind: input, shape index: {}]   ;;  %s2284_s7 = inlined_call_operand.vmem [shape: f32[32,8], index: 7, kind: input, shape index: {}]   ;;  %s2285_s8 = inlined_call_operand.vmem [shape: f32[2,4,8], index: 8, kind: output, shape index: {}]  }
   0x1   :  { %s1521_s29 = smov 0   ;;  %s1523_s30 = smov 0  }
   0x2   :  { %s1525_s9 = smov 0  }
   0x3 LB: > { %s27_s10 = sadd.s32 1, %s1460_s29  ;;  %s30_s11 = sadd.s32 1, %s1464_s30  ;;  %s1468_s9 = sphi %s1525_s9, %s18_s9   ;;  %s1464_s30 = sphi %s1523_s30, %s2307_s30   ;;  %s1460_s29 = sphi %s1521_s29, %s2306_s29   ;;  %s1456_s28 = sphi %s1519_s28, %s2305_s28   ;;  %s1452_s27 = sphi %s1517_s27, %s2304_s27  }
   0x4   : > { %p28_p0 = scmp.ge.s32.totalorder %s27_s10, 2  ;;  %p1261_p1 = scmp.ge.s32.totalorder %s1468_s9, 1 }
   0x5   : > { %p282_p2 = scmp.lt.s32.totalorder %s1468_s9, 5 }
   0x6   : > { %s2309_s10 = smov (%p28_p0, %s27_s10), 0  ;;  %s2311_s11 = smov (!%p28_p0, %s30_s11), %s1464_s30 }
   0x7   : > { %p283_p3 = pnand %p1261_p1, %p282_p2  ;;  %p32_p4 = scmp.ge.s32.totalorder %s2311_s11, 2 }
   0x8   : > { %s1262_s12 = sshll.u32 (!%p283_p3), %s1452_s27, 3  ;;  %p321_p5 = scmp.lt.s32.totalorder (!%p283_p3), %s1456_s28, 1 }
   0x9   : > { %s2313_s11 = smov (%p32_p4, %s2311_s11), 0  ;;  %286 = sbr.rel (%p283_p3) target bundleno = 664 (0x298), region = 52 }
   0xa   : > { %p323_p6 = scmp.lt.s32.totalorder (!%p283_p3), %s1262_s12, 15  ;;  %p1300_p7 = scmp.ne.s32.totalorder (!%p283_p3), %s1452_s27, 0 }
   0xe   : > { %s2315_s28 = smov (!%p321_p5, %s1456_s28), 1  ;;  %s2317_s12 = smov (!%p323_p6, %s1262_s12), 15  ;;  %vm367_vm0 = vcmask 261120   ;;  %v1470_v40 = vmov 32.0  }
   0xf   : > { %s1264_s13 = sshll.u32 %s2315_s28, 5  ;;  %s1266_s14 = sshll.u32 %s2315_s28, 2  ;;  %1396 = vrcp.f32 %v1470_v40 }
  0x10   : > { %s1263_s15 = sshll.u32 %s2317_s12, 1  ;;  %s1553_s18 = scalar_lea.vmem %s2285_s8, %s1266_s14 }
  0x11   : > { %s327_s19 = sadd.s32 %s1264_s13, %s1263_s15 }
  0x12   : > { %s1265_s20 = sshll.u32 %s327_s19, 2 }
  0x13   : > { %s1558_s23 = scalar_lea.vmem %s2277_s0, %s1265_s20 }
  0x14   : > { %v1561_v0 = vld [vmem:[%s1558_s23 + $0x20] sm:$0xff]   ;;  %v1564_v1 = vld [vmem:[%s1558_s23 + $0x8] sm:$0xff]   ;;  %v1573_v6 = vld [vmem:[%s1558_s23 + $0x10] sm:$0xff]  }
  0x15   : > { %v1567_v2 = vld [vmem:[%s1558_s23] sm:$0xff]   ;;  %v1322_v3 = vunpack.c.h.bf16 %v1561_v0  ;;  %v1309_v4 = vunpack.c.l.bf16 %v1564_v1  ;;  %v1313_v10 = vunpack.c.l.bf16 %v1573_v6  ;;  %v1310_v11 = vunpack.c.h.bf16 %v1564_v1  ;;  %v1597_v16 = vld [vmem:[%s1558_s23 + $0x28] sm:$0xff]   ;;  %v1612_v23 = vld [vmem:[%s1558_s23 + $0x30] sm:$0xff]   ;;  %v1397_v41 = vpop.eup %1396 }
  0x16   : > { %v1305_v5 = vunpack.c.l.bf16 %v1567_v2  ;;  %v1306_v12 = vunpack.c.h.bf16 %v1567_v2  ;;  %v1326_v17 = vunpack.c.h.bf16 %v1597_v16  ;;  %v1314_v18 = vunpack.c.h.bf16 %v1573_v6  ;;  %v1615_v24 = vld [vmem:[%s1558_s23 + $0x18] sm:$0xff]  }
  0x17   : > { %v395_v7 = vsel %vm367_vm0, %v1322_v3, 0.0  ;;  %v374_v8 = vsel %vm367_vm0, %v1309_v4, 0.0  ;;  %v380_v13 = vsel %vm367_vm0, %v1313_v10, 0.0  ;;  %v377_v14 = vsel %vm367_vm0, %v1310_v11, 0.0  ;;  %v1634_v33 = vld [vmem:[%s1558_s23 + $0x38] sm:$0xff]  }
  0x18   : > { %v368_v9 = vsel %vm367_vm0, %v1305_v5, 0.0  ;;  %396 = vadd.xlane.f32.xlu2 %v395_v7  ;;  %375 = vadd.xlane.f32.xlu1 %v374_v8  ;;  %v371_v15 = vsel %vm367_vm0, %v1306_v12, 0.0  ;;  %v1325_v19 = vunpack.c.l.bf16 %v1597_v16  ;;  %v401_v20 = vsel %vm367_vm0, %v1326_v17, 0.0 }
  0x19   : > { %369 = vadd.xlane.f32.xlu0 %v368_v9  ;;  %v383_v21 = vsel %vm367_vm0, %v1314_v18, 0.0  ;;  %v1329_v25 = vunpack.c.l.bf16 %v1612_v23  ;;  %v1317_v26 = vunpack.c.l.bf16 %v1615_v24  ;;  %v1330_v29 = vunpack.c.h.bf16 %v1612_v23 }
  0x1a   : > { %v398_v22 = vsel %vm367_vm0, %v1325_v19, 0.0  ;;  %v1318_v30 = vunpack.c.h.bf16 %v1615_v24  ;;  %v1333_v34 = vunpack.c.l.bf16 %v1634_v33  ;;  %v1321_v35 = vunpack.c.l.bf16 %v1561_v0 }
  0x1b   : > { %v404_v27 = vsel %vm367_vm0, %v1329_v25, 0.0  ;;  %v386_v28 = vsel %vm367_vm0, %v1317_v26, 0.0  ;;  %v407_v31 = vsel %vm367_vm0, %v1330_v29, 0.0  ;;  %v1334_v38 = vunpack.c.h.bf16 %v1634_v33  ;;  %v891_v33 = vld [vmem:[%s2282_s5 + $0x18] sm:$0xff] }
  0x1c   : > { %v389_v32 = vsel %vm367_vm0, %v1318_v30, 0.0  ;;  %v410_v36 = vsel %vm367_vm0, %v1333_v34, 0.0  ;;  %v392_v37 = vsel %vm367_vm0, %v1321_v35, 0.0  ;;  %v417_v42 = vmul.f32 32.0, %v1397_v41  ;;  %908 = vmatpush.msra.mxu1 %v891_v33  ;;  %1346 = vmatpush.msra.mxu2 %v891_v33 }
  0x1d   : > { %v413_v39 = vsel %vm367_vm0, %v1334_v38, 0.0  ;;  %vm421_vm1 = vweird.f32 %v1397_v41 }
  0x1e   : > { %v418_v43 = vsub.f32 1.0, %v417_v42 }
  0x20   : > { %381 = vadd.xlane.f32.xlu2 %v380_v13  ;;  %378 = vadd.xlane.f32.xlu1 %v377_v14  ;;  %v419_v44 = vmul.f32 %v1397_v41, %v418_v43 }
  0x21   : > { %372 = vadd.xlane.f32.xlu0 %v371_v15 }
  0x22   : > { %v420_v45 = vadd.f32 %v1397_v41, %v419_v44 }
  0x24   : > { %v1648_v46 = vsel %vm421_vm1, %v1397_v41, %v420_v45 }
  0x28   : > { %402 = vadd.xlane.f32.xlu2 %v401_v20  ;;  %384 = vadd.xlane.f32.xlu1 %v383_v21 }
  0x29   : > { %399 = vadd.xlane.f32.xlu0 %v398_v22 }
  0x30   : > { %405 = vadd.xlane.f32.xlu2 %v404_v27  ;;  %387 = vadd.xlane.f32.xlu1 %v386_v28 }
  0x38   : > { %408 = vadd.xlane.f32.xlu2 %v407_v31  ;;  %390 = vadd.xlane.f32.xlu1 %v389_v32 }
  0x40   : > { %411 = vadd.xlane.f32.xlu2 %v410_v36  ;;  %393 = vadd.xlane.f32.xlu1 %v392_v37 }
  0x48   : > { %414 = vadd.xlane.f32.xlu2 %v413_v39 }
  0x8b   : > { %v397_v47 = vpop.xlane.xlu2 %396  ;;  %v376_v48 = vpop.xlane.xlu1 %375 }
  0x8c   : > { %v432_v49 = vmul.f32 %v1648_v46, %v397_v47  ;;  %v370_v50 = vpop.xlane.xlu0 %369  ;;  %v425_v61 = vmul.f32 %v1648_v46, %v376_v48 }
  0x8d   : > { %v423_v51 = vmul.f32 %v1648_v46, %v370_v50 }
  0x8e   : > { %v1654_v52 = vsub.f32 %v1322_v3, %v432_v49  ;;  %v1674_v3 = vsub.f32 %v1309_v4, %v425_v61 }
  0x8f   : > { %v1658_v53 = vsub.f32 %v1305_v5, %v423_v51 }
  0x90   : > { %v464_v54 = vmul.f32 %v1654_v52, %v1654_v52 }
  0x91   : > { %v455_v55 = vmul.f32 %v1658_v53, %v1658_v53 }
  0x92   : > { %v498_v56 = vsel %vm367_vm0, %v464_v54, 0.0 }
  0x93   : > { %v382_v57 = vpop.xlane.xlu2 %381  ;;  %499 = vadd.xlane.f32.xlu1 %v498_v56  ;;  %v379_v58 = vpop.xlane.xlu1 %378  ;;  %v471_v59 = vsel %vm367_vm0, %v455_v55, 0.0 }
  0x94   : > { %472 = vadd.xlane.f32.xlu0 %v471_v59  ;;  %v373_v60 = vpop.xlane.xlu0 %372  ;;  %v426_v15 = vmul.f32 %v1648_v46, %v379_v58  ;;  %v427_v1 = vmul.f32 %v1648_v46, %v382_v57 }
  0x95   : > { %v424_v62 = vmul.f32 %v1648_v46, %v373_v60 }
  0x96   : > { %v1696_v22 = vsub.f32 %v1310_v11, %v426_v15  ;;  %v1722_v43 = vsub.f32 %v1313_v10, %v427_v1  ;;  %v890_v15 = vld [vmem:[%s2282_s5 + $0x10] sm:$0xff] }
  0x97   : > { %v1670_v63 = vsub.f32 %v1306_v12, %v424_v62  ;;  %v457_v12 = vmul.f32 %v1674_v3, %v1674_v3  ;;  %909 = vmatpush.msra.mxu1 %v890_v15  ;;  %1347 = vmatpush.msra.mxu2 %v890_v15 }
  0x98   : > { %v458_v11 = vmul.f32 %v1696_v22, %v1696_v22  ;;  %v459_v6 = vmul.f32 %v1722_v43, %v1722_v43 }
  0x99   : > { %v456_v5 = vmul.f32 %v1670_v63, %v1670_v63  ;;  %v477_v27 = vsel %vm367_vm0, %v457_v12, 0.0  ;;  %v889_v12 = vld [vmem:[%s2282_s5 + $0x8] sm:$0xff] }
  0x9a   : > { %v480_v44 = vsel %vm367_vm0, %v458_v11, 0.0  ;;  %v483_v54 = vsel %vm367_vm0, %v459_v6, 0.0  ;;  %910 = vmatpush.msra.mxu1 %v889_v12  ;;  %1348 = vmatpush.msra.mxu2 %v889_v12 }
  0x9b   : > { %v403_v7 = vpop.xlane.xlu2 %402  ;;  %v385_v8 = vpop.xlane.xlu1 %384  ;;  %v474_v9 = vsel %vm367_vm0, %v456_v5, 0.0 }
  0x9c   : > { %v428_v13 = vmul.f32 %v1648_v46, %v385_v8  ;;  %475 = vadd.xlane.f32.xlu0 %v474_v9  ;;  %v400_v14 = vpop.xlane.xlu0 %399  ;;  %v434_v49 = vmul.f32 %v1648_v46, %v403_v7 }
  0x9d   : > { %v433_v2 = vmul.f32 %v1648_v46, %v400_v14 }
  0x9e   : > { %v1686_v4 = vsub.f32 %v1314_v18, %v428_v13  ;;  %v1739_v51 = vsub.f32 %v1326_v17, %v434_v49 }
  0x9f   : > { %v1690_v20 = vsub.f32 %v1325_v19, %v433_v2  ;;  %v768_v2 = vld [vmem:[%s2280_s3 + $0x8] sm:$0xff] }
  0xa0   : > { %v460_v21 = vmul.f32 %v1686_v4, %v1686_v4 }
  0xa1   : > { %v465_v28 = vmul.f32 %v1690_v20, %v1690_v20 }
  0xa2   : > { %v486_v31 = vsel %vm367_vm0, %v460_v21, 0.0  ;;  %v767_v21 = vld [vmem:[%s2280_s3] sm:$0xff] }
  0xa3   : > { %v406_v18 = vpop.xlane.xlu2 %405  ;;  %487 = vadd.xlane.f32.xlu2 %v486_v31  ;;  %v388_v32 = vpop.xlane.xlu1 %387  ;;  %v501_v19 = vsel %vm367_vm0, %v465_v28, 0.0 }
  0xa4   : > { %v435_v36 = vmul.f32 %v1648_v46, %v406_v18  ;;  %v429_v37 = vmul.f32 %v1648_v46, %v388_v32  ;;  %478 = vadd.xlane.f32.xlu0 %v477_v27  ;;  %502 = vadd.xlane.f32.xlu1 %v501_v19  ;;  %v888_v27 = vld [vmem:[%s2282_s5] sm:$0xff] }
  0xa5   : > { %911 = vmatpush.msra.mxu1 %v888_v27  ;;  %1349 = vmatpush.msra.mxu2 %v888_v27 }
  0xa6   : > { %v1710_v39 = vsub.f32 %v1329_v25, %v435_v36  ;;  %v1714_v40 = vsub.f32 %v1317_v26, %v429_v37 }
  0xa8   : > { %v467_v41 = vmul.f32 %v1710_v39, %v1710_v39  ;;  %v461_v42 = vmul.f32 %v1714_v40, %v1714_v40 }
  0xaa   : > { %v507_v45 = vsel %vm367_vm0, %v467_v41, 0.0  ;;  %v489_v25 = vsel %vm367_vm0, %v461_v42, 0.0 }
  0xab   : > { %v409_v47 = vpop.xlane.xlu2 %408  ;;  %508 = vadd.xlane.f32.xlu2 %v507_v45  ;;  %v391_v26 = vpop.xlane.xlu1 %390 }
  0xac   : > { %v436_v48 = vmul.f32 %v1648_v46, %v409_v47  ;;  %481 = vadd.xlane.f32.xlu0 %v480_v44  ;;  %490 = vadd.xlane.f32.xlu1 %v489_v25  ;;  %v430_v23 = vmul.f32 %v1648_v46, %v391_v26 }
  0xae   : > { %v1733_v10 = vsub.f32 %v1330_v29, %v436_v48  ;;  %v466_v29 = vmul.f32 %v1739_v51, %v1739_v51  ;;  %v1755_v59 = vsub.f32 %v1318_v30, %v430_v23 }
  0xb0   : > { %v468_v50 = vmul.f32 %v1733_v10, %v1733_v10  ;;  %v504_v60 = vsel %vm367_vm0, %v466_v29, 0.0 }
  0xb2   : > { %v510_v55 = vsel %vm367_vm0, %v468_v50, 0.0 }
  0xb3   : > { %v412_v56 = vpop.xlane.xlu2 %411  ;;  %v394_v57 = vpop.xlane.xlu1 %393 }
  0xb4   : > { %v431_v58 = vmul.f32 %v1648_v46, %v394_v57  ;;  %484 = vadd.xlane.f32.xlu0 %v483_v54  ;;  %511 = vadd.xlane.f32.xlu1 %v510_v55  ;;  %v437_v0 = vmul.f32 %v1648_v46, %v412_v56 }
  0xb6   : > { %v1749_v16 = vsub.f32 %v1321_v35, %v431_v58  ;;  %v462_v35 = vmul.f32 %v1755_v59, %v1755_v59  ;;  %v1771_v30 = vsub.f32 %v1333_v34, %v437_v0  ;;  %v769_v34 = vld [vmem:[%s2280_s3 + $0x10] sm:$0xff] }
  0xb8   : > { %v463_v17 = vmul.f32 %v1749_v16, %v1749_v16  ;;  %v492_v8 = vsel %vm367_vm0, %v462_v35, 0.0  ;;  %v469_v13 = vmul.f32 %v1771_v30, %v1771_v30 }
  0xba   : > { %v495_v61 = vsel %vm367_vm0, %v463_v17, 0.0  ;;  %v513_v14 = vsel %vm367_vm0, %v469_v13, 0.0 }
  0xbb   : > { %v415_v62 = vpop.xlane.xlu2 %414  ;;  %496 = vadd.xlane.f32.xlu2 %v495_v61 }
  0xbc   : > { %v438_v5 = vmul.f32 %v1648_v46, %v415_v62  ;;  %505 = vadd.xlane.f32.xlu0 %v504_v60 }
  0xbe   : > { %v1765_v7 = vsub.f32 %v1334_v38, %v438_v5  ;;  %v770_v38 = vld [vmem:[%s2280_s3 + $0x18] sm:$0xff] }
  0xbf   : > { %835 = vmatpush.msra.mxu0 %v770_v38  ;;  %1342 = vmatpush.msra.mxu3 %v770_v38 }
  0xc0   : > { %v470_v24 = vmul.f32 %v1765_v7, %v1765_v7 }
  0xc1   : > { %836 = vmatpush.msra.mxu0 %v769_v34  ;;  %1343 = vmatpush.msra.mxu3 %v769_v34  ;;  %v1826_v34 = vld [vmem:[%s2278_s1] ss:$0 sm:$0xff] }
  0xc2   : > { %v516_v9 = vsel %vm367_vm0, %v470_v24, 0.0 }
  0xc3   : > { %517 = vadd.xlane.f32.xlu1 %v516_v9  ;;  %837 = vmatpush.msra.mxu0 %v768_v2 }
  0xc4   : > { %493 = vadd.xlane.f32.xlu0 %v492_v8  ;;  %1344 = vmatpush.msra.mxu3 %v768_v2 }
  0xc5   : > { %838 = vmatpush.msra.mxu0 %v767_v21 }
  0xc6   : > { %1345 = vmatpush.msra.mxu3 %v767_v21 }
  0xcc   : > { %514 = vadd.xlane.f32.xlu0 %v513_v14 }
 0x106   : > { %v500_v28 = vpop.xlane.xlu1 %499 }
 0x107   : > { %v528_v31 = vmul.f32 %v500_v28, %v1648_v46  ;;  %v473_v18 = vpop.xlane.xlu0 %472 }
 0x108   : > { %v519_v32 = vmul.f32 %v473_v18, %v1648_v46 }
 0x109   : > { %v544_v19 = vadd.f32 1e-05, %v528_v31 }
 0x10a   : > { %v535_v36 = vadd.f32 1e-05, %v519_v32 }
 0x10b   : > { %1398 = vrsqrt.f32 %v544_v19  ;;  %vm647_vm2 = vweird.f32 %v544_v19 }
 0x10c   : > { %1400 = vrsqrt.f32 %v535_v36  ;;  %vm557_vm6 = vweird.f32 %v535_v36 }
 0x10f   : > { %v476_v37 = vpop.xlane.xlu0 %475 }
 0x110   : > { %v520_v1 = vmul.f32 %v476_v37, %v1648_v46 }
 0x111   : > { %v1399_v11 = vpop.eup %1398 }
 0x112   : > { %v1401_v41 = vpop.eup %1400  ;;  %v642_v42 = vmul.f32 %v1399_v11, %v544_v19  ;;  %v536_v44 = vadd.f32 1e-05, %v520_v1  ;;  %vm648_vm3 = vweird.f32 %v1399_v11  ;;  %v1843_v19 = vld [vmem:[%s2279_s2] ss:$0 sm:$0xff] }
 0x113   : > { %v552_v45 = vmul.f32 %v1401_v41, %v535_v36  ;;  %vm1807_vm4 = vmor %vm647_vm2, %vm648_vm3  ;;  %vm558_vm5 = vweird.f32 %v1401_v41 }
 0x114   : > { %v643_v25 = vmul.f32 %v1399_v11, %v642_v42  ;;  %1402 = vrsqrt.f32 %v536_v44  ;;  %vm559_vm7 = vmor %vm557_vm6, %vm558_vm5  ;;  %vm567_vm9 = vweird.f32 %v536_v44 }
 0x115   : > { %v553_v47 = vmul.f32 %v1401_v41, %v552_v45 }
 0x116   : > { %v644_v26 = vmul.f32 0.5, %v643_v25  ;;  %v488_v48 = vpop.xlane.xlu2 %487 }
 0x117   : > { %v554_v49 = vmul.f32 0.5, %v553_v47  ;;  %v503_v6 = vpop.xlane.xlu1 %502  ;;  %v479_v50 = vpop.xlane.xlu0 %478  ;;  %v524_v23 = vmul.f32 %v488_v48, %v1648_v46 }
 0x118   : > { %v645_v54 = vsub.f32 1.5, %v644_v26  ;;  %v529_v55 = vmul.f32 %v503_v6, %v1648_v46  ;;  %v521_v56 = vmul.f32 %v479_v50, %v1648_v46 }
 0x119   : > { %v555_v58 = vsub.f32 1.5, %v554_v49  ;;  %v1819_v8 = vadd.f32 1e-05, %v524_v23 }
 0x11a   : > { %v1403_v29 = vpop.eup %1402  ;;  %v646_v17 = vmul.f32 %v1399_v11, %v645_v54  ;;  %v1812_v60 = vadd.f32 1e-05, %v529_v55  ;;  %v1814_v61 = vadd.f32 1e-05, %v521_v56 }
 0x11b   : > { %v556_v62 = vmul.f32 %v1401_v41, %v555_v58  ;;  %v562_v5 = vmul.f32 %v1403_v29, %v536_v44  ;;  %vm568_vm8 = vweird.f32 %v1403_v29 }
 0x11c   : > { %v650_v0 = vsel %vm1807_vm4, %v1399_v11, %v646_v17  ;;  %1404 = vrsqrt.f32 %v1812_v60  ;;  %vm569_vm10 = vmor %vm567_vm9, %vm568_vm8  ;;  %vm657_vm11 = vweird.f32 %v1812_v60  ;;  %vm577_vm15 = vweird.f32 %v1814_v61 }
 0x11d   : > { %v560_v35 = vsel %vm559_vm7, %v1401_v41, %v556_v62  ;;  %v563_v24 = vmul.f32 %v1403_v29, %v562_v5  ;;  %1406 = vrsqrt.f32 %v1814_v61  ;;  %v720_v15 = vmul.f32 %v650_v0, %v1654_v52 }
 0x11e   : > { %v509_v9 = vpop.xlane.xlu2 %508  ;;  %v711_v33 = vmul.f32 %v560_v35, %v1658_v53  ;;  %1408 = vrsqrt.f32 %v1819_v8  ;;  %vm607_vm4 = vweird.f32 %v1819_v8 }
 0x11f   : > { %v564_v13 = vmul.f32 0.5, %v563_v24  ;;  %v491_v14 = vpop.xlane.xlu1 %490  ;;  %v482_v38 = vpop.xlane.xlu0 %481  ;;  %v531_v2 = vmul.f32 %v509_v9, %v1648_v46  ;;  %v740_v36 = vmul.f32 %v1826_v34, %v720_v15 }
 0x120   : > { %v522_v12 = vmul.f32 %v482_v38, %v1648_v46  ;;  %v525_v53 = vmul.f32 %v491_v14, %v1648_v46  ;;  %v731_v32 = vmul.f32 %v1826_v34, %v711_v33 }
 0x121   : > { %v565_v21 = vsub.f32 1.5, %v564_v13  ;;  %v1847_v1 = vadd.f32 1e-05, %v531_v2  ;;  %v760_v26 = vadd.f32 %v1843_v19, %v740_v36 }
 0x122   : > { %v1832_v27 = vpop.eup %1404  ;;  %v1835_v28 = vadd.f32 1e-05, %v522_v12  ;;  %v1851_v44 = vadd.f32 1e-05, %v525_v53  ;;  %v751_v47 = vadd.f32 %v1843_v19, %v731_v32 }
 0x123   : > { %v1407_v31 = vpop.eup %1406  ;;  %v566_v18 = vmul.f32 %v1403_v29, %v565_v21  ;;  %v652_v52 = vmul.f32 %v1832_v27, %v1812_v60  ;;  %vm658_vm12 = vweird.f32 %v1832_v27  ;;  %1276 = vmatmul.msk.f32.vlgmr.msra.gmra.mxu3 %vm367_vm0, %v760_v26  ;;  %1292 = vmatmul.msk.f32.vlgmr.msra.gmra.mxu2 %vm367_vm0, %v760_v26  ;;  %vm677_vm7 = vweird.f32 %v1847_v1 }
 0x124   : > { %v572_v37 = vmul.f32 %v1407_v31, %v1814_v61  ;;  %1410 = vrsqrt.f32 %v1835_v28  ;;  %v1854_v45 = vpop.eup %1408  ;;  %1267 = vmatmul.msk.f32.vlgmr.msra.gmra.mxu0 %vm367_vm0, %v751_v47  ;;  %vm578_vm13 = vweird.f32 %v1407_v31  ;;  %1283 = vmatmul.msk.f32.vlgmr.msra.gmra.mxu1 %vm367_vm0, %v751_v47  ;;  %vm1875_vm14 = vmor %vm657_vm11, %vm658_vm12  ;;  %vm587_vm3 = vweird.f32 %v1835_v28 }
 0x125   : > { %v570_v11 = vsel %vm569_vm10, %v1403_v29, %v566_v18  ;;  %v653_v41 = vmul.f32 %v1832_v27, %v652_v52  ;;  %1412 = vrsqrt.f32 %v1847_v1  ;;  %v602_v57 = vmul.f32 %v1854_v45, %v1819_v8  ;;  %vm1883_vm1 = vmor %vm577_vm15, %vm578_vm13 }
 0x126   : > { %v573_v42 = vmul.f32 %v1407_v31, %v572_v37  ;;  %v712_v6 = vmul.f32 %v570_v11, %v1670_v63  ;;  %1414 = vrsqrt.f32 %v1851_v44  ;;  %vm608_vm6 = vweird.f32 %v1854_v45 }
 0x127   : > { %v654_v25 = vmul.f32 0.5, %v653_v41  ;;  %v512_v48 = vpop.xlane.xlu1 %511  ;;  %v485_v49 = vpop.xlane.xlu0 %484  ;;  %v603_v9 = vmul.f32 %v1854_v45, %v602_v57  ;;  %vm1962_vm9 = vmor %vm607_vm4, %vm608_vm6  ;;  %vm617_vm12 = vweird.f32 %v1851_v44 }
 0x128   : > { %v574_v50 = vmul.f32 0.5, %v573_v42  ;;  %v523_v54 = vmul.f32 %v485_v49, %v1648_v46  ;;  %v732_v56 = vmul.f32 %v1826_v34, %v712_v6  ;;  %v532_v63 = vmul.f32 %v512_v48, %v1648_v46 }
 0x129   : > { %v655_v55 = vsub.f32 1.5, %v654_v25  ;;  %v604_v52 = vmul.f32 0.5, %v603_v9 }
 0x12a   : > { %v575_v58 = vsub.f32 1.5, %v574_v50  ;;  %v1879_v17 = vadd.f32 1e-05, %v523_v54  ;;  %v1411_v62 = vpop.eup %1410  ;;  %v752_v60 = vadd.f32 %v1843_v19, %v732_v56  ;;  %v1897_v14 = vadd.f32 1e-05, %v532_v63 }
 0x12b   : > { %v656_v23 = vmul.f32 %v1832_v27, %v655_v55  ;;  %v582_v35 = vmul.f32 %v1411_v62, %v1835_v28  ;;  %v1889_v24 = vpop.eup %1412  ;;  %vm588_vm2 = vweird.f32 %v1411_v62  ;;  %v605_v28 = vsub.f32 1.5, %v604_v52 }
 0x12c   : > { %v576_v5 = vmul.f32 %v1407_v31, %v575_v58  ;;  %1416 = vrsqrt.f32 %v1879_v17  ;;  %v672_v21 = vmul.f32 %v1889_v24, %v1847_v1  ;;  %1268 = vmatmul.msk.f32.gmra.mxu0 %vm367_vm0, %v752_v60  ;;  %v1907_v18 = vpop.eup %1414  ;;  %1284 = vmatmul.msk.f32.gmra.mxu1 %vm367_vm0, %v752_v60  ;;  %vm589_vm5 = vmor %vm587_vm3, %vm588_vm2  ;;  %vm678_vm8 = vweird.f32 %v1889_v24 }
 0x12d   : > { %v660_v13 = vsel %vm1875_vm14, %v1832_v27, %v656_v23  ;;  %v583_v33 = vmul.f32 %v1411_v62, %v582_v35  ;;  %1418 = vrsqrt.f32 %v1897_v14  ;;  %v612_v42 = vmul.f32 %v1907_v18, %v1851_v44  ;;  %vm2003_vm4 = vmor %vm677_vm7, %vm678_vm8 }
 0x12e   : > { %v580_v61 = vsel %vm1883_vm1, %v1407_v31, %v576_v5  ;;  %v497_v38 = vpop.xlane.xlu2 %496  ;;  %v721_v31 = vmul.f32 %v660_v13, %v1690_v20  ;;  %v673_v20 = vmul.f32 %v1889_v24, %v672_v21  ;;  %v606_v60 = vmul.f32 %v1854_v45, %v605_v28 }
 0x12f   : > { %v506_v15 = vpop.xlane.xlu0 %505  ;;  %v527_v2 = vmul.f32 %v497_v38, %v1648_v46  ;;  %v584_v53 = vmul.f32 0.5, %v583_v33  ;;  %v713_v27 = vmul.f32 %v580_v61, %v1674_v3  ;;  %v613_v23 = vmul.f32 %v1907_v18, %v612_v42 }
 0x130   : > { %v530_v12 = vmul.f32 %v506_v15, %v1648_v46  ;;  %v741_v41 = vmul.f32 %v1826_v34, %v721_v31  ;;  %v674_v63 = vmul.f32 0.5, %v673_v20  ;;  %vm597_vm11 = vweird.f32 %v1879_v17 }
 0x131   : > { %v1911_v32 = vadd.f32 1e-05, %v527_v2  ;;  %v585_v37 = vsub.f32 1.5, %v584_v53  ;;  %v733_v11 = vmul.f32 %v1826_v34, %v713_v27  ;;  %v614_v8 = vmul.f32 0.5, %v613_v23 }
 0x132   : > { %v1913_v36 = vadd.f32 1e-05, %v530_v12  ;;  %v1919_v3 = vpop.eup %1416  ;;  %v761_v6 = vadd.f32 %v1843_v19, %v741_v41  ;;  %v675_v15 = vsub.f32 1.5, %v674_v63  ;;  %v610_v27 = vsel %vm1962_vm9, %v1854_v45, %v606_v60 }
 0x133   : > { %1420 = vrsqrt.f32 %v1911_v32  ;;  %v586_v25 = vmul.f32 %v1411_v62, %v585_v37  ;;  %v592_v47 = vmul.f32 %v1919_v3, %v1879_v17  ;;  %v753_v49 = vadd.f32 %v1843_v19, %v733_v11  ;;  %v1930_v54 = vpop.eup %1418 }
 0x134   : > { %1422 = vrsqrt.f32 %v1913_v36  ;;  %1277 = vmatmul.msk.f32.gmra.mxu3 %vm367_vm0, %v761_v6  ;;  %1293 = vmatmul.msk.f32.gmra.mxu2 %vm367_vm0, %v761_v6  ;;  %v682_v9 = vmul.f32 %v1930_v54, %v1897_v14  ;;  %vm598_vm10 = vweird.f32 %v1919_v3  ;;  %vm637_vm14 = vweird.f32 %v1911_v32 }
 0x135   : > { %v590_v48 = vsel %vm589_vm5, %v1411_v62, %v586_v25  ;;  %v593_v55 = vmul.f32 %v1919_v3, %v592_v47  ;;  %1269 = vmatmul.msk.f32.gmra.mxu0 %vm367_vm0, %v753_v49  ;;  %1285 = vmatmul.msk.f32.gmra.mxu1 %vm367_vm0, %v753_v49  ;;  %vm599_vm13 = vmor %vm597_vm11, %vm598_vm10  ;;  %v676_v20 = vmul.f32 %v1889_v24, %v675_v15  ;;  %vm618_vm1 = vweird.f32 %v1907_v18 }
 0x136   : > { %v518_v26 = vpop.xlane.xlu1 %517  ;;  %v714_v58 = vmul.f32 %v590_v48, %v1696_v22  ;;  %v683_v52 = vmul.f32 %v1930_v54, %v682_v9  ;;  %v615_v25 = vsub.f32 1.5, %v614_v8  ;;  %vm667_vm5 = vweird.f32 %v1913_v36  ;;  %vm2034_vm9 = vmor %vm617_vm12, %vm618_vm1 }
 0x137   : > { %v494_v50 = vpop.xlane.xlu0 %493  ;;  %v534_v56 = vmul.f32 %v518_v26, %v1648_v46  ;;  %v594_v62 = vmul.f32 0.5, %v593_v55  ;;  %vm687_vm10 = vweird.f32 %v1897_v14  ;;  %vm688_vm11 = vweird.f32 %v1930_v54 }
 0x138   : > { %v526_v57 = vmul.f32 %v494_v50, %v1648_v46  ;;  %v734_v0 = vmul.f32 %v1826_v34, %v714_v58  ;;  %v684_v6 = vmul.f32 0.5, %v683_v52  ;;  %v680_v58 = vsel %vm2003_vm4, %v1889_v24, %v676_v20  ;;  %vm2056_vm12 = vmor %vm687_vm10, %vm688_vm11 }
 0x139   : > { %v1941_v29 = vpop.eup %1420  ;;  %v1945_v5 = vadd.f32 1e-05, %v534_v56  ;;  %v595_v38 = vsub.f32 1.5, %v594_v62  ;;  %v616_v60 = vmul.f32 %v1907_v18, %v615_v25 }
 0x13a   : > { %v1947_v22 = vadd.f32 1e-05, %v526_v57  ;;  %v1950_v35 = vpop.eup %1422  ;;  %v632_v13 = vmul.f32 %v1941_v29, %v1911_v32  ;;  %v754_v53 = vadd.f32 %v1843_v19, %v734_v0  ;;  %vm638_vm15 = vweird.f32 %v1941_v29 }
 0x13b   : > { %v662_v33 = vmul.f32 %v1950_v35, %v1913_v36  ;;  %1424 = vrsqrt.f32 %v1945_v5  ;;  %v596_v12 = vmul.f32 %v1919_v3, %v595_v38  ;;  %vm1989_vm2 = vmor %vm637_vm14, %vm638_vm15  ;;  %vm668_vm3 = vweird.f32 %v1950_v35 }
 0x13c   : > { %v633_v2 = vmul.f32 %v1941_v29, %v632_v13  ;;  %1426 = vrsqrt.f32 %v1947_v22  ;;  %vm669_vm6 = vmor %vm667_vm5, %vm668_vm3  ;;  %v716_v57 = vmul.f32 %v610_v27, %v1686_v4  ;;  %vm707_vm7 = vweird.f32 %v1945_v5 }
 0x13d   : > { %v663_v21 = vmul.f32 %v1950_v35, %v662_v33  ;;  %v600_v37 = vsel %vm599_vm13, %v1919_v3, %v596_v12  ;;  %1270 = vmatmul.msk.f32.gmra.mxu0 %vm367_vm0, %v754_v53  ;;  %1286 = vmatmul.msk.f32.gmra.mxu1 %vm367_vm0, %v754_v53  ;;  %v685_v9 = vsub.f32 1.5, %v684_v6  ;;  %v620_v14 = vsel %vm2034_vm9, %v1907_v18, %v616_v60 }
 0x13e   : > { %v634_v31 = vmul.f32 0.5, %v633_v2  ;;  %v715_v45 = vmul.f32 %v600_v37, %v1722_v43  ;;  %v736_v44 = vmul.f32 %v1826_v34, %v716_v57  ;;  %v723_v2 = vmul.f32 %v680_v58, %v1710_v39  ;;  %v2112_v57 = vld [vmem:[%s2281_s4] ss:$0 sm:$0xff] }
 0x13f   : > { %v515_v17 = vpop.xlane.xlu0 %514  ;;  %v664_v11 = vmul.f32 0.5, %v663_v21  ;;  %v686_v8 = vmul.f32 %v1930_v54, %v685_v9  ;;  %vm627_vm14 = vweird.f32 %v1947_v22  ;;  %v2117_v58 = vld [vmem:[%s2283_s6] ss:$0 sm:$0xff]  ;;  %vm1141_vm5 = vcmask 1040384  }
 0x140   : > { %v533_v41 = vmul.f32 %v515_v17, %v1648_v46  ;;  %v635_v42 = vsub.f32 1.5, %v634_v31  ;;  %v735_v49 = vmul.f32 %v1826_v34, %v715_v45  ;;  %v756_v39 = vadd.f32 %v1843_v19, %v736_v44 }
 0x141   : > { %v1425_v32 = vpop.eup %1424  ;;  %v665_v26 = vsub.f32 1.5, %v664_v11  ;;  %v717_v17 = vmul.f32 %v620_v14, %v1714_v40  ;;  %v743_v52 = vmul.f32 %v1826_v34, %v723_v2  ;;  %v690_v37 = vsel %vm2056_vm12, %v1930_v54, %v686_v8 }
 0x142   : > { %v1995_v46 = vadd.f32 1e-05, %v533_v41  ;;  %v1997_v3 = vpop.eup %1426  ;;  %v636_v28 = vmul.f32 %v1941_v29, %v635_v42  ;;  %v702_v48 = vmul.f32 %v1425_v32, %v1945_v5  ;;  %v755_v36 = vadd.f32 %v1843_v19, %v735_v49 }
 0x143   : > { %v666_v50 = vmul.f32 %v1950_v35, %v665_v26  ;;  %v622_v55 = vmul.f32 %v1997_v3, %v1947_v22  ;;  %vm708_vm8 = vweird.f32 %v1425_v32  ;;  %vm628_vm15 = vweird.f32 %v1997_v3 }
 0x144   : > { %1428 = vrsqrt.f32 %v1995_v46  ;;  %v640_v1 = vsel %vm1989_vm2, %v1941_v29, %v636_v28  ;;  %v703_v56 = vmul.f32 %v1425_v32, %v702_v48  ;;  %vm2042_vm13 = vmor %vm707_vm7, %vm708_vm8  ;;  %v737_v40 = vmul.f32 %v1826_v34, %v717_v17 }
 0x145   : > { %v670_v63 = vsel %vm669_vm6, %v1950_v35, %v666_v50  ;;  %v623_v23 = vmul.f32 %v1997_v3, %v622_v55  ;;  %v719_v62 = vmul.f32 %v640_v1, %v1749_v16  ;;  %1271 = vmatmul.msk.f32.gmra.mxu0 %vm367_vm0, %v755_v36  ;;  %1287 = vmatmul.msk.f32.gmra.mxu1 %vm367_vm0, %v755_v36  ;;  %vm629_vm1 = vmor %vm627_vm14, %vm628_vm15  ;;  %vm697_vm2 = vweird.f32 %v1995_v46 }
 0x146   : > { %v704_v0 = vmul.f32 0.5, %v703_v56  ;;  %v722_v29 = vmul.f32 %v670_v63, %v1739_v51  ;;  %v763_v22 = vadd.f32 %v1843_v19, %v743_v52  ;;  %v724_v54 = vmul.f32 %v690_v37, %v1733_v10  ;;  %v1149_v63 = vld [vmem:[%s2284_s7 + $0x10] sm:$0xff] }
 0x147   : > { %v624_v4 = vmul.f32 0.5, %v623_v23  ;;  %v739_v13 = vmul.f32 %v1826_v34, %v719_v62  ;;  %vm1143_vm6 = vcmask 1041408   ;;  %vm1145_vm7 = vcmask 1042432  }
 0x148   : > { %v705_v16 = vsub.f32 1.5, %v704_v0  ;;  %v742_v5 = vmul.f32 %v1826_v34, %v722_v29  ;;  %v744_v47 = vmul.f32 %v1826_v34, %v724_v54 }
 0x149   : > { %v759_v61 = vadd.f32 %v1843_v19, %v739_v13  ;;  %v625_v12 = vsub.f32 1.5, %v624_v4 }
 0x14a   : > { %v1429_v51 = vpop.eup %1428  ;;  %v706_v38 = vmul.f32 %v1425_v32, %v705_v16  ;;  %v762_v15 = vadd.f32 %v1843_v19, %v742_v5 }
 0x14b   : > { %v692_v33 = vmul.f32 %v1429_v51, %v1995_v46  ;;  %v626_v11 = vmul.f32 %v1997_v3, %v625_v12  ;;  %vm698_vm3 = vweird.f32 %v1429_v51  ;;  %v764_v46 = vadd.f32 %v1843_v19, %v744_v47 }
 0x14c   : > { %v710_v53 = vsel %vm2042_vm13, %v1425_v32, %v706_v38  ;;  %1278 = vmatmul.msk.f32.gmra.mxu3 %vm367_vm0, %v762_v15  ;;  %1294 = vmatmul.msk.f32.gmra.mxu2 %vm367_vm0, %v762_v15  ;;  %vm699_vm4 = vmor %vm697_vm2, %vm698_vm3  ;;  %v757_v32 = vadd.f32 %v1843_v19, %v737_v40 }
 0x14d   : > { %v693_v27 = vmul.f32 %v1429_v51, %v692_v33  ;;  %v726_v31 = vmul.f32 %v710_v53, %v1765_v7  ;;  %1272 = vmatmul.msk.f32.gmra.mxu0 %vm367_vm0, %v756_v39  ;;  %1288 = vmatmul.msk.f32.gmra.mxu1 %vm367_vm0, %v756_v39  ;;  %v630_v42 = vsel %vm629_vm1, %v1997_v3, %v626_v11 }
 0x14e   : > { %v718_v25 = vmul.f32 %v630_v42, %v1755_v59 }
 0x14f   : > { %v694_v18 = vmul.f32 0.5, %v693_v27  ;;  %v746_v41 = vmul.f32 %v1826_v34, %v726_v31 }
 0x150   : > { %v738_v10 = vmul.f32 %v1826_v34, %v718_v25 }
 0x151   : > { %v695_v20 = vsub.f32 1.5, %v694_v18  ;;  %v766_v7 = vadd.f32 %v1843_v19, %v746_v41 }
 0x152   : > { %v758_v43 = vadd.f32 %v1843_v19, %v738_v10 }
 0x153   : > { %v696_v45 = vmul.f32 %v1429_v51, %v695_v20 }
 0x154   : > { %1279 = vmatmul.msk.f32.gmra.mxu3 %vm367_vm0, %v763_v22  ;;  %1295 = vmatmul.msk.f32.gmra.mxu2 %vm367_vm0, %v763_v22 }
 0x155   : > { %v700_v26 = vsel %vm699_vm4, %v1429_v51, %v696_v45  ;;  %1273 = vmatmul.msk.f32.gmra.mxu0 %vm367_vm0, %v757_v32  ;;  %1289 = vmatmul.msk.f32.gmra.mxu1 %vm367_vm0, %v757_v32 }
 0x156   : > { %v725_v3 = vmul.f32 %v700_v26, %v1771_v30 }
 0x158   : > { %v745_v59 = vmul.f32 %v1826_v34, %v725_v3 }
 0x15a   : > { %v765_v28 = vadd.f32 %v1843_v19, %v745_v59  ;;  %v1150_v19 = vld [vmem:[%s2284_s7 + $0x18] sm:$0xff] }
 0x15b   : > { %1166 = vmatpush.msrb.mxu2 %v1150_v19 }
 0x15c   : > { %1280 = vmatmul.msk.f32.gmra.mxu3 %vm367_vm0, %v764_v46  ;;  %1296 = vmatmul.msk.f32.gmra.mxu2 %vm367_vm0, %v764_v46 }
 0x15d   : > { %1274 = vmatmul.msk.f32.gmra.mxu0 %vm367_vm0, %v758_v43  ;;  %1290 = vmatmul.msk.f32.gmra.mxu1 %vm367_vm0, %v758_v43 }
 0x15e   : > { %1167 = vmatpush.msrb.mxu2 %v1149_v63 }
 0x164   : > { %1281 = vmatmul.msk.f32.gmra.mxu3 %vm367_vm0, %v765_v28  ;;  %1297 = vmatmul.msk.f32.gmra.mxu2 %vm367_vm0, %v765_v28 }
 0x165   : > { %1275 = vmatmul.msk.f32.gmra.mxu0 %vm367_vm0, %v759_v61  ;;  %1291 = vmatmul.msk.f32.gmra.mxu1 %vm367_vm0, %v759_v61 }
 0x16c   : > { %1282 = vmatmul.msk.f32.gmra.mxu3 %vm367_vm0, %v766_v7  ;;  %1298 = vmatmul.msk.f32.gmra.mxu2 %vm367_vm0, %v766_v7 }
 0x1a1   : > { %v840_v30 = vpop.f32.mrf.mxu0  ;;  %v913_v34 = vpop.f32.mrf.mxu1 }
 0x1a2   : > { %v841_v62 = vadd.f32 %v2112_v57, %v840_v30  ;;  %v914_v0 = vadd.f32 %v2117_v58, %v913_v34 }
 0x1a4   : > { %v998_v5 = vmul.f32 %v841_v62, %v841_v62  ;;  %v1088_v51 = vmul.f32 %v914_v0, %v914_v0  ;;  %v961_v33 = vsel %vm367_vm0, %v841_v62, 0.0  ;;  %v1051_v15 = vsel %vm367_vm0, %v914_v0, 0.0 }
 0x1a6   : > { %v867_v56 = vpop.f32.mrf.mxu3  ;;  %v940_v36 = vpop.f32.mrf.mxu2  ;;  %v1014_v12 = vsel %vm367_vm0, %v998_v5, 0.0  ;;  %v1104_v21 = vsel %vm367_vm0, %v1088_v51, 0.0  ;;  %v1148_v5 = vld [vmem:[%s2284_s7 + $0x8] sm:$0xff] }
 0x1a7   : > { %v868_v60 = vadd.f32 %v2112_v57, %v867_v56  ;;  %v941_v24 = vadd.f32 %v2117_v58, %v940_v36  ;;  %1168 = vmatpush.msrb.mxu2 %v1148_v5 }
 0x1a9   : > { %v843_v48 = vpop.f32.mrf.mxu0  ;;  %v916_v49 = vpop.f32.mrf.mxu1  ;;  %v1007_v35 = vmul.f32 %v868_v60, %v868_v60  ;;  %v1097_v2 = vmul.f32 %v941_v24, %v941_v24  ;;  %v2135_v53 = vsel %vm367_vm0, %v868_v60, 0.0  ;;  %v2138_v27 = vsel %vm367_vm0, %v941_v24, 0.0 }
 0x1aa   : > { %v844_v13 = vadd.f32 %v2112_v57, %v843_v48  ;;  %v917_v16 = vadd.f32 %v2117_v58, %v916_v49 }
 0x1ab   : > { %v2141_v31 = vsel %vm367_vm0, %v1007_v35, 0.0  ;;  %v2149_v22 = vsel %vm367_vm0, %v1097_v2, 0.0 }
 0x1ac   : > { %v999_v61 = vmul.f32 %v844_v13, %v844_v13  ;;  %v1089_v14 = vmul.f32 %v917_v16, %v917_v16  ;;  %v962_v18 = vsel %vm367_vm0, %v844_v13, 0.0  ;;  %v1052_v17 = vsel %vm367_vm0, %v917_v16, 0.0 }
 0x1ad   : > { %v963_v32 = vadd.f32 %v962_v18, %v961_v33  ;;  %v1053_v25 = vadd.f32 %v1052_v17, %v1051_v15 }
 0x1ae   : > { %v1015_v41 = vsel %vm367_vm0, %v999_v61, 0.0  ;;  %v1105_v54 = vsel %vm367_vm0, %v1089_v14, 0.0 }
 0x1af   : > { %v1016_v10 = vadd.f32 %v1015_v41, %v1014_v12  ;;  %v1106_v59 = vadd.f32 %v1105_v54, %v1104_v21 }
 0x1b2   : > { %v846_v6 = vpop.f32.mrf.mxu0  ;;  %v919_v50 = vpop.f32.mrf.mxu1 }
 0x1b3   : > { %v847_v44 = vadd.f32 %v2112_v57, %v846_v6  ;;  %v920_v38 = vadd.f32 %v2117_v58, %v919_v50 }
 0x1b5   : > { %v1000_v52 = vmul.f32 %v847_v44, %v847_v44  ;;  %v1090_v20 = vmul.f32 %v920_v38, %v920_v38  ;;  %v964_v47 = vsel %vm367_vm0, %v847_v44, 0.0  ;;  %v1054_v26 = vsel %vm367_vm0, %v920_v38, 0.0 }
 0x1b6   : > { %v965_v48 = vadd.f32 %v964_v47, %v963_v32  ;;  %v1055_v49 = vadd.f32 %v1054_v26, %v1053_v25 }
 0x1b7   : > { %v870_v9 = vpop.f32.mrf.mxu3  ;;  %v943_v4 = vpop.f32.mrf.mxu2  ;;  %v1017_v46 = vsel %vm367_vm0, %v1000_v52, 0.0  ;;  %v1107_v28 = vsel %vm367_vm0, %v1090_v20, 0.0 }
 0x1b8   : > { %v871_v7 = vadd.f32 %v2112_v57, %v870_v9  ;;  %v944_v42 = vadd.f32 %v2117_v58, %v943_v4 }
 0x1ba   : > { %v849_v55 = vpop.f32.mrf.mxu0  ;;  %v922_v1 = vpop.f32.mrf.mxu1  ;;  %v1008_v30 = vmul.f32 %v871_v7, %v871_v7  ;;  %v1098_v19 = vmul.f32 %v944_v42, %v944_v42  ;;  %v2164_v62 = vsel %vm367_vm0, %v871_v7, 0.0  ;;  %v2170_v13 = vsel %vm367_vm0, %v944_v42, 0.0 }
 0x1bb   : > { %v850_v40 = vadd.f32 %v2112_v57, %v849_v55  ;;  %v923_v45 = vadd.f32 %v2117_v58, %v922_v1  ;;  %v1018_v55 = vadd.f32 %v1017_v46, %v1016_v10 }
 0x1bc   : > { %v2167_v4 = vsel %vm367_vm0, %v1008_v30, 0.0  ;;  %v2178_v51 = vsel %vm367_vm0, %v1098_v19, 0.0 }
 0x1bd   : > { %v1001_v34 = vmul.f32 %v850_v40, %v850_v40  ;;  %v1091_v6 = vmul.f32 %v923_v45, %v923_v45  ;;  %v966_v1 = vsel %vm367_vm0, %v850_v40, 0.0  ;;  %v1056_v56 = vsel %vm367_vm0, %v923_v45, 0.0 }
 0x1be   : > { %v967_v35 = vadd.f32 %v966_v1, %v965_v48  ;;  %v1057_v44 = vadd.f32 %v1056_v56, %v1055_v49 }
 0x1bf   : > { %v1019_v24 = vsel %vm367_vm0, %v1001_v34, 0.0  ;;  %v1109_v61 = vsel %vm367_vm0, %v1091_v6, 0.0 }
 0x1c0   : > { %v1020_v14 = vadd.f32 %v1019_v24, %v1018_v55 }
 0x1c2   : > { %v852_v23 = vpop.f32.mrf.mxu0  ;;  %v925_v29 = vpop.f32.mrf.mxu1 }
 0x1c3   : > { %v853_v3 = vadd.f32 %v2112_v57, %v852_v23  ;;  %v926_v43 = vadd.f32 %v2117_v58, %v925_v29  ;;  %v1108_v23 = vadd.f32 %v1107_v28, %v1106_v59 }
 0x1c5   : > { %v1002_v0 = vmul.f32 %v853_v3, %v853_v3  ;;  %v1092_v29 = vmul.f32 %v926_v43, %v926_v43  ;;  %v968_v38 = vsel %vm367_vm0, %v853_v3, 0.0  ;;  %v1058_v33 = vsel %vm367_vm0, %v926_v43, 0.0 }
 0x1c6   : > { %v1110_v41 = vadd.f32 %v1109_v61, %v1108_v23  ;;  %v969_v20 = vadd.f32 %v968_v38, %v967_v35  ;;  %v1059_v7 = vadd.f32 %v1058_v33, %v1057_v44  ;;  %v1147_v61 = vld [vmem:[%s2284_s7] sm:$0xff] }
 0x1c7   : > { %v1111_v12 = vsel %vm367_vm0, %v1092_v29, 0.0  ;;  %1169 = vmatpush.msrb.mxu2 %v1147_v61 }
 0x1c8   : > { %v1112_v26 = vadd.f32 %v1111_v12, %v1110_v41 }
 0x1ca   : > { %v855_v8 = vpop.f32.mrf.mxu0  ;;  %v928_v39 = vpop.f32.mrf.mxu1 }
 0x1cb   : > { %v856_v36 = vadd.f32 %v2112_v57, %v855_v8  ;;  %v929_v16 = vadd.f32 %v2117_v58, %v928_v39  ;;  %v1021_v8 = vsel %vm367_vm0, %v1002_v0, 0.0 }
 0x1cc   : > { %v1022_v42 = vadd.f32 %v1021_v8, %v1020_v14 }
 0x1cd   : > { %v1003_v15 = vmul.f32 %v856_v36, %v856_v36  ;;  %v970_v39 = vsel %vm367_vm0, %v856_v36, 0.0  ;;  %v1093_v18 = vmul.f32 %v929_v16, %v929_v16  ;;  %v1060_v40 = vsel %vm367_vm0, %v929_v16, 0.0 }
 0x1ce   : > { %v971_v10 = vadd.f32 %v970_v39, %v969_v20  ;;  %v1061_v43 = vadd.f32 %v1060_v40, %v1059_v7 }
 0x1cf   : > { %v873_v37 = vpop.f32.mrf.mxu3  ;;  %v946_v11 = vpop.f32.mrf.mxu2  ;;  %v1023_v45 = vsel %vm367_vm0, %v1003_v15, 0.0  ;;  %v1113_v59 = vsel %vm367_vm0, %v1093_v18, 0.0 }
 0x1d0   : > { %v874_v17 = vadd.f32 %v2112_v57, %v873_v37  ;;  %v947_v52 = vadd.f32 %v2117_v58, %v946_v11  ;;  %v1024_v34 = vadd.f32 %v1023_v45, %v1022_v42  ;;  %v1114_v56 = vadd.f32 %v1113_v59, %v1112_v26 }
 0x1d2   : > { %v858_v50 = vpop.f32.mrf.mxu0  ;;  %v931_v63 = vpop.f32.mrf.mxu1  ;;  %v1009_v28 = vmul.f32 %v874_v17, %v874_v17  ;;  %v1099_v30 = vmul.f32 %v947_v52, %v947_v52  ;;  %v2196_v48 = vsel %vm367_vm0, %v874_v17, 0.0  ;;  %v1072_v36 = vsel %vm367_vm0, %v947_v52, 0.0 }
 0x1d3   : > { %v859_v2 = vadd.f32 %v2112_v57, %v858_v50  ;;  %v932_v21 = vadd.f32 %v2117_v58, %v931_v63 }
 0x1d4   : > { %v2206_v0 = vsel %vm367_vm0, %v1009_v28, 0.0  ;;  %v2209_v29 = vsel %vm367_vm0, %v1099_v30, 0.0 }
 0x1d5   : > { %v1004_v32 = vmul.f32 %v859_v2, %v859_v2  ;;  %v1094_v46 = vmul.f32 %v932_v21, %v932_v21  ;;  %v972_v49 = vsel %vm367_vm0, %v859_v2, 0.0  ;;  %v1062_v50 = vsel %vm367_vm0, %v932_v21, 0.0 }
 0x1d6   : > { %v1063_v5 = vadd.f32 %v1062_v50, %v1061_v43 }
 0x1d7   : > { %v876_v60 = vpop.f32.mrf.mxu3  ;;  %v949_v9 = vpop.f32.mrf.mxu2  ;;  %v1025_v6 = vsel %vm367_vm0, %v1004_v32, 0.0  ;;  %v1115_v63 = vsel %vm367_vm0, %v1094_v46, 0.0 }
 0x1d8   : > { %v877_v19 = vadd.f32 %v2112_v57, %v876_v60  ;;  %v950_v55 = vadd.f32 %v2117_v58, %v949_v9  ;;  %v973_v60 = vadd.f32 %v972_v49, %v971_v10  ;;  %v1026_v16 = vadd.f32 %v1025_v6, %v1024_v34 }
 0x1d9   : > { %v1116_v38 = vadd.f32 %v1115_v63, %v1114_v56 }
 0x1da   : > { %v861_v54 = vpop.f32.mrf.mxu0  ;;  %v934_v47 = vpop.f32.mrf.mxu1  ;;  %v1010_v35 = vmul.f32 %v877_v19, %v877_v19  ;;  %v1100_v33 = vmul.f32 %v950_v55, %v950_v55  ;;  %v984_v32 = vsel %vm367_vm0, %v877_v19, 0.0  ;;  %v1074_v10 = vsel %vm367_vm0, %v950_v55, 0.0 }
 0x1db   : > { %v862_v25 = vadd.f32 %v2112_v57, %v861_v54  ;;  %v935_v37 = vadd.f32 %v2117_v58, %v934_v47 }
 0x1dc   : > { %v1127_v43 = vsel %vm367_vm0, %v1100_v33, 0.0 }
 0x1dd   : > { %v1005_v1 = vmul.f32 %v862_v25, %v862_v25  ;;  %v1095_v23 = vmul.f32 %v935_v37, %v935_v37  ;;  %v974_v24 = vsel %vm367_vm0, %v862_v25, 0.0  ;;  %v1064_v9 = vsel %vm367_vm0, %v935_v37, 0.0 }
 0x1de   : > { %v975_v8 = vadd.f32 %v974_v24, %v973_v60  ;;  %v1065_v52 = vadd.f32 %v1064_v9, %v1063_v5 }
 0x1df   : > { %v879_v3 = vpop.f32.mrf.mxu3  ;;  %v952_v11 = vpop.f32.mrf.mxu2  ;;  %v1027_v15 = vsel %vm367_vm0, %v1005_v1, 0.0  ;;  %v1117_v12 = vsel %vm367_vm0, %v1095_v23, 0.0 }
 0x1e0   : > { %v880_v21 = vadd.f32 %v2112_v57, %v879_v3  ;;  %v953_v41 = vadd.f32 %v2117_v58, %v952_v11  ;;  %v1028_v40 = vadd.f32 %v1027_v15, %v1026_v16  ;;  %v1118_v25 = vadd.f32 %v1117_v12, %v1116_v38 }
 0x1e1   : > { %v1037_v11 = vsel %vm367_vm0, %v1010_v35, 0.0 }
 0x1e2   : > { %v864_v44 = vpop.f32.mrf.mxu0  ;;  %v937_v14 = vpop.f32.mrf.mxu1  ;;  %v1011_v30 = vmul.f32 %v880_v21, %v880_v21  ;;  %v1101_v34 = vmul.f32 %v953_v41, %v953_v41  ;;  %v986_v6 = vsel %vm367_vm0, %v880_v21, 0.0  ;;  %v1076_v1 = vsel %vm367_vm0, %v953_v41, 0.0 }
 0x1e3   : > { %v865_v2 = vadd.f32 %v2112_v57, %v864_v44  ;;  %v938_v39 = vadd.f32 %v2117_v58, %v937_v14 }
 0x1e4   : > { %v1129_v16 = vsel %vm367_vm0, %v1101_v34, 0.0 }
 0x1e5   : > { %v976_v20 = vsel %vm367_vm0, %v865_v2, 0.0  ;;  %v1006_v7 = vmul.f32 %v865_v2, %v865_v2  ;;  %v1066_v42 = vsel %vm367_vm0, %v938_v39, 0.0  ;;  %v1096_v45 = vmul.f32 %v938_v39, %v938_v39 }
 0x1e6   : > { %v977_v54 = vadd.f32 %v976_v20, %v975_v8  ;;  %v1067_v26 = vadd.f32 %v1066_v42, %v1065_v52 }
 0x1e7   : > { %v882_v18 = vpop.f32.mrf.mxu3  ;;  %v955_v17 = vpop.f32.mrf.mxu2  ;;  %v1029_v47 = vsel %vm367_vm0, %v1006_v7, 0.0  ;;  %v1119_v3 = vsel %vm367_vm0, %v1096_v45, 0.0 }
 0x1e8   : > { %v979_v46 = vadd.f32 %v2135_v53, %v977_v54  ;;  %v1030_v37 = vadd.f32 %v1029_v47, %v1028_v40  ;;  %v1069_v59 = vadd.f32 %v2138_v27, %v1067_v26  ;;  %v1120_v28 = vadd.f32 %v1119_v3, %v1118_v25 }
 0x1e9   : > { %v883_v55 = vadd.f32 %v2112_v57, %v882_v18  ;;  %v956_v63 = vadd.f32 %v2117_v58, %v955_v17 }
 0x1ea   : > { %v981_v49 = vadd.f32 %v2164_v62, %v979_v46  ;;  %v1032_v19 = vadd.f32 %v2141_v31, %v1030_v37  ;;  %v1071_v53 = vadd.f32 %v2170_v13, %v1069_v59  ;;  %v1122_v50 = vadd.f32 %v2149_v22, %v1120_v28 }
 0x1eb   : > { %v1039_v22 = vsel %vm367_vm0, %v1011_v30, 0.0  ;;  %v1012_v35 = vmul.f32 %v883_v55, %v883_v55  ;;  %v1078_v8 = vsel %vm367_vm0, %v956_v63, 0.0 }
 0x1ec   : > { %v1034_v56 = vadd.f32 %v2167_v4, %v1032_v19  ;;  %v983_v27 = vadd.f32 %v2196_v48, %v981_v49  ;;  %v1124_v31 = vadd.f32 %v2178_v51, %v1122_v50  ;;  %v1073_v60 = vadd.f32 %v1072_v36, %v1071_v53 }
 0x1ed   : > { %v1102_v51 = vmul.f32 %v956_v63, %v956_v63  ;;  %v1041_v12 = vsel %vm367_vm0, %v1012_v35, 0.0 }
 0x1ee   : > { %v985_v5 = vadd.f32 %v984_v32, %v983_v27  ;;  %v1036_v4 = vadd.f32 %v2206_v0, %v1034_v56  ;;  %v1075_v48 = vadd.f32 %v1074_v10, %v1073_v60  ;;  %v1126_v9 = vadd.f32 %v2209_v29, %v1124_v31 }
 0x1ef   : > { %v885_v23 = vpop.f32.mrf.mxu3  ;;  %v958_v62 = vpop.f32.mrf.mxu2  ;;  %v1131_v17 = vsel %vm367_vm0, %v1102_v51, 0.0 }
 0x1f0   : > { %v886_v24 = vadd.f32 %v2112_v57, %v885_v23  ;;  %v959_v13 = vadd.f32 %v2117_v58, %v958_v62  ;;  %v987_v61 = vadd.f32 %v986_v6, %v985_v5  ;;  %v1038_v38 = vadd.f32 %v1037_v11, %v1036_v4 }
 0x1f1   : > { %v988_v57 = vsel %vm367_vm0, %v883_v55, 0.0  ;;  %v1077_v33 = vadd.f32 %v1076_v1, %v1075_v48  ;;  %v1128_v58 = vadd.f32 %v1127_v43, %v1126_v9 }
 0x1f2   : > { %v1013_v44 = vmul.f32 %v886_v24, %v886_v24  ;;  %v1103_v36 = vmul.f32 %v959_v13, %v959_v13  ;;  %v990_v15 = vsel %vm367_vm0, %v886_v24, 0.0  ;;  %v989_v2 = vadd.f32 %v988_v57, %v987_v61 }
 0x1f3   : > { %v1040_v14 = vadd.f32 %v1039_v22, %v1038_v38  ;;  %v1080_v0 = vsel %vm367_vm0, %v959_v13, 0.0  ;;  %v1079_v29 = vadd.f32 %v1078_v8, %v1077_v33  ;;  %v1130_v21 = vadd.f32 %v1129_v16, %v1128_v58 }
 0x1f4   : > { %v1043_v39 = vsel %vm367_vm0, %v1013_v44, 0.0  ;;  %v991_v52 = vadd.f32 %v990_v15, %v989_v2  ;;  %v1133_v41 = vsel %vm367_vm0, %v1103_v36, 0.0 }
 0x1f5   : > { %v1042_v18 = vadd.f32 %v1041_v12, %v1040_v14  ;;  %v1132_v20 = vadd.f32 %v1131_v17, %v1130_v21  ;;  %v1081_v7 = vadd.f32 %v1080_v0, %v1079_v29 }
 0x1f6   : > { %v992_v40 = vrot.slane %v991_v52, 4 }
 0x1f7   : > { %v1044_v54 = vadd.f32 %v1043_v39, %v1042_v18  ;;  %v1082_v42 = vrot.slane %v1081_v7, 4  ;;  %v1134_v45 = vadd.f32 %v1133_v41, %v1132_v20 }
 0x1f8   : > { %v993_v32 = vadd.f32 %v992_v40, %v991_v52 }
 0x1f9   : > { %v1045_v25 = vrot.slane %v1044_v54, 4  ;;  %v1083_v47 = vadd.f32 %v1082_v42, %v1081_v7  ;;  %v1135_v26 = vrot.slane %v1134_v45, 4 }
 0x1fa   : > { %v994_v10 = vrot.slane %v993_v32, 2 }
 0x1fb   : > { %v1046_v46 = vadd.f32 %v1045_v25, %v1044_v54  ;;  %v1084_v37 = vrot.slane %v1083_v47, 2  ;;  %v1136_v3 = vadd.f32 %v1135_v26, %v1134_v45 }
 0x1fc   : > { %v995_v11 = vadd.f32 %v994_v10, %v993_v32 }
 0x1fd   : > { %v1047_v43 = vrot.slane %v1046_v46, 2  ;;  %v1085_v59 = vadd.f32 %v1084_v37, %v1083_v47  ;;  %v1137_v28 = vrot.slane %v1136_v3, 2 }
 0x1fe   : > { %v996_v30 = vrot.slane %v995_v11, 1 }
 0x1ff   : > { %v1048_v34 = vadd.f32 %v1047_v43, %v1046_v46  ;;  %v1086_v49 = vrot.slane %v1085_v59, 1  ;;  %v1138_v19 = vadd.f32 %v1137_v28, %v1136_v3 }
 0x200   : > { %v997_v50 = vadd.f32 %v996_v30, %v995_v11 }
 0x201   : > { %v1049_v6 = vrot.slane %v1048_v34, 1  ;;  %v1139_v53 = vrot.slane %v1138_v19, 1  ;;  %v1087_v1 = vadd.f32 %v1086_v49, %v1085_v59 }
 0x203   : > { %v1050_v55 = vadd.f32 %v1049_v6, %v1048_v34  ;;  %v1140_v56 = vadd.f32 %v1139_v53, %v1138_v19 }
 0x205   : > { %v1142_v27 = vsel %vm1141_vm5, %v997_v50, %v1050_v55 }
 0x206   : > { %v1144_v63 = vsel %vm1143_vm6, %v1142_v27, %v1087_v1 }
 0x207   : > { %v1146_v23 = vsel %vm1145_vm7, %v1144_v63, %v1140_v56 }
 0x208   : > { %1299 = vmatmul.msk.f32.vlgmr.msrb.gmra.mxu2 %vm367_vm0, %v1146_v23 }
 0x287   : > { %1177 = sbr.rel (%p1300_p7) target bundleno = 654 (0x28e), region = 56 }
 0x28b   : > { %v1171_v62 = vpop.f32.mrf.mxu2 }
 0x28c   : > { %vm1178_vm8 = vcmask 60416   ;;  %v1471_v31 = vmov 0.0  }
 0x28d   : > { %1179 = vst.msk [vmem:[%s1553_s18] sm:$0xf] %vm1178_vm8, %v1471_v31 }
 0x28e PF: > { %vm1182_vm9 = vcmask 60416  }
 0x294   : > { %v1180_v60 = vld [vmem:[%s1553_s18] sm:$0xf] }
 0x295   : > { %v1181_v24 = vadd.f32 %v1180_v60, %v1171_v62 }
 0x297   : > { %1183 = vst.msk [vmem:[%s1553_s18] sm:$0xf] %vm1182_vm9, %v1181_v24 }
 0x298 PF: > { %s18_s9 = sadd.s32 1, %s1468_s9   ;;  %s2304_s27 = smov %s1460_s29 }
 0x299   : > { %p15_p8 = scmp.ge.s32.totalorder %s18_s9, 6   ;;  %s2305_s28 = smov %s1464_s30 }
 0x29a   : > { %s2306_s29 = smov %s2309_s10  ;;  %s2307_s30 = smov %s2313_s11 }
 0x29b   :  { %17 = sbr.rel (!%p15_p8) target bundleno = 3 (0x3), region = 86 }

// kernel: ptavit_stage_no_down.11
= control target key start
LH: loop header
LB: loop body
LE: loop exit
PB: predicated region body
PF: predicated region fallthrough
CT: control target
= control target key end

     0   :  { %s3552_s26 = smov 0   ;;  %s3554_s27 = smov 0   ;;  %s4619_s0 = inlined_call_operand.vmem [shape: bf16[2,16,16,32], index: 0, kind: input, shape index: {}]   ;;  %s4620_s1 = inlined_call_operand.vmem [shape: f32[2,4,8], index: 1, kind: input, shape index: {}]   ;;  %s4621_s2 = inlined_call_operand.vmem [shape: f32[64,64], index: 2, kind: input, shape index: {}]   ;;  %s4622_s3 = inlined_call_operand.vmem [shape: f32[1,32], index: 3, kind: input, shape index: {}]   ;;  %s4623_s4 = inlined_call_operand.vmem [shape: f32[1,32], index: 4, kind: input, shape index: {}]   ;;  %s4624_s5 = inlined_call_operand.vmem [shape: f32[32,32], index: 5, kind: input, shape index: {}]   ;;  %s4625_s6 = inlined_call_operand.vmem [shape: f32[1,32], index: 6, kind: input, shape index: {}]   ;;  %s4626_s7 = inlined_call_operand.vmem [shape: f32[32,32], index: 7, kind: input, shape index: {}]   ;;  %s4627_s8 = inlined_call_operand.vmem [shape: f32[1,32], index: 8, kind: input, shape index: {}]   ;;  %s4628_s9 = inlined_call_operand.vmem [shape: f32[32,32], index: 9, kind: input, shape index: {}]   ;;  %s4629_s10 = inlined_call_operand.vmem [shape: f32[1,32], index: 10, kind: input, shape index: {}]   ;;  %s4630_s11 = inlined_call_operand.vmem [shape: f32[8,32], index: 11, kind: input, shape index: {}]   ;;  %s4631_s12 = inlined_call_operand.vmem [shape: f32[1,32], index: 12, kind: input, shape index: {}]   ;;  %s4632_s13 = inlined_call_operand.vmem [shape: f32[1,32], index: 13, kind: input, shape index: {}]   ;;  %s4633_s14 = inlined_call_operand.vmem [shape: f32[1,32], index: 14, kind: input, shape index: {}]   ;;  %s4634_s15 = inlined_call_operand.vmem [shape: f32[1,32], index: 15, kind: input, shape index: {}]   ;;  %s4635_s16 = inlined_call_operand.vmem [shape: f32[32,32], index: 16, kind: input, shape index: {}]   ;;  %s4636_s17 = inlined_call_operand.vmem [shape: f32[1,32], index: 17, kind: input, shape index: {}]   ;;  %s4637_s18 = inlined_call_operand.vmem [shape: f32[1,32], index: 18, kind: input, shape index: {}]   ;;  %s4638_s19 = inlined_call_operand.vmem [shape: f32[1,32], index: 19, kind: input, shape index: {}]   ;;  %s4639_s20 = inlined_call_operand.vmem [shape: f32[32,128], index: 20, kind: input, shape index: {}]   ;;  %s4640_s21 = inlined_call_operand.vmem [shape: f32[1,128], index: 21, kind: input, shape index: {}]   ;;  %s4641_s22 = inlined_call_operand.vmem [shape: f32[128,32], index: 22, kind: input, shape index: {}]   ;;  %s4642_s23 = inlined_call_operand.vmem [shape: f32[1,32], index: 23, kind: input, shape index: {}]   ;;  %s4643_s24 = inlined_call_operand.vmem [shape: bf16[2,16,16,32], index: 24, kind: output, shape index: {}]  }
   0x1   :  { %4649 = sst [smem:[#allocation4_spill]] %s4619_s0  ;;  %s3556_s28 = smov 0  }
   0x2   :  { %4650 = sst [smem:[#allocation5_spill]] %s4620_s1 }
   0x3   :  { %4651 = sst [smem:[#allocation6_spill]] %s4621_s2 }
   0x4   :  { %4652 = sst [smem:[#allocation7_spill]] %s4622_s3 }
   0x5   :  { %4653 = sst [smem:[#allocation8_spill]] %s4623_s4 }
   0x6   :  { %4654 = sst [smem:[#allocation9_spill]] %s4624_s5  ;;  %s3550_s5 = smov 0  }
   0x7   :  { %4655 = sst [smem:[#allocation10_spill]] %s4625_s6  ;;  %s3558_s6 = smov 0  }
   0x8   :  { %4656 = sst [smem:[#allocation11_spill]] %s4626_s7 }
   0x9   :  { %4657 = sst [smem:[#allocation12_spill]] %s4627_s8 }
   0xa   :  { %4658 = sst [smem:[#allocation13_spill]] %s4628_s9 }
   0xb   :  { %4659 = sst [smem:[#allocation14_spill]] %s4629_s10 }
   0xc LB: > { %s43_s2 = sadd.s32 1, %s3412_s27  ;;  %s46_s29 = sadd.s32 1, %s3416_s28  ;;  %s3420_s6 = sphi %s3558_s6, %s34_s6   ;;  %s3416_s28 = sphi %s3556_s28, %s4682_s28   ;;  %s3412_s27 = sphi %s3554_s27, %s4681_s27   ;;  %s3408_s26 = sphi %s3552_s26, %s4680_s26   ;;  %s3404_s5 = sphi %s3550_s5, %s4679_s5  }
   0xd   : > { %p44_p0 = scmp.ge.s32.totalorder %s43_s2, 4  ;;  %p3018_p1 = scmp.ge.s32.totalorder %s3420_s6, 1 }
   0xe   : > { %p693_p2 = scmp.lt.s32.totalorder %s3420_s6, 9 }
   0xf   : > { %s4684_s2 = smov (%p44_p0, %s43_s2), 0  ;;  %s4686_s29 = smov (!%p44_p0, %s46_s29), %s3416_s28 }
  0x10   : > { %p694_p3 = pnand %p3018_p1, %p693_p2  ;;  %p48_p4 = scmp.ge.s32.totalorder %s4686_s29, 2 }
  0x11   : > { %s3019_s0 = sshll.u32 (!%p694_p3), %s3404_s5, 2  ;;  %p774_p5 = scmp.lt.s32.totalorder (!%p694_p3), %s3408_s26, 1 }
  0x12   : > { %s4688_s29 = smov (%p48_p4, %s4686_s29), 0  ;;  %697 = sbr.rel (%p694_p3) target bundleno = 2123 (0x84b), region = 116 }
  0x13   : > { %4660 = sst [smem:[#allocation3_spill]] %s4688_s29  ;;  %p776_p6 = scmp.lt.s32.totalorder (!%p694_p3), %s3019_s0, 15 }
  0x14   : > { %s4661_s1 = sld [smem:[#allocation4_spill]] (!%p694_p3) }
  0x15   : > { %s4672_s9 = sld [smem:[#allocation13_spill]] (!%p694_p3) }
  0x16   : > { %s4675_s10 = sld [smem:[#allocation14_spill]] (!%p694_p3) }
  0x17   : > { %s4690_s26 = smov (!%p774_p5, %s3408_s26), 1  ;;  %s4692_s0 = smov (!%p776_p6, %s3019_s0), 15  ;;  %vm815_vm0 = vcmask 261120   ;;  %v3422_v20 = vmov 32.0   ;;  %vm1205_vm2 = vcmask 64512  }
  0x18   : > { %s3021_s7 = sshll.u32 %s4690_s26, 5  ;;  %s3020_s30 = sshll.u32 %s4692_s0, 1  ;;  %3234 = vrcp.f32 %v3422_v20  ;;  %v1195_v20 = vld [vmem:[%s4630_s11] sm:$0xff] }
  0x19   : > { %s3583_s3 = sadd.s32 %s3021_s7, %s3020_s30  ;;  %s3023_s5 = sshll.u32 %s4690_s26, 2  ;;  %1224 = vmatpush.msra.mxu3 %v1195_v20 }
  0x1a   : > { %s4647_s25 = sshll.u32 %s3583_s3, 2  ;;  %s4662_s7 = sld [smem:[#allocation5_spill]] }
  0x1b   : > { %s782_s29 = scalar_lea.vmem %s4661_s1, %s4647_s25  ;;  %1259 = vmatpush.msrb.mxu3 %v1195_v20  ;;  %s4665_s0 = sld [smem:[#allocation11_spill]] }
  0x1c   : > { %v3148_v0 = vld [vmem:[%s782_s29 + $0x18] sm:$0xff]   ;;  %v3131_v1 = vld [vmem:[%s782_s29] sm:$0xff]   ;;  %v3147_v5 = vld [vmem:[%s782_s29 + $0x10] sm:$0xff]   ;;  %s4669_s26 = sld [smem:[#allocation8_spill]] }
  0x1d   : > { %v3591_v2 = vunpack.c.l.bf16 %v3148_v0  ;;  %v3593_v3 = vunpack.c.h.bf16 %v3131_v1  ;;  %v3595_v4 = vunpack.c.l.bf16 %v3131_v1  ;;  %v3603_v9 = vunpack.c.h.bf16 %v3148_v0  ;;  %v3146_v15 = vld [vmem:[%s782_s29 + $0x8] sm:$0xff]   ;;  %s4674_s1 = sld [smem:[#allocation10_spill]] }
  0x1e   : > { %v3605_v10 = vunpack.c.h.bf16 %v3147_v5  ;;  %v3607_v11 = vunpack.c.l.bf16 %v3147_v5  ;;  %v3615_v16 = vunpack.c.h.bf16 %v3146_v15  ;;  %v3617_v17 = vunpack.c.l.bf16 %v3146_v15  ;;  %v3235_v21 = vpop.eup %3234 }
  0x1f   : > { %v834_v6 = vsel %vm815_vm0, %v3591_v2, 0.0  ;;  %v819_v7 = vsel %vm815_vm0, %v3593_v3, 0.0  ;;  %v816_v8 = vsel %vm815_vm0, %v3595_v4, 0.0  ;;  %v837_v12 = vsel %vm815_vm0, %v3603_v9, 0.0 }
  0x20   : > { %835 = vadd.xlane.f32.xlu2 %v834_v6  ;;  %820 = vadd.xlane.f32.xlu1 %v819_v7  ;;  %v831_v13 = vsel %vm815_vm0, %v3605_v10, 0.0  ;;  %v828_v14 = vsel %vm815_vm0, %v3607_v11, 0.0  ;;  %v825_v18 = vsel %vm815_vm0, %v3615_v16, 0.0  ;;  %v822_v19 = vsel %vm815_vm0, %v3617_v17, 0.0  ;;  %s787_s30 = scalar_lea.vmem %s4662_s7, %s3023_s5  ;;  %s4663_s5 = sld [smem:[#allocation9_spill]] }
  0x21   : > { %817 = vadd.xlane.f32.xlu0 %v816_v8  ;;  %v841_v22 = vmul.f32 32.0, %v3235_v21  ;;  %vm845_vm1 = vweird.f32 %v3235_v21  ;;  %v1194_v6 = vld [vmem:[%s787_s30] sm:$0xf]  ;;  %s4666_s30 = sld [smem:[#allocation7_spill]] }
  0x22   : > { %v1198_v7 = vmul.f32 0.0009765625, %v1194_v6 }
  0x23   : > { %v842_v23 = vsub.f32 1.0, %v841_v22 }
  0x24   : > { %v1199_v8 = vmul.f32 %v1198_v7, %v1198_v7  ;;  %3052 = vmatmul.msk.f32.vlgmr.msra.gmra.mxu3 %vm1205_vm2, %v1198_v7 }
  0x25   : > { %v843_v24 = vmul.f32 %v3235_v21, %v842_v23  ;;  %1324 = vmatpush.msra.mxu3 %v1195_v20 }
  0x26   : > { %s4664_s29 = smov %s4663_s5 }
  0x27   : > { %v844_v25 = vadd.f32 %v3235_v21, %v843_v24 }
  0x28   : > { %838 = vadd.xlane.f32.xlu2 %v837_v12  ;;  %832 = vadd.xlane.f32.xlu1 %v831_v13  ;;  %v1201_v12 = vrot.slane %v1199_v8, 7 }
  0x29   : > { %829 = vadd.xlane.f32.xlu0 %v828_v14  ;;  %v3623_v26 = vsel %vm845_vm1, %v3235_v21, %v844_v25 }
  0x2a   : > { %v1203_v13 = vsub.f32 %v1198_v7, %v1201_v12 }
  0x2c   : > { %v1204_v14 = vmax.f32 %v1203_v13, 0.0 }
  0x2e   : > { %v1229_v15 = vadd.f32 1e-05, %v1204_v14 }
  0x30   : > { %826 = vadd.xlane.f32.xlu1 %v825_v18  ;;  %3236 = vrsqrt.f32 %v1229_v15  ;;  %vm1236_vm3 = vweird.f32 %v1229_v15 }
  0x31   : > { %823 = vadd.xlane.f32.xlu0 %v822_v19 }
  0x36   : > { %v3237_v18 = vpop.eup %3236 }
  0x37   : > { %v1231_v19 = vmul.f32 %v3237_v18, %v1229_v15  ;;  %vm1237_vm4 = vweird.f32 %v3237_v18 }
  0x38   : > { %vm1238_vm5 = vmor %vm1236_vm3, %vm1237_vm4 }
  0x39   : > { %v1232_v21 = vmul.f32 %v3237_v18, %v1231_v19 }
  0x3b   : > { %v1233_v22 = vmul.f32 0.5, %v1232_v21 }
  0x3d   : > { %v1234_v23 = vsub.f32 1.5, %v1233_v22 }
  0x3f   : > { %v1235_v24 = vmul.f32 %v3237_v18, %v1234_v23 }
  0x41   : > { %v1239_v25 = vsel %vm1238_vm5, %v3237_v18, %v1235_v24 }
  0x93   : > { %v836_v27 = vpop.xlane.xlu2 %835  ;;  %v821_v28 = vpop.xlane.xlu1 %820 }
  0x94   : > { %v848_v29 = vmul.f32 %v3623_v26, %v821_v28  ;;  %v818_v30 = vpop.xlane.xlu0 %817  ;;  %v853_v43 = vmul.f32 %v3623_v26, %v836_v27  ;;  %v1241_v27 = vrot.slane %v1239_v25, 1  ;;  %v1026_v28 = vld [vmem:[%s4663_s5 + $0x18] sm:$0xff]  ;;  %s4673_s5 = sld [smem:[#allocation12_spill]] }
  0x95   : > { %v847_v31 = vmul.f32 %v3623_v26, %v818_v30  ;;  %1067 = vmatpush.msra.mxu0 %v1026_v28  ;;  %3149 = vmatpush.msra.mxu2 %v1026_v28  ;;  %v1306_v30 = vrot.slane %v1198_v7, 2 }
  0x96   : > { %v3628_v32 = vsub.f32 %v3593_v3, %v848_v29  ;;  %v3657_v50 = vsub.f32 %v3591_v2, %v853_v43  ;;  %3053 = vmatmul.msk.f32.vlgmr.msrb.gmra.mxu3 %vm1205_vm2, %v1241_v27  ;;  %v1025_v29 = vld [vmem:[%s4664_s29 + $0x10] sm:$0xff] }
  0x97   : > { %v3631_v33 = vsub.f32 %v3595_v4, %v847_v31  ;;  %1347 = vmatpush.msrb.mxu3 %v1195_v20  ;;  %1068 = vmatpush.msra.mxu0 %v1025_v29  ;;  %v1024_v31 = vld [vmem:[%s4664_s29 + $0x8] sm:$0xff] }
  0x98   : > { %v864_v34 = vmul.f32 %v3628_v32, %v3628_v32  ;;  %v869_v59 = vmul.f32 %v3657_v50, %v3657_v50  ;;  %3150 = vmatpush.msra.mxu2 %v1025_v29 }
  0x99   : > { %v863_v35 = vmul.f32 %v3631_v33, %v3631_v33  ;;  %1069 = vmatpush.msra.mxu0 %v1024_v31 }
  0x9a   : > { %v874_v36 = vsel %vm815_vm0, %v864_v34, 0.0  ;;  %v889_v62 = vsel %vm815_vm0, %v869_v59, 0.0  ;;  %3151 = vmatpush.msra.mxu2 %v1024_v31  ;;  %v1023_v34 = vld [vmem:[%s4664_s29] sm:$0xff] }
  0x9b   : > { %v839_v37 = vpop.xlane.xlu2 %838  ;;  %875 = vadd.xlane.f32.xlu1 %v874_v36  ;;  %v833_v38 = vpop.xlane.xlu1 %832  ;;  %v871_v39 = vsel %vm815_vm0, %v863_v35, 0.0  ;;  %1070 = vmatpush.msra.mxu0 %v1023_v34  ;;  %v1099_v36 = vld [vmem:[%s4665_s0 + $0x18] sm:$0xff] }
  0x9c   : > { %v854_v40 = vmul.f32 %v3623_v26, %v839_v37  ;;  %v852_v41 = vmul.f32 %v3623_v26, %v833_v38  ;;  %872 = vadd.xlane.f32.xlu2 %v871_v39  ;;  %v830_v42 = vpop.xlane.xlu0 %829  ;;  %3152 = vmatpush.msra.mxu2 %v1023_v34 }
  0x9d   : > { %v851_v44 = vmul.f32 %v3623_v26, %v830_v42  ;;  %3153 = vmatpush.msra.mxu1 %v1099_v36  ;;  %1116 = vmatpush.msrb.mxu0 %v1099_v36 }
  0x9e   : > { %v3644_v45 = vsub.f32 %v3603_v9, %v854_v40  ;;  %v3647_v46 = vsub.f32 %v3605_v10, %v852_v41  ;;  %3054 = vmatmul.msk.f32.vlgmr.msra.gmra.mxu3 %vm1205_vm2, %v1306_v30  ;;  %v1329_v40 = vrot.slane %v1239_v25, 3  ;;  %v1098_v41 = vld [vmem:[%s4665_s0 + $0x10] sm:$0xff]  ;;  %v3739_v30 = vld [vmem:[%s4666_s30] ss:$0 sm:$0xff]  ;;  %s4676_s30 = sld [smem:[#allocation6_spill]] }
  0x9f   : > { %v3650_v47 = vsub.f32 %v3607_v11, %v851_v44  ;;  %3154 = vmatpush.msra.mxu1 %v1098_v41  ;;  %1117 = vmatpush.msrb.mxu0 %v1098_v41  ;;  %v1097_v44 = vld [vmem:[%s4665_s0 + $0x8] sm:$0xff] }
  0xa0   : > { %v870_v48 = vmul.f32 %v3644_v45, %v3644_v45  ;;  %v868_v49 = vmul.f32 %v3647_v46, %v3647_v46 }
  0xa1   : > { %v867_v51 = vmul.f32 %v3650_v47, %v3650_v47  ;;  %3155 = vmatpush.msra.mxu1 %v1097_v44  ;;  %1118 = vmatpush.msrb.mxu0 %v1097_v44 }
  0xa2   : > { %v892_v52 = vsel %vm815_vm0, %v870_v48, 0.0  ;;  %v886_v53 = vsel %vm815_vm0, %v868_v49, 0.0  ;;  %v1096_v48 = vld [vmem:[%s4665_s0] sm:$0xff] }
  0xa3   : > { %893 = vadd.xlane.f32.xlu1 %v892_v52  ;;  %v883_v54 = vsel %vm815_vm0, %v867_v51, 0.0  ;;  %v827_v55 = vpop.xlane.xlu1 %826  ;;  %3156 = vmatpush.msra.mxu1 %v1096_v48 }
  0xa4   : > { %887 = vadd.xlane.f32.xlu2 %v886_v53  ;;  %884 = vadd.xlane.f32.xlu0 %v883_v54  ;;  %v824_v56 = vpop.xlane.xlu0 %823  ;;  %v850_v58 = vmul.f32 %v3623_v26, %v827_v55 }
  0xa5   : > { %v849_v57 = vmul.f32 %v3623_v26, %v824_v56  ;;  %1119 = vmatpush.msrb.mxu0 %v1096_v48 }
  0xa6   : > { %v3672_v61 = vsub.f32 %v3615_v16, %v850_v58  ;;  %3055 = vmatmul.msk.f32.vlgmr.msrb.gmra.mxu3 %vm1205_vm2, %v1329_v40 }
  0xa7   : > { %v3669_v60 = vsub.f32 %v3617_v17, %v849_v57 }
  0xa8   : > { %v866_v1 = vmul.f32 %v3672_v61, %v3672_v61 }
  0xa9   : > { %v865_v63 = vmul.f32 %v3669_v60, %v3669_v60 }
  0xaa   : > { %v880_v5 = vsel %vm815_vm0, %v866_v1, 0.0 }
  0xab   : > { %v877_v0 = vsel %vm815_vm0, %v865_v63, 0.0 }
  0xac   : > { %890 = vadd.xlane.f32.xlu0 %v889_v62  ;;  %878 = vadd.xlane.f32.xlu2 %v877_v0 }
  0xb4   : > { %881 = vadd.xlane.f32.xlu0 %v880_v5 }
 0x10e   : > { %v876_v35 = vpop.xlane.xlu1 %875 }
 0x10f   : > { %v896_v37 = vmul.f32 %v876_v35, %v3623_v26  ;;  %v873_v38 = vpop.xlane.xlu2 %872 }
 0x110   : > { %v895_v39 = vmul.f32 %v873_v38, %v3623_v26  ;;  %v3750_v38 = vld [vmem:[%s4669_s26] ss:$0 sm:$0xff] }
 0x111   : > { %v904_v42 = vadd.f32 1e-05, %v896_v37 }
 0x112   : > { %v903_v43 = vadd.f32 1e-05, %v895_v39 }
 0x113   : > { %3238 = vrsqrt.f32 %v904_v42  ;;  %vm927_vm8 = vweird.f32 %v904_v42 }
 0x114   : > { %3240 = vrsqrt.f32 %v903_v43  ;;  %vm917_vm7 = vweird.f32 %v903_v43 }
 0x116   : > { %v894_v52 = vpop.xlane.xlu1 %893 }
 0x117   : > { %v888_v49 = vpop.xlane.xlu2 %887  ;;  %v885_v51 = vpop.xlane.xlu0 %884  ;;  %v902_v63 = vmul.f32 %v894_v52, %v3623_v26 }
 0x118   : > { %v900_v53 = vmul.f32 %v888_v49, %v3623_v26  ;;  %v899_v54 = vmul.f32 %v885_v51, %v3623_v26 }
 0x119   : > { %v3239_v55 = vpop.eup %3238  ;;  %v3724_v7 = vadd.f32 1e-05, %v902_v63 }
 0x11a   : > { %v3241_v56 = vpop.eup %3240  ;;  %v922_v57 = vmul.f32 %v3239_v55, %v904_v42  ;;  %v3720_v58 = vadd.f32 1e-05, %v900_v53  ;;  %v907_v59 = vadd.f32 1e-05, %v899_v54  ;;  %vm928_vm9 = vweird.f32 %v3239_v55 }
 0x11b   : > { %v912_v62 = vmul.f32 %v3241_v56, %v903_v43  ;;  %vm918_vm6 = vweird.f32 %v3241_v56  ;;  %vm3742_vm11 = vmor %vm927_vm8, %vm928_vm9 }
 0x11c   : > { %v923_v0 = vmul.f32 %v3239_v55, %v922_v57  ;;  %3242 = vrsqrt.f32 %v3720_v58  ;;  %vm919_vm10 = vmor %vm917_vm7, %vm918_vm6  ;;  %vm967_vm13 = vweird.f32 %v3720_v58  ;;  %vm957_vm14 = vweird.f32 %v907_v59 }
 0x11d   : > { %v913_v1 = vmul.f32 %v3241_v56, %v912_v62  ;;  %3244 = vrsqrt.f32 %v907_v59 }
 0x11e   : > { %v924_v5 = vmul.f32 0.5, %v923_v0  ;;  %3246 = vrsqrt.f32 %v3724_v7 }
 0x11f   : > { %v914_v6 = vmul.f32 0.5, %v913_v1  ;;  %v879_v8 = vpop.xlane.xlu2 %878  ;;  %v891_v12 = vpop.xlane.xlu0 %890 }
 0x120   : > { %v925_v13 = vsub.f32 1.5, %v924_v5  ;;  %v897_v14 = vmul.f32 %v879_v8, %v3623_v26  ;;  %v901_v15 = vmul.f32 %v891_v12, %v3623_v26 }
 0x121   : > { %v915_v18 = vsub.f32 1.5, %v914_v6 }
 0x122   : > { %v3728_v19 = vpop.eup %3242  ;;  %v905_v20 = vadd.f32 1e-05, %v897_v14  ;;  %v3733_v24 = vadd.f32 1e-05, %v901_v15  ;;  %v926_v25 = vmul.f32 %v3239_v55, %v925_v13 }
 0x123   : > { %v3245_v21 = vpop.eup %3244  ;;  %v916_v22 = vmul.f32 %v3241_v56, %v915_v18  ;;  %v962_v23 = vmul.f32 %v3728_v19, %v3720_v58  ;;  %vm968_vm15 = vweird.f32 %v3728_v19 }
 0x124   : > { %v952_v27 = vmul.f32 %v3245_v21, %v907_v59  ;;  %3248 = vrsqrt.f32 %v905_v20  ;;  %v930_v39 = vsel %vm3742_vm11, %v3239_v55, %v926_v25  ;;  %v3755_v42 = vpop.eup %3246  ;;  %vm958_vm12 = vweird.f32 %v3245_v21  ;;  %vm3774_vm2 = vmor %vm967_vm13, %vm968_vm15 }
 0x125   : > { %v920_v28 = vsel %vm919_vm10, %v3241_v56, %v916_v22  ;;  %v963_v29 = vmul.f32 %v3728_v19, %v962_v23  ;;  %3250 = vrsqrt.f32 %v3733_v24  ;;  %v992_v52 = vmul.f32 %v930_v39, %v3628_v32  ;;  %vm959_vm1 = vmor %vm957_vm14, %vm958_vm12 }
 0x126   : > { %v953_v31 = vmul.f32 %v3245_v21, %v952_v27  ;;  %v991_v37 = vmul.f32 %v920_v28, %v3631_v33  ;;  %v982_v54 = vmul.f32 %v3755_v42, %v3724_v7  ;;  %vm937_vm3 = vweird.f32 %v905_v20 }
 0x127   : > { %v964_v35 = vmul.f32 0.5, %v963_v29  ;;  %v882_v36 = vpop.xlane.xlu0 %881  ;;  %v1004_v1 = vmul.f32 %v3739_v30, %v992_v52  ;;  %vm977_vm6 = vweird.f32 %v3733_v24  ;;  %vm987_vm11 = vweird.f32 %v3724_v7 }
 0x128   : > { %v954_v40 = vmul.f32 0.5, %v953_v31  ;;  %v898_v41 = vmul.f32 %v882_v36, %v3623_v26  ;;  %v1003_v44 = vmul.f32 %v3739_v30, %v991_v37  ;;  %v983_v8 = vmul.f32 %v3755_v42, %v982_v54  ;;  %v1145_v54 = vld [vmem:[%s4672_s9] sm:$0xff] }
 0x129   : > { %v965_v43 = vsub.f32 1.5, %v964_v35  ;;  %v3784_v18 = vadd.f32 %v3750_v38, %v1004_v1  ;;  %vm988_vm12 = vweird.f32 %v3755_v42  ;;  %vm1400_vm15 = vcmask 130048  }
 0x12a   : > { %v955_v48 = vsub.f32 1.5, %v954_v40  ;;  %v906_v49 = vadd.f32 1e-05, %v898_v41  ;;  %v3249_v33 = vpop.eup %3248  ;;  %v3760_v51 = vadd.f32 %v3750_v38, %v1003_v44  ;;  %v984_v25 = vmul.f32 0.5, %v983_v8  ;;  %vm989_vm14 = vmor %vm987_vm11, %vm988_vm12 }
 0x12b   : > { %v3251_v53 = vpop.eup %3250  ;;  %v932_v56 = vmul.f32 %v3249_v33, %v905_v20  ;;  %v966_v57 = vmul.f32 %v3728_v19, %v965_v43  ;;  %vm938_vm4 = vweird.f32 %v3249_v33 }
 0x12c   : > { %v956_v55 = vmul.f32 %v3245_v21, %v955_v48  ;;  %v972_v62 = vmul.f32 %v3251_v53, %v3733_v24  ;;  %3252 = vrsqrt.f32 %v906_v49  ;;  %3028 = vmatmul.msk.f32.vlgmr.msra.gmra.mxu0 %vm815_vm0, %v3760_v51  ;;  %vm939_vm5 = vmor %vm937_vm3, %vm938_vm4  ;;  %vm978_vm7 = vweird.f32 %v3251_v53 }
 0x12d   : > { %v933_v32 = vmul.f32 %v3249_v33, %v932_v56  ;;  %v970_v12 = vsel %vm3774_vm2, %v3728_v19, %v966_v57  ;;  %vm979_vm8 = vmor %vm977_vm6, %vm978_vm7  ;;  %vm947_vm9 = vweird.f32 %v906_v49  ;;  %v985_v34 = vsub.f32 1.5, %v984_v25 }
 0x12e   : > { %v960_v63 = vsel %vm959_vm1, %v3245_v21, %v956_v55  ;;  %v973_v0 = vmul.f32 %v3251_v53, %v972_v62  ;;  %v996_v23 = vmul.f32 %v970_v12, %v3647_v46  ;;  %vm1506_vm1 = vcmask 523264  }
 0x12f   : > { %v995_v5 = vmul.f32 %v960_v63, %v3650_v47  ;;  %v934_v6 = vmul.f32 0.5, %v933_v32  ;;  %v986_v41 = vmul.f32 %v3755_v42, %v985_v34  ;;  %v3223_v63 = vld [vmem:[%s4673_s5] ss:$0 sm:$0xff]  ;;  %s3423_s5 = smov 112  }
 0x130   : > { %v974_v13 = vmul.f32 0.5, %v973_v0  ;;  %v1008_v46 = vmul.f32 %v3739_v30, %v996_v23  ;;  %v3880_v23 = vld [vmem:[%s4674_s1] ss:$0 sm:$0xff] }
 0x131   : > { %v1007_v14 = vmul.f32 %v3739_v30, %v995_v5  ;;  %v935_v15 = vsub.f32 1.5, %v934_v6  ;;  %v990_v48 = vsel %vm989_vm14, %v3755_v42, %v986_v41  ;;  %v1147_v42 = vld [vmem:[%s4672_s9 + $0x10] sm:$0xff] }
 0x132   : > { %v3253_v47 = vpop.eup %3252  ;;  %v975_v58 = vsub.f32 1.5, %v974_v13  ;;  %v998_v52 = vmul.f32 %v990_v48, %v3644_v45  ;;  %v1146_v45 = vld [vmem:[%s4672_s9 + $0x8] sm:$0xff] }
 0x133   : > { %v3787_v21 = vadd.f32 %v3750_v38, %v1007_v14  ;;  %v936_v20 = vmul.f32 %v3249_v33, %v935_v15  ;;  %v942_v22 = vmul.f32 %v3253_v47, %v906_v49  ;;  %vm948_vm10 = vweird.f32 %v3253_v47  ;;  %v3866_v14 = vld [vmem:[%s4633_s14] ss:$0 sm:$0xff] }
 0x134   : > { %v976_v27 = vmul.f32 %v3251_v53, %v975_v58  ;;  %3029 = vmatmul.msk.f32.gmra.mxu0 %vm815_vm0, %v3784_v18  ;;  %vm949_vm13 = vmor %vm947_vm9, %vm948_vm10  ;;  %v3872_v58 = vld [vmem:[%s4634_s15] ss:$0 sm:$0xff] }
 0x135   : > { %3040 = vmatmul.msk.f32.vlgmr.msra.gmra.mxu1 %vm815_vm0, %v3787_v21  ;;  %v940_v19 = vsel %vm939_vm5, %v3249_v33, %v936_v20  ;;  %v943_v28 = vmul.f32 %v3253_v47, %v942_v22 }
 0x136   : > { %v993_v29 = vmul.f32 %v940_v19, %v3669_v60  ;;  %v980_v35 = vsel %vm979_vm8, %v3251_v53, %v976_v27  ;;  %v1020_v60 = vadd.f32 %v3750_v38, %v1008_v46  ;;  %v1010_v53 = vmul.f32 %v3739_v30, %v998_v52 }
 0x137   : > { %v944_v31 = vmul.f32 0.5, %v943_v28  ;;  %v997_v40 = vmul.f32 %v980_v35, %v3657_v50 }
 0x138   : > { %v1005_v24 = vmul.f32 %v3739_v30, %v993_v29  ;;  %v1022_v55 = vadd.f32 %v3750_v38, %v1010_v53 }
 0x139   : > { %v945_v36 = vsub.f32 1.5, %v944_v31  ;;  %v1009_v44 = vmul.f32 %v3739_v30, %v997_v40 }
 0x13a   : > { %v1017_v37 = vadd.f32 %v3750_v38, %v1005_v24 }
 0x13b   : > { %v946_v39 = vmul.f32 %v3253_v47, %v945_v36  ;;  %v1021_v33 = vadd.f32 %v3750_v38, %v1009_v44 }
 0x13c   : > { %3030 = vmatmul.msk.f32.vlgmr.msra.gmra.mxu2 %vm815_vm0, %v1017_v37  ;;  %3036 = vmatmul.msk.f32.vlgmr.msrb.gmra.mxu0 %vm815_vm0, %v3760_v51 }
 0x13d   : > { %v950_v43 = vsel %vm949_vm13, %v3253_v47, %v946_v39  ;;  %3041 = vmatmul.msk.f32.gmra.mxu1 %vm815_vm0, %v1020_v60 }
 0x13e   : > { %v994_v7 = vmul.f32 %v950_v43, %v3672_v61  ;;  %v1148_v61 = vld [vmem:[%s4672_s9 + $0x18] sm:$0xff]  ;;  %s4677_s9 = sshll.u32 %s3583_s3, 2 }
 0x13f   : > { %1165 = vmatpush.msrb.mxu2 %v1148_v61  ;;  %s4579_s4 = scalar_lea.vmem %s4643_s24, %s4677_s9 }
 0x140   : > { %v1006_v49 = vmul.f32 %v3739_v30, %v994_v7  ;;  %v1226_v30 = vpop.f32.mrf.mxu3 }
 0x141   : > { %1166 = vmatpush.msrb.mxu2 %v1147_v42  ;;  %v3887_v29 = vperm.slane %v1226_v30, 0  ;;  %v3911_v30 = vld [vmem:[%s4631_s12] ss:$0 sm:$0xff] }
 0x142   : > { %v1018_v50 = vadd.f32 %v3750_v38, %v1006_v49 }
 0x143   : > { %1167 = vmatpush.msrb.mxu2 %v1146_v45 }
 0x144   : > { %3031 = vmatmul.msk.f32.gmra.mxu2 %vm815_vm0, %v1018_v50  ;;  %3037 = vmatmul.msk.f32.gmra.mxu0 %vm815_vm0, %v3784_v18 }
 0x145   : > { %3042 = vmatmul.msk.f32.gmra.mxu1 %vm815_vm0, %v1021_v33  ;;  %1168 = vmatpush.msrb.mxu2 %v1145_v54 }
 0x148   : > { %v1261_v38 = vpop.f32.mrf.mxu3 }
 0x149   : > { %v3894_v41 = vperm.slane %v1261_v38, 0 }
 0x14c   : > { %3032 = vmatmul.msk.f32.gmra.mxu2 %vm815_vm0, %v3787_v21  ;;  %3038 = vmatmul.msk.f32.gmra.mxu0 %vm815_vm0, %v1017_v37 }
 0x14d   : > { %3043 = vmatmul.msk.f32.gmra.mxu1 %vm815_vm0, %v1022_v55 }
 0x154   : > { %3033 = vmatmul.msk.f32.gmra.mxu2 %vm815_vm0, %v1020_v60  ;;  %3039 = vmatmul.msk.f32.gmra.mxu0 %vm815_vm0, %v1018_v50 }
 0x15c   : > { %3034 = vmatmul.msk.f32.gmra.mxu2 %vm815_vm0, %v1021_v33 }
 0x164   : > { %3035 = vmatmul.msk.f32.gmra.mxu2 %vm815_vm0, %v1022_v55 }
 0x16c   : > { %3044 = vmatmul.msk.f32.vlgmr.msrb.gmra.mxu2 %vm815_vm0, %v3760_v51  ;;  %v1326_v51 = vpop.f32.mrf.mxu3 }
 0x16d   : > { %v3855_v5 = vperm.slane %v1326_v51, 0 }
 0x174   : > { %3045 = vmatmul.msk.f32.gmra.mxu2 %vm815_vm0, %v3784_v18  ;;  %v1349_v0 = vpop.f32.mrf.mxu3 }
 0x175   : > { %v3857_v6 = vperm.slane %v1349_v0, 0 }
 0x17c   : > { %3046 = vmatmul.msk.f32.gmra.mxu2 %vm815_vm0, %v1017_v37 }
 0x184   : > { %3047 = vmatmul.msk.f32.gmra.mxu2 %vm815_vm0, %v1018_v50 }
 0x18c   : > { %3048 = vmatmul.msk.f32.gmra.mxu2 %vm815_vm0, %v3787_v21 }
 0x194   : > { %3049 = vmatmul.msk.f32.gmra.mxu2 %vm815_vm0, %v1020_v60 }
 0x19c   : > { %3050 = vmatmul.msk.f32.gmra.mxu2 %vm815_vm0, %v1021_v33 }
 0x1a4   : > { %3051 = vmatmul.msk.f32.gmra.mxu2 %vm815_vm0, %v1022_v55 }
 0x1a9   : > { %v1072_v56 = vpop.f32.mrf.mxu0 }
 0x1aa   : > { %v1073_v31 = vadd.f32 %v3880_v23, %v1072_v56 }
 0x1ac   : > { %v1265_v43 = vsub.f32 %v1073_v31, %v3887_v29 }
 0x1ae   : > { %v1274_v61 = vmul.f32 %v3894_v41, %v1265_v43 }
 0x1b1   : > { %v1075_v57 = vpop.f32.mrf.mxu0 }
 0x1b2   : > { %v1133_v62 = vpop.f32.mrf.mxu1  ;;  %v1076_v51 = vadd.f32 %v3880_v23, %v1075_v57  ;;  %v1285_v57 = vmul.f32 %v3911_v30, %v1274_v61 }
 0x1b3   : > { %v1134_v22 = vadd.f32 %v3223_v63, %v1133_v62 }
 0x1b5   : > { %v1357_v28 = vsub.f32 %v1134_v22, %v3855_v5 }
 0x1b7   : > { %v1366_v40 = vmul.f32 %v3857_v6, %v1357_v28 }
 0x1b9   : > { %v1121_v32 = vpop.f32.mrf.mxu0  ;;  %v1377_v52 = vmul.f32 %v3866_v14, %v1366_v40 }
 0x1ba   : > { %v1136_v1 = vpop.f32.mrf.mxu1  ;;  %v1122_v38 = vadd.f32 %v3223_v63, %v1121_v32  ;;  %v3928_v32 = vld [vmem:[%s4632_s13] ss:$0 sm:$0xff] }
 0x1bb   : > { %v1137_v59 = vadd.f32 %v3223_v63, %v1136_v1  ;;  %v1388_v1 = vadd.f32 %v3872_v58, %v1377_v52  ;;  %v1296_v22 = vadd.f32 %v3928_v32, %v1285_v57 }
 0x1bd   : > { %v1358_v8 = vsub.f32 %v1137_v59, %v3855_v5 }
 0x1bf   : > { %v1367_v12 = vmul.f32 %v3857_v6, %v1358_v8  ;;  %v3861_v13 = vpop.f32.mrf.mxu2  ;;  %v1353_v8 = vsub.f32 %v1122_v38, %v3855_v5 }
 0x1c1   : > { %v1124_v15 = vpop.f32.mrf.mxu0  ;;  %v1378_v47 = vmul.f32 %v3866_v14, %v1367_v12 }
 0x1c2   : > { %v1139_v18 = vpop.f32.mrf.mxu1  ;;  %v1125_v39 = vadd.f32 %v3223_v63, %v1124_v15  ;;  %v1266_v15 = vsub.f32 %v1076_v51, %v3887_v29 }
 0x1c3   : > { %v1140_v21 = vadd.f32 %v3223_v63, %v1139_v18  ;;  %v3875_v20 = vadd.f32 %v3872_v58, %v1378_v47 }
 0x1c4   : > { %v1354_v50 = vsub.f32 %v1125_v39, %v3855_v5 }
 0x1c5   : > { %v1359_v25 = vsub.f32 %v1140_v21, %v3855_v5  ;;  %1798 = vrot.lane.b32.xlu0 %v3875_v20, %s3423_s5 }
 0x1c6   : > { %v1363_v62 = vmul.f32 %v3857_v6, %v1354_v50 }
 0x1c7   : > { %v1368_v27 = vmul.f32 %v3857_v6, %v1359_v25  ;;  %v1081_v19 = vpop.f32.mrf.mxu2 }
 0x1c8   : > { %v1082_v53 = vadd.f32 %v3880_v23, %v1081_v19  ;;  %v1374_v47 = vmul.f32 %v3866_v14, %v1363_v62  ;;  %v1275_v19 = vmul.f32 %v3894_v41, %v1266_v15 }
 0x1c9   : > { %v1127_v46 = vpop.f32.mrf.mxu0  ;;  %v1379_v34 = vmul.f32 %v3866_v14, %v1368_v27  ;;  %v1362_v27 = vmul.f32 %v3857_v6, %v1353_v8 }
 0x1ca   : > { %v1128_v35 = vadd.f32 %v3223_v63, %v1127_v46  ;;  %v1142_v24 = vpop.f32.mrf.mxu1  ;;  %v1268_v59 = vsub.f32 %v1082_v53, %v3887_v29  ;;  %v1385_v31 = vadd.f32 %v3872_v58, %v1374_v47 }
 0x1cb   : > { %v1143_v36 = vadd.f32 %v3223_v63, %v1142_v24  ;;  %v1390_v37 = vadd.f32 %v3872_v58, %v1379_v34  ;;  %v1373_v34 = vmul.f32 %v3866_v14, %v1362_v27 }
 0x1cc   : > { %v1355_v60 = vsub.f32 %v1128_v35, %v3855_v5  ;;  %v1277_v21 = vmul.f32 %v3894_v41, %v1268_v59 }
 0x1cd   : > { %v1360_v7 = vsub.f32 %v1143_v36, %v3855_v5  ;;  %1800 = vrot.lane.b32.xlu2 %v1390_v37, %s3423_s5  ;;  %v1286_v36 = vmul.f32 %v3911_v30, %v1275_v19  ;;  %v1384_v40 = vadd.f32 %v3872_v58, %v1373_v34 }
 0x1ce   : > { %v1364_v44 = vmul.f32 %v3857_v6, %v1355_v60 }
 0x1cf   : > { %v1369_v48 = vmul.f32 %v3857_v6, %v1360_v7  ;;  %v1084_v49 = vpop.f32.mrf.mxu2  ;;  %v1297_v7 = vadd.f32 %v3928_v32, %v1286_v36 }
 0x1d0   : > { %v1375_v33 = vmul.f32 %v3866_v14, %v1364_v44  ;;  %v1085_v28 = vadd.f32 %v3880_v23, %v1084_v49 }
 0x1d1   : > { %v1130_v42 = vpop.f32.mrf.mxu0  ;;  %v1380_v45 = vmul.f32 %v3866_v14, %v1369_v48 }
 0x1d2   : > { %v1131_v54 = vadd.f32 %v3223_v63, %v1130_v42  ;;  %v1386_v55 = vadd.f32 %v3872_v58, %v1375_v33  ;;  %v1269_v35 = vsub.f32 %v1085_v28, %v3887_v29 }
 0x1d3   : > { %v1391_v56 = vadd.f32 %v3872_v58, %v1380_v45 }
 0x1d4   : > { %v1356_v0 = vsub.f32 %v1131_v54, %v3855_v5  ;;  %1792 = vrot.lane.b32.xlu0 %v1386_v55, %s3423_s5  ;;  %v1079_v5 = vadd.f32 %v3880_v23, %v3861_v13 }
 0x1d5   : > { %1802 = vrot.lane.b32.xlu1 %v1391_v56, %s3423_s5  ;;  %3056 = vmatpush.xpose.msk.msra.mxu3 %vm1400_vm15, %v1391_v56 }
 0x1d6   : > { %v1365_v63 = vmul.f32 %v3857_v6, %v1356_v0  ;;  %1796 = vrot.lane.b32.xlu2 %v1388_v1, %s3423_s5  ;;  %v1288_v6 = vmul.f32 %v3911_v30, %v1277_v21  ;;  %v1267_v46 = vsub.f32 %v1079_v5, %v3887_v29 }
 0x1d7   : > { %v1087_v12 = vpop.f32.mrf.mxu2 }
 0x1d8   : > { %v1376_v18 = vmul.f32 %v3866_v14, %v1365_v63  ;;  %v1276_v39 = vmul.f32 %v3894_v41, %v1267_v46  ;;  %v1088_v60 = vadd.f32 %v3880_v23, %v1087_v12  ;;  %v1278_v14 = vmul.f32 %v3894_v41, %v1269_v35 }
 0x1d9   : > { %3057 = vmatpush.xpose.msk.msra.mxu3 %vm1400_vm15, %v1390_v37  ;;  %v1299_v37 = vadd.f32 %v3928_v32, %v1288_v6 }
 0x1da   : > { %v1387_v25 = vadd.f32 %v3872_v58, %v1376_v18  ;;  %v1270_v48 = vsub.f32 %v1088_v60, %v3887_v29  ;;  %v1287_v58 = vmul.f32 %v3911_v30, %v1276_v39  ;;  %v1289_v33 = vmul.f32 %v3911_v30, %v1278_v14  ;;  %v1392_v39 = vld [vmem:[%s4676_s30] sm:$0xff] }
 0x1dc   : > { %1772 = vrot.lane.b32.xlu0 %v1296_v22, %s3423_s5  ;;  %v1279_v42 = vmul.f32 %v3894_v41, %v1270_v48  ;;  %v1298_v45 = vadd.f32 %v3928_v32, %v1287_v58  ;;  %v1300_v54 = vadd.f32 %v3928_v32, %v1289_v33 }
 0x1dd   : > { %3058 = vmatpush.xpose.msk.msra.mxu3 %vm1400_vm15, %v3875_v20  ;;  %1794 = vrot.lane.b32.xlu1 %v1387_v25, %s3423_s5 }
 0x1de   : > { %1790 = vrot.lane.b32.xlu2 %v1385_v31, %s3423_s5 }
 0x1df   : > { %v1090_v13 = vpop.f32.mrf.mxu2 }
 0x1e0   : > { %v1091_v24 = vadd.f32 %v3880_v23, %v1090_v13 }
 0x1e1   : > { %3059 = vmatpush.xpose.msk.msra.mxu3 %vm1400_vm15, %v1388_v1 }
 0x1e2   : > { %v1271_v20 = vsub.f32 %v1091_v24, %v3887_v29 }
 0x1e4   : > { %v1280_v43 = vmul.f32 %v3894_v41, %v1271_v20  ;;  %1778 = vrot.lane.b32.xlu0 %v1299_v37, %s3423_s5 }
 0x1e5   : > { %1788 = vrot.lane.b32.xlu1 %v1384_v40, %s3423_s5  ;;  %3060 = vmatpush.xpose.msk.msra.mxu3 %vm1400_vm15, %v1387_v25 }
 0x1e6   : > { %1774 = vrot.lane.b32.xlu2 %v1297_v7, %s3423_s5  ;;  %v1291_v44 = vmul.f32 %v3911_v30, %v1280_v43 }
 0x1e7   : > { %v1093_v49 = vpop.f32.mrf.mxu2 }
 0x1e8   : > { %v1094_v50 = vadd.f32 %v3880_v23, %v1093_v49  ;;  %v1302_v61 = vadd.f32 %v3928_v32, %v1291_v44  ;;  %v1393_v44 = vld [vmem:[%s4676_s30 + $0x8] sm:$0xff] }
 0x1e9   : > { %3061 = vmatpush.xpose.msk.msra.mxu3 %vm1400_vm15, %v1386_v55 }
 0x1ea   : > { %v1272_v52 = vsub.f32 %v1094_v50, %v3887_v29  ;;  %v1290_v29 = vmul.f32 %v3911_v30, %v1279_v42 }
 0x1ec   : > { %v1281_v53 = vmul.f32 %v3894_v41, %v1272_v52  ;;  %1784 = vrot.lane.b32.xlu0 %v1302_v61, %s3423_s5  ;;  %v1301_v38 = vadd.f32 %v3928_v32, %v1290_v29  ;;  %v3228_v41 = vld [vmem:[%s4675_s10] ss:$0 sm:$0xff] }
 0x1ed   : > { %1776 = vrot.lane.b32.xlu1 %v1298_v45, %s3423_s5  ;;  %3062 = vmatpush.xpose.msk.msra.mxu3 %vm1400_vm15, %v1385_v31 }
 0x1ee   : > { %1780 = vrot.lane.b32.xlu2 %v1300_v54, %s3423_s5  ;;  %v1292_v55 = vmul.f32 %v3911_v30, %v1281_v53 }
 0x1ef   : > { %v1170_v23 = vpop.f32.mrf.mxu2 }
 0x1f0   : > { %v1303_v56 = vadd.f32 %v3928_v32, %v1292_v55  ;;  %v3995_v62 = vadd.f32 %v3228_v41, %v1170_v23 }
 0x1f1   : > { %3063 = vmatpush.xpose.msk.msra.mxu3 %vm1400_vm15, %v1384_v40 }
 0x1f4   : > { %3064 = vmatmul.msk.f32.vlgmr.msra.gmra.mxu3 %vm1400_vm15, %v1296_v22 }
 0x1f5   : > { %1782 = vrot.lane.b32.xlu1 %v1301_v38, %s3423_s5 }
 0x1f6   : > { %1786 = vrot.lane.b32.xlu2 %v1303_v56, %s3423_s5 }
 0x1f7   : > { %v1173_v51 = vpop.f32.mrf.mxu2 }
 0x1f8   : > { %v3997_v30 = vadd.f32 %v3228_v41, %v1173_v51  ;;  %v1394_v51 = vld [vmem:[%s4676_s30 + $0x10] sm:$0xff] }
 0x1fa   : > { %v3215_v0 = vpack.i.bf16 %v3995_v62, %v3997_v30 }
 0x1fc   : > { %3065 = vmatmul.msk.f32.gmra.mxu3 %vm1400_vm15, %v1297_v7 }
 0x1ff   : > { %v1176_v1 = vpop.f32.mrf.mxu2 }
 0x200   : > { %v4003_v63 = vadd.f32 %v3228_v41, %v1176_v1 }
 0x204   : > { %3066 = vmatmul.msk.f32.gmra.mxu3 %vm1400_vm15, %v1298_v45 }
 0x207   : > { %v1179_v59 = vpop.f32.mrf.mxu2 }
 0x208   : > { %v4005_v57 = vadd.f32 %v3228_v41, %v1179_v59 }
 0x20a   : > { %v3210_v32 = vpack.i.bf16 %v4003_v63, %v4005_v57 }
 0x20c   : > { %3067 = vmatmul.msk.f32.gmra.mxu3 %vm1400_vm15, %v1299_v37 }
 0x20f   : > { %v1182_v8 = vpop.f32.mrf.mxu2 }
 0x210   : > { %v4011_v15 = vadd.f32 %v3228_v41, %v1182_v8 }
 0x214   : > { %3068 = vmatmul.msk.f32.gmra.mxu3 %vm1400_vm15, %v1300_v54 }
 0x217   : > { %v1185_v12 = vpop.f32.mrf.mxu2 }
 0x218   : > { %v4013_v47 = vadd.f32 %v3228_v41, %v1185_v12 }
 0x21a   : > { %v3205_v18 = vpack.i.bf16 %v4011_v15, %v4013_v47 }
 0x21c   : > { %3069 = vmatmul.msk.f32.gmra.mxu3 %vm1400_vm15, %v1301_v38 }
 0x21f   : > { %v1188_v21 = vpop.f32.mrf.mxu2 }
 0x220   : > { %v4019_v25 = vadd.f32 %v3228_v41, %v1188_v21 }
 0x224   : > { %3070 = vmatmul.msk.f32.gmra.mxu3 %vm1400_vm15, %v1302_v61 }
 0x227   : > { %v1191_v22 = vpop.f32.mrf.mxu2  ;;  %v1801_v28 = vpop.permute.xlu2 %1800 }
 0x228   : > { %v4021_v27 = vadd.f32 %v3228_v41, %v1191_v22  ;;  %v1395_v22 = vld [vmem:[%s4676_s30 + $0x18] sm:$0xff] }
 0x22a   : > { %v3200_v5 = vpack.i.bf16 %v4019_v25, %v4021_v27  ;;  %1731 = vmatpush.msra.mxu0 %v4021_v27 }
 0x22c   : > { %3071 = vmatmul.msk.f32.gmra.mxu3 %vm1400_vm15, %v1303_v56  ;;  %1732 = vmatpush.msra.mxu0 %v4019_v25 }
 0x22e   : > { %1733 = vmatpush.msra.mxu0 %v4013_v47 }
 0x230   : > { %1734 = vmatpush.msra.mxu0 %v4011_v15  ;;  %v1797_v6 = vpop.permute.xlu2 %1796 }
 0x232   : > { %1735 = vmatpush.msra.mxu0 %v4005_v57 }
 0x234   : > { %1736 = vmatpush.msra.mxu0 %v4003_v63 }
 0x236   : > { %1737 = vmatpush.msra.mxu0 %v3997_v30 }
 0x237   : > { %v1799_v31 = vpop.permute.xlu0 %1798 }
 0x238   : > { %1738 = vmatpush.msra.mxu0 %v3995_v62  ;;  %v1791_v34 = vpop.permute.xlu2 %1790 }
 0x240   : > { %v1775_v36 = vpop.permute.xlu2 %1774 }
 0x246   : > { %v1793_v13 = vpop.permute.xlu0 %1792 }
 0x247   : > { %v1803_v19 = vpop.permute.xlu1 %1802 }
 0x248   : > { %3080 = vmatpush.xpose.msk.msrb.mxu1 %vm1400_vm15, %v1803_v19  ;;  %v1781_v50 = vpop.permute.xlu2 %1780 }
 0x24c   : > { %3081 = vmatpush.xpose.msk.msrb.mxu1 %vm1400_vm15, %v1801_v28 }
 0x24e   : > { %v1773_v24 = vpop.permute.xlu0 %1772 }
 0x24f   : > { %v1795_v46 = vpop.permute.xlu1 %1794 }
 0x250   : > { %3082 = vmatpush.xpose.msk.msrb.mxu1 %vm1400_vm15, %v1799_v31  ;;  %v1787_v61 = vpop.permute.xlu2 %1786 }
 0x254   : > { %3083 = vmatpush.xpose.msk.msrb.mxu1 %vm1400_vm15, %v1797_v6 }
 0x256   : > { %v1779_v43 = vpop.permute.xlu0 %1778 }
 0x257   : > { %v1789_v35 = vpop.permute.xlu1 %1788 }
 0x258   : > { %3084 = vmatpush.xpose.msk.msrb.mxu1 %vm1400_vm15, %v1795_v46 }
 0x25c   : > { %3085 = vmatpush.xpose.msk.msrb.mxu1 %vm1400_vm15, %v1793_v13 }
 0x25e   : > { %v1785_v52 = vpop.permute.xlu0 %1784 }
 0x25f   : > { %v1777_v20 = vpop.permute.xlu1 %1776 }
 0x260   : > { %3086 = vmatpush.xpose.msk.msrb.mxu1 %vm1400_vm15, %v1791_v34  ;;  %v4085_v34 = vld [vmem:[%s4676_s30 + $0x20] sm:$0xff] }
 0x264   : > { %3087 = vmatpush.xpose.msk.msrb.mxu1 %vm1400_vm15, %v1789_v35 }
 0x267   : > { %3088 = vmatmul.msk.f32.vlgmr.msrb.gmra.mxu1 %vm1400_vm15, %v1773_v24  ;;  %v1783_v33 = vpop.permute.xlu1 %1782 }
 0x26f   : > { %3089 = vmatmul.msk.f32.gmra.mxu1 %vm1400_vm15, %v1775_v36 }
 0x277   : > { %v1466_v37 = vpop.f32.mrf.mxu3  ;;  %3090 = vmatmul.msk.f32.gmra.mxu1 %vm1400_vm15, %v1777_v20 }
 0x278   : > { %v1490_v60 = vmul.f32 0.25, %v1466_v37 }
 0x27a   : > { %v4048_v40 = vadd.f32 %v1490_v60, %v1392_v39 }
 0x27c   : > { %v1507_v14 = vsel %vm1506_vm1, %v4048_v40, -inf }
 0x27d   : > { %1508 = vmax.xlane.f32.xlu1 %v1507_v14 }
 0x27f   : > { %v1469_v7 = vpop.f32.mrf.mxu3  ;;  %3091 = vmatmul.msk.f32.gmra.mxu1 %vm1400_vm15, %v1779_v43 }
 0x280   : > { %v1491_v48 = vmul.f32 0.25, %v1469_v7 }
 0x282   : > { %v4056_v49 = vadd.f32 %v1491_v48, %v1393_v44 }
 0x284   : > { %v1510_v58 = vsel %vm1506_vm1, %v4056_v49, -inf }
 0x285   : > { %1511 = vmax.xlane.f32.xlu2 %v1510_v58 }
 0x287   : > { %3092 = vmatmul.msk.f32.gmra.mxu1 %vm1400_vm15, %v1781_v50  ;;  %v1472_v21 = vpop.f32.mrf.mxu3 }
 0x288   : > { %v1492_v28 = vmul.f32 0.25, %v1472_v21 }
 0x28a   : > { %v4080_v13 = vadd.f32 %v1492_v28, %v1394_v51 }
 0x28c   : > { %v1513_v24 = vsel %vm1506_vm1, %v4080_v13, -inf }
 0x28f   : > { %3093 = vmatmul.msk.f32.gmra.mxu1 %vm1400_vm15, %v1783_v33 }
 0x297   : > { %3094 = vmatmul.msk.f32.gmra.mxu1 %vm1400_vm15, %v1785_v52 }
 0x29f   : > { %3095 = vmatmul.msk.f32.gmra.mxu1 %vm1400_vm15, %v1787_v61 }
 0x2e4   : > { %v1853_v42 = vpop.f32.mrf.mxu1 }
 0x2e5   : > { %v1877_v45 = vmul.f32 0.25, %v1853_v42 }
 0x2e7   : > { %v1885_v53 = vadd.f32 %v1877_v45, %v1392_v39  ;;  %v4097_v39 = vld [vmem:[%s4676_s30 + $0x28] sm:$0xff] }
 0x2e9   : > { %v1893_v54 = vsel %vm1506_vm1, %v1885_v53, -inf }
 0x2ea   : > { %1894 = vmax.xlane.f32.xlu1 %v1893_v54 }
 0x2ec   : > { %v1856_v23 = vpop.f32.mrf.mxu1 }
 0x2ed   : > { %v1878_v29 = vmul.f32 0.25, %v1856_v23 }
 0x2ef   : > { %v1886_v55 = vadd.f32 %v1878_v29, %v1393_v44  ;;  %v4119_v44 = vld [vmem:[%s4676_s30 + $0x30] sm:$0xff] }
 0x2f0   : > { %v4140_v50 = vpop.xlane.xlu1 %1508 }
 0x2f1   : > { %v1896_v38 = vsel %vm1506_vm1, %v1886_v55, -inf }
 0x2f2   : > { %1897 = vmax.xlane.f32.xlu0 %v1896_v38 }
 0x2f4   : > { %v1859_v41 = vpop.f32.mrf.mxu1 }
 0x2f5   : > { %v1879_v56 = vmul.f32 0.25, %v1859_v41 }
 0x2f7   : > { %v4069_v1 = vadd.f32 %v1879_v56, %v1394_v51 }
 0x2f8   : > { %v4142_v42 = vpop.xlane.xlu2 %1511 }
 0x2f9   : > { %v1899_v59 = vsel %vm1506_vm1, %v4069_v1, -inf }
 0x2fa   : > { %1900 = vmax.xlane.f32.xlu2 %v1899_v59 }
 0x2fc   : > { %v1862_v8 = vpop.f32.mrf.mxu1 }
 0x2fd   : > { %v1880_v12 = vmul.f32 0.25, %v1862_v8 }
 0x2ff   : > { %v4076_v19 = vadd.f32 %v1880_v12, %v1395_v22 }
 0x301   : > { %v1902_v31 = vsel %vm1506_vm1, %v4076_v19, -inf }
 0x302   : > { %1903 = vmax.xlane.f32.xlu1 %v1902_v31 }
 0x304   : > { %v1865_v6 = vpop.f32.mrf.mxu1 }
 0x305   : > { %v1881_v46 = vmul.f32 0.25, %v1865_v6 }
 0x307   : > { %v4088_v35 = vadd.f32 %v1881_v46, %v4085_v34 }
 0x309   : > { %v1905_v36 = vsel %vm1506_vm1, %v4088_v35, -inf }
 0x30a   : > { %1514 = vmax.xlane.f32.xlu1 %v1513_v24  ;;  %1906 = vmax.xlane.f32.xlu0 %v1905_v36 }
 0x30c   : > { %v1868_v20 = vpop.f32.mrf.mxu1 }
 0x30d   : > { %v1882_v37 = vmul.f32 0.25, %v1868_v20 }
 0x30f   : > { %v4100_v60 = vadd.f32 %v1882_v37, %v4097_v39 }
 0x311   : > { %v1908_v14 = vsel %vm1506_vm1, %v4100_v60, -inf }
 0x312   : > { %1909 = vmax.xlane.f32.xlu2 %v1908_v14 }
 0x314   : > { %v1871_v43 = vpop.f32.mrf.mxu1 }
 0x315   : > { %v1883_v7 = vmul.f32 0.25, %v1871_v43 }
 0x317   : > { %v4122_v63 = vadd.f32 %v1883_v7, %v4119_v44 }
 0x319   : > { %v1911_v15 = vsel %vm1506_vm1, %v4122_v63, -inf }
 0x31c   : > { %v1874_v57 = vpop.f32.mrf.mxu1 }
 0x31d   : > { %v1884_v48 = vmul.f32 0.25, %v1874_v57 }
 0x31e   : > { %3211 = vrot.lane.b32.xlu0 %v3210_v32, %s3423_s5  ;;  %v1475_v32 = vpop.f32.mrf.mxu3 }
 0x31f   : > { %v1493_v47 = vmul.f32 0.25, %v1475_v32 }
 0x321   : > { %v4134_v27 = vadd.f32 %v1493_v47, %v1395_v22 }
 0x323   : > { %3206 = vrot.lane.b32.xlu1 %v3205_v18, %s3423_s5  ;;  %v4129_v18 = vld [vmem:[%s4676_s30 + $0x38] sm:$0xff]  ;;  %v1516_v58 = vsel %vm1506_vm1, %v4134_v27, -inf }
 0x324   : > { %v4132_v25 = vadd.f32 %v1884_v48, %v4129_v18 }
 0x32a   : > { %3201 = vrot.lane.b32.xlu2 %v3200_v5, %s3423_s5  ;;  %v1914_v5 = vsel %vm1506_vm1, %v4132_v25, -inf }
 0x348   : > { %1912 = vmax.xlane.f32.xlu0 %v1911_v15 }
 0x350   : > { %1915 = vmax.xlane.f32.xlu0 %v1914_v5 }
 0x353   : > { %1517 = vmax.xlane.f32.xlu2 %v1516_v58 }
 0x35d   : > { %v1895_v33 = vpop.xlane.xlu1 %1894 }
 0x35e   : > { %v1917_v52 = vsub.f32 %v1885_v53, %v1895_v33  ;;  %v1478_v53 = vpop.f32.mrf.mxu3 }
 0x360   : > { %v1925_v61 = vmul.f32 1.442695, %v1917_v52 }
 0x362   : > { %3254 = vpow2.f32 %v1925_v61 }
 0x365   : > { %v1898_v45 = vpop.xlane.xlu0 %1897 }
 0x366   : > { %v1918_v54 = vsub.f32 %v1886_v55, %v1898_v45  ;;  %v1481_v31 = vpop.f32.mrf.mxu3 }
 0x367   : > { %v1495_v36 = vmul.f32 0.25, %v1481_v31 }
 0x368   : > { %v4144_v23 = vpop.eup %3254  ;;  %v1927_v29 = vmul.f32 1.442695, %v1918_v54 }
 0x369   : > { %v1941_v38 = vsel %vm1506_vm1, %v4144_v23, 0.0  ;;  %v4168_v14 = vadd.f32 %v1495_v36, %v4097_v39 }
 0x36a   : > { %3256 = vpow2.f32 %v1927_v29  ;;  %1942 = vadd.xlane.f32.xlu1 %v1941_v38 }
 0x36b   : > { %v1522_v32 = vsel %vm1506_vm1, %v4168_v14, -inf }
 0x36d   : > { %v1901_v41 = vpop.xlane.xlu2 %1900 }
 0x36e   : > { %v1919_v56 = vsub.f32 %v4069_v1, %v1901_v41 }
 0x370   : > { %v4149_v51 = vpop.eup %3256  ;;  %v1929_v59 = vmul.f32 1.442695, %v1919_v56  ;;  %v1531_v56 = vsub.f32 %v4048_v40, %v4140_v50 }
 0x371   : > { %v1944_v8 = vsel %vm1506_vm1, %v4149_v51, 0.0 }
 0x372   : > { %3258 = vpow2.f32 %v1929_v59  ;;  %1945 = vadd.xlane.f32.xlu0 %v1944_v8  ;;  %v1494_v59 = vmul.f32 0.25, %v1478_v53  ;;  %v1539_v8 = vmul.f32 1.442695, %v1531_v56 }
 0x375   : > { %v1904_v55 = vpop.xlane.xlu1 %1903 }
 0x376   : > { %v1920_v12 = vsub.f32 %v4076_v19, %v1904_v55  ;;  %v1484_v19 = vpop.f32.mrf.mxu3  ;;  %v1532_v55 = vsub.f32 %v4056_v49, %v4142_v42 }
 0x377   : > { %v1496_v57 = vmul.f32 0.25, %v1484_v19 }
 0x378   : > { %v4154_v21 = vpop.eup %3258  ;;  %v1931_v22 = vmul.f32 1.442695, %v1920_v12 }
 0x379   : > { %v1947_v28 = vsel %vm1506_vm1, %v4154_v21, 0.0  ;;  %v4178_v39 = vadd.f32 %v1496_v57, %v4119_v44 }
 0x37a   : > { %3260 = vpow2.f32 %v1931_v22  ;;  %1948 = vadd.xlane.f32.xlu0 %v1947_v28  ;;  %v1541_v22 = vmul.f32 1.442695, %v1532_v55 }
 0x37b   : > { %v1525_v58 = vsel %vm1506_vm1, %v4178_v39, -inf }
 0x37d   : > { %v1907_v1 = vpop.xlane.xlu0 %1906  ;;  %v1515_v30 = vpop.xlane.xlu1 %1514 }
 0x37e   : > { %v1921_v6 = vsub.f32 %v4088_v35, %v1907_v1  ;;  %v1487_v48 = vpop.f32.mrf.mxu3  ;;  %v1533_v42 = vsub.f32 %v4080_v13, %v1515_v30 }
 0x37f   : > { %v1497_v5 = vmul.f32 0.25, %v1487_v48 }
 0x380   : > { %v4159_v46 = vpop.eup %3260  ;;  %v1933_v24 = vmul.f32 1.442695, %v1921_v6  ;;  %v1543_v1 = vmul.f32 1.442695, %v1533_v42 }
 0x381   : > { %v1950_v20 = vsel %vm1506_vm1, %v4159_v46, 0.0  ;;  %v4187_v44 = vadd.f32 %v1497_v5, %v4129_v18  ;;  %v4194_v18 = vadd.f32 %v1494_v59, %v4085_v34 }
 0x382   : > { %1951 = vadd.xlane.f32.xlu2 %v1950_v20  ;;  %3262 = vpow2.f32 %v1933_v24 }
 0x383   : > { %3216 = vrot.lane.b32.xlu1 %v3215_v0, %s3423_s5  ;;  %v1528_v29 = vsel %vm1506_vm1, %v4187_v44, -inf  ;;  %v1519_v12 = vsel %vm1506_vm1, %v4194_v18, -inf  ;;  %s3424_s5 = smov 16  }
 0x385   : > { %v1910_v37 = vpop.xlane.xlu2 %1909 }
 0x386   : > { %v1922_v35 = vsub.f32 %v4100_v60, %v1910_v37 }
 0x388   : > { %v1935_v43 = vmul.f32 1.442695, %v1922_v35  ;;  %v4171_v7 = vpop.eup %3262 }
 0x389   : > { %v1953_v62 = vsel %vm1506_vm1, %v4171_v7, 0.0 }
 0x38a   : > { %3264 = vpow2.f32 %v1935_v43  ;;  %1523 = vmax.xlane.f32.xlu2 %v1522_v32  ;;  %1954 = vadd.xlane.f32.xlu0 %v1953_v62 }
 0x38b   : > { %3266 = vpow2.f32 %v1539_v8 }
 0x38c   : > { %3268 = vpow2.f32 %v1541_v22 }
 0x38d   : > { %v3202_v0 = vpop.permute.xlu2 %3201 }
 0x38e   : > { %v3203_v60 = vunpack.i.l.bf16 %v3202_v0  ;;  %v3204_v47 = vunpack.i.h.bf16 %v3202_v0 }
 0x390   : > { %v4180_v15 = vpop.eup %3264  ;;  %2149 = vmatpush.msra.mxu2 %v3203_v60  ;;  %v3212_v45 = vpop.permute.xlu0 %3211 }
 0x391   : > { %v1956_v33 = vsel %vm1506_vm1, %v4180_v15, 0.0  ;;  %v3213_v38 = vunpack.i.l.bf16 %v3212_v45  ;;  %v3214_v41 = vunpack.i.h.bf16 %v3212_v45  ;;  %v4200_v28 = vpop.eup %3266 }
 0x392   : > { %1526 = vmax.xlane.f32.xlu2 %v1525_v58  ;;  %2150 = vmatpush.msra.mxu2 %v3204_v47  ;;  %v1555_v40 = vsel %vm1506_vm1, %v4200_v28, 0.0  ;;  %v4204_v50 = vpop.eup %3268 }
 0x393   : > { %1957 = vadd.xlane.f32.xlu0 %v1956_v33  ;;  %v1558_v49 = vsel %vm1506_vm1, %v4204_v50, 0.0 }
 0x395   : > { %v3207_v52 = vpop.permute.xlu1 %3206 }
 0x396   : > { %v3208_v61 = vunpack.i.l.bf16 %v3207_v52  ;;  %v3209_v54 = vunpack.i.h.bf16 %v3207_v52 }
 0x398   : > { %2151 = vmatpush.msra.mxu2 %v3208_v61 }
 0x39a   : > { %1529 = vmax.xlane.f32.xlu2 %v1528_v29  ;;  %2152 = vmatpush.msra.mxu2 %v3209_v54 }
 0x39c   : > { %2153 = vmatpush.msra.mxu2 %v3213_v38 }
 0x39e   : > { %2154 = vmatpush.msra.mxu2 %v3214_v41 }
 0x3ad   : > { %1520 = vmax.xlane.f32.xlu1 %v1519_v12 }
 0x3b5   : > { %1556 = vadd.xlane.f32.xlu1 %v1555_v40 }
 0x3bb   : > { %v1913_v34 = vpop.xlane.xlu0 %1912 }
 0x3bc   : > { %v1923_v53 = vsub.f32 %v4122_v63, %v1913_v34 }
 0x3bd   : > { %1559 = vadd.xlane.f32.xlu1 %v1558_v49 }
 0x3be   : > { %v1937_v31 = vmul.f32 1.442695, %v1923_v53 }
 0x3c0   : > { %3270 = vpow2.f32 %v1937_v31 }
 0x3c1   : > { %3272 = vpow2.f32 %v1543_v1 }
 0x3c3   : > { %v1916_v6 = vpop.xlane.xlu0 %1915 }
 0x3c4   : > { %v1924_v24 = vsub.f32 %v4132_v25, %v1916_v6 }
 0x3c6   : > { %v4211_v36 = vpop.eup %3270  ;;  %v1939_v20 = vmul.f32 1.442695, %v1924_v24  ;;  %v1518_v19 = vpop.xlane.xlu2 %1517 }
 0x3c7   : > { %v1534_v37 = vsub.f32 %v4134_v27, %v1518_v19  ;;  %v1959_v63 = vsel %vm1506_vm1, %v4211_v36, 0.0  ;;  %v4216_v13 = vpop.eup %3272 }
 0x3c8   : > { %3274 = vpow2.f32 %v1939_v20  ;;  %1960 = vadd.xlane.f32.xlu0 %v1959_v63  ;;  %v1561_v25 = vsel %vm1506_vm1, %v4216_v13, 0.0 }
 0x3c9   : > { %v1545_v35 = vmul.f32 1.442695, %v1534_v37 }
 0x3cb   : > { %3276 = vpow2.f32 %v1545_v35 }
 0x3ce   : > { %v4218_v43 = vpop.eup %3274 }
 0x3cf   : > { %v1962_v57 = vsel %vm1506_vm1, %v4218_v43, 0.0 }
 0x3d0   : > { %1562 = vadd.xlane.f32.xlu0 %v1561_v25  ;;  %1963 = vadd.xlane.f32.xlu2 %v1962_v57 }
 0x3d1   : > { %v4224_v27 = vpop.eup %3276 }
 0x3d2   : > { %v1564_v32 = vsel %vm1506_vm1, %v4224_v27, 0.0 }
 0x3d3   : > { %1565 = vadd.xlane.f32.xlu1 %v1564_v32 }
 0x3dd   : > { %v1943_v62 = vpop.xlane.xlu1 %1942 }
 0x3de   : > { %3278 = vrcp.f32 %v1943_v62  ;;  %v1976_v45 = vand.u32 2147483648, %v1943_v62  ;;  %vm1970_vm3 = vweird.f32 %v1943_v62  ;;  %v1974_v54 = vand.u32 2147483647, %v1943_v62 }
 0x3e0   : > { %v1977_v56 = vor.u32 1.1754944e-38, %v1976_v45  ;;  %vm1975_vm5 = vcmp.eq.f32.partialorder %v1974_v54, 8.507059e+37 }
 0x3e4   : > { %v3279_v30 = vpop.eup %3278 }
 0x3e5   : > { %v1966_v0 = vmul.f32 %v3279_v30, %v1943_v62  ;;  %v1946_v48 = vpop.xlane.xlu0 %1945  ;;  %vm1971_vm2 = vweird.f32 %v3279_v30 }
 0x3e6   : > { %3280 = vrcp.f32 %v1946_v48  ;;  %vm1972_vm4 = vmor %vm1970_vm3, %vm1971_vm2  ;;  %v1991_v53 = vand.u32 2147483648, %v1946_v48  ;;  %vm1985_vm7 = vweird.f32 %v1946_v48  ;;  %v1989_v31 = vand.u32 2147483647, %v1946_v48 }
 0x3e7   : > { %v1967_v60 = vsub.f32 1.0, %v1966_v0 }
 0x3e8   : > { %v1992_v20 = vor.u32 1.1754944e-38, %v1991_v53  ;;  %vm1990_vm9 = vcmp.eq.f32.partialorder %v1989_v31, 8.507059e+37 }
 0x3e9   : > { %v1968_v47 = vmul.f32 %v3279_v30, %v1967_v60 }
 0x3eb   : > { %v1969_v52 = vadd.f32 %v3279_v30, %v1968_v47 }
 0x3ec   : > { %v3281_v5 = vpop.eup %3280 }
 0x3ed   : > { %v1981_v58 = vmul.f32 %v3281_v5, %v1946_v48  ;;  %v1949_v33 = vpop.xlane.xlu0 %1948  ;;  %v1973_v29 = vsel %vm1972_vm4, %v3279_v30, %v1969_v52  ;;  %vm1986_vm6 = vweird.f32 %v3281_v5 }
 0x3ee   : > { %3282 = vrcp.f32 %v1949_v33  ;;  %v1978_v12 = vsel %vm1975_vm5, %v1977_v56, %v1973_v29  ;;  %vm1987_vm8 = vmor %vm1985_vm7, %vm1986_vm6  ;;  %v2006_v32 = vand.u32 2147483648, %v1949_v33  ;;  %vm2000_vm11 = vweird.f32 %v1949_v33 }
 0x3ef   : > { %v1982_v61 = vsub.f32 1.0, %v1981_v58  ;;  %v1979_v42 = vmul.f32 %v4144_v23, %v1978_v12  ;;  %v2004_v0 = vand.u32 2147483647, %v1949_v33 }
 0x3f0   : > { %v2007_v47 = vor.u32 1.1754944e-38, %v2006_v32 }
 0x3f1   : > { %v1983_v38 = vmul.f32 %v3281_v5, %v1982_v61  ;;  %vm2005_vm13 = vcmp.eq.f32.partialorder %v2004_v0, 8.507059e+37 }
 0x3f3   : > { %v1984_v34 = vadd.f32 %v3281_v5, %v1983_v38 }
 0x3f4   : > { %v3283_v41 = vpop.eup %3282 }
 0x3f5   : > { %v1996_v59 = vmul.f32 %v3283_v41, %v1949_v33  ;;  %v3217_v8 = vpop.permute.xlu1 %3216  ;;  %v4228_v55 = vpop.xlane.xlu2 %1951  ;;  %v1988_v6 = vsel %vm1987_vm8, %v3281_v5, %v1984_v34  ;;  %vm2001_vm10 = vweird.f32 %v3283_v41 }
 0x3f6   : > { %v3218_v22 = vunpack.i.l.bf16 %v3217_v8  ;;  %3284 = vrcp.f32 %v4228_v55  ;;  %v3219_v49 = vunpack.i.h.bf16 %v3217_v8  ;;  %v1993_v25 = vsel %vm1990_vm9, %v1992_v20, %v1988_v6  ;;  %vm2002_vm12 = vmor %vm2000_vm11, %vm2001_vm10 }
 0x3f7   : > { %v1997_v40 = vsub.f32 1.0, %v1996_v59  ;;  %v1994_v30 = vmul.f32 %v4149_v51, %v1993_v25  ;;  %v2021_v33 = vand.u32 2147483648, %v4228_v55  ;;  %vm2015_vm2 = vweird.f32 %v4228_v55 }
 0x3f8   : > { %2155 = vmatpush.msra.mxu2 %v3218_v22 }
 0x3f9   : > { %v1998_v1 = vmul.f32 %v3283_v41, %v1997_v40  ;;  %v2022_v12 = vor.u32 1.1754944e-38, %v2021_v33 }
 0x3fa   : > { %2156 = vmatpush.msra.mxu2 %v3219_v49 }
 0x3fb   : > { %3096 = vmatmul.msk.f32.vlgmr.msra.gmra.mxu2 %vm1506_vm1, %v1979_v42  ;;  %v1999_v23 = vadd.f32 %v3283_v41, %v1998_v1 }
 0x3fc   : > { %v3285_v24 = vpop.eup %3284 }
 0x3fd   : > { %v2011_v19 = vmul.f32 %v3285_v24, %v4228_v55  ;;  %v1524_v37 = vpop.xlane.xlu2 %1523  ;;  %v1955_v35 = vpop.xlane.xlu0 %1954  ;;  %v2003_v60 = vsel %vm2002_vm12, %v3283_v41, %v1999_v23  ;;  %vm2016_vm14 = vweird.f32 %v3285_v24 }
 0x3fe   : > { %v1536_v63 = vsub.f32 %v4168_v14, %v1524_v37  ;;  %3286 = vrcp.f32 %v1955_v35  ;;  %v2008_v45 = vsel %vm2005_vm13, %v2007_v47, %v2003_v60  ;;  %vm2017_vm3 = vmor %vm2015_vm2, %vm2016_vm14  ;;  %v2036_v42 = vand.u32 2147483648, %v1955_v35 }
 0x3ff   : > { %v2012_v57 = vsub.f32 1.0, %v2011_v19  ;;  %v2009_v56 = vmul.f32 %v4154_v21, %v2008_v45  ;;  %vm2030_vm6 = vweird.f32 %v1955_v35  ;;  %v2034_v1 = vand.u32 2147483647, %v1955_v35 }
 0x400   : > { %v1549_v62 = vmul.f32 1.442695, %v1536_v63  ;;  %v2037_v20 = vor.u32 1.1754944e-38, %v2036_v42 }
 0x401   : > { %v2013_v48 = vmul.f32 %v3285_v24, %v2012_v57  ;;  %vm2035_vm8 = vcmp.eq.f32.partialorder %v2034_v1, 8.507059e+37 }
 0x402   : > { %3288 = vpow2.f32 %v1549_v62 }
 0x403   : > { %3097 = vmatmul.msk.f32.gmra.mxu2 %vm1506_vm1, %v1994_v30  ;;  %v2014_v54 = vadd.f32 %v3285_v24, %v2013_v48 }
 0x404   : > { %v3287_v14 = vpop.eup %3286 }
 0x405   : > { %v1527_v5 = vpop.xlane.xlu2 %1526  ;;  %v2026_v58 = vmul.f32 %v3287_v14, %v1955_v35  ;;  %v2018_v8 = vsel %vm2017_vm3, %v3285_v24, %v2014_v54  ;;  %vm2031_vm5 = vweird.f32 %v3287_v14 }
 0x406   : > { %v1537_v52 = vsub.f32 %v4178_v39, %v1527_v5  ;;  %v1958_v61 = vpop.xlane.xlu0 %1957  ;;  %v2019_v39 = vand.u32 2147483647, %v4228_v55  ;;  %vm2032_vm7 = vmor %vm2030_vm6, %vm2031_vm5 }
 0x407   : > { %3290 = vrcp.f32 %v1958_v61  ;;  %v2027_v29 = vsub.f32 1.0, %v2026_v58  ;;  %v2051_v63 = vand.u32 2147483648, %v1958_v61  ;;  %vm2045_vm10 = vweird.f32 %v1958_v61 }
 0x408   : > { %v4238_v51 = vpop.eup %3288  ;;  %v1551_v38 = vmul.f32 1.442695, %v1537_v52  ;;  %vm2020_vm4 = vcmp.eq.f32.partialorder %v2019_v39, 8.507059e+37  ;;  %v2049_v57 = vand.u32 2147483647, %v1958_v61 }
 0x409   : > { %v1570_v41 = vsel %vm1506_vm1, %v4238_v51, 0.0  ;;  %v2028_v59 = vmul.f32 %v3287_v14, %v2027_v29  ;;  %v2023_v34 = vsel %vm2020_vm4, %v2022_v12, %v2018_v8  ;;  %v2052_v35 = vor.u32 1.1754944e-38, %v2051_v63 }
 0x40a   : > { %3292 = vpow2.f32 %v1551_v38  ;;  %1571 = vadd.xlane.f32.xlu0 %v1570_v41  ;;  %v2024_v31 = vmul.f32 %v4159_v46, %v2023_v34  ;;  %vm2050_vm12 = vcmp.eq.f32.partialorder %v2049_v57, 8.507059e+37 }
 0x40b   : > { %3098 = vmatmul.msk.f32.gmra.mxu2 %vm1506_vm1, %v2009_v56  ;;  %v2029_v53 = vadd.f32 %v3287_v14, %v2028_v59 }
 0x40d   : > { %v3291_v22 = vpop.eup %3290  ;;  %v2033_v24 = vsel %vm2032_vm7, %v3287_v14, %v2029_v53  ;;  %v1530_v32 = vpop.xlane.xlu2 %1529 }
 0x40e   : > { %v2041_v40 = vmul.f32 %v3291_v22, %v1958_v61  ;;  %v2038_v19 = vsel %vm2035_vm8, %v2037_v20, %v2033_v24  ;;  %vm2046_vm9 = vweird.f32 %v3291_v22  ;;  %v1538_v48 = vsub.f32 %v4187_v44, %v1530_v32 }
 0x40f   : > { %v2039_v25 = vmul.f32 %v4171_v7, %v2038_v19  ;;  %vm2047_vm11 = vmor %vm2045_vm10, %vm2046_vm9 }
 0x410   : > { %v4247_v49 = vpop.eup %3292  ;;  %v2042_v21 = vsub.f32 1.0, %v2041_v40  ;;  %v1553_v7 = vmul.f32 1.442695, %v1538_v48 }
 0x411   : > { %v1573_v55 = vsel %vm1506_vm1, %v4247_v49, 0.0 }
 0x412   : > { %1574 = vadd.xlane.f32.xlu1 %v1573_v55  ;;  %v2043_v6 = vmul.f32 %v3291_v22, %v2042_v21 }
 0x413   : > { %3099 = vmatmul.msk.f32.gmra.mxu2 %vm1506_vm1, %v2024_v31 }
 0x414   : > { %v2044_v37 = vadd.f32 %v3291_v22, %v2043_v6 }
 0x416   : > { %v2048_v46 = vsel %vm2047_vm11, %v3291_v22, %v2044_v37 }
 0x417   : > { %v2053_v23 = vsel %vm2050_vm12, %v2052_v35, %v2048_v46 }
 0x418   : > { %v2054_v0 = vmul.f32 %v4180_v15, %v2053_v23 }
 0x41b   : > { %3100 = vmatmul.msk.f32.gmra.mxu2 %vm1506_vm1, %v2039_v25 }
 0x420   : > { %v1521_v62 = vpop.xlane.xlu1 %1520 }
 0x421   : > { %v1535_v30 = vsub.f32 %v4194_v18, %v1521_v62 }
 0x423   : > { %v1547_v60 = vmul.f32 1.442695, %v1535_v30  ;;  %3101 = vmatmul.msk.f32.gmra.mxu2 %vm1506_vm1, %v2054_v0 }
 0x425   : > { %3294 = vpow2.f32 %v1547_v60 }
 0x428   : > { %v1557_v47 = vpop.xlane.xlu1 %1556 }
 0x429   : > { %3296 = vrcp.f32 %v1557_v47  ;;  %v1590_v61 = vand.u32 2147483648, %v1557_v47  ;;  %v1588_v54 = vand.u32 2147483647, %v1557_v47  ;;  %vm1584_vm14 = vweird.f32 %v1557_v47 }
 0x42a   : > { %3298 = vpow2.f32 %v1553_v7 }
 0x42b   : > { %v4259_v14 = vpop.eup %3294  ;;  %v1591_v41 = vor.u32 1.1754944e-38, %v1590_v61  ;;  %vm1589_vm3 = vcmp.eq.f32.partialorder %v1588_v54, 8.507059e+37 }
 0x42c   : > { %v1567_v5 = vsel %vm1506_vm1, %v4259_v14, 0.0 }
 0x42d   : > { %1568 = vadd.xlane.f32.xlu2 %v1567_v5 }
 0x42f   : > { %v3297_v58 = vpop.eup %3296 }
 0x430   : > { %v1580_v18 = vmul.f32 %v3297_v58, %v1557_v47  ;;  %v1560_v52 = vpop.xlane.xlu1 %1559  ;;  %v4263_v15 = vpop.eup %3298  ;;  %vm1585_vm13 = vweird.f32 %v3297_v58 }
 0x431   : > { %3300 = vrcp.f32 %v1560_v52  ;;  %v1576_v33 = vsel %vm1506_vm1, %v4263_v15, 0.0  ;;  %vm1586_vm2 = vmor %vm1584_vm14, %vm1585_vm13  ;;  %v1605_v22 = vand.u32 2147483648, %v1560_v52  ;;  %v1603_v53 = vand.u32 2147483647, %v1560_v52 }
 0x432   : > { %v1581_v44 = vsub.f32 1.0, %v1580_v18  ;;  %vm1599_vm5 = vweird.f32 %v1560_v52 }
 0x433   : > { %v1606_v21 = vor.u32 1.1754944e-38, %v1605_v22  ;;  %vm1604_vm7 = vcmp.eq.f32.partialorder %v1603_v53, 8.507059e+37 }
 0x434   : > { %v1582_v45 = vmul.f32 %v3297_v58, %v1581_v44 }
 0x435   : > { %1577 = vadd.xlane.f32.xlu2 %v1576_v33 }
 0x436   : > { %v1583_v29 = vadd.f32 %v3297_v58, %v1582_v45 }
 0x437   : > { %v3301_v38 = vpop.eup %3300 }
 0x438   : > { %v1587_v56 = vsel %vm1586_vm2, %v3297_v58, %v1583_v29  ;;  %v1595_v39 = vmul.f32 %v3301_v38, %v1560_v52  ;;  %vm1600_vm4 = vweird.f32 %v3301_v38 }
 0x439   : > { %v1592_v59 = vsel %vm1589_vm3, %v1591_v41, %v1587_v56  ;;  %vm1601_vm6 = vmor %vm1599_vm5, %vm1600_vm4 }
 0x43a   : > { %v1596_v8 = vsub.f32 1.0, %v1595_v39  ;;  %v1593_v12 = vmul.f32 %v4200_v28, %v1592_v59 }
 0x43b   : > { %v1961_v40 = vpop.xlane.xlu0 %1960 }
 0x43c   : > { %v1597_v34 = vmul.f32 %v3301_v38, %v1596_v8  ;;  %3302 = vrcp.f32 %v1961_v40  ;;  %3072 = vmatmul.msk.f32.vlgmr.msra.gmra.mxu0 %vm1506_vm1, %v1593_v12  ;;  %v2066_v37 = vand.u32 2147483648, %v1961_v40  ;;  %v2064_v57 = vand.u32 2147483647, %v1961_v40 }
 0x43d   : > { %vm2060_vm9 = vweird.f32 %v1961_v40 }
 0x43e   : > { %v1598_v42 = vadd.f32 %v3301_v38, %v1597_v34  ;;  %v2067_v23 = vor.u32 1.1754944e-38, %v2066_v37  ;;  %vm2065_vm11 = vcmp.eq.f32.partialorder %v2064_v57, 8.507059e+37 }
 0x440   : > { %v1602_v55 = vsel %vm1601_vm6, %v3301_v38, %v1598_v42 }
 0x441   : > { %v1607_v31 = vsel %vm1604_vm7, %v1606_v21, %v1602_v55 }
 0x442   : > { %v3303_v1 = vpop.eup %3302  ;;  %v1608_v6 = vmul.f32 %v4204_v50, %v1607_v31 }
 0x443   : > { %v2056_v24 = vmul.f32 %v3303_v1, %v1961_v40  ;;  %v1964_v28 = vpop.xlane.xlu2 %1963  ;;  %v1563_v20 = vpop.xlane.xlu0 %1562  ;;  %vm2061_vm8 = vweird.f32 %v3303_v1 }
 0x444   : > { %3304 = vrcp.f32 %v1964_v28  ;;  %3073 = vmatmul.msk.f32.gmra.mxu0 %vm1506_vm1, %v1608_v6  ;;  %vm2062_vm10 = vmor %vm2060_vm9, %vm2061_vm8  ;;  %v2081_v47 = vand.u32 2147483648, %v1964_v28  ;;  %v1620_v58 = vand.u32 2147483648, %v1563_v20  ;;  %v1618_v44 = vand.u32 2147483647, %v1563_v20 }
 0x445   : > { %v2057_v19 = vsub.f32 1.0, %v2056_v24  ;;  %3306 = vrcp.f32 %v1563_v20  ;;  %v2079_v61 = vand.u32 2147483647, %v1964_v28  ;;  %vm2075_vm14 = vweird.f32 %v1964_v28 }
 0x446   : > { %v1566_v63 = vpop.xlane.xlu1 %1565  ;;  %v2082_v29 = vor.u32 1.1754944e-38, %v2081_v47  ;;  %vm1614_vm2 = vweird.f32 %v1563_v20  ;;  %vm1619_vm5 = vcmp.eq.f32.partialorder %v1618_v44, 8.507059e+37 }
 0x447   : > { %v2058_v25 = vmul.f32 %v3303_v1, %v2057_v19  ;;  %3308 = vrcp.f32 %v1566_v63  ;;  %vm2080_vm6 = vcmp.eq.f32.partialorder %v2079_v61, 8.507059e+37  ;;  %v1635_v12 = vand.u32 2147483648, %v1566_v63 }
 0x448   : > { %vm1629_vm8 = vweird.f32 %v1566_v63  ;;  %v1633_v53 = vand.u32 2147483647, %v1566_v63 }
 0x449   : > { %v2059_v46 = vadd.f32 %v3303_v1, %v2058_v25  ;;  %v1636_v21 = vor.u32 1.1754944e-38, %v1635_v12 }
 0x44a   : > { %v3305_v35 = vpop.eup %3304 }
 0x44b   : > { %v3307_v50 = vpop.eup %3306  ;;  %v2071_v32 = vmul.f32 %v3305_v35, %v1964_v28  ;;  %v2063_v62 = vsel %vm2062_vm10, %v3303_v1, %v2059_v46  ;;  %vm2076_vm12 = vweird.f32 %v3305_v35  ;;  %vm1634_vm10 = vcmp.eq.f32.partialorder %v1633_v53, 8.507059e+37 }
 0x44c   : > { %v1610_v30 = vmul.f32 %v3307_v50, %v1563_v20  ;;  %v2068_v0 = vsel %vm2065_vm11, %v2067_v23, %v2063_v62  ;;  %vm1615_vm13 = vweird.f32 %v3307_v50  ;;  %vm2077_vm3 = vmor %vm2075_vm14, %vm2076_vm12 }
 0x44d   : > { %v3309_v48 = vpop.eup %3308  ;;  %v2072_v60 = vsub.f32 1.0, %v2071_v32  ;;  %v2069_v7 = vmul.f32 %v4211_v36, %v2068_v0  ;;  %v1621_v36 = vor.u32 1.1754944e-38, %v1620_v58  ;;  %vm1616_vm4 = vmor %vm1614_vm2, %vm1615_vm13 }
 0x44e   : > { %v1611_v5 = vsub.f32 1.0, %v1610_v30  ;;  %v1625_v18 = vmul.f32 %v3309_v48, %v1566_v63  ;;  %vm1630_vm7 = vweird.f32 %v3309_v48  ;;  %v2234_v63 = vld [vmem:[%s4635_s16 + $0x18] sm:$0xff] }
 0x44f   : > { %v2073_v52 = vmul.f32 %v3305_v35, %v2072_v60  ;;  %3102 = vmatmul.msk.f32.gmra.mxu2 %vm1506_vm1, %v2069_v7  ;;  %vm1631_vm9 = vmor %vm1629_vm8, %vm1630_vm7  ;;  %2275 = vmatpush.msrb.mxu3 %v2234_v63 }
 0x450   : > { %v1612_v45 = vmul.f32 %v3307_v50, %v1611_v5  ;;  %v1626_v54 = vsub.f32 1.0, %v1625_v18 }
 0x451   : > { %v2074_v33 = vadd.f32 %v3305_v35, %v2073_v52 }
 0x452   : > { %v1627_v38 = vmul.f32 %v3309_v48, %v1626_v54  ;;  %v1613_v41 = vadd.f32 %v3307_v50, %v1612_v45 }
 0x453   : > { %v2078_v56 = vsel %vm2077_vm3, %v3305_v35, %v2074_v33 }
 0x454   : > { %v1617_v39 = vsel %vm1616_vm4, %v3307_v50, %v1613_v41  ;;  %v2083_v59 = vsel %vm2080_vm6, %v2082_v29, %v2078_v56  ;;  %v1628_v8 = vadd.f32 %v3309_v48, %v1627_v38 }
 0x455   : > { %v1622_v22 = vsel %vm1619_vm5, %v1621_v36, %v1617_v39  ;;  %v2084_v40 = vmul.f32 %v4218_v43, %v2083_v59  ;;  %v2233_v36 = vld [vmem:[%s4635_s16 + $0x10] sm:$0xff] }
 0x456   : > { %v1623_v34 = vmul.f32 %v4216_v13, %v1622_v22  ;;  %v1632_v42 = vsel %vm1631_vm9, %v3309_v48, %v1628_v8  ;;  %2276 = vmatpush.msrb.mxu3 %v2233_v36 }
 0x457   : > { %3103 = vmatmul.msk.f32.gmra.mxu2 %vm1506_vm1, %v2084_v40  ;;  %v1637_v55 = vsel %vm1634_vm10, %v1636_v21, %v1632_v42  ;;  %v2232_v42 = vld [vmem:[%s4635_s16 + $0x8] sm:$0xff] }
 0x458   : > { %3074 = vmatmul.msk.f32.gmra.mxu0 %vm1506_vm1, %v1623_v34  ;;  %v1638_v31 = vmul.f32 %v4224_v27, %v1637_v55  ;;  %2277 = vmatpush.msrb.mxu3 %v2232_v42 }
 0x460   : > { %3075 = vmatmul.msk.f32.gmra.mxu0 %vm1506_vm1, %v1638_v31 }
 0x47d   : > { %v1572_v24 = vpop.xlane.xlu0 %1571 }
 0x47e   : > { %v2158_v1 = vpop.f32.mrf.mxu2  ;;  %3310 = vrcp.f32 %v1572_v24  ;;  %v1665_v44 = vand.u32 2147483648, %v1572_v24  ;;  %vm1659_vm3 = vweird.f32 %v1572_v24  ;;  %v1663_v54 = vand.u32 2147483647, %v1572_v24 }
 0x47f   : > { %2190 = vrot.lane.b32.xlu0 %v2158_v1, %s3424_s5 }
 0x480   : > { %v1666_v41 = vor.u32 1.1754944e-38, %v1665_v44  ;;  %vm1664_vm5 = vcmp.eq.f32.partialorder %v1663_v54, 8.507059e+37  ;;  %v4341_v44 = vld [vmem:[%s4636_s17] ss:$0 sm:$0xff] }
 0x484   : > { %v3311_v27 = vpop.eup %3310 }
 0x485   : > { %v1575_v20 = vpop.xlane.xlu1 %1574  ;;  %v1655_v37 = vmul.f32 %v3311_v27, %v1572_v24  ;;  %vm1660_vm14 = vweird.f32 %v3311_v27 }
 0x486   : > { %v2161_v43 = vpop.f32.mrf.mxu2  ;;  %vm1661_vm4 = vmor %vm1659_vm3, %vm1660_vm14  ;;  %vm1674_vm7 = vweird.f32 %v1575_v20  ;;  %v1678_v22 = vand.u32 2147483647, %v1575_v20  ;;  %vm2214_vm14 = vcmask 261248  }
 0x487   : > { %2192 = vrot.lane.b32.xlu1 %v2161_v43, %s3424_s5  ;;  %v1656_v46 = vsub.f32 1.0, %v1655_v37 }
 0x488   : > { %vm1679_vm9 = vcmp.eq.f32.partialorder %v1678_v22, 8.507059e+37 }
 0x489   : > { %v1657_v62 = vmul.f32 %v3311_v27, %v1656_v46 }
 0x48b   : > { %v1658_v18 = vadd.f32 %v3311_v27, %v1657_v62 }
 0x48d   : > { %v1662_v38 = vsel %vm1661_vm4, %v3311_v27, %v1658_v18 }
 0x48e   : > { %v2164_v13 = vpop.f32.mrf.mxu2  ;;  %v1667_v56 = vsel %vm1664_vm5, %v1666_v41, %v1662_v38 }
 0x48f   : > { %2194 = vrot.lane.b32.xlu2 %v2164_v13, %s3424_s5  ;;  %v1668_v12 = vmul.f32 %v4238_v51, %v1667_v56 }
 0x496   : > { %v2167_v6 = vpop.f32.mrf.mxu2 }
 0x497   : > { %2196 = vrot.lane.b32.xlu0 %v2167_v6, %s3424_s5 }
 0x49e   : > { %v2170_v28 = vpop.f32.mrf.mxu2 }
 0x49f   : > { %2198 = vrot.lane.b32.xlu1 %v2170_v28, %s3424_s5 }
 0x4a0   : > { %v1569_v19 = vpop.xlane.xlu2 %1568 }
 0x4a1   : > { %3312 = vrcp.f32 %v1569_v19  ;;  %v1650_v30 = vand.u32 2147483648, %v1569_v19  ;;  %v1648_v60 = vand.u32 2147483647, %v1569_v19  ;;  %vm1644_vm12 = vweird.f32 %v1569_v19 }
 0x4a2   : > { %3314 = vrcp.f32 %v1575_v20 }
 0x4a3   : > { %v1651_v47 = vor.u32 1.1754944e-38, %v1650_v30  ;;  %vm1649_vm2 = vcmp.eq.f32.partialorder %v1648_v60, 8.507059e+37 }
 0x4a6   : > { %v2173_v25 = vpop.f32.mrf.mxu2 }
 0x4a7   : > { %v3313_v57 = vpop.eup %3312  ;;  %2200 = vrot.lane.b32.xlu0 %v2173_v25, %s3424_s5 }
 0x4a8   : > { %v1640_v35 = vmul.f32 %v3313_v57, %v1569_v19  ;;  %v4288_v23 = vpop.xlane.xlu2 %1577  ;;  %v3315_v50 = vpop.eup %3314  ;;  %vm1645_vm11 = vweird.f32 %v3313_v57 }
 0x4a9   : > { %3316 = vrcp.f32 %v4288_v23  ;;  %v1670_v0 = vmul.f32 %v3315_v50, %v1575_v20  ;;  %vm1646_vm13 = vmor %vm1644_vm12, %vm1645_vm11  ;;  %vm1675_vm6 = vweird.f32 %v3315_v50  ;;  %v1695_v31 = vand.u32 2147483648, %v4288_v23 }
 0x4aa   : > { %v1641_v32 = vsub.f32 1.0, %v1640_v35  ;;  %vm1676_vm8 = vmor %vm1674_vm7, %vm1675_vm6  ;;  %vm1689_vm11 = vweird.f32 %v4288_v23  ;;  %v1693_v43 = vand.u32 2147483647, %v4288_v23 }
 0x4ab   : > { %v1671_v5 = vsub.f32 1.0, %v1670_v0  ;;  %v1696_v6 = vor.u32 1.1754944e-38, %v1695_v31 }
 0x4ac   : > { %v1642_v48 = vmul.f32 %v3313_v57, %v1641_v32 }
 0x4ad   : > { %v1672_v33 = vmul.f32 %v3315_v50, %v1671_v5 }
 0x4ae   : > { %v1643_v7 = vadd.f32 %v3313_v57, %v1642_v48 }
 0x4af   : > { %v3317_v52 = vpop.eup %3316  ;;  %v1673_v59 = vadd.f32 %v3315_v50, %v1672_v33 }
 0x4b0   : > { %v1647_v58 = vsel %vm1646_vm13, %v3313_v57, %v1643_v7  ;;  %v1685_v29 = vmul.f32 %v3317_v52, %v4288_v23  ;;  %vm1690_vm10 = vweird.f32 %v3317_v52  ;;  %vm1694_vm13 = vcmp.eq.f32.partialorder %v1693_v43, 8.507059e+37 }
 0x4b1   : > { %v1652_v61 = vsel %vm1649_vm2, %v1651_v47, %v1647_v58  ;;  %v1677_v34 = vsel %vm1676_vm8, %v3315_v50, %v1673_v59  ;;  %vm1691_vm12 = vmor %vm1689_vm11, %vm1690_vm10 }
 0x4b2   : > { %v1653_v45 = vmul.f32 %v4259_v14, %v1652_v61  ;;  %v1686_v39 = vsub.f32 1.0, %v1685_v29  ;;  %v1680_v14 = vand.u32 2147483648, %v1575_v20  ;;  %v2231_v20 = vld [vmem:[%s4635_s16] sm:$0xff] }
 0x4b3   : > { %2278 = vmatpush.msrb.mxu3 %v2231_v20 }
 0x4b4   : > { %3076 = vmatmul.msk.f32.gmra.mxu0 %vm1506_vm1, %v1653_v45  ;;  %v1687_v40 = vmul.f32 %v3317_v52, %v1686_v39  ;;  %v1681_v53 = vor.u32 1.1754944e-38, %v1680_v14 }
 0x4b6   : > { %v1682_v21 = vsel %vm1679_vm9, %v1681_v53, %v1677_v34  ;;  %v1688_v55 = vadd.f32 %v3317_v52, %v1687_v40 }
 0x4b7   : > { %v1683_v51 = vmul.f32 %v4247_v49, %v1682_v21 }
 0x4b8   : > { %v1692_v13 = vsel %vm1691_vm12, %v3317_v52, %v1688_v55 }
 0x4b9   : > { %v1740_v8 = vpop.f32.mrf.mxu0  ;;  %v1697_v24 = vsel %vm1694_vm13, %v1696_v6, %v1692_v13 }
 0x4ba   : > { %1764 = vst.msk [vmem:[#allocation2] sm:$0xff] %vm1400_vm15, %v1740_v8  ;;  %v1698_v28 = vmul.f32 %v4263_v15, %v1697_v24 }
 0x4bc   : > { %3077 = vmatmul.msk.f32.gmra.mxu0 %vm1506_vm1, %v1668_v12 }
 0x4c1   : > { %v1743_v1 = vpop.f32.mrf.mxu0 }
 0x4c2   : > { %1765 = vst.msk [vmem:[#allocation2 + $0x8] sm:$0xff] %vm1400_vm15, %v1743_v1 }
 0x4c4   : > { %3078 = vmatmul.msk.f32.gmra.mxu0 %vm1506_vm1, %v1683_v51 }
 0x4cc   : > { %3079 = vmatmul.msk.f32.gmra.mxu0 %vm1506_vm1, %v1698_v28 }
 0x4d2   : > { %v2176_v27 = vpop.f32.mrf.mxu2 }
 0x4d3   : > { %2202 = vrot.lane.b32.xlu2 %v2176_v27, %s3424_s5 }
 0x4d5   : > { %v1746_v49 = vpop.f32.mrf.mxu0 }
 0x4d6   : > { %1766 = vst.msk [vmem:[#allocation2 + $0x10] sm:$0xff] %vm1400_vm15, %v1746_v49 }
 0x4da   : > { %v2179_v19 = vpop.f32.mrf.mxu2 }
 0x4db   : > { %2204 = vrot.lane.b32.xlu1 %v2179_v19, %s3424_s5 }
 0x4dd   : > { %v1749_v37 = vpop.f32.mrf.mxu0 }
 0x4de   : > { %1767 = vst.msk [vmem:[#allocation2 + $0x18] sm:$0xff] %vm1400_vm15, %v1749_v37 }
 0x4e9   : > { %v2195_v15 = vpop.permute.xlu2 %2194 }
 0x4ea   : > { %2217 = vst.msk [vmem:[#allocation2 + $0x10] sm:$0xff] %vm2214_vm14, %v2195_v15 }
 0x4f1   : > { %v2191_v63 = vpop.permute.xlu0 %2190  ;;  %v2225_v23 = vld [vmem:[#allocation2 + $0x10] sm:$0xff] }
 0x4f2   : > { %2215 = vst.msk [vmem:[#allocation2] sm:$0xff] %vm2214_vm14, %v2191_v63 }
 0x4f9   : > { %v2193_v25 = vpop.permute.xlu1 %2192  ;;  %v2223_v57 = vld [vmem:[#allocation2] sm:$0xff] }
 0x4fa   : > { %2216 = vst.msk [vmem:[#allocation2 + $0x8] sm:$0xff] %vm2214_vm14, %v2193_v25  ;;  %3104 = vmatmul.msk.f32.vlgmr.msrb.gmra.mxu3 %vm815_vm0, %v2223_v57 }
 0x501   : > { %v2224_v46 = vld [vmem:[#allocation2 + $0x8] sm:$0xff] }
 0x502   : > { %3105 = vmatmul.msk.f32.gmra.mxu3 %vm815_vm0, %v2224_v46 }
 0x509   : > { %v2197_v35 = vpop.permute.xlu0 %2196 }
 0x50a   : > { %2218 = vst.msk [vmem:[#allocation2 + $0x18] sm:$0xff] %vm2214_vm14, %v2197_v35  ;;  %3106 = vmatmul.msk.f32.gmra.mxu3 %vm815_vm0, %v2225_v23 }
 0x511   : > { %v2226_v50 = vld [vmem:[#allocation2 + $0x18] sm:$0xff]  ;;  %v2199_v62 = vpop.permute.xlu1 %2198 }
 0x512   : > { %3107 = vmatmul.msk.f32.gmra.mxu3 %vm815_vm0, %v2226_v50 }
 0x519   : > { %v2201_v0 = vpop.permute.xlu0 %2200 }
 0x52d   : > { %v2203_v7 = vpop.permute.xlu2 %2202 }
 0x531   : > { %v1752_v32 = vpop.f32.mrf.mxu0 }
 0x532   : > { %1768 = vst.msk [vmem:[#allocation2 + $0x20] sm:$0xff] %vm1400_vm15, %v1752_v32 }
 0x533   : > { %2219 = vst.msk [vmem:[#allocation2 + $0x20] sm:$0xff] %vm2214_vm14, %v2199_v62 }
 0x539   : > { %v1755_v30 = vpop.f32.mrf.mxu0 }
 0x53a   : > { %1769 = vst.msk [vmem:[#allocation2 + $0x28] sm:$0xff] %vm1400_vm15, %v1755_v30  ;;  %v2227_v48 = vld [vmem:[#allocation2 + $0x20] sm:$0xff] }
 0x53b   : > { %2220 = vst.msk [vmem:[#allocation2 + $0x28] sm:$0xff] %vm2214_vm14, %v2201_v0  ;;  %3108 = vmatmul.msk.f32.gmra.mxu3 %vm815_vm0, %v2227_v48 }
 0x541   : > { %v1758_v60 = vpop.f32.mrf.mxu0 }
 0x542   : > { %1770 = vst.msk [vmem:[#allocation2 + $0x30] sm:$0xff] %vm1400_vm15, %v1758_v60  ;;  %v2228_v47 = vld [vmem:[#allocation2 + $0x28] sm:$0xff] }
 0x543   : > { %2221 = vst.msk [vmem:[#allocation2 + $0x30] sm:$0xff] %vm2214_vm14, %v2203_v7  ;;  %3109 = vmatmul.msk.f32.gmra.mxu3 %vm815_vm0, %v2228_v47 }
 0x549   : > { %v1761_v5 = vpop.f32.mrf.mxu0 }
 0x54a   : > { %1771 = vst.msk [vmem:[#allocation2 + $0x38] sm:$0xff] %vm1400_vm15, %v1761_v5  ;;  %v2229_v58 = vld [vmem:[#allocation2 + $0x30] sm:$0xff] }
 0x54b   : > { %3110 = vmatmul.msk.f32.gmra.mxu3 %vm815_vm0, %v2229_v58 }
 0x54d   : > { %v2205_v18 = vpop.permute.xlu1 %2204 }
 0x54e   : > { %2222 = vst.msk [vmem:[#allocation2 + $0x38] sm:$0xff] %vm2214_vm14, %v2205_v18 }
 0x555   : > { %v2230_v52 = vld [vmem:[#allocation2 + $0x38] sm:$0xff] }
 0x556   : > { %3111 = vmatmul.msk.f32.gmra.mxu3 %vm815_vm0, %v2230_v52 }
 0x57d   : > { %v2280_v61 = vpop.f32.mrf.mxu3 }
 0x57e   : > { %v2281_v45 = vadd.f32 %v4341_v44, %v2280_v61 }
 0x580   : > { %v3112_v54 = vmul.f32 -1.442695, %v2281_v45 }
 0x582   : > { %3318 = vpow2.f32 %v3112_v54 }
 0x585   : > { %v2283_v33 = vpop.f32.mrf.mxu3 }
 0x586   : > { %v2284_v29 = vadd.f32 %v4341_v44, %v2283_v33 }
 0x588   : > { %v3319_v38 = vpop.eup %3318  ;;  %v3113_v41 = vmul.f32 -1.442695, %v2284_v29 }
 0x589   : > { %v2328_v36 = vadd.f32 1.0, %v3319_v38 }
 0x58a   : > { %3320 = vpow2.f32 %v3113_v41 }
 0x58b   : > { %3322 = vrcp.f32 %v2328_v36  ;;  %v2347_v53 = vand.u32 2147483648, %v2328_v36  ;;  %v2345_v55 = vand.u32 2147483647, %v2328_v36  ;;  %vm2341_vm1 = vweird.f32 %v2328_v36 }
 0x58d   : > { %v2286_v56 = vpop.f32.mrf.mxu3  ;;  %v2348_v6 = vor.u32 1.1754944e-38, %v2347_v53  ;;  %vm2346_vm3 = vcmp.eq.f32.partialorder %v2345_v55, 8.507059e+37 }
 0x58e   : > { %v2287_v39 = vadd.f32 %v4341_v44, %v2286_v56 }
 0x590   : > { %v3321_v59 = vpop.eup %3320  ;;  %v3114_v14 = vmul.f32 -1.442695, %v2287_v39 }
 0x591   : > { %v3323_v8 = vpop.eup %3322  ;;  %v2329_v12 = vadd.f32 1.0, %v3321_v59 }
 0x592   : > { %v2337_v22 = vmul.f32 %v3323_v8, %v2328_v36  ;;  %3324 = vpow2.f32 %v3114_v14  ;;  %vm2342_vm15 = vweird.f32 %v3323_v8 }
 0x593   : > { %3326 = vrcp.f32 %v2329_v12  ;;  %vm2343_vm2 = vmor %vm2341_vm1, %vm2342_vm15  ;;  %v2362_v19 = vand.u32 2147483648, %v2329_v12  ;;  %v2360_v63 = vand.u32 2147483647, %v2329_v12  ;;  %vm2356_vm5 = vweird.f32 %v2329_v12 }
 0x594   : > { %v2338_v40 = vsub.f32 1.0, %v2337_v22 }
 0x595   : > { %v2289_v34 = vpop.f32.mrf.mxu3  ;;  %v2363_v50 = vor.u32 1.1754944e-38, %v2362_v19  ;;  %vm2361_vm7 = vcmp.eq.f32.partialorder %v2360_v63, 8.507059e+37 }
 0x596   : > { %v2290_v42 = vadd.f32 %v4341_v44, %v2289_v34  ;;  %v2339_v21 = vmul.f32 %v3323_v8, %v2338_v40 }
 0x598   : > { %v3325_v31 = vpop.eup %3324  ;;  %v3115_v1 = vmul.f32 -1.442695, %v2290_v42  ;;  %v2340_v51 = vadd.f32 %v3323_v8, %v2339_v21 }
 0x599   : > { %v3327_v43 = vpop.eup %3326  ;;  %v2330_v13 = vadd.f32 1.0, %v3325_v31 }
 0x59a   : > { %v2352_v24 = vmul.f32 %v3327_v43, %v2329_v12  ;;  %3328 = vpow2.f32 %v3115_v1  ;;  %v2344_v28 = vsel %vm2343_vm2, %v3323_v8, %v2340_v51  ;;  %vm2357_vm4 = vweird.f32 %v3327_v43 }
 0x59b   : > { %3330 = vrcp.f32 %v2330_v13  ;;  %v2349_v27 = vsel %vm2346_vm3, %v2348_v6, %v2344_v28  ;;  %vm2358_vm6 = vmor %vm2356_vm5, %vm2357_vm4  ;;  %v2377_v48 = vand.u32 2147483648, %v2330_v13  ;;  %v2375_v47 = vand.u32 2147483647, %v2330_v13 }
 0x59c   : > { %v2353_v20 = vsub.f32 1.0, %v2352_v24  ;;  %v2456_v49 = vadd.f32 1.0, %v2349_v27  ;;  %vm2371_vm9 = vweird.f32 %v2330_v13 }
 0x59d   : > { %v2378_v52 = vor.u32 1.1754944e-38, %v2377_v48  ;;  %vm2376_vm11 = vcmp.eq.f32.partialorder %v2375_v47, 8.507059e+37 }
 0x59e   : > { %v4348_v37 = vmul.f32 %v3595_v4, %v2456_v49  ;;  %v2354_v15 = vmul.f32 %v3327_v43, %v2353_v20 }
 0x5a0   : > { %v3329_v25 = vpop.eup %3328  ;;  %v2472_v57 = vsel %vm815_vm0, %v4348_v37, 0.0  ;;  %v2355_v46 = vadd.f32 %v3327_v43, %v2354_v15 }
 0x5a1   : > { %v3331_v35 = vpop.eup %3330  ;;  %v2331_v23 = vadd.f32 1.0, %v3329_v25  ;;  %2473 = vadd.xlane.f32.xlu0 %v2472_v57 }
 0x5a2   : > { %v2367_v32 = vmul.f32 %v3331_v35, %v2330_v13  ;;  %v2359_v62 = vsel %vm2358_vm6, %v3327_v43, %v2355_v46  ;;  %vm2372_vm8 = vweird.f32 %v3331_v35 }
 0x5a3   : > { %3332 = vrcp.f32 %v2331_v23  ;;  %v2364_v4 = vsel %vm2361_vm7, %v2363_v50, %v2359_v62  ;;  %vm2373_vm10 = vmor %vm2371_vm9, %vm2372_vm8  ;;  %v2390_v36 = vand.u32 2147483647, %v2331_v23  ;;  %vm2386_vm13 = vweird.f32 %v2331_v23 }
 0x5a4   : > { %v2368_v30 = vsub.f32 1.0, %v2367_v32  ;;  %v2457_v0 = vadd.f32 1.0, %v2364_v4 }
 0x5a5   : > { %vm2391_vm15 = vcmp.eq.f32.partialorder %v2390_v36, 8.507059e+37 }
 0x5a6   : > { %v4353_v60 = vmul.f32 %v3593_v3, %v2457_v0  ;;  %v2369_v7 = vmul.f32 %v3331_v35, %v2368_v30  ;;  %v2392_v3 = vand.u32 2147483648, %v2331_v23 }
 0x5a8   : > { %v2475_v5 = vsel %vm815_vm0, %v4353_v60, 0.0  ;;  %v2370_v58 = vadd.f32 %v3331_v35, %v2369_v7  ;;  %v2393_v59 = vor.u32 1.1754944e-38, %v2392_v3 }
 0x5a9   : > { %v3333_v18 = vpop.eup %3332  ;;  %2476 = vadd.xlane.f32.xlu2 %v2475_v5 }
 0x5aa   : > { %v2382_v61 = vmul.f32 %v3333_v18, %v2331_v23  ;;  %v2374_v45 = vsel %vm2373_vm10, %v3331_v35, %v2370_v58  ;;  %vm2387_vm12 = vweird.f32 %v3333_v18 }
 0x5ab   : > { %v2379_v54 = vsel %vm2376_vm11, %v2378_v52, %v2374_v45  ;;  %vm2388_vm14 = vmor %vm2386_vm13, %vm2387_vm12 }
 0x5ac   : > { %v2383_v33 = vsub.f32 1.0, %v2382_v61  ;;  %v2458_v29 = vadd.f32 1.0, %v2379_v54 }
 0x5ae   : > { %v4358_v38 = vmul.f32 %v3617_v17, %v2458_v29  ;;  %v2384_v41 = vmul.f32 %v3333_v18, %v2383_v33 }
 0x5b0   : > { %v2478_v56 = vsel %vm815_vm0, %v4358_v38, 0.0  ;;  %v2385_v39 = vadd.f32 %v3333_v18, %v2384_v41 }
 0x5b1   : > { %2479 = vadd.xlane.f32.xlu1 %v2478_v56 }
 0x5b2   : > { %v2389_v14 = vsel %vm2388_vm14, %v3333_v18, %v2385_v39 }
 0x5b3   : > { %v2394_v8 = vsel %vm2391_vm15, %v2393_v59, %v2389_v14 }
 0x5b4   : > { %v2459_v12 = vadd.f32 1.0, %v2394_v8 }
 0x5b6   : > { %v4363_v22 = vmul.f32 %v3615_v16, %v2459_v12 }
 0x5b8   : > { %v2481_v17 = vsel %vm815_vm0, %v4363_v22, 0.0 }
 0x5b9   : > { %2482 = vadd.xlane.f32.xlu0 %v2481_v17 }
 0x5be   : > { %v2292_v40 = vpop.f32.mrf.mxu3 }
 0x5bf   : > { %v2293_v34 = vadd.f32 %v4341_v44, %v2292_v40 }
 0x5c1   : > { %v3116_v53 = vmul.f32 -1.442695, %v2293_v34 }
 0x5c3   : > { %3334 = vpow2.f32 %v3116_v53 }
 0x5c6   : > { %v2295_v42 = vpop.f32.mrf.mxu3 }
 0x5c7   : > { %v2296_v21 = vadd.f32 %v4341_v44, %v2295_v42 }
 0x5c9   : > { %v3335_v55 = vpop.eup %3334  ;;  %v3117_v31 = vmul.f32 -1.442695, %v2296_v21 }
 0x5ca   : > { %v2332_v1 = vadd.f32 1.0, %v3335_v55 }
 0x5cb   : > { %3336 = vpow2.f32 %v3117_v31 }
 0x5cc   : > { %3338 = vrcp.f32 %v2332_v1  ;;  %v2407_v20 = vand.u32 2147483648, %v2332_v1  ;;  %v2405_v19 = vand.u32 2147483647, %v2332_v1  ;;  %vm2401_vm2 = vweird.f32 %v2332_v1 }
 0x5ce   : > { %v2298_v51 = vpop.f32.mrf.mxu3  ;;  %v2408_v46 = vor.u32 1.1754944e-38, %v2407_v20  ;;  %vm2406_vm4 = vcmp.eq.f32.partialorder %v2405_v19, 8.507059e+37 }
 0x5cf   : > { %v2299_v16 = vadd.f32 %v4341_v44, %v2298_v51 }
 0x5d1   : > { %v3337_v43 = vpop.eup %3336  ;;  %v3118_v13 = vmul.f32 -1.442695, %v2299_v16 }
 0x5d2   : > { %v3339_v6 = vpop.eup %3338  ;;  %v2333_v24 = vadd.f32 1.0, %v3337_v43 }
 0x5d3   : > { %v2397_v28 = vmul.f32 %v3339_v6, %v2332_v1  ;;  %3340 = vpow2.f32 %v3118_v13  ;;  %vm2402_vm1 = vweird.f32 %v3339_v6 }
 0x5d4   : > { %3342 = vrcp.f32 %v2333_v24  ;;  %vm2403_vm3 = vmor %vm2401_vm2, %vm2402_vm1  ;;  %v2422_v4 = vand.u32 2147483648, %v2333_v24  ;;  %v2420_v48 = vand.u32 2147483647, %v2333_v24  ;;  %vm2416_vm6 = vweird.f32 %v2333_v24 }
 0x5d5   : > { %v2398_v27 = vsub.f32 1.0, %v2397_v28 }
 0x5d6   : > { %v2423_v58 = vor.u32 1.1754944e-38, %v2422_v4  ;;  %vm2421_vm8 = vcmp.eq.f32.partialorder %v2420_v48, 8.507059e+37 }
 0x5d7   : > { %v2399_v49 = vmul.f32 %v3339_v6, %v2398_v27 }
 0x5d9   : > { %v3341_v15 = vpop.eup %3340  ;;  %v2400_v63 = vadd.f32 %v3339_v6, %v2399_v49  ;;  %v2301_v52 = vpop.f32.mrf.mxu3 }
 0x5da   : > { %v3343_v25 = vpop.eup %3342  ;;  %v2334_v57 = vadd.f32 1.0, %v3341_v15  ;;  %v2302_v33 = vadd.f32 %v4341_v44, %v2301_v52 }
 0x5db   : > { %v2412_v35 = vmul.f32 %v3343_v25, %v2333_v24  ;;  %v2404_v23 = vsel %vm2403_vm3, %v3339_v6, %v2400_v63  ;;  %vm2417_vm5 = vweird.f32 %v3343_v25 }
 0x5dc   : > { %3344 = vrcp.f32 %v2334_v57  ;;  %v2409_v50 = vsel %vm2406_vm4, %v2408_v46, %v2404_v23  ;;  %vm2418_vm7 = vmor %vm2416_vm6, %vm2417_vm5  ;;  %v2437_v29 = vand.u32 2147483648, %v2334_v57  ;;  %v2435_v36 = vand.u32 2147483647, %v2334_v57 }
 0x5dd   : > { %v2413_v32 = vsub.f32 1.0, %v2412_v35  ;;  %v2460_v62 = vadd.f32 1.0, %v2409_v50  ;;  %vm2431_vm10 = vweird.f32 %v2334_v57  ;;  %v3119_v14 = vmul.f32 -1.442695, %v2302_v33 }
 0x5de   : > { %v2438_v59 = vor.u32 1.1754944e-38, %v2437_v29  ;;  %vm2436_vm12 = vcmp.eq.f32.partialorder %v2435_v36, 8.507059e+37 }
 0x5df   : > { %v4371_v30 = vmul.f32 %v3607_v11, %v2460_v62  ;;  %v2414_v0 = vmul.f32 %v3343_v25, %v2413_v32  ;;  %3346 = vpow2.f32 %v3119_v14  ;;  %v2674_v14 = vld [vmem:[%s4639_s20 + $0x10] sm:$0xff] }
 0x5e1   : > { %v2484_v7 = vsel %vm815_vm0, %v4371_v30, 0.0  ;;  %v2415_v47 = vadd.f32 %v3343_v25, %v2414_v0 }
 0x5e2   : > { %v3345_v5 = vpop.eup %3344  ;;  %2485 = vadd.xlane.f32.xlu2 %v2484_v7 }
 0x5e3   : > { %v2427_v18 = vmul.f32 %v3345_v5, %v2334_v57  ;;  %v2419_v61 = vsel %vm2418_vm7, %v3343_v25, %v2415_v47  ;;  %vm2432_vm9 = vweird.f32 %v3345_v5 }
 0x5e4   : > { %v2424_v45 = vsel %vm2421_vm8, %v2423_v58, %v2419_v61  ;;  %vm2433_vm11 = vmor %vm2431_vm10, %vm2432_vm9 }
 0x5e5   : > { %v2428_v54 = vsub.f32 1.0, %v2427_v18  ;;  %v2461_v11 = vadd.f32 1.0, %v2424_v45  ;;  %v3347_v40 = vpop.eup %3346 }
 0x5e6   : > { %v2335_v34 = vadd.f32 1.0, %v3347_v40 }
 0x5e7   : > { %v4377_v3 = vmul.f32 %v3605_v10, %v2461_v11  ;;  %v2429_v41 = vmul.f32 %v3345_v5, %v2428_v54 }
 0x5e8   : > { %3348 = vrcp.f32 %v2335_v34  ;;  %v2452_v1 = vand.u32 2147483648, %v2335_v34  ;;  %vm2446_vm14 = vweird.f32 %v2335_v34  ;;  %v2450_v51 = vand.u32 2147483647, %v2335_v34 }
 0x5e9   : > { %v2487_v56 = vsel %vm815_vm0, %v4377_v3, 0.0  ;;  %v2430_v39 = vadd.f32 %v3345_v5, %v2429_v41 }
 0x5ea   : > { %2488 = vadd.xlane.f32.xlu1 %v2487_v56  ;;  %v2453_v13 = vor.u32 1.1754944e-38, %v2452_v1  ;;  %vm2451_vm1 = vcmp.eq.f32.partialorder %v2450_v51, 8.507059e+37 }
 0x5eb   : > { %v2434_v8 = vsel %vm2433_vm11, %v3345_v5, %v2430_v39 }
 0x5ec   : > { %v2439_v12 = vsel %vm2436_vm12, %v2438_v59, %v2434_v8  ;;  %v2675_v59 = vld [vmem:[%s4639_s20 + $0x18] sm:$0xff]  ;;  %v2673_v8 = vld [vmem:[%s4639_s20 + $0x8] sm:$0xff] }
 0x5ed   : > { %v2462_v44 = vadd.f32 1.0, %v2439_v12  ;;  %2716 = vmatpush.msrb.mxu0 %v2675_v59  ;;  %v2672_v12 = vld [vmem:[%s4639_s20] sm:$0xff] }
 0x5ee   : > { %v3349_v53 = vpop.eup %3348 }
 0x5ef   : > { %v4382_v10 = vmul.f32 %v3591_v2, %v2462_v44  ;;  %v2442_v42 = vmul.f32 %v3349_v53, %v2335_v34  ;;  %vm2447_vm13 = vweird.f32 %v3349_v53  ;;  %2717 = vmatpush.msrb.mxu0 %v2674_v14 }
 0x5f0   : > { %vm2448_vm15 = vmor %vm2446_vm14, %vm2447_vm13 }
 0x5f1   : > { %v2490_v17 = vsel %vm815_vm0, %v4382_v10, 0.0  ;;  %v2443_v21 = vsub.f32 1.0, %v2442_v42  ;;  %2718 = vmatpush.msrb.mxu0 %v2673_v8 }
 0x5f2   : > { %2491 = vadd.xlane.f32.xlu2 %v2490_v17 }
 0x5f3   : > { %v2444_v55 = vmul.f32 %v3349_v53, %v2443_v21  ;;  %2719 = vmatpush.msrb.mxu0 %v2672_v12 }
 0x5f5   : > { %v2445_v31 = vadd.f32 %v3349_v53, %v2444_v55 }
 0x5f7   : > { %v2449_v43 = vsel %vm2448_vm15, %v3349_v53, %v2445_v31 }
 0x5f8   : > { %v2454_v24 = vsel %vm2451_vm1, %v2453_v13, %v2449_v43 }
 0x5f9   : > { %v2463_v20 = vadd.f32 1.0, %v2454_v24 }
 0x5fb   : > { %v4398_v63 = vmul.f32 %v3603_v9, %v2463_v20 }
 0x5fd   : > { %v2493_v46 = vsel %vm815_vm0, %v4398_v63, 0.0 }
 0x614   : > { %v2474_v16 = vpop.xlane.xlu0 %2473 }
 0x615   : > { %v2496_v2 = vmul.f32 %v2474_v16, %v3623_v26 }
 0x617   : > { %v4388_v6 = vsub.f32 %v4348_v37, %v2496_v2 }
 0x619   : > { %v2512_v28 = vmul.f32 %v4388_v6, %v4388_v6 }
 0x61b   : > { %v2520_v27 = vsel %vm815_vm0, %v2512_v28, 0.0 }
 0x61c   : > { %2521 = vadd.xlane.f32.xlu0 %v2520_v27  ;;  %v2477_v49 = vpop.xlane.xlu2 %2476 }
 0x61d   : > { %v2497_v19 = vmul.f32 %v2477_v49, %v3623_v26 }
 0x61f   : > { %v4395_v15 = vsub.f32 %v4353_v60, %v2497_v19 }
 0x621   : > { %v2513_v25 = vmul.f32 %v4395_v15, %v4395_v15 }
 0x623   : > { %v2523_v57 = vsel %vm815_vm0, %v2513_v25, 0.0 }
 0x624   : > { %2524 = vadd.xlane.f32.xlu1 %v2523_v57  ;;  %2494 = vadd.xlane.f32.xlu0 %v2493_v46  ;;  %v2480_v35 = vpop.xlane.xlu1 %2479  ;;  %v4465_v57 = vld [vmem:[%s4637_s18] ss:$0 sm:$0xff] }
 0x625   : > { %v2498_v23 = vmul.f32 %v2480_v35, %v3623_v26 }
 0x627   : > { %v4407_v50 = vsub.f32 %v4358_v38, %v2498_v23 }
 0x629   : > { %v2514_v9 = vmul.f32 %v4407_v50, %v4407_v50 }
 0x62b   : > { %v2526_v32 = vsel %vm815_vm0, %v2514_v9, 0.0  ;;  %v4471_v9 = vld [vmem:[%s4638_s19] ss:$0 sm:$0xff] }
 0x62c   : > { %v2483_v62 = vpop.xlane.xlu0 %2482  ;;  %2527 = vadd.xlane.f32.xlu2 %v2526_v32 }
 0x62d   : > { %v2499_v4 = vmul.f32 %v2483_v62, %v3623_v26 }
 0x62f   : > { %v4414_v0 = vsub.f32 %v4363_v22, %v2499_v4 }
 0x631   : > { %v2515_v48 = vmul.f32 %v4414_v0, %v4414_v0 }
 0x633   : > { %v2529_v7 = vsel %vm815_vm0, %v2515_v48, 0.0 }
 0x634   : > { %2530 = vadd.xlane.f32.xlu1 %v2529_v7 }
 0x655   : > { %v2486_v47 = vpop.xlane.xlu2 %2485 }
 0x656   : > { %v2500_v5 = vmul.f32 %v2486_v47, %v3623_v26 }
 0x658   : > { %v4421_v58 = vsub.f32 %v4371_v30, %v2500_v5 }
 0x65a   : > { %v2516_v18 = vmul.f32 %v4421_v58, %v4421_v58 }
 0x65c   : > { %v2532_v52 = vsel %vm815_vm0, %v2516_v18, 0.0 }
 0x65d   : > { %2533 = vadd.xlane.f32.xlu0 %v2532_v52  ;;  %v2489_v61 = vpop.xlane.xlu1 %2488 }
 0x65e   : > { %v2501_v45 = vmul.f32 %v2489_v61, %v3623_v26 }
 0x660   : > { %v4428_v54 = vsub.f32 %v4377_v3, %v2501_v45 }
 0x662   : > { %v2517_v11 = vmul.f32 %v4428_v54, %v4428_v54 }
 0x664   : > { %v2535_v33 = vsel %vm815_vm0, %v2517_v11, 0.0 }
 0x665   : > { %v2492_v29 = vpop.xlane.xlu2 %2491  ;;  %2536 = vadd.xlane.f32.xlu2 %v2535_v33 }
 0x666   : > { %v2502_v41 = vmul.f32 %v2492_v29, %v3623_v26 }
 0x668   : > { %v4435_v36 = vsub.f32 %v4382_v10, %v2502_v41 }
 0x66a   : > { %v2518_v56 = vmul.f32 %v4435_v36, %v4435_v36 }
 0x66c   : > { %v2538_v39 = vsel %vm815_vm0, %v2518_v56, 0.0 }
 0x66d   : > { %2539 = vadd.xlane.f32.xlu1 %v2538_v39 }
 0x68f   : > { %v2522_v44 = vpop.xlane.xlu0 %2521 }
 0x690   : > { %v2544_v17 = vmul.f32 %v2522_v44, %v3623_v26 }
 0x692   : > { %v2552_v40 = vadd.f32 1e-05, %v2544_v17 }
 0x694   : > { %3350 = vrsqrt.f32 %v2552_v40  ;;  %vm2566_vm3 = vweird.f32 %v2552_v40 }
 0x697   : > { %v2495_v34 = vpop.xlane.xlu0 %2494  ;;  %v2525_v53 = vpop.xlane.xlu1 %2524 }
 0x698   : > { %v2503_v42 = vmul.f32 %v2495_v34, %v3623_v26  ;;  %v2545_v21 = vmul.f32 %v2525_v53, %v3623_v26 }
 0x69a   : > { %v3351_v55 = vpop.eup %3350  ;;  %v4456_v31 = vsub.f32 %v4398_v63, %v2503_v42  ;;  %v2553_v1 = vadd.f32 1e-05, %v2545_v21 }
 0x69b   : > { %v2561_v51 = vmul.f32 %v3351_v55, %v2552_v40  ;;  %vm2567_vm2 = vweird.f32 %v3351_v55 }
 0x69c   : > { %3352 = vrsqrt.f32 %v2553_v1  ;;  %v2519_v16 = vmul.f32 %v4456_v31, %v4456_v31  ;;  %vm2568_vm4 = vmor %vm2566_vm3, %vm2567_vm2  ;;  %vm2576_vm6 = vweird.f32 %v2553_v1 }
 0x69d   : > { %v2562_v2 = vmul.f32 %v3351_v55, %v2561_v51 }
 0x69e   : > { %v2541_v43 = vsel %vm815_vm0, %v2519_v16, 0.0 }
 0x69f   : > { %v2563_v13 = vmul.f32 0.5, %v2562_v2  ;;  %2542 = vadd.xlane.f32.xlu0 %v2541_v43  ;;  %v2528_v24 = vpop.xlane.xlu2 %2527 }
 0x6a0   : > { %v2546_v28 = vmul.f32 %v2528_v24, %v3623_v26 }
 0x6a1   : > { %v2564_v27 = vsub.f32 1.5, %v2563_v13 }
 0x6a2   : > { %v3353_v20 = vpop.eup %3352  ;;  %v2554_v49 = vadd.f32 1e-05, %v2546_v28 }
 0x6a3   : > { %v2565_v19 = vmul.f32 %v3351_v55, %v2564_v27  ;;  %v2571_v25 = vmul.f32 %v3353_v20, %v2553_v1  ;;  %vm2577_vm5 = vweird.f32 %v3353_v20 }
 0x6a4   : > { %3354 = vrsqrt.f32 %v2554_v49  ;;  %vm2578_vm7 = vmor %vm2576_vm6, %vm2577_vm5  ;;  %vm2586_vm9 = vweird.f32 %v2554_v49 }
 0x6a5   : > { %v2569_v46 = vsel %vm2568_vm4, %v3351_v55, %v2565_v19  ;;  %v2572_v35 = vmul.f32 %v3353_v20, %v2571_v25 }
 0x6a6   : > { %v2640_v23 = vmul.f32 %v2569_v46, %v4388_v6 }
 0x6a7   : > { %v2573_v32 = vmul.f32 0.5, %v2572_v35  ;;  %v2531_v62 = vpop.xlane.xlu1 %2530 }
 0x6a8   : > { %v2652_v4 = vmul.f32 %v4465_v57, %v2640_v23  ;;  %v2547_v48 = vmul.f32 %v2531_v62, %v3623_v26 }
 0x6a9   : > { %v2574_v7 = vsub.f32 1.5, %v2573_v32 }
 0x6aa   : > { %v3355_v47 = vpop.eup %3354  ;;  %v2555_v5 = vadd.f32 1e-05, %v2547_v48  ;;  %v2664_v18 = vadd.f32 %v4471_v9, %v2652_v4 }
 0x6ab   : > { %v2575_v52 = vmul.f32 %v3353_v20, %v2574_v7  ;;  %v2581_v6 = vmul.f32 %v3355_v47, %v2554_v49  ;;  %vm2587_vm8 = vweird.f32 %v3355_v47 }
 0x6ac   : > { %3356 = vrsqrt.f32 %v2555_v5  ;;  %3120 = vmatmul.msk.f32.vlgmr.msrb.gmra.mxu0 %vm815_vm0, %v2664_v18  ;;  %vm2588_vm10 = vmor %vm2586_vm9, %vm2587_vm8  ;;  %vm2596_vm12 = vweird.f32 %v2555_v5 }
 0x6ad   : > { %v2579_v61 = vsel %vm2578_vm7, %v3353_v20, %v2575_v52  ;;  %v2582_v45 = vmul.f32 %v3355_v47, %v2581_v6 }
 0x6ae   : > { %v2641_v11 = vmul.f32 %v2579_v61, %v4395_v15 }
 0x6af   : > { %v2583_v33 = vmul.f32 0.5, %v2582_v45 }
 0x6b0   : > { %v2653_v29 = vmul.f32 %v4465_v57, %v2641_v11 }
 0x6b1   : > { %v2584_v41 = vsub.f32 1.5, %v2583_v33 }
 0x6b2   : > { %v3357_v56 = vpop.eup %3356  ;;  %v2665_v39 = vadd.f32 %v4471_v9, %v2653_v29 }
 0x6b3   : > { %v2585_v59 = vmul.f32 %v3355_v47, %v2584_v41  ;;  %v2591_v14 = vmul.f32 %v3357_v56, %v2555_v5  ;;  %vm2597_vm11 = vweird.f32 %v3357_v56 }
 0x6b4   : > { %3121 = vmatmul.msk.f32.gmra.mxu0 %vm815_vm0, %v2665_v39  ;;  %vm2598_vm13 = vmor %vm2596_vm12, %vm2597_vm11 }
 0x6b5   : > { %v2589_v8 = vsel %vm2588_vm10, %v3355_v47, %v2585_v59  ;;  %v2592_v12 = vmul.f32 %v3357_v56, %v2591_v14 }
 0x6b6   : > { %v2642_v44 = vmul.f32 %v2589_v8, %v4407_v50 }
 0x6b7   : > { %v2593_v17 = vmul.f32 0.5, %v2592_v12  ;;  %v2831_v12 = vld [vmem:[%s4641_s22 + $0x70] sm:$0xff] }
 0x6b8   : > { %v2654_v15 = vmul.f32 %v4465_v57, %v2642_v44  ;;  %v2829_v44 = vld [vmem:[%s4641_s22 + $0x60] sm:$0xff] }
 0x6b9   : > { %v2594_v40 = vsub.f32 1.5, %v2593_v17  ;;  %v2828_v17 = vld [vmem:[%s4641_s22 + $0x58] sm:$0xff] }
 0x6ba   : > { %v2666_v34 = vadd.f32 %v4471_v9, %v2654_v15  ;;  %v2827_v15 = vld [vmem:[%s4641_s22 + $0x50] sm:$0xff] }
 0x6bb   : > { %v2595_v53 = vmul.f32 %v3357_v56, %v2594_v40  ;;  %v2826_v40 = vld [vmem:[%s4641_s22 + $0x48] sm:$0xff] }
 0x6bc   : > { %3122 = vmatmul.msk.f32.gmra.mxu0 %vm815_vm0, %v2666_v34 }
 0x6bd   : > { %v2599_v42 = vsel %vm2598_vm13, %v3357_v56, %v2595_v53 }
 0x6be   : > { %v2643_v21 = vmul.f32 %v2599_v42, %v4414_v0  ;;  %v2825_v42 = vld [vmem:[%s4641_s22 + $0x40] sm:$0xff] }
 0x6c0   : > { %v2655_v55 = vmul.f32 %v4465_v57, %v2643_v21 }
 0x6c2   : > { %v2667_v1 = vadd.f32 %v4471_v9, %v2655_v55  ;;  %v2824_v55 = vld [vmem:[%s4641_s22 + $0x38] sm:$0xff] }
 0x6c4   : > { %3123 = vmatmul.msk.f32.gmra.mxu0 %vm815_vm0, %v2667_v1  ;;  %v2823_v1 = vld [vmem:[%s4641_s22 + $0x30] sm:$0xff] }
 0x6d0   : > { %v2534_v50 = vpop.xlane.xlu0 %2533 }
 0x6d1   : > { %v2548_v51 = vmul.f32 %v2534_v50, %v3623_v26  ;;  %v2821_v50 = vld [vmem:[%s4641_s22 + $0x20] sm:$0xff] }
 0x6d3   : > { %v2556_v16 = vadd.f32 1e-05, %v2548_v51 }
 0x6d5   : > { %3358 = vrsqrt.f32 %v2556_v16  ;;  %vm2606_vm15 = vweird.f32 %v2556_v16 }
 0x6d8   : > { %v2537_v2 = vpop.xlane.xlu2 %2536 }
 0x6d9   : > { %v2549_v43 = vmul.f32 %v2537_v2, %v3623_v26 }
 0x6db   : > { %v3359_v13 = vpop.eup %3358  ;;  %v2557_v24 = vadd.f32 1e-05, %v2549_v43  ;;  %v2819_v43 = vld [vmem:[%s4641_s22 + $0x10] sm:$0xff] }
 0x6dc   : > { %v2601_v28 = vmul.f32 %v3359_v13, %v2556_v16  ;;  %vm2607_vm14 = vweird.f32 %v3359_v13  ;;  %v2820_v16 = vld [vmem:[%s4641_s22 + $0x18] sm:$0xff] }
 0x6dd   : > { %3360 = vrsqrt.f32 %v2557_v24  ;;  %vm2608_vm1 = vmor %vm2606_vm15, %vm2607_vm14  ;;  %vm2616_vm3 = vweird.f32 %v2557_v24 }
 0x6de   : > { %v2602_v27 = vmul.f32 %v3359_v13, %v2601_v28 }
 0x6e0   : > { %v2603_v0 = vmul.f32 0.5, %v2602_v27  ;;  %v2540_v20 = vpop.xlane.xlu1 %2539  ;;  %v2817_v27 = vld [vmem:[%s4641_s22] sm:$0xff] }
 0x6e1   : > { %v2550_v49 = vmul.f32 %v2540_v20, %v3623_v26 }
 0x6e2   : > { %v2604_v19 = vsub.f32 1.5, %v2603_v0 }
 0x6e3   : > { %v3361_v25 = vpop.eup %3360  ;;  %v2558_v46 = vadd.f32 1e-05, %v2550_v49  ;;  %v4556_v49 = vld [vmem:[%s4640_s21] ss:$0 sm:$0xff] }
 0x6e4   : > { %v2605_v35 = vmul.f32 %v3359_v13, %v2604_v19  ;;  %v2611_v23 = vmul.f32 %v3361_v25, %v2557_v24  ;;  %vm2617_vm2 = vweird.f32 %v3361_v25 }
 0x6e5   : > { %3362 = vrsqrt.f32 %v2558_v46  ;;  %vm2618_vm4 = vmor %vm2616_vm3, %vm2617_vm2  ;;  %vm2626_vm6 = vweird.f32 %v2558_v46 }
 0x6e6   : > { %v2609_v32 = vsel %vm2608_vm1, %v3359_v13, %v2605_v35  ;;  %v2612_v62 = vmul.f32 %v3361_v25, %v2611_v23  ;;  %v2818_v13 = vld [vmem:[%s4641_s22 + $0x8] sm:$0xff] }
 0x6e7   : > { %v2644_v4 = vmul.f32 %v2609_v32, %v4421_v58 }
 0x6e8   : > { %v2613_v48 = vmul.f32 0.5, %v2612_v62 }
 0x6e9   : > { %v2656_v7 = vmul.f32 %v4465_v57, %v2644_v4 }
 0x6ea   : > { %v2614_v47 = vsub.f32 1.5, %v2613_v48 }
 0x6eb   : > { %v3363_v5 = vpop.eup %3362  ;;  %v2668_v18 = vadd.f32 %v4471_v9, %v2656_v7 }
 0x6ec   : > { %v2615_v52 = vmul.f32 %v3361_v25, %v2614_v47  ;;  %v2621_v6 = vmul.f32 %v3363_v5, %v2558_v46  ;;  %vm2627_vm5 = vweird.f32 %v3363_v5 }
 0x6ed   : > { %3124 = vmatmul.msk.f32.gmra.mxu0 %vm815_vm0, %v2668_v18  ;;  %vm2628_vm7 = vmor %vm2626_vm6, %vm2627_vm5 }
 0x6ee   : > { %v2619_v61 = vsel %vm2618_vm4, %v3361_v25, %v2615_v52  ;;  %v2622_v45 = vmul.f32 %v3363_v5, %v2621_v6 }
 0x6ef   : > { %v2645_v11 = vmul.f32 %v2619_v61, %v4428_v54  ;;  %v2832_v54 = vld [vmem:[%s4641_s22 + $0x78] sm:$0xff] }
 0x6f0   : > { %v2623_v33 = vmul.f32 0.5, %v2622_v45  ;;  %2837 = vmatpush.msra.mxu1 %v2832_v54 }
 0x6f1   : > { %v2657_v58 = vmul.f32 %v4465_v57, %v2645_v11 }
 0x6f2   : > { %v2624_v29 = vsub.f32 1.5, %v2623_v33  ;;  %2838 = vmatpush.msra.mxu1 %v2831_v12 }
 0x6f3   : > { %v2669_v41 = vadd.f32 %v4471_v9, %v2657_v58 }
 0x6f4   : > { %v2625_v56 = vmul.f32 %v3363_v5, %v2624_v29 }
 0x6f5   : > { %3125 = vmatmul.msk.f32.gmra.mxu0 %vm815_vm0, %v2669_v41 }
 0x6f6   : > { %v2629_v39 = vsel %vm2628_vm7, %v3363_v5, %v2625_v56 }
 0x6f7   : > { %v2646_v59 = vmul.f32 %v2629_v39, %v4435_v36  ;;  %v2830_v36 = vld [vmem:[%s4641_s22 + $0x68] sm:$0xff] }
 0x6f8   : > { %2839 = vmatpush.msra.mxu1 %v2830_v36 }
 0x6f9   : > { %v2658_v14 = vmul.f32 %v4465_v57, %v2646_v59 }
 0x6fa   : > { %2840 = vmatpush.msra.mxu1 %v2829_v44 }
 0x6fb   : > { %v2670_v8 = vadd.f32 %v4471_v9, %v2658_v14 }
 0x6fc   : > { %2841 = vmatpush.msra.mxu1 %v2828_v17 }
 0x6fd   : > { %3126 = vmatmul.msk.f32.gmra.mxu0 %vm815_vm0, %v2670_v8 }
 0x6fe   : > { %2842 = vmatpush.msra.mxu1 %v2827_v15 }
 0x700   : > { %2843 = vmatpush.msra.mxu1 %v2826_v40 }
 0x702   : > { %2844 = vmatpush.msra.mxu1 %v2825_v42 }
 0x704   : > { %2845 = vmatpush.msra.mxu1 %v2824_v55 }
 0x706   : > { %2846 = vmatpush.msra.mxu1 %v2823_v1 }
 0x712   : > { %v2543_v34 = vpop.xlane.xlu0 %2542 }
 0x713   : > { %v2551_v53 = vmul.f32 %v2543_v34, %v3623_v26  ;;  %v2822_v26 = vld [vmem:[%s4641_s22 + $0x28] sm:$0xff] }
 0x714   : > { %2847 = vmatpush.msra.mxu1 %v2822_v26 }
 0x715   : > { %v2559_v21 = vadd.f32 1e-05, %v2551_v53 }
 0x716   : > { %2848 = vmatpush.msra.mxu1 %v2821_v50 }
 0x717   : > { %3364 = vrsqrt.f32 %v2559_v21  ;;  %vm2636_vm9 = vweird.f32 %v2559_v21 }
 0x718   : > { %2849 = vmatpush.msra.mxu1 %v2820_v16 }
 0x71a   : > { %2850 = vmatpush.msra.mxu1 %v2819_v43 }
 0x71c   : > { %2851 = vmatpush.msra.mxu1 %v2818_v13 }
 0x71d   : > { %v3365_v51 = vpop.eup %3364 }
 0x71e   : > { %v2631_v2 = vmul.f32 %v3365_v51, %v2559_v21  ;;  %vm2637_vm8 = vweird.f32 %v3365_v51  ;;  %2852 = vmatpush.msra.mxu1 %v2817_v27 }
 0x71f   : > { %vm2638_vm10 = vmor %vm2636_vm9, %vm2637_vm8 }
 0x720   : > { %v2632_v24 = vmul.f32 %v3365_v51, %v2631_v2 }
 0x722   : > { %v2633_v28 = vmul.f32 0.5, %v2632_v24 }
 0x724   : > { %v2634_v0 = vsub.f32 1.5, %v2633_v28 }
 0x726   : > { %v2635_v20 = vmul.f32 %v3365_v51, %v2634_v0 }
 0x728   : > { %v2639_v19 = vsel %vm2638_vm10, %v3365_v51, %v2635_v20 }
 0x729   : > { %v2721_v25 = vpop.f32.mrf.mxu0  ;;  %v2647_v46 = vmul.f32 %v2639_v19, %v4456_v31 }
 0x72a   : > { %v2722_v35 = vadd.f32 %v4556_v49, %v2721_v25 }
 0x72b   : > { %v2659_v23 = vmul.f32 %v4465_v57, %v2647_v46 }
 0x72c   : > { %v2745_v32 = vmul.f32 %v2722_v35, %v2722_v35 }
 0x72d   : > { %v2671_v62 = vadd.f32 %v4471_v9, %v2659_v23 }
 0x72e   : > { %v2753_v4 = vmul.f32 %v2745_v32, %v2722_v35 }
 0x72f   : > { %3127 = vmatmul.msk.f32.gmra.mxu0 %vm815_vm0, %v2671_v62  ;;  %vm2894_vm0 = vcmask 257024  }
 0x730   : > { %v2761_v48 = vmul.f32 0.044715, %v2753_v4 }
 0x731   : > { %v2724_v7 = vpop.f32.mrf.mxu0 }
 0x732   : > { %v2769_v47 = vadd.f32 %v2761_v48, %v2722_v35  ;;  %v2725_v5 = vadd.f32 %v4556_v49, %v2724_v7 }
 0x734   : > { %v2777_v18 = vmul.f32 0.7978846, %v2769_v47  ;;  %v2746_v52 = vmul.f32 %v2725_v5, %v2725_v5 }
 0x736   : > { %3366 = vtanh.f32 %v2777_v18  ;;  %v2754_v6 = vmul.f32 %v2746_v52, %v2725_v5 }
 0x738   : > { %v2762_v31 = vmul.f32 0.044715, %v2754_v6 }
 0x739   : > { %v2727_v61 = vpop.f32.mrf.mxu0 }
 0x73a   : > { %v2728_v45 = vadd.f32 %v4556_v49, %v2727_v61  ;;  %v2770_v57 = vadd.f32 %v2762_v31, %v2725_v5 }
 0x73c   : > { %v3367_v11 = vpop.eup %3366  ;;  %v2747_v33 = vmul.f32 %v2728_v45, %v2728_v45  ;;  %v2778_v9 = vmul.f32 0.7978846, %v2770_v57 }
 0x73d   : > { %v2793_v58 = vadd.f32 1.0, %v3367_v11 }
 0x73e   : > { %v2755_v29 = vmul.f32 %v2747_v33, %v2728_v45  ;;  %3368 = vtanh.f32 %v2778_v9 }
 0x73f   : > { %v2801_v41 = vmul.f32 0.5, %v2793_v58 }
 0x740   : > { %v2763_v56 = vmul.f32 0.044715, %v2755_v29 }
 0x741   : > { %v2730_v39 = vpop.f32.mrf.mxu0  ;;  %v2809_v59 = vmul.f32 %v2801_v41, %v2722_v35 }
 0x742   : > { %v2731_v14 = vadd.f32 %v4556_v49, %v2730_v39  ;;  %v2771_v8 = vadd.f32 %v2763_v56, %v2728_v45 }
 0x743   : > { %2853 = vmatmul.f32.vlgmr.msra.gmra.mxu1 %v2809_v59 }
 0x744   : > { %v3369_v54 = vpop.eup %3368  ;;  %v2748_v12 = vmul.f32 %v2731_v14, %v2731_v14  ;;  %v2779_v36 = vmul.f32 0.7978846, %v2771_v8 }
 0x745   : > { %v2794_v44 = vadd.f32 1.0, %v3369_v54 }
 0x746   : > { %v2756_v17 = vmul.f32 %v2748_v12, %v2731_v14  ;;  %3370 = vtanh.f32 %v2779_v36 }
 0x747   : > { %v2802_v15 = vmul.f32 0.5, %v2794_v44  ;;  %v3233_v44 = vld [vmem:[%s4642_s23] ss:$0 sm:$0xff] }
 0x748   : > { %v2764_v40 = vmul.f32 0.044715, %v2756_v17 }
 0x749   : > { %v2810_v34 = vmul.f32 %v2802_v15, %v2725_v5 }
 0x74a   : > { %v2772_v53 = vadd.f32 %v2764_v40, %v2731_v14 }
 0x74b   : > { %2856 = vmatmul.f32.gmra.mxu1 %v2810_v34 }
 0x74c   : > { %v3371_v42 = vpop.eup %3370  ;;  %v2780_v21 = vmul.f32 0.7978846, %v2772_v53 }
 0x74d   : > { %v2795_v55 = vadd.f32 1.0, %v3371_v42 }
 0x74e   : > { %3372 = vtanh.f32 %v2780_v21 }
 0x74f   : > { %v2803_v1 = vmul.f32 0.5, %v2795_v55 }
 0x751   : > { %v2811_v26 = vmul.f32 %v2803_v1, %v2728_v45 }
 0x753   : > { %2859 = vmatmul.f32.gmra.mxu1 %v2811_v26 }
 0x754   : > { %v3373_v50 = vpop.eup %3372 }
 0x755   : > { %v2796_v51 = vadd.f32 1.0, %v3373_v50 }
 0x757   : > { %v2804_v16 = vmul.f32 0.5, %v2796_v51 }
 0x759   : > { %v2812_v2 = vmul.f32 %v2804_v16, %v2731_v14 }
 0x75b   : > { %2862 = vmatmul.f32.gmra.mxu1 %v2812_v2 }
 0x76a   : > { %v2733_v43 = vpop.f32.mrf.mxu0 }
 0x76b   : > { %v2734_v13 = vadd.f32 %v4556_v49, %v2733_v43 }
 0x76d   : > { %v2749_v24 = vmul.f32 %v2734_v13, %v2734_v13 }
 0x76f   : > { %v2757_v28 = vmul.f32 %v2749_v24, %v2734_v13 }
 0x771   : > { %v2765_v27 = vmul.f32 0.044715, %v2757_v28 }
 0x772   : > { %v2736_v0 = vpop.f32.mrf.mxu0 }
 0x773   : > { %v2737_v20 = vadd.f32 %v4556_v49, %v2736_v0  ;;  %v2773_v19 = vadd.f32 %v2765_v27, %v2734_v13 }
 0x775   : > { %v2750_v25 = vmul.f32 %v2737_v20, %v2737_v20  ;;  %v2781_v46 = vmul.f32 0.7978846, %v2773_v19 }
 0x777   : > { %v2758_v35 = vmul.f32 %v2750_v25, %v2737_v20  ;;  %3374 = vtanh.f32 %v2781_v46 }
 0x779   : > { %v2766_v23 = vmul.f32 0.044715, %v2758_v35 }
 0x77a   : > { %v2739_v32 = vpop.f32.mrf.mxu0 }
 0x77b   : > { %v2740_v62 = vadd.f32 %v4556_v49, %v2739_v32  ;;  %v2774_v4 = vadd.f32 %v2766_v23, %v2737_v20 }
 0x77d   : > { %v3375_v48 = vpop.eup %3374  ;;  %v2751_v7 = vmul.f32 %v2740_v62, %v2740_v62  ;;  %v2782_v47 = vmul.f32 0.7978846, %v2774_v4 }
 0x77e   : > { %v2797_v5 = vadd.f32 1.0, %v3375_v48 }
 0x77f   : > { %v2759_v18 = vmul.f32 %v2751_v7, %v2740_v62  ;;  %3376 = vtanh.f32 %v2782_v47 }
 0x780   : > { %v2805_v52 = vmul.f32 0.5, %v2797_v5 }
 0x781   : > { %v2767_v6 = vmul.f32 0.044715, %v2759_v18 }
 0x782   : > { %v2813_v31 = vmul.f32 %v2805_v52, %v2734_v13 }
 0x783   : > { %v2775_v61 = vadd.f32 %v2767_v6, %v2740_v62 }
 0x784   : > { %2865 = vmatmul.f32.gmra.mxu1 %v2813_v31 }
 0x785   : > { %v3377_v45 = vpop.eup %3376  ;;  %v2783_v57 = vmul.f32 0.7978846, %v2775_v61 }
 0x786   : > { %v2798_v11 = vadd.f32 1.0, %v3377_v45 }
 0x787   : > { %3378 = vtanh.f32 %v2783_v57 }
 0x788   : > { %v2806_v33 = vmul.f32 0.5, %v2798_v11 }
 0x78a   : > { %v2814_v9 = vmul.f32 %v2806_v33, %v2737_v20 }
 0x78c   : > { %2868 = vmatmul.f32.gmra.mxu1 %v2814_v9 }
 0x78d   : > { %v3379_v58 = vpop.eup %3378 }
 0x78e   : > { %v2799_v29 = vadd.f32 1.0, %v3379_v58 }
 0x790   : > { %v2807_v41 = vmul.f32 0.5, %v2799_v29 }
 0x792   : > { %v2815_v56 = vmul.f32 %v2807_v41, %v2740_v62 }
 0x794   : > { %2871 = vmatmul.f32.gmra.mxu1 %v2815_v56 }
 0x7ac   : > { %v2742_v39 = vpop.f32.mrf.mxu0 }
 0x7ad   : > { %v2743_v59 = vadd.f32 %v4556_v49, %v2742_v39 }
 0x7af   : > { %v2752_v14 = vmul.f32 %v2743_v59, %v2743_v59 }
 0x7b1   : > { %v2760_v8 = vmul.f32 %v2752_v14, %v2743_v59 }
 0x7b3   : > { %v2768_v54 = vmul.f32 0.044715, %v2760_v8 }
 0x7b5   : > { %v2776_v12 = vadd.f32 %v2768_v54, %v2743_v59 }
 0x7b7   : > { %v2784_v36 = vmul.f32 0.7978846, %v2776_v12 }
 0x7b9   : > { %3380 = vtanh.f32 %v2784_v36 }
 0x7bf   : > { %v3381_v17 = vpop.eup %3380 }
 0x7c0   : > { %v2854_v15 = vpop.f32.mrf.mxu1  ;;  %v2800_v40 = vadd.f32 1.0, %v3381_v17 }
 0x7c1   : > { %v2855_v34 = vadd.f32 %v3233_v44, %v2854_v15 }
 0x7c2   : > { %v2808_v53 = vmul.f32 0.5, %v2800_v40 }
 0x7c3   : > { %v2878_v42 = vadd.f32 %v2855_v34, %v4348_v37 }
 0x7c4   : > { %v2816_v49 = vmul.f32 %v2808_v53, %v2743_v59 }
 0x7c5   : > { %v2886_v21 = vpack.c.bf16 %v2878_v42, %v2878_v42 }
 0x7c6   : > { %2874 = vmatmul.f32.gmra.mxu1 %v2816_v49 }
 0x7c7   : > { %2895 = vst.msk [vmem:[%s4579_s4] sm:$0xf] %vm2894_vm0, %v2886_v21 }
 0x7c8   : > { %v2857_v55 = vpop.f32.mrf.mxu1 }
 0x7c9   : > { %v2858_v1 = vadd.f32 %v3233_v44, %v2857_v55 }
 0x7cb   : > { %v2879_v37 = vadd.f32 %v2858_v1, %v4353_v60 }
 0x7cd   : > { %v2887_v26 = vpack.c.bf16 %v2879_v37, %v2879_v37 }
 0x7cf   : > { %2896 = vst.msk [vmem:[%s4579_s4 + $0x4] sm:$0xf] %vm2894_vm0, %v2887_v26 }
 0x7d0   : > { %v2860_v50 = vpop.f32.mrf.mxu1 }
 0x7d1   : > { %v2861_v51 = vadd.f32 %v3233_v44, %v2860_v50 }
 0x7d3   : > { %v2880_v16 = vadd.f32 %v2861_v51, %v4358_v38 }
 0x7d5   : > { %v2888_v2 = vpack.c.bf16 %v2880_v16, %v2880_v16 }
 0x7d7   : > { %2897 = vst.msk [vmem:[%s4579_s4 + $0x8] sm:$0xf] %vm2894_vm0, %v2888_v2 }
 0x7d8   : > { %v2863_v43 = vpop.f32.mrf.mxu1 }
 0x7d9   : > { %v2864_v13 = vadd.f32 %v3233_v44, %v2863_v43 }
 0x7db   : > { %v2881_v24 = vadd.f32 %v2864_v13, %v4363_v22 }
 0x7dd   : > { %v2889_v28 = vpack.c.bf16 %v2881_v24, %v2881_v24 }
 0x7df   : > { %2898 = vst.msk [vmem:[%s4579_s4 + $0xc] sm:$0xf] %vm2894_vm0, %v2889_v28 }
 0x801   : > { %v2866_v60 = vpop.f32.mrf.mxu1 }
 0x802   : > { %v2867_v27 = vadd.f32 %v3233_v44, %v2866_v60 }
 0x804   : > { %v2882_v0 = vadd.f32 %v2867_v27, %v4371_v30 }
 0x806   : > { %v2890_v20 = vpack.c.bf16 %v2882_v0, %v2882_v0 }
 0x808   : > { %2899 = vst.msk [vmem:[%s4579_s4 + $0x10] sm:$0xf] %vm2894_vm0, %v2890_v20 }
 0x809   : > { %v2869_v38 = vpop.f32.mrf.mxu1 }
 0x80a   : > { %v2870_v19 = vadd.f32 %v3233_v44, %v2869_v38 }
 0x80c   : > { %v2883_v25 = vadd.f32 %v2870_v19, %v4377_v3 }
 0x80e   : > { %v2891_v46 = vpack.c.bf16 %v2883_v25, %v2883_v25 }
 0x810   : > { %2900 = vst.msk [vmem:[%s4579_s4 + $0x14] sm:$0xf] %vm2894_vm0, %v2891_v46 }
 0x811   : > { %v2872_v22 = vpop.f32.mrf.mxu1 }
 0x812   : > { %v2873_v35 = vadd.f32 %v3233_v44, %v2872_v22 }
 0x814   : > { %v2884_v23 = vadd.f32 %v2873_v35, %v4382_v10 }
 0x816   : > { %v2892_v32 = vpack.c.bf16 %v2884_v23, %v2884_v23 }
 0x818   : > { %2901 = vst.msk [vmem:[%s4579_s4 + $0x18] sm:$0xf] %vm2894_vm0, %v2892_v32 }
 0x843   : > { %v2875_v62 = vpop.f32.mrf.mxu1 }
 0x844   : > { %v2876_v30 = vadd.f32 %v3233_v44, %v2875_v62 }
 0x846   : > { %v2885_v4 = vadd.f32 %v2876_v30, %v4398_v63 }
 0x848   : > { %v2893_v48 = vpack.c.bf16 %v2885_v4, %v2885_v4 }
 0x84a   : > { %2902 = vst.msk [vmem:[%s4579_s4 + $0x1c] sm:$0xf] %vm2894_vm0, %v2893_v48 }
 0x84b PF: > { %s34_s6 = sadd.s32 1, %s3420_s6   ;;  %s4678_s3 = sld [smem:[#allocation3_spill]] }
 0x84c   : > { %p31_p7 = scmp.ge.s32.totalorder %s34_s6, 10   ;;  %s4679_s5 = smov %s3412_s27 }
 0x84d   : > { %s4680_s26 = smov %s3416_s28  ;;  %s4681_s27 = smov %s4684_s2 }
 0x84e   :  { %33 = sbr.rel (!%p31_p7) target bundleno = 12 (0xc), region = 149 }
 0x851   : > { %s4682_s28 = smov %s4678_s3 }

</bundles_post_ra>
